<compile_context>
chip_gen: v7x
topology: tpu7x:2x2x1
jax: 0.10.0
libtpu: 0.0.40
codegen_flags: <defaults>
</compile_context>

<pallas_src>
import jax
import jax.numpy as jnp
from jax.experimental import pallas as pl
from jax.experimental.pallas import tpu as pltpu

BN_EPS = 1e-5
_TAP_LOOP_MIN_CIN = 32  # below this, K = Cin starves the 128-deep MXU


def _pick_vmem_limit():
    """~3/4 of this generation's physical VMEM (96 MiB v5e/v6e, 48 MiB v7x)."""
    default_cap = 128 * 1024 * 1024
    try:
        cap = int(getattr(pltpu.get_tpu_info(), "vmem_capacity_bytes",
                          default_cap))
    except Exception:
        cap = default_cap
    return min(cap * 3 // 4, 100 * 1024 * 1024)


_VMEM_LIMIT = _pick_vmem_limit()


# ------------------------------ Pallas kernels ------------------------------ #

def _conv_acc(xp_ref, w_ref, lhs_ref):
    """3x3 same-conv of one image on the MXU, f32 accumulation.

    xp_ref : (H+2, W+2, Cin) f32 padded input (one image)
    w_ref  : (9*Cin, Cout)   bf16 weights, tap t = ky*3+kx stacked along K
    lhs_ref: (H, W, 9*Cin)   bf16/f32 im2col VMEM scratch, or None (tap-loop)
    returns: (H*W, Cout)     f32 pre-activations (bias dropped: cancelled by BN)
    """
    Hp, Wp, Cin = xp_ref.shape
    H, W = Hp - 2, Wp - 2
    Cout = w_ref.shape[1]
    if lhs_ref is not None:
        # Small-Cin path: build the 9-tap im2col slab in VMEM so one matmul
        # with K = 9*Cin keeps the MXU full.  Slab dtype chosen by the wrapper.
        for ky in range(3):
            for kx in range(3):
                t = ky * 3 + kx
                lhs_ref[:, :, t * Cin:(t + 1) * Cin] = (
                    xp_ref[ky:ky + H, kx:kx + W, :].astype(lhs_ref.dtype))
        lhs = lhs_ref[...].reshape(H * W, 9 * Cin)
        return jnp.dot(lhs.astype(jnp.bfloat16), w_ref[...],
                       preferred_element_type=jnp.float32)
    # Wide-Cin path: nine (H*W, Cin) x (Cin, Cout) matmuls on shifted windows,
    # accumulated in f32 -- no 9x im2col slab and ~9x less VMEM store traffic.
    acc = jnp.zeros((H * W, Cout), jnp.float32)
    for ky in range(3):
        for kx in range(3):
            t = ky * 3 + kx
            tap = xp_ref[ky:ky + H, kx:kx + W, :].reshape(H * W, Cin)
            acc = acc + jnp.dot(tap.astype(jnp.bfloat16),
                                w_ref[t * Cin:(t + 1) * Cin, :],
                                preferred_element_type=jnp.float32)
    return acc


def conv_stats_kernel(xp_ref, w_ref, sum_ref, ssq_ref, *scratch):
    """Pass A: per-channel sum / sum-of-squares of the conv pre-activations.

    Grid = (shard, image-within-shard).  The shard axis is "parallel" (megacore
    on v7x); sum/ssq blocks are resident accumulators along the inner
    "arbitrary" axis, initialized via pl.when.
    """
    acc = _conv_acc(xp_ref, w_ref, scratch[0] if scratch else None)

    @pl.when(pl.program_id(1) == 0)
    def _init():
        sum_ref[...] = jnp.zeros_like(sum_ref)
        ssq_ref[...] = jnp.zeros_like(ssq_ref)

    sum_ref[...] += jnp.sum(acc, axis=0, keepdims=True)
    ssq_ref[...] += jnp.sum(acc * acc, axis=0, keepdims=True)


def conv_bn_relu_kernel(xp_ref, w_ref, scale_ref, shift_ref, y_ref, *scratch):
    """Pass B: conv -> y = relu(acc * scale + shift), BN pre-folded to vectors."""
    acc = _conv_acc(xp_ref, w_ref, scratch[0] if scratch else None)
    y_ref[...] = jnp.maximum(acc * scale_ref[...] + shift_ref[...],
                             0.0).astype(y_ref.dtype)


def maxpool_kernel(y_ref, p_ref):
    """y_ref: (Hh, 2, Wh, 2*C) free HBM view of one image's CNNBlock output.
       p_ref: (Hh, Wh, C)."""
    C = p_ref.shape[-1]
    m = jnp.maximum(y_ref[:, 0, :, :], y_ref[:, 1, :, :])   # pool over h-parity
    p_ref[...] = jnp.maximum(m[:, :, :C], m[:, :, C:])      # pool over w-parity


# ------------------------------ stage wrappers ------------------------------ #

def conv_bn_relu(x_nhwc, w_oihw, gamma, beta):
    """CNNBlock forward (conv bias omitted -- cancelled by training-mode BN)."""
    N, H, W, Cin = x_nhwc.shape
    Cout = w_oihw.shape[0]
    Hp, Wp = H + 2, W + 2
    # TODO(synk): drop the padded HBM copy (DMA interior + zero halo in-kernel).
    xp = jnp.pad(x_nhwc, ((0, 0), (1, 1), (1, 1), (0, 0)))
    # (Cout, Cin, 3, 3) -> (ky, kx, Cin, Cout) -> (9*Cin, Cout), tap t = ky*3+kx
    wmat = jnp.transpose(w_oihw, (2, 3, 1, 0)).reshape(9 * Cin, Cout)
    wmat = wmat.astype(jnp.bfloat16)
    count = N * H * W

    # Conv LHS construction mode (see module docstring).
    use_im2col = (Cin < _TAP_LOOP_MIN_CIN) or (W % 8 != 0)
    slab_dtype = jnp.bfloat16 if W % 16 == 0 else jnp.float32
    scratch_shapes = ([pltpu.VMEM((H, W, 9 * Cin), slab_dtype)]
                      if use_im2col else [])

    # ---- Pass A: BN training statistics, sharded across TensorCores. ----
    num_shards = 2 if N % 2 == 0 else 1
    n_inner = N // num_shards
    sum_parts, ssq_parts = pl.pallas_call(
        conv_stats_kernel,
        out_shape=(jax.ShapeDtypeStruct((num_shards, 1, Cout), jnp.float32),
                   jax.ShapeDtypeStruct((num_shards, 1, Cout), jnp.float32)),
        grid_spec=pltpu.PrefetchScalarGridSpec(
            num_scalar_prefetch=0, grid=(num_shards, n_inner),
            in_specs=[
                pl.BlockSpec((None, Hp, Wp, Cin),
                             lambda s, i: (s * n_inner + i, 0, 0, 0)),
                pl.BlockSpec((9 * Cin, Cout), lambda s, i: (0, 0)),
            ],
            out_specs=(pl.BlockSpec((None, 1, Cout), lambda s, i: (s, 0, 0)),
                       pl.BlockSpec((None, 1, Cout), lambda s, i: (s, 0, 0))),
            scratch_shapes=scratch_shapes),
        compiler_params=pltpu.CompilerParams(
            dimension_semantics=("parallel", "arbitrary"),
            vmem_limit_bytes=_VMEM_LIMIT),
    )(xp, wmat)

    # ---- Fold training-mode BN into per-channel scale/shift (once). ----
    ch_sum = jnp.sum(sum_parts, axis=(0, 1))
    ch_ssq = jnp.sum(ssq_parts, axis=(0, 1))
    mean = ch_sum / count
    var = ch_ssq / count - mean * mean
    scale = gamma * jax.lax.rsqrt(var + BN_EPS)
    shift = beta - mean * scale

    # ---- Pass B: recompute conv, apply scale/shift + ReLU, write route y. ----
    y = pl.pallas_call(
        conv_bn_relu_kernel,
        out_shape=jax.ShapeDtypeStruct((N, H * W, Cout), jnp.float32),
        grid_spec=pltpu.PrefetchScalarGridSpec(
            num_scalar_prefetch=0, grid=(N,),
            in_specs=[
                pl.BlockSpec((None, Hp, Wp, Cin), lambda n: (n, 0, 0, 0)),
                pl.BlockSpec((9 * Cin, Cout), lambda n: (0, 0)),
                pl.BlockSpec((1, Cout), lambda n: (0, 0)),
                pl.BlockSpec((1, Cout), lambda n: (0, 0)),
            ],
            out_specs=pl.BlockSpec((None, H * W, Cout), lambda n: (n, 0, 0)),
            scratch_shapes=scratch_shapes),
        compiler_params=pltpu.CompilerParams(
            dimension_semantics=("parallel",),
            vmem_limit_bytes=_VMEM_LIMIT),
    )(xp, wmat, scale.reshape(1, Cout), shift.reshape(1, Cout))
    return y.reshape(N, H, W, Cout)


def maxpool2x2(y_nhwc):
    N, H, W, C = y_nhwc.shape
    assert H % 2 == 0 and W % 2 == 0, "MaxPool2d(2,2) requires even H and W"
    Hh, Wh = H // 2, W // 2
    # Free (layout-preserving) HBM view: (N, H, W, C) -> (N, Hh, 2, Wh, 2*C).
    y_view = y_nhwc.reshape(N, Hh, 2, Wh, 2 * C)
    return pl.pallas_call(
        maxpool_kernel,
        out_shape=jax.ShapeDtypeStruct((N, Hh, Wh, C), jnp.float32),
        grid_spec=pltpu.PrefetchScalarGridSpec(
            num_scalar_prefetch=0, grid=(N,),
            in_specs=[pl.BlockSpec((None, Hh, 2, Wh, 2 * C),
                                   lambda n: (n, 0, 0, 0, 0))],
            out_specs=pl.BlockSpec((None, Hh, Wh, C), lambda n: (n, 0, 0, 0))),
        compiler_params=pltpu.CompilerParams(
            dimension_semantics=("parallel",),
            vmem_limit_bytes=_VMEM_LIMIT),
    )(y_view)


def cnn_backbone(x_nchw, params):
    """Forward pass of CNNBackbone. Returns (x, route_connection) in NCHW."""
    x = jnp.transpose(x_nchw, (0, 2, 3, 1))  # NCHW -> NHWC
    route_connection = []
    for (w, _b, g, bt) in params:
        # conv bias `_b` is dropped: training-mode BN subtracts it exactly.
        y = conv_bn_relu(x, w, g, bt)                    # CNNBlock
        route_connection.append(jnp.transpose(y, (0, 3, 1, 2)))
        x = maxpool2x2(y)                                # MaxPool2d(2, 2)
    return jnp.transpose(x, (0, 3, 1, 2)), route_connection


# ---------------------------- params & reference ---------------------------- #

def init_params(key, in_channels, out_channels, size):
    params = []
    cin, cout = in_channels, out_channels
    for _ in range(size):
        key, k1, k2 = jax.random.split(key, 3)
        w = jax.random.normal(k1, (cout, cin, 3, 3), jnp.float32) * 0.1
        b = jax.random.normal(k2, (cout,), jnp.float32) * 0.1
        g = jnp.ones((cout,), jnp.float32)    # BatchNorm2d weight init
        bt = jnp.zeros((cout,), jnp.float32)  # BatchNorm2d bias init
        params.append((w, b, g, bt))
        cin, cout = cout, cout * 2
    return params


def ref_forward(x, params):
    """Plain-JAX f32 reference matching the PyTorch forward semantics."""
    routes = []
    for (w, b, g, bt) in params:
        y = jax.lax.conv_general_dilated(
            x, w, (1, 1), ((1, 1), (1, 1)),
            dimension_numbers=('NCHW', 'OIHW', 'NCHW'),
            precision=jax.lax.Precision.HIGHEST)
        y = y + b[None, :, None, None]
        mean = jnp.mean(y, axis=(0, 2, 3), keepdims=True)
        var = jnp.mean((y - mean) ** 2, axis=(0, 2, 3), keepdims=True)
        y = (y - mean) * jax.lax.rsqrt(var + BN_EPS)
        y = y * g[None, :, None, None] + bt[None, :, None, None]
        y = jnp.maximum(y, 0.0)
        routes.append(y)
        N, C, H, W = y.shape
        x = jnp.max(y.reshape(N, C, H // 2, 2, W // 2, 2), axis=(3, 5))
    return x, routes


# ----------------------------------- main ----------------------------------- #

if __name__ == "__main__":
    key = jax.random.PRNGKey(0)

    def run_check(key, n, cin, cout, spatial, size):
        kx_, kp_ = jax.random.split(key)
        x = jax.random.normal(kx_, (n, cin, spatial, spatial), jnp.float32)
        params = init_params(kp_, cin, cout, size)
        out, routes = jax.jit(cnn_backbone)(x, params)
        jax.block_until_ready((out, routes))
        ref_out, ref_routes = ref_forward(x, params)
        assert out.shape == ref_out.shape, (out.shape, ref_out.shape)
        # bf16 MXU inputs with f32 accumulation vs f32 HIGHEST reference.
        assert jnp.allclose(out, ref_out, rtol=2e-2, atol=2e-2)
        for r, rr in zip(routes, ref_routes):
            assert r.shape == rr.shape
            assert jnp.allclose(r, rr, rtol=2e-2, atol=2e-2)

    k1, k2 = jax.random.split(key)
    # Small-Cin config: im2col path (bf16 slab at W=16, f32 fallback at W=8),
    # even batch -> 2-shard ("parallel") stats pass.
    run_check(k1, n=2, cin=4, cout=8, spatial=16, size=2)
    # Wide-Cin config: slab-free tap-loop path, odd batch -> single-shard stats.
    run_check(k2, n=3, cin=32, cout=16, spatial=16, size=1)

    print("KERNEL_OK")
</pallas_src>

<mosaic_0001>
module attributes {stable_mosaic.version = 11 : i64} {
  func.func @conv_stats_kernel(%arg0: i32, %arg1: i32, %arg2: memref<1x18x18x4xf32, #tpu.memory_space<vmem>>, %arg3: memref<36x8xbf16, #tpu.memory_space<vmem>>, %arg4: memref<1x1x8xf32, #tpu.memory_space<vmem>>, %arg5: memref<1x1x8xf32, #tpu.memory_space<vmem>>, %arg6: memref<16x16x36xbf16, #tpu.memory_space<vmem>>) attributes {dimension_semantics = [#tpu.dimension_semantics<parallel>, #tpu.dimension_semantics<arbitrary>], iteration_bounds = array<i64: 2, 1>, scalar_prefetch = 0 : i64, scratch_operands = 1 : i64, tpu.core_type = #tpu.core_type<tc>, window_params = [{transform_indices = @transform_0, window_bounds = array<i64: 1, 18, 18, 4>}, {pipeline_mode = #tpu.pipeline_mode<synchronous>, transform_indices = @transform_1, window_bounds = array<i64: 36, 8>}, {transform_indices = @transform_2, window_bounds = array<i64: 1, 1, 8>}, {transform_indices = @transform_3, window_bounds = array<i64: 1, 1, 8>}]} {
    %c0 = arith.constant 0 : index
    %c0_0 = arith.constant 0 : index
    %c0_1 = arith.constant 0 : index
    %c0_2 = arith.constant 0 : index
    %0 = vector.load %arg2[%c0, %c0_0, %c0_1, %c0_2] : memref<1x18x18x4xf32, #tpu.memory_space<vmem>>, vector<1x16x16x4xf32>
    %1 = vector.shape_cast %0 : vector<1x16x16x4xf32> to vector<16x16x4xf32>
    %2 = arith.truncf %1 : vector<16x16x4xf32> to vector<16x16x4xbf16>
    %c0_3 = arith.constant 0 : index
    %c0_4 = arith.constant 0 : index
    %c0_5 = arith.constant 0 : index
    %3 = vector.load %arg6[%c0_3, %c0_4, %c0_5] : memref<16x16x36xbf16, #tpu.memory_space<vmem>>, vector<16x16x4xbf16>
    tpu.vector_store %arg6[%c0_3, %c0_4, %c0_5], %2 {strides = array<i32>} : memref<16x16x36xbf16, #tpu.memory_space<vmem>>, vector<16x16x4xbf16>,
    %c0_6 = arith.constant 0 : index
    %c0_7 = arith.constant 0 : index
    %c1 = arith.constant 1 : index
    %c0_8 = arith.constant 0 : index
    %4 = vector.load %arg2[%c0_6, %c0_7, %c1, %c0_8] : memref<1x18x18x4xf32, #tpu.memory_space<vmem>>, vector<1x16x16x4xf32>
    %5 = vector.shape_cast %4 : vector<1x16x16x4xf32> to vector<16x16x4xf32>
    %6 = arith.truncf %5 : vector<16x16x4xf32> to vector<16x16x4xbf16>
    %c0_9 = arith.constant 0 : index
    %c0_10 = arith.constant 0 : index
    %c4 = arith.constant 4 : index
    %7 = vector.load %arg6[%c0_9, %c0_10, %c4] : memref<16x16x36xbf16, #tpu.memory_space<vmem>>, vector<16x16x4xbf16>
    tpu.vector_store %arg6[%c0_9, %c0_10, %c4], %6 {strides = array<i32>} : memref<16x16x36xbf16, #tpu.memory_space<vmem>>, vector<16x16x4xbf16>,
    %c0_11 = arith.constant 0 : index
    %c0_12 = arith.constant 0 : index
    %c2 = arith.constant 2 : index
    %c0_13 = arith.constant 0 : index
    %8 = vector.load %arg2[%c0_11, %c0_12, %c2, %c0_13] : memref<1x18x18x4xf32, #tpu.memory_space<vmem>>, vector<1x16x16x4xf32>
    %9 = vector.shape_cast %8 : vector<1x16x16x4xf32> to vector<16x16x4xf32>
    %10 = arith.truncf %9 : vector<16x16x4xf32> to vector<16x16x4xbf16>
    %c0_14 = arith.constant 0 : index
    %c0_15 = arith.constant 0 : index
    %c8 = arith.constant 8 : index
    %11 = vector.load %arg6[%c0_14, %c0_15, %c8] : memref<16x16x36xbf16, #tpu.memory_space<vmem>>, vector<16x16x4xbf16>
    tpu.vector_store %arg6[%c0_14, %c0_15, %c8], %10 {strides = array<i32>} : memref<16x16x36xbf16, #tpu.memory_space<vmem>>, vector<16x16x4xbf16>,
    %c0_16 = arith.constant 0 : index
    %c1_17 = arith.constant 1 : index
    %c0_18 = arith.constant 0 : index
    %c0_19 = arith.constant 0 : index
    %12 = vector.load %arg2[%c0_16, %c1_17, %c0_18, %c0_19] : memref<1x18x18x4xf32, #tpu.memory_space<vmem>>, vector<1x16x16x4xf32>
    %13 = vector.shape_cast %12 : vector<1x16x16x4xf32> to vector<16x16x4xf32>
    %14 = arith.truncf %13 : vector<16x16x4xf32> to vector<16x16x4xbf16>
    %c0_20 = arith.constant 0 : index
    %c0_21 = arith.constant 0 : index
    %c12 = arith.constant 12 : index
    %15 = vector.load %arg6[%c0_20, %c0_21, %c12] : memref<16x16x36xbf16, #tpu.memory_space<vmem>>, vector<16x16x4xbf16>
    tpu.vector_store %arg6[%c0_20, %c0_21, %c12], %14 {strides = array<i32>} : memref<16x16x36xbf16, #tpu.memory_space<vmem>>, vector<16x16x4xbf16>,
    %c0_22 = arith.constant 0 : index
    %c1_23 = arith.constant 1 : index
    %c1_24 = arith.constant 1 : index
    %c0_25 = arith.constant 0 : index
    %16 = vector.load %arg2[%c0_22, %c1_23, %c1_24, %c0_25] : memref<1x18x18x4xf32, #tpu.memory_space<vmem>>, vector<1x16x16x4xf32>
    %17 = vector.shape_cast %16 : vector<1x16x16x4xf32> to vector<16x16x4xf32>
    %18 = arith.truncf %17 : vector<16x16x4xf32> to vector<16x16x4xbf16>
    %c0_26 = arith.constant 0 : index
    %c0_27 = arith.constant 0 : index
    %c16 = arith.constant 16 : index
    %19 = vector.load %arg6[%c0_26, %c0_27, %c16] : memref<16x16x36xbf16, #tpu.memory_space<vmem>>, vector<16x16x4xbf16>
    tpu.vector_store %arg6[%c0_26, %c0_27, %c16], %18 {strides = array<i32>} : memref<16x16x36xbf16, #tpu.memory_space<vmem>>, vector<16x16x4xbf16>,
    %c0_28 = arith.constant 0 : index
    %c1_29 = arith.constant 1 : index
    %c2_30 = arith.constant 2 : index
    %c0_31 = arith.constant 0 : index
    %20 = vector.load %arg2[%c0_28, %c1_29, %c2_30, %c0_31] : memref<1x18x18x4xf32, #tpu.memory_space<vmem>>, vector<1x16x16x4xf32>
    %21 = vector.shape_cast %20 : vector<1x16x16x4xf32> to vector<16x16x4xf32>
    %22 = arith.truncf %21 : vector<16x16x4xf32> to vector<16x16x4xbf16>
    %c0_32 = arith.constant 0 : index
    %c0_33 = arith.constant 0 : index
    %c20 = arith.constant 20 : index
    %23 = vector.load %arg6[%c0_32, %c0_33, %c20] : memref<16x16x36xbf16, #tpu.memory_space<vmem>>, vector<16x16x4xbf16>
    tpu.vector_store %arg6[%c0_32, %c0_33, %c20], %22 {strides = array<i32>} : memref<16x16x36xbf16, #tpu.memory_space<vmem>>, vector<16x16x4xbf16>,
    %c0_34 = arith.constant 0 : index
    %c2_35 = arith.constant 2 : index
    %c0_36 = arith.constant 0 : index
    %c0_37 = arith.constant 0 : index
    %24 = vector.load %arg2[%c0_34, %c2_35, %c0_36, %c0_37] : memref<1x18x18x4xf32, #tpu.memory_space<vmem>>, vector<1x16x16x4xf32>
    %25 = vector.shape_cast %24 : vector<1x16x16x4xf32> to vector<16x16x4xf32>
    %26 = arith.truncf %25 : vector<16x16x4xf32> to vector<16x16x4xbf16>
    %c0_38 = arith.constant 0 : index
    %c0_39 = arith.constant 0 : index
    %c24 = arith.constant 24 : index
    %27 = vector.load %arg6[%c0_38, %c0_39, %c24] : memref<16x16x36xbf16, #tpu.memory_space<vmem>>, vector<16x16x4xbf16>
    tpu.vector_store %arg6[%c0_38, %c0_39, %c24], %26 {strides = array<i32>} : memref<16x16x36xbf16, #tpu.memory_space<vmem>>, vector<16x16x4xbf16>,
    %c0_40 = arith.constant 0 : index
    %c2_41 = arith.constant 2 : index
    %c1_42 = arith.constant 1 : index
    %c0_43 = arith.constant 0 : index
    %28 = vector.load %arg2[%c0_40, %c2_41, %c1_42, %c0_43] : memref<1x18x18x4xf32, #tpu.memory_space<vmem>>, vector<1x16x16x4xf32>
    %29 = vector.shape_cast %28 : vector<1x16x16x4xf32> to vector<16x16x4xf32>
    %30 = arith.truncf %29 : vector<16x16x4xf32> to vector<16x16x4xbf16>
    %c0_44 = arith.constant 0 : index
    %c0_45 = arith.constant 0 : index
    %c28 = arith.constant 28 : index
    %31 = vector.load %arg6[%c0_44, %c0_45, %c28] : memref<16x16x36xbf16, #tpu.memory_space<vmem>>, vector<16x16x4xbf16>
    tpu.vector_store %arg6[%c0_44, %c0_45, %c28], %30 {strides = array<i32>} : memref<16x16x36xbf16, #tpu.memory_space<vmem>>, vector<16x16x4xbf16>,
    %c0_46 = arith.constant 0 : index
    %c2_47 = arith.constant 2 : index
    %c2_48 = arith.constant 2 : index
    %c0_49 = arith.constant 0 : index
    %32 = vector.load %arg2[%c0_46, %c2_47, %c2_48, %c0_49] : memref<1x18x18x4xf32, #tpu.memory_space<vmem>>, vector<1x16x16x4xf32>
    %33 = vector.shape_cast %32 : vector<1x16x16x4xf32> to vector<16x16x4xf32>
    %34 = arith.truncf %33 : vector<16x16x4xf32> to vector<16x16x4xbf16>
    %c0_50 = arith.constant 0 : index
    %c0_51 = arith.constant 0 : index
    %c32 = arith.constant 32 : index
    %35 = vector.load %arg6[%c0_50, %c0_51, %c32] : memref<16x16x36xbf16, #tpu.memory_space<vmem>>, vector<16x16x4xbf16>
    tpu.vector_store %arg6[%c0_50, %c0_51, %c32], %34 {strides = array<i32>} : memref<16x16x36xbf16, #tpu.memory_space<vmem>>, vector<16x16x4xbf16>,
    %c0_52 = arith.constant 0 : index
    %c0_53 = arith.constant 0 : index
    %c0_54 = arith.constant 0 : index
    %36 = vector.load %arg6[%c0_52, %c0_53, %c0_54] : memref<16x16x36xbf16, #tpu.memory_space<vmem>>, vector<16x16x36xbf16>
    %37 = vector.shape_cast %36 : vector<16x16x36xbf16> to vector<256x36xbf16>
    %c0_55 = arith.constant 0 : index
    %c0_56 = arith.constant 0 : index
    %38 = vector.load %arg3[%c0_55, %c0_56] : memref<36x8xbf16, #tpu.memory_space<vmem>>, vector<36x8xbf16>
    %cst = arith.constant dense<0.000000e+00> : vector<256x8xf32>
    %39 = tpu.matmul %37, %38, %cst {dimension_numbers = #tpu.dot_dimension_numbers<[1], [0], [0], [1], [0, 0, 1, 1], [], []>} : vector<256x36xbf16>, vector<36x8xbf16>, vector<256x8xf32> -> vector<256x8xf32>
    %c0_i32 = arith.constant 0 : i32
    %40 = arith.cmpi eq, %arg1, %c0_i32 : i32
    %41 = arith.extui %40 : i1 to i32
    %c0_i32_57 = arith.constant 0 : i32
    %42 = arith.cmpi ne, %41, %c0_i32_57 : i32
    scf.if %42 {
      %cst_72 = arith.constant 0.000000e+00 : f32
      %60 = vector.broadcast %cst_72 : f32 to vector<1x8xf32>
      %c0_73 = arith.constant 0 : index
      %c0_74 = arith.constant 0 : index
      %c0_75 = arith.constant 0 : index
      %61 = vector.load %arg4[%c0_73, %c0_74, %c0_75] : memref<1x1x8xf32, #tpu.memory_space<vmem>>, vector<1x1x8xf32>
      %62 = vector.shape_cast %61 : vector<1x1x8xf32> to vector<1x8xf32>
      %63 = vector.shape_cast %60 : vector<1x8xf32> to vector<1x1x8xf32>
      tpu.vector_store %arg4[%c0_73, %c0_74, %c0_75], %63 {strides = array<i32>} : memref<1x1x8xf32, #tpu.memory_space<vmem>>, vector<1x1x8xf32>,
      %cst_76 = arith.constant 0.000000e+00 : f32
      %64 = vector.broadcast %cst_76 : f32 to vector<1x8xf32>
      %c0_77 = arith.constant 0 : index
      %c0_78 = arith.constant 0 : index
      %c0_79 = arith.constant 0 : index
      %65 = vector.load %arg5[%c0_77, %c0_78, %c0_79] : memref<1x1x8xf32, #tpu.memory_space<vmem>>, vector<1x1x8xf32>
      %66 = vector.shape_cast %65 : vector<1x1x8xf32> to vector<1x8xf32>
      %67 = vector.shape_cast %64 : vector<1x8xf32> to vector<1x1x8xf32>
      tpu.vector_store %arg5[%c0_77, %c0_78, %c0_79], %67 {strides = array<i32>} : memref<1x1x8xf32, #tpu.memory_space<vmem>>, vector<1x1x8xf32>,
    } else {
    }
    %c0_58 = arith.constant 0 : index
    %c0_59 = arith.constant 0 : index
    %c0_60 = arith.constant 0 : index
    %43 = vector.load %arg4[%c0_58, %c0_59, %c0_60] : memref<1x1x8xf32, #tpu.memory_space<vmem>>, vector<1x1x8xf32>
    %44 = vector.shape_cast %43 : vector<1x1x8xf32> to vector<1x8xf32>
    %cst_61 = arith.constant dense<0.000000e+00> : vector<8xf32>
    %45 = vector.multi_reduction <add>, %39, %cst_61 [0] : vector<256x8xf32> to vector<8xf32>
    %46 = vector.shape_cast %45 : vector<8xf32> to vector<1x8xf32>
    %47 = arith.addf %44, %46 : vector<1x8xf32>
    %c0_62 = arith.constant 0 : index
    %c0_63 = arith.constant 0 : index
    %c0_64 = arith.constant 0 : index
    %48 = vector.load %arg4[%c0_62, %c0_63, %c0_64] : memref<1x1x8xf32, #tpu.memory_space<vmem>>, vector<1x1x8xf32>
    %49 = vector.shape_cast %48 : vector<1x1x8xf32> to vector<1x8xf32>
    %50 = vector.shape_cast %47 : vector<1x8xf32> to vector<1x1x8xf32>
    tpu.vector_store %arg4[%c0_62, %c0_63, %c0_64], %50 {strides = array<i32>} : memref<1x1x8xf32, #tpu.memory_space<vmem>>, vector<1x1x8xf32>,
    %c0_65 = arith.constant 0 : index
    %c0_66 = arith.constant 0 : index
    %c0_67 = arith.constant 0 : index
    %51 = vector.load %arg5[%c0_65, %c0_66, %c0_67] : memref<1x1x8xf32, #tpu.memory_space<vmem>>, vector<1x1x8xf32>
    %52 = vector.shape_cast %51 : vector<1x1x8xf32> to vector<1x8xf32>
    %53 = arith.mulf %39, %39 : vector<256x8xf32>
    %cst_68 = arith.constant dense<0.000000e+00> : vector<8xf32>
    %54 = vector.multi_reduction <add>, %53, %cst_68 [0] : vector<256x8xf32> to vector<8xf32>
    %55 = vector.shape_cast %54 : vector<8xf32> to vector<1x8xf32>
    %56 = arith.addf %52, %55 : vector<1x8xf32>
    %c0_69 = arith.constant 0 : index
    %c0_70 = arith.constant 0 : index
    %c0_71 = arith.constant 0 : index
    %57 = vector.load %arg5[%c0_69, %c0_70, %c0_71] : memref<1x1x8xf32, #tpu.memory_space<vmem>>, vector<1x1x8xf32>
    %58 = vector.shape_cast %57 : vector<1x1x8xf32> to vector<1x8xf32>
    %59 = vector.shape_cast %56 : vector<1x8xf32> to vector<1x1x8xf32>
    tpu.vector_store %arg5[%c0_69, %c0_70, %c0_71], %59 {strides = array<i32>} : memref<1x1x8xf32, #tpu.memory_space<vmem>>, vector<1x1x8xf32>,
    return
  }
  func.func @transform_0(%arg0: i32, %arg1: i32) -> (i32, i32, i32, i32) {
    %c1_i32 = arith.constant 1 : i32
    %0 = arith.muli %arg0, %c1_i32 : i32
    %1 = arith.addi %0, %arg1 : i32
    %c0_i32 = arith.constant 0 : i32
    %c0_i32_0 = arith.constant 0 : i32
    %c0_i32_1 = arith.constant 0 : i32
    %c0_i32_2 = arith.constant 0 : i32
    return %1, %c0_i32, %c0_i32_0, %c0_i32_1 : i32, i32, i32, i32
  }
  func.func @transform_1(%arg0: i32, %arg1: i32) -> (i32, i32) {
    %c0_i32 = arith.constant 0 : i32
    %c0_i32_0 = arith.constant 0 : i32
    %c0_i32_1 = arith.constant 0 : i32
    return %c0_i32, %c0_i32_0 : i32, i32
  }
  func.func @transform_2(%arg0: i32, %arg1: i32) -> (i32, i32, i32) {
    %c0_i32 = arith.constant 0 : i32
    %c0_i32_0 = arith.constant 0 : i32
    %c0_i32_1 = arith.constant 0 : i32
    return %arg0, %c0_i32, %c0_i32_0 : i32, i32, i32
  }
  func.func @transform_3(%arg0: i32, %arg1: i32) -> (i32, i32, i32) {
    %c0_i32 = arith.constant 0 : i32
    %c0_i32_0 = arith.constant 0 : i32
    %c0_i32_1 = arith.constant 0 : i32
    return %arg0, %c0_i32, %c0_i32_0 : i32, i32, i32
  }
}

module attributes {stable_mosaic.version = 11 : i64} {
  func.func @conv_bn_relu_kernel(%arg0: i32, %arg1: memref<1x18x18x4xf32, #tpu.memory_space<vmem>>, %arg2: memref<36x8xbf16, #tpu.memory_space<vmem>>, %arg3: memref<1x8xf32, #tpu.memory_space<vmem>>, %arg4: memref<1x8xf32, #tpu.memory_space<vmem>>, %arg5: memref<1x256x8xf32, #tpu.memory_space<vmem>>, %arg6: memref<16x16x36xbf16, #tpu.memory_space<vmem>>) attributes {dimension_semantics = [#tpu.dimension_semantics<parallel>], iteration_bounds = array<i64: 2>, scalar_prefetch = 0 : i64, scratch_operands = 1 : i64, tpu.core_type = #tpu.core_type<tc>, window_params = [{transform_indices = @transform_0, window_bounds = array<i64: 1, 18, 18, 4>}, {pipeline_mode = #tpu.pipeline_mode<synchronous>, transform_indices = @transform_1, window_bounds = array<i64: 36, 8>}, {pipeline_mode = #tpu.pipeline_mode<synchronous>, transform_indices = @transform_2, window_bounds = array<i64: 1, 8>}, {pipeline_mode = #tpu.pipeline_mode<synchronous>, transform_indices = @transform_3, window_bounds = array<i64: 1, 8>}, {transform_indices = @transform_4, window_bounds = array<i64: 1, 256, 8>}]} {
    %c0 = arith.constant 0 : index
    %c0_0 = arith.constant 0 : index
    %c0_1 = arith.constant 0 : index
    %c0_2 = arith.constant 0 : index
    %0 = vector.load %arg1[%c0, %c0_0, %c0_1, %c0_2] : memref<1x18x18x4xf32, #tpu.memory_space<vmem>>, vector<1x16x16x4xf32>
    %1 = vector.shape_cast %0 : vector<1x16x16x4xf32> to vector<16x16x4xf32>
    %2 = arith.truncf %1 : vector<16x16x4xf32> to vector<16x16x4xbf16>
    %c0_3 = arith.constant 0 : index
    %c0_4 = arith.constant 0 : index
    %c0_5 = arith.constant 0 : index
    %3 = vector.load %arg6[%c0_3, %c0_4, %c0_5] : memref<16x16x36xbf16, #tpu.memory_space<vmem>>, vector<16x16x4xbf16>
    tpu.vector_store %arg6[%c0_3, %c0_4, %c0_5], %2 {strides = array<i32>} : memref<16x16x36xbf16, #tpu.memory_space<vmem>>, vector<16x16x4xbf16>,
    %c0_6 = arith.constant 0 : index
    %c0_7 = arith.constant 0 : index
    %c1 = arith.constant 1 : index
    %c0_8 = arith.constant 0 : index
    %4 = vector.load %arg1[%c0_6, %c0_7, %c1, %c0_8] : memref<1x18x18x4xf32, #tpu.memory_space<vmem>>, vector<1x16x16x4xf32>
    %5 = vector.shape_cast %4 : vector<1x16x16x4xf32> to vector<16x16x4xf32>
    %6 = arith.truncf %5 : vector<16x16x4xf32> to vector<16x16x4xbf16>
    %c0_9 = arith.constant 0 : index
    %c0_10 = arith.constant 0 : index
    %c4 = arith.constant 4 : index
    %7 = vector.load %arg6[%c0_9, %c0_10, %c4] : memref<16x16x36xbf16, #tpu.memory_space<vmem>>, vector<16x16x4xbf16>
    tpu.vector_store %arg6[%c0_9, %c0_10, %c4], %6 {strides = array<i32>} : memref<16x16x36xbf16, #tpu.memory_space<vmem>>, vector<16x16x4xbf16>,
    %c0_11 = arith.constant 0 : index
    %c0_12 = arith.constant 0 : index
    %c2 = arith.constant 2 : index
    %c0_13 = arith.constant 0 : index
    %8 = vector.load %arg1[%c0_11, %c0_12, %c2, %c0_13] : memref<1x18x18x4xf32, #tpu.memory_space<vmem>>, vector<1x16x16x4xf32>
    %9 = vector.shape_cast %8 : vector<1x16x16x4xf32> to vector<16x16x4xf32>
    %10 = arith.truncf %9 : vector<16x16x4xf32> to vector<16x16x4xbf16>
    %c0_14 = arith.constant 0 : index
    %c0_15 = arith.constant 0 : index
    %c8 = arith.constant 8 : index
    %11 = vector.load %arg6[%c0_14, %c0_15, %c8] : memref<16x16x36xbf16, #tpu.memory_space<vmem>>, vector<16x16x4xbf16>
    tpu.vector_store %arg6[%c0_14, %c0_15, %c8], %10 {strides = array<i32>} : memref<16x16x36xbf16, #tpu.memory_space<vmem>>, vector<16x16x4xbf16>,
    %c0_16 = arith.constant 0 : index
    %c1_17 = arith.constant 1 : index
    %c0_18 = arith.constant 0 : index
    %c0_19 = arith.constant 0 : index
    %12 = vector.load %arg1[%c0_16, %c1_17, %c0_18, %c0_19] : memref<1x18x18x4xf32, #tpu.memory_space<vmem>>, vector<1x16x16x4xf32>
    %13 = vector.shape_cast %12 : vector<1x16x16x4xf32> to vector<16x16x4xf32>
    %14 = arith.truncf %13 : vector<16x16x4xf32> to vector<16x16x4xbf16>
    %c0_20 = arith.constant 0 : index
    %c0_21 = arith.constant 0 : index
    %c12 = arith.constant 12 : index
    %15 = vector.load %arg6[%c0_20, %c0_21, %c12] : memref<16x16x36xbf16, #tpu.memory_space<vmem>>, vector<16x16x4xbf16>
    tpu.vector_store %arg6[%c0_20, %c0_21, %c12], %14 {strides = array<i32>} : memref<16x16x36xbf16, #tpu.memory_space<vmem>>, vector<16x16x4xbf16>,
    %c0_22 = arith.constant 0 : index
    %c1_23 = arith.constant 1 : index
    %c1_24 = arith.constant 1 : index
    %c0_25 = arith.constant 0 : index
    %16 = vector.load %arg1[%c0_22, %c1_23, %c1_24, %c0_25] : memref<1x18x18x4xf32, #tpu.memory_space<vmem>>, vector<1x16x16x4xf32>
    %17 = vector.shape_cast %16 : vector<1x16x16x4xf32> to vector<16x16x4xf32>
    %18 = arith.truncf %17 : vector<16x16x4xf32> to vector<16x16x4xbf16>
    %c0_26 = arith.constant 0 : index
    %c0_27 = arith.constant 0 : index
    %c16 = arith.constant 16 : index
    %19 = vector.load %arg6[%c0_26, %c0_27, %c16] : memref<16x16x36xbf16, #tpu.memory_space<vmem>>, vector<16x16x4xbf16>
    tpu.vector_store %arg6[%c0_26, %c0_27, %c16], %18 {strides = array<i32>} : memref<16x16x36xbf16, #tpu.memory_space<vmem>>, vector<16x16x4xbf16>,
    %c0_28 = arith.constant 0 : index
    %c1_29 = arith.constant 1 : index
    %c2_30 = arith.constant 2 : index
    %c0_31 = arith.constant 0 : index
    %20 = vector.load %arg1[%c0_28, %c1_29, %c2_30, %c0_31] : memref<1x18x18x4xf32, #tpu.memory_space<vmem>>, vector<1x16x16x4xf32>
    %21 = vector.shape_cast %20 : vector<1x16x16x4xf32> to vector<16x16x4xf32>
    %22 = arith.truncf %21 : vector<16x16x4xf32> to vector<16x16x4xbf16>
    %c0_32 = arith.constant 0 : index
    %c0_33 = arith.constant 0 : index
    %c20 = arith.constant 20 : index
    %23 = vector.load %arg6[%c0_32, %c0_33, %c20] : memref<16x16x36xbf16, #tpu.memory_space<vmem>>, vector<16x16x4xbf16>
    tpu.vector_store %arg6[%c0_32, %c0_33, %c20], %22 {strides = array<i32>} : memref<16x16x36xbf16, #tpu.memory_space<vmem>>, vector<16x16x4xbf16>,
    %c0_34 = arith.constant 0 : index
    %c2_35 = arith.constant 2 : index
    %c0_36 = arith.constant 0 : index
    %c0_37 = arith.constant 0 : index
    %24 = vector.load %arg1[%c0_34, %c2_35, %c0_36, %c0_37] : memref<1x18x18x4xf32, #tpu.memory_space<vmem>>, vector<1x16x16x4xf32>
    %25 = vector.shape_cast %24 : vector<1x16x16x4xf32> to vector<16x16x4xf32>
    %26 = arith.truncf %25 : vector<16x16x4xf32> to vector<16x16x4xbf16>
    %c0_38 = arith.constant 0 : index
    %c0_39 = arith.constant 0 : index
    %c24 = arith.constant 24 : index
    %27 = vector.load %arg6[%c0_38, %c0_39, %c24] : memref<16x16x36xbf16, #tpu.memory_space<vmem>>, vector<16x16x4xbf16>
    tpu.vector_store %arg6[%c0_38, %c0_39, %c24], %26 {strides = array<i32>} : memref<16x16x36xbf16, #tpu.memory_space<vmem>>, vector<16x16x4xbf16>,
    %c0_40 = arith.constant 0 : index
    %c2_41 = arith.constant 2 : index
    %c1_42 = arith.constant 1 : index
    %c0_43 = arith.constant 0 : index
    %28 = vector.load %arg1[%c0_40, %c2_41, %c1_42, %c0_43] : memref<1x18x18x4xf32, #tpu.memory_space<vmem>>, vector<1x16x16x4xf32>
    %29 = vector.shape_cast %28 : vector<1x16x16x4xf32> to vector<16x16x4xf32>
    %30 = arith.truncf %29 : vector<16x16x4xf32> to vector<16x16x4xbf16>
    %c0_44 = arith.constant 0 : index
    %c0_45 = arith.constant 0 : index
    %c28 = arith.constant 28 : index
    %31 = vector.load %arg6[%c0_44, %c0_45, %c28] : memref<16x16x36xbf16, #tpu.memory_space<vmem>>, vector<16x16x4xbf16>
    tpu.vector_store %arg6[%c0_44, %c0_45, %c28], %30 {strides = array<i32>} : memref<16x16x36xbf16, #tpu.memory_space<vmem>>, vector<16x16x4xbf16>,
    %c0_46 = arith.constant 0 : index
    %c2_47 = arith.constant 2 : index
    %c2_48 = arith.constant 2 : index
    %c0_49 = arith.constant 0 : index
    %32 = vector.load %arg1[%c0_46, %c2_47, %c2_48, %c0_49] : memref<1x18x18x4xf32, #tpu.memory_space<vmem>>, vector<1x16x16x4xf32>
    %33 = vector.shape_cast %32 : vector<1x16x16x4xf32> to vector<16x16x4xf32>
    %34 = arith.truncf %33 : vector<16x16x4xf32> to vector<16x16x4xbf16>
    %c0_50 = arith.constant 0 : index
    %c0_51 = arith.constant 0 : index
    %c32 = arith.constant 32 : index
    %35 = vector.load %arg6[%c0_50, %c0_51, %c32] : memref<16x16x36xbf16, #tpu.memory_space<vmem>>, vector<16x16x4xbf16>
    tpu.vector_store %arg6[%c0_50, %c0_51, %c32], %34 {strides = array<i32>} : memref<16x16x36xbf16, #tpu.memory_space<vmem>>, vector<16x16x4xbf16>,
    %c0_52 = arith.constant 0 : index
    %c0_53 = arith.constant 0 : index
    %c0_54 = arith.constant 0 : index
    %36 = vector.load %arg6[%c0_52, %c0_53, %c0_54] : memref<16x16x36xbf16, #tpu.memory_space<vmem>>, vector<16x16x36xbf16>
    %37 = vector.shape_cast %36 : vector<16x16x36xbf16> to vector<256x36xbf16>
    %c0_55 = arith.constant 0 : index
    %c0_56 = arith.constant 0 : index
    %38 = vector.load %arg2[%c0_55, %c0_56] : memref<36x8xbf16, #tpu.memory_space<vmem>>, vector<36x8xbf16>
    %cst = arith.constant dense<0.000000e+00> : vector<256x8xf32>
    %39 = tpu.matmul %37, %38, %cst {dimension_numbers = #tpu.dot_dimension_numbers<[1], [0], [0], [1], [0, 0, 1, 1], [], []>} : vector<256x36xbf16>, vector<36x8xbf16>, vector<256x8xf32> -> vector<256x8xf32>
    %c0_57 = arith.constant 0 : index
    %c0_58 = arith.constant 0 : index
    %40 = vector.load %arg3[%c0_57, %c0_58] : memref<1x8xf32, #tpu.memory_space<vmem>>, vector<1x8xf32>
    %41 = vector.broadcast %40 : vector<1x8xf32> to vector<256x8xf32>
    %42 = arith.mulf %39, %41 : vector<256x8xf32>
    %c0_59 = arith.constant 0 : index
    %c0_60 = arith.constant 0 : index
    %43 = vector.load %arg4[%c0_59, %c0_60] : memref<1x8xf32, #tpu.memory_space<vmem>>, vector<1x8xf32>
    %44 = vector.broadcast %43 : vector<1x8xf32> to vector<256x8xf32>
    %45 = arith.addf %42, %44 : vector<256x8xf32>
    %cst_61 = arith.constant 0.000000e+00 : f32
    %46 = vector.broadcast %cst_61 : f32 to vector<256x8xf32>
    %47 = arith.maximumf %45, %46 : vector<256x8xf32>
    %c0_62 = arith.constant 0 : index
    %c0_63 = arith.constant 0 : index
    %c0_64 = arith.constant 0 : index
    %48 = vector.load %arg5[%c0_62, %c0_63, %c0_64] : memref<1x256x8xf32, #tpu.memory_space<vmem>>, vector<1x256x8xf32>
    %49 = vector.shape_cast %48 : vector<1x256x8xf32> to vector<256x8xf32>
    %50 = vector.shape_cast %47 : vector<256x8xf32> to vector<1x256x8xf32>
    tpu.vector_store %arg5[%c0_62, %c0_63, %c0_64], %50 {strides = array<i32>} : memref<1x256x8xf32, #tpu.memory_space<vmem>>, vector<1x256x8xf32>,
    return
  }
  func.func @transform_0(%arg0: i32) -> (i32, i32, i32, i32) {
    %c0_i32 = arith.constant 0 : i32
    %c0_i32_0 = arith.constant 0 : i32
    %c0_i32_1 = arith.constant 0 : i32
    %c0_i32_2 = arith.constant 0 : i32
    return %arg0, %c0_i32, %c0_i32_0, %c0_i32_1 : i32, i32, i32, i32
  }
  func.func @transform_1(%arg0: i32) -> (i32, i32) {
    %c0_i32 = arith.constant 0 : i32
    %c0_i32_0 = arith.constant 0 : i32
    %c0_i32_1 = arith.constant 0 : i32
    return %c0_i32, %c0_i32_0 : i32, i32
  }
  func.func @transform_2(%arg0: i32) -> (i32, i32) {
    %c0_i32 = arith.constant 0 : i32
    %c0_i32_0 = arith.constant 0 : i32
    %c0_i32_1 = arith.constant 0 : i32
    return %c0_i32, %c0_i32_0 : i32, i32
  }
  func.func @transform_3(%arg0: i32) -> (i32, i32) {
    %c0_i32 = arith.constant 0 : i32
    %c0_i32_0 = arith.constant 0 : i32
    %c0_i32_1 = arith.constant 0 : i32
    return %c0_i32, %c0_i32_0 : i32, i32
  }
  func.func @transform_4(%arg0: i32) -> (i32, i32, i32) {
    %c0_i32 = arith.constant 0 : i32
    %c0_i32_0 = arith.constant 0 : i32
    %c0_i32_1 = arith.constant 0 : i32
    return %arg0, %c0_i32, %c0_i32_0 : i32, i32, i32
  }
}

module attributes {stable_mosaic.version = 11 : i64} {
  func.func @maxpool_kernel(%arg0: i32, %arg1: memref<1x8x2x8x16xf32, #tpu.memory_space<vmem>>, %arg2: memref<1x8x8x8xf32, #tpu.memory_space<vmem>>) attributes {dimension_semantics = [#tpu.dimension_semantics<parallel>], iteration_bounds = array<i64: 2>, scalar_prefetch = 0 : i64, scratch_operands = 0 : i64, tpu.core_type = #tpu.core_type<tc>, window_params = [{transform_indices = @transform_0, window_bounds = array<i64: 1, 8, 2, 8, 16>}, {transform_indices = @transform_1, window_bounds = array<i64: 1, 8, 8, 8>}]} {
    %c0 = arith.constant 0 : index
    %c0_0 = arith.constant 0 : index
    %c0_1 = arith.constant 0 : index
    %c0_2 = arith.constant 0 : index
    %c0_3 = arith.constant 0 : index
    %0 = vector.load %arg1[%c0, %c0_0, %c0_1, %c0_2, %c0_3] : memref<1x8x2x8x16xf32, #tpu.memory_space<vmem>>, vector<1x8x1x8x16xf32>
    %1 = vector.shape_cast %0 : vector<1x8x1x8x16xf32> to vector<8x8x16xf32>
    %c0_4 = arith.constant 0 : index
    %c0_5 = arith.constant 0 : index
    %c1 = arith.constant 1 : index
    %c0_6 = arith.constant 0 : index
    %c0_7 = arith.constant 0 : index
    %2 = vector.load %arg1[%c0_4, %c0_5, %c1, %c0_6, %c0_7] : memref<1x8x2x8x16xf32, #tpu.memory_space<vmem>>, vector<1x8x1x8x16xf32>
    %3 = vector.shape_cast %2 : vector<1x8x1x8x16xf32> to vector<8x8x16xf32>
    %4 = arith.maximumf %1, %3 : vector<8x8x16xf32>
    %5 = vector.extract_strided_slice %4 {offsets = [0, 0, 0], sizes = [8, 8, 8], strides = [1, 1, 1]} : vector<8x8x16xf32> to vector<8x8x8xf32>
    %6 = vector.extract_strided_slice %4 {offsets = [0, 0, 8], sizes = [8, 8, 8], strides = [1, 1, 1]} : vector<8x8x16xf32> to vector<8x8x8xf32>
    %7 = arith.maximumf %5, %6 : vector<8x8x8xf32>
    %c0_8 = arith.constant 0 : index
    %c0_9 = arith.constant 0 : index
    %c0_10 = arith.constant 0 : index
    %c0_11 = arith.constant 0 : index
    %8 = vector.load %arg2[%c0_8, %c0_9, %c0_10, %c0_11] : memref<1x8x8x8xf32, #tpu.memory_space<vmem>>, vector<1x8x8x8xf32>
    %9 = vector.shape_cast %8 : vector<1x8x8x8xf32> to vector<8x8x8xf32>
    %10 = vector.shape_cast %7 : vector<8x8x8xf32> to vector<1x8x8x8xf32>
    tpu.vector_store %arg2[%c0_8, %c0_9, %c0_10, %c0_11], %10 {strides = array<i32>} : memref<1x8x8x8xf32, #tpu.memory_space<vmem>>, vector<1x8x8x8xf32>,
    return
  }
  func.func @transform_0(%arg0: i32) -> (i32, i32, i32, i32, i32) {
    %c0_i32 = arith.constant 0 : i32
    %c0_i32_0 = arith.constant 0 : i32
    %c0_i32_1 = arith.constant 0 : i32
    %c0_i32_2 = arith.constant 0 : i32
    %c0_i32_3 = arith.constant 0 : i32
    return %arg0, %c0_i32, %c0_i32_0, %c0_i32_1, %c0_i32_2 : i32, i32, i32, i32, i32
  }
  func.func @transform_1(%arg0: i32) -> (i32, i32, i32, i32) {
    %c0_i32 = arith.constant 0 : i32
    %c0_i32_0 = arith.constant 0 : i32
    %c0_i32_1 = arith.constant 0 : i32
    %c0_i32_2 = arith.constant 0 : i32
    return %arg0, %c0_i32, %c0_i32_0, %c0_i32_1 : i32, i32, i32, i32
  }
}

module attributes {stable_mosaic.version = 11 : i64} {
  func.func @conv_stats_kernel(%arg0: i32, %arg1: i32, %arg2: memref<1x10x10x8xf32, #tpu.memory_space<vmem>>, %arg3: memref<72x16xbf16, #tpu.memory_space<vmem>>, %arg4: memref<1x1x16xf32, #tpu.memory_space<vmem>>, %arg5: memref<1x1x16xf32, #tpu.memory_space<vmem>>, %arg6: memref<8x8x72xf32, #tpu.memory_space<vmem>>) attributes {dimension_semantics = [#tpu.dimension_semantics<parallel>, #tpu.dimension_semantics<arbitrary>], iteration_bounds = array<i64: 2, 1>, scalar_prefetch = 0 : i64, scratch_operands = 1 : i64, tpu.core_type = #tpu.core_type<tc>, window_params = [{transform_indices = @transform_0, window_bounds = array<i64: 1, 10, 10, 8>}, {pipeline_mode = #tpu.pipeline_mode<synchronous>, transform_indices = @transform_1, window_bounds = array<i64: 72, 16>}, {transform_indices = @transform_2, window_bounds = array<i64: 1, 1, 16>}, {transform_indices = @transform_3, window_bounds = array<i64: 1, 1, 16>}]} {
    %c0 = arith.constant 0 : index
    %c0_0 = arith.constant 0 : index
    %c0_1 = arith.constant 0 : index
    %c0_2 = arith.constant 0 : index
    %0 = vector.load %arg2[%c0, %c0_0, %c0_1, %c0_2] : memref<1x10x10x8xf32, #tpu.memory_space<vmem>>, vector<1x8x8x8xf32>
    %1 = vector.shape_cast %0 : vector<1x8x8x8xf32> to vector<8x8x8xf32>
    %c0_3 = arith.constant 0 : index
    %c0_4 = arith.constant 0 : index
    %c0_5 = arith.constant 0 : index
    %2 = vector.load %arg6[%c0_3, %c0_4, %c0_5] : memref<8x8x72xf32, #tpu.memory_space<vmem>>, vector<8x8x8xf32>
    tpu.vector_store %arg6[%c0_3, %c0_4, %c0_5], %1 {strides = array<i32>} : memref<8x8x72xf32, #tpu.memory_space<vmem>>, vector<8x8x8xf32>,
    %c0_6 = arith.constant 0 : index
    %c0_7 = arith.constant 0 : index
    %c1 = arith.constant 1 : index
    %c0_8 = arith.constant 0 : index
    %3 = vector.load %arg2[%c0_6, %c0_7, %c1, %c0_8] : memref<1x10x10x8xf32, #tpu.memory_space<vmem>>, vector<1x8x8x8xf32>
    %4 = vector.shape_cast %3 : vector<1x8x8x8xf32> to vector<8x8x8xf32>
    %c0_9 = arith.constant 0 : index
    %c0_10 = arith.constant 0 : index
    %c8 = arith.constant 8 : index
    %5 = vector.load %arg6[%c0_9, %c0_10, %c8] : memref<8x8x72xf32, #tpu.memory_space<vmem>>, vector<8x8x8xf32>
    tpu.vector_store %arg6[%c0_9, %c0_10, %c8], %4 {strides = array<i32>} : memref<8x8x72xf32, #tpu.memory_space<vmem>>, vector<8x8x8xf32>,
    %c0_11 = arith.constant 0 : index
    %c0_12 = arith.constant 0 : index
    %c2 = arith.constant 2 : index
    %c0_13 = arith.constant 0 : index
    %6 = vector.load %arg2[%c0_11, %c0_12, %c2, %c0_13] : memref<1x10x10x8xf32, #tpu.memory_space<vmem>>, vector<1x8x8x8xf32>
    %7 = vector.shape_cast %6 : vector<1x8x8x8xf32> to vector<8x8x8xf32>
    %c0_14 = arith.constant 0 : index
    %c0_15 = arith.constant 0 : index
    %c16 = arith.constant 16 : index
    %8 = vector.load %arg6[%c0_14, %c0_15, %c16] : memref<8x8x72xf32, #tpu.memory_space<vmem>>, vector<8x8x8xf32>
    tpu.vector_store %arg6[%c0_14, %c0_15, %c16], %7 {strides = array<i32>} : memref<8x8x72xf32, #tpu.memory_space<vmem>>, vector<8x8x8xf32>,
    %c0_16 = arith.constant 0 : index
    %c1_17 = arith.constant 1 : index
    %c0_18 = arith.constant 0 : index
    %c0_19 = arith.constant 0 : index
    %9 = vector.load %arg2[%c0_16, %c1_17, %c0_18, %c0_19] : memref<1x10x10x8xf32, #tpu.memory_space<vmem>>, vector<1x8x8x8xf32>
    %10 = vector.shape_cast %9 : vector<1x8x8x8xf32> to vector<8x8x8xf32>
    %c0_20 = arith.constant 0 : index
    %c0_21 = arith.constant 0 : index
    %c24 = arith.constant 24 : index
    %11 = vector.load %arg6[%c0_20, %c0_21, %c24] : memref<8x8x72xf32, #tpu.memory_space<vmem>>, vector<8x8x8xf32>
    tpu.vector_store %arg6[%c0_20, %c0_21, %c24], %10 {strides = array<i32>} : memref<8x8x72xf32, #tpu.memory_space<vmem>>, vector<8x8x8xf32>,
    %c0_22 = arith.constant 0 : index
    %c1_23 = arith.constant 1 : index
    %c1_24 = arith.constant 1 : index
    %c0_25 = arith.constant 0 : index
    %12 = vector.load %arg2[%c0_22, %c1_23, %c1_24, %c0_25] : memref<1x10x10x8xf32, #tpu.memory_space<vmem>>, vector<1x8x8x8xf32>
    %13 = vector.shape_cast %12 : vector<1x8x8x8xf32> to vector<8x8x8xf32>
    %c0_26 = arith.constant 0 : index
    %c0_27 = arith.constant 0 : index
    %c32 = arith.constant 32 : index
    %14 = vector.load %arg6[%c0_26, %c0_27, %c32] : memref<8x8x72xf32, #tpu.memory_space<vmem>>, vector<8x8x8xf32>
    tpu.vector_store %arg6[%c0_26, %c0_27, %c32], %13 {strides = array<i32>} : memref<8x8x72xf32, #tpu.memory_space<vmem>>, vector<8x8x8xf32>,
    %c0_28 = arith.constant 0 : index
    %c1_29 = arith.constant 1 : index
    %c2_30 = arith.constant 2 : index
    %c0_31 = arith.constant 0 : index
    %15 = vector.load %arg2[%c0_28, %c1_29, %c2_30, %c0_31] : memref<1x10x10x8xf32, #tpu.memory_space<vmem>>, vector<1x8x8x8xf32>
    %16 = vector.shape_cast %15 : vector<1x8x8x8xf32> to vector<8x8x8xf32>
    %c0_32 = arith.constant 0 : index
    %c0_33 = arith.constant 0 : index
    %c40 = arith.constant 40 : index
    %17 = vector.load %arg6[%c0_32, %c0_33, %c40] : memref<8x8x72xf32, #tpu.memory_space<vmem>>, vector<8x8x8xf32>
    tpu.vector_store %arg6[%c0_32, %c0_33, %c40], %16 {strides = array<i32>} : memref<8x8x72xf32, #tpu.memory_space<vmem>>, vector<8x8x8xf32>,
    %c0_34 = arith.constant 0 : index
    %c2_35 = arith.constant 2 : index
    %c0_36 = arith.constant 0 : index
    %c0_37 = arith.constant 0 : index
    %18 = vector.load %arg2[%c0_34, %c2_35, %c0_36, %c0_37] : memref<1x10x10x8xf32, #tpu.memory_space<vmem>>, vector<1x8x8x8xf32>
    %19 = vector.shape_cast %18 : vector<1x8x8x8xf32> to vector<8x8x8xf32>
    %c0_38 = arith.constant 0 : index
    %c0_39 = arith.constant 0 : index
    %c48 = arith.constant 48 : index
    %20 = vector.load %arg6[%c0_38, %c0_39, %c48] : memref<8x8x72xf32, #tpu.memory_space<vmem>>, vector<8x8x8xf32>
    tpu.vector_store %arg6[%c0_38, %c0_39, %c48], %19 {strides = array<i32>} : memref<8x8x72xf32, #tpu.memory_space<vmem>>, vector<8x8x8xf32>,
    %c0_40 = arith.constant 0 : index
    %c2_41 = arith.constant 2 : index
    %c1_42 = arith.constant 1 : index
    %c0_43 = arith.constant 0 : index
    %21 = vector.load %arg2[%c0_40, %c2_41, %c1_42, %c0_43] : memref<1x10x10x8xf32, #tpu.memory_space<vmem>>, vector<1x8x8x8xf32>
    %22 = vector.shape_cast %21 : vector<1x8x8x8xf32> to vector<8x8x8xf32>
    %c0_44 = arith.constant 0 : index
    %c0_45 = arith.constant 0 : index
    %c56 = arith.constant 56 : index
    %23 = vector.load %arg6[%c0_44, %c0_45, %c56] : memref<8x8x72xf32, #tpu.memory_space<vmem>>, vector<8x8x8xf32>
    tpu.vector_store %arg6[%c0_44, %c0_45, %c56], %22 {strides = array<i32>} : memref<8x8x72xf32, #tpu.memory_space<vmem>>, vector<8x8x8xf32>,
    %c0_46 = arith.constant 0 : index
    %c2_47 = arith.constant 2 : index
    %c2_48 = arith.constant 2 : index
    %c0_49 = arith.constant 0 : index
    %24 = vector.load %arg2[%c0_46, %c2_47, %c2_48, %c0_49] : memref<1x10x10x8xf32, #tpu.memory_space<vmem>>, vector<1x8x8x8xf32>
    %25 = vector.shape_cast %24 : vector<1x8x8x8xf32> to vector<8x8x8xf32>
    %c0_50 = arith.constant 0 : index
    %c0_51 = arith.constant 0 : index
    %c64 = arith.constant 64 : index
    %26 = vector.load %arg6[%c0_50, %c0_51, %c64] : memref<8x8x72xf32, #tpu.memory_space<vmem>>, vector<8x8x8xf32>
    tpu.vector_store %arg6[%c0_50, %c0_51, %c64], %25 {strides = array<i32>} : memref<8x8x72xf32, #tpu.memory_space<vmem>>, vector<8x8x8xf32>,
    %c0_52 = arith.constant 0 : index
    %c0_53 = arith.constant 0 : index
    %c0_54 = arith.constant 0 : index
    %27 = vector.load %arg6[%c0_52, %c0_53, %c0_54] : memref<8x8x72xf32, #tpu.memory_space<vmem>>, vector<8x8x72xf32>
    %28 = vector.shape_cast %27 : vector<8x8x72xf32> to vector<64x72xf32>
    %29 = arith.truncf %28 : vector<64x72xf32> to vector<64x72xbf16>
    %c0_55 = arith.constant 0 : index
    %c0_56 = arith.constant 0 : index
    %30 = vector.load %arg3[%c0_55, %c0_56] : memref<72x16xbf16, #tpu.memory_space<vmem>>, vector<72x16xbf16>
    %cst = arith.constant dense<0.000000e+00> : vector<64x16xf32>
    %31 = tpu.matmul %29, %30, %cst {dimension_numbers = #tpu.dot_dimension_numbers<[1], [0], [0], [1], [0, 0, 1, 1], [], []>} : vector<64x72xbf16>, vector<72x16xbf16>, vector<64x16xf32> -> vector<64x16xf32>
    %c0_i32 = arith.constant 0 : i32
    %32 = arith.cmpi eq, %arg1, %c0_i32 : i32
    %33 = arith.extui %32 : i1 to i32
    %c0_i32_57 = arith.constant 0 : i32
    %34 = arith.cmpi ne, %33, %c0_i32_57 : i32
    scf.if %34 {
      %cst_72 = arith.constant 0.000000e+00 : f32
      %52 = vector.broadcast %cst_72 : f32 to vector<1x16xf32>
      %c0_73 = arith.constant 0 : index
      %c0_74 = arith.constant 0 : index
      %c0_75 = arith.constant 0 : index
      %53 = vector.load %arg4[%c0_73, %c0_74, %c0_75] : memref<1x1x16xf32, #tpu.memory_space<vmem>>, vector<1x1x16xf32>
      %54 = vector.shape_cast %53 : vector<1x1x16xf32> to vector<1x16xf32>
      %55 = vector.shape_cast %52 : vector<1x16xf32> to vector<1x1x16xf32>
      tpu.vector_store %arg4[%c0_73, %c0_74, %c0_75], %55 {strides = array<i32>} : memref<1x1x16xf32, #tpu.memory_space<vmem>>, vector<1x1x16xf32>,
      %cst_76 = arith.constant 0.000000e+00 : f32
      %56 = vector.broadcast %cst_76 : f32 to vector<1x16xf32>
      %c0_77 = arith.constant 0 : index
      %c0_78 = arith.constant 0 : index
      %c0_79 = arith.constant 0 : index
      %57 = vector.load %arg5[%c0_77, %c0_78, %c0_79] : memref<1x1x16xf32, #tpu.memory_space<vmem>>, vector<1x1x16xf32>
      %58 = vector.shape_cast %57 : vector<1x1x16xf32> to vector<1x16xf32>
      %59 = vector.shape_cast %56 : vector<1x16xf32> to vector<1x1x16xf32>
      tpu.vector_store %arg5[%c0_77, %c0_78, %c0_79], %59 {strides = array<i32>} : memref<1x1x16xf32, #tpu.memory_space<vmem>>, vector<1x1x16xf32>,
    } else {
    }
    %c0_58 = arith.constant 0 : index
    %c0_59 = arith.constant 0 : index
    %c0_60 = arith.constant 0 : index
    %35 = vector.load %arg4[%c0_58, %c0_59, %c0_60] : memref<1x1x16xf32, #tpu.memory_space<vmem>>, vector<1x1x16xf32>
    %36 = vector.shape_cast %35 : vector<1x1x16xf32> to vector<1x16xf32>
    %cst_61 = arith.constant dense<0.000000e+00> : vector<16xf32>
    %37 = vector.multi_reduction <add>, %31, %cst_61 [0] : vector<64x16xf32> to vector<16xf32>
    %38 = vector.shape_cast %37 : vector<16xf32> to vector<1x16xf32>
    %39 = arith.addf %36, %38 : vector<1x16xf32>
    %c0_62 = arith.constant 0 : index
    %c0_63 = arith.constant 0 : index
    %c0_64 = arith.constant 0 : index
    %40 = vector.load %arg4[%c0_62, %c0_63, %c0_64] : memref<1x1x16xf32, #tpu.memory_space<vmem>>, vector<1x1x16xf32>
    %41 = vector.shape_cast %40 : vector<1x1x16xf32> to vector<1x16xf32>
    %42 = vector.shape_cast %39 : vector<1x16xf32> to vector<1x1x16xf32>
    tpu.vector_store %arg4[%c0_62, %c0_63, %c0_64], %42 {strides = array<i32>} : memref<1x1x16xf32, #tpu.memory_space<vmem>>, vector<1x1x16xf32>,
    %c0_65 = arith.constant 0 : index
    %c0_66 = arith.constant 0 : index
    %c0_67 = arith.constant 0 : index
    %43 = vector.load %arg5[%c0_65, %c0_66, %c0_67] : memref<1x1x16xf32, #tpu.memory_space<vmem>>, vector<1x1x16xf32>
    %44 = vector.shape_cast %43 : vector<1x1x16xf32> to vector<1x16xf32>
    %45 = arith.mulf %31, %31 : vector<64x16xf32>
    %cst_68 = arith.constant dense<0.000000e+00> : vector<16xf32>
    %46 = vector.multi_reduction <add>, %45, %cst_68 [0] : vector<64x16xf32> to vector<16xf32>
    %47 = vector.shape_cast %46 : vector<16xf32> to vector<1x16xf32>
    %48 = arith.addf %44, %47 : vector<1x16xf32>
    %c0_69 = arith.constant 0 : index
    %c0_70 = arith.constant 0 : index
    %c0_71 = arith.constant 0 : index
    %49 = vector.load %arg5[%c0_69, %c0_70, %c0_71] : memref<1x1x16xf32, #tpu.memory_space<vmem>>, vector<1x1x16xf32>
    %50 = vector.shape_cast %49 : vector<1x1x16xf32> to vector<1x16xf32>
    %51 = vector.shape_cast %48 : vector<1x16xf32> to vector<1x1x16xf32>
    tpu.vector_store %arg5[%c0_69, %c0_70, %c0_71], %51 {strides = array<i32>} : memref<1x1x16xf32, #tpu.memory_space<vmem>>, vector<1x1x16xf32>,
    return
  }
  func.func @transform_0(%arg0: i32, %arg1: i32) -> (i32, i32, i32, i32) {
    %c1_i32 = arith.constant 1 : i32
    %0 = arith.muli %arg0, %c1_i32 : i32
    %1 = arith.addi %0, %arg1 : i32
    %c0_i32 = arith.constant 0 : i32
    %c0_i32_0 = arith.constant 0 : i32
    %c0_i32_1 = arith.constant 0 : i32
    %c0_i32_2 = arith.constant 0 : i32
    return %1, %c0_i32, %c0_i32_0, %c0_i32_1 : i32, i32, i32, i32
  }
  func.func @transform_1(%arg0: i32, %arg1: i32) -> (i32, i32) {
    %c0_i32 = arith.constant 0 : i32
    %c0_i32_0 = arith.constant 0 : i32
    %c0_i32_1 = arith.constant 0 : i32
    return %c0_i32, %c0_i32_0 : i32, i32
  }
  func.func @transform_2(%arg0: i32, %arg1: i32) -> (i32, i32, i32) {
    %c0_i32 = arith.constant 0 : i32
    %c0_i32_0 = arith.constant 0 : i32
    %c0_i32_1 = arith.constant 0 : i32
    return %arg0, %c0_i32, %c0_i32_0 : i32, i32, i32
  }
  func.func @transform_3(%arg0: i32, %arg1: i32) -> (i32, i32, i32) {
    %c0_i32 = arith.constant 0 : i32
    %c0_i32_0 = arith.constant 0 : i32
    %c0_i32_1 = arith.constant 0 : i32
    return %arg0, %c0_i32, %c0_i32_0 : i32, i32, i32
  }
}

module attributes {stable_mosaic.version = 11 : i64} {
  func.func @conv_bn_relu_kernel(%arg0: i32, %arg1: memref<1x10x10x8xf32, #tpu.memory_space<vmem>>, %arg2: memref<72x16xbf16, #tpu.memory_space<vmem>>, %arg3: memref<1x16xf32, #tpu.memory_space<vmem>>, %arg4: memref<1x16xf32, #tpu.memory_space<vmem>>, %arg5: memref<1x64x16xf32, #tpu.memory_space<vmem>>, %arg6: memref<8x8x72xf32, #tpu.memory_space<vmem>>) attributes {dimension_semantics = [#tpu.dimension_semantics<parallel>], iteration_bounds = array<i64: 2>, scalar_prefetch = 0 : i64, scratch_operands = 1 : i64, tpu.core_type = #tpu.core_type<tc>, window_params = [{transform_indices = @transform_0, window_bounds = array<i64: 1, 10, 10, 8>}, {pipeline_mode = #tpu.pipeline_mode<synchronous>, transform_indices = @transform_1, window_bounds = array<i64: 72, 16>}, {pipeline_mode = #tpu.pipeline_mode<synchronous>, transform_indices = @transform_2, window_bounds = array<i64: 1, 16>}, {pipeline_mode = #tpu.pipeline_mode<synchronous>, transform_indices = @transform_3, window_bounds = array<i64: 1, 16>}, {transform_indices = @transform_4, window_bounds = array<i64: 1, 64, 16>}]} {
    %c0 = arith.constant 0 : index
    %c0_0 = arith.constant 0 : index
    %c0_1 = arith.constant 0 : index
    %c0_2 = arith.constant 0 : index
    %0 = vector.load %arg1[%c0, %c0_0, %c0_1, %c0_2] : memref<1x10x10x8xf32, #tpu.memory_space<vmem>>, vector<1x8x8x8xf32>
    %1 = vector.shape_cast %0 : vector<1x8x8x8xf32> to vector<8x8x8xf32>
    %c0_3 = arith.constant 0 : index
    %c0_4 = arith.constant 0 : index
    %c0_5 = arith.constant 0 : index
    %2 = vector.load %arg6[%c0_3, %c0_4, %c0_5] : memref<8x8x72xf32, #tpu.memory_space<vmem>>, vector<8x8x8xf32>
    tpu.vector_store %arg6[%c0_3, %c0_4, %c0_5], %1 {strides = array<i32>} : memref<8x8x72xf32, #tpu.memory_space<vmem>>, vector<8x8x8xf32>,
    %c0_6 = arith.constant 0 : index
    %c0_7 = arith.constant 0 : index
    %c1 = arith.constant 1 : index
    %c0_8 = arith.constant 0 : index
    %3 = vector.load %arg1[%c0_6, %c0_7, %c1, %c0_8] : memref<1x10x10x8xf32, #tpu.memory_space<vmem>>, vector<1x8x8x8xf32>
    %4 = vector.shape_cast %3 : vector<1x8x8x8xf32> to vector<8x8x8xf32>
    %c0_9 = arith.constant 0 : index
    %c0_10 = arith.constant 0 : index
    %c8 = arith.constant 8 : index
    %5 = vector.load %arg6[%c0_9, %c0_10, %c8] : memref<8x8x72xf32, #tpu.memory_space<vmem>>, vector<8x8x8xf32>
    tpu.vector_store %arg6[%c0_9, %c0_10, %c8], %4 {strides = array<i32>} : memref<8x8x72xf32, #tpu.memory_space<vmem>>, vector<8x8x8xf32>,
    %c0_11 = arith.constant 0 : index
    %c0_12 = arith.constant 0 : index
    %c2 = arith.constant 2 : index
    %c0_13 = arith.constant 0 : index
    %6 = vector.load %arg1[%c0_11, %c0_12, %c2, %c0_13] : memref<1x10x10x8xf32, #tpu.memory_space<vmem>>, vector<1x8x8x8xf32>
    %7 = vector.shape_cast %6 : vector<1x8x8x8xf32> to vector<8x8x8xf32>
    %c0_14 = arith.constant 0 : index
    %c0_15 = arith.constant 0 : index
    %c16 = arith.constant 16 : index
    %8 = vector.load %arg6[%c0_14, %c0_15, %c16] : memref<8x8x72xf32, #tpu.memory_space<vmem>>, vector<8x8x8xf32>
    tpu.vector_store %arg6[%c0_14, %c0_15, %c16], %7 {strides = array<i32>} : memref<8x8x72xf32, #tpu.memory_space<vmem>>, vector<8x8x8xf32>,
    %c0_16 = arith.constant 0 : index
    %c1_17 = arith.constant 1 : index
    %c0_18 = arith.constant 0 : index
    %c0_19 = arith.constant 0 : index
    %9 = vector.load %arg1[%c0_16, %c1_17, %c0_18, %c0_19] : memref<1x10x10x8xf32, #tpu.memory_space<vmem>>, vector<1x8x8x8xf32>
    %10 = vector.shape_cast %9 : vector<1x8x8x8xf32> to vector<8x8x8xf32>
    %c0_20 = arith.constant 0 : index
    %c0_21 = arith.constant 0 : index
    %c24 = arith.constant 24 : index
    %11 = vector.load %arg6[%c0_20, %c0_21, %c24] : memref<8x8x72xf32, #tpu.memory_space<vmem>>, vector<8x8x8xf32>
    tpu.vector_store %arg6[%c0_20, %c0_21, %c24], %10 {strides = array<i32>} : memref<8x8x72xf32, #tpu.memory_space<vmem>>, vector<8x8x8xf32>,
    %c0_22 = arith.constant 0 : index
    %c1_23 = arith.constant 1 : index
    %c1_24 = arith.constant 1 : index
    %c0_25 = arith.constant 0 : index
    %12 = vector.load %arg1[%c0_22, %c1_23, %c1_24, %c0_25] : memref<1x10x10x8xf32, #tpu.memory_space<vmem>>, vector<1x8x8x8xf32>
    %13 = vector.shape_cast %12 : vector<1x8x8x8xf32> to vector<8x8x8xf32>
    %c0_26 = arith.constant 0 : index
    %c0_27 = arith.constant 0 : index
    %c32 = arith.constant 32 : index
    %14 = vector.load %arg6[%c0_26, %c0_27, %c32] : memref<8x8x72xf32, #tpu.memory_space<vmem>>, vector<8x8x8xf32>
    tpu.vector_store %arg6[%c0_26, %c0_27, %c32], %13 {strides = array<i32>} : memref<8x8x72xf32, #tpu.memory_space<vmem>>, vector<8x8x8xf32>,
    %c0_28 = arith.constant 0 : index
    %c1_29 = arith.constant 1 : index
    %c2_30 = arith.constant 2 : index
    %c0_31 = arith.constant 0 : index
    %15 = vector.load %arg1[%c0_28, %c1_29, %c2_30, %c0_31] : memref<1x10x10x8xf32, #tpu.memory_space<vmem>>, vector<1x8x8x8xf32>
    %16 = vector.shape_cast %15 : vector<1x8x8x8xf32> to vector<8x8x8xf32>
    %c0_32 = arith.constant 0 : index
    %c0_33 = arith.constant 0 : index
    %c40 = arith.constant 40 : index
    %17 = vector.load %arg6[%c0_32, %c0_33, %c40] : memref<8x8x72xf32, #tpu.memory_space<vmem>>, vector<8x8x8xf32>
    tpu.vector_store %arg6[%c0_32, %c0_33, %c40], %16 {strides = array<i32>} : memref<8x8x72xf32, #tpu.memory_space<vmem>>, vector<8x8x8xf32>,
    %c0_34 = arith.constant 0 : index
    %c2_35 = arith.constant 2 : index
    %c0_36 = arith.constant 0 : index
    %c0_37 = arith.constant 0 : index
    %18 = vector.load %arg1[%c0_34, %c2_35, %c0_36, %c0_37] : memref<1x10x10x8xf32, #tpu.memory_space<vmem>>, vector<1x8x8x8xf32>
    %19 = vector.shape_cast %18 : vector<1x8x8x8xf32> to vector<8x8x8xf32>
    %c0_38 = arith.constant 0 : index
    %c0_39 = arith.constant 0 : index
    %c48 = arith.constant 48 : index
    %20 = vector.load %arg6[%c0_38, %c0_39, %c48] : memref<8x8x72xf32, #tpu.memory_space<vmem>>, vector<8x8x8xf32>
    tpu.vector_store %arg6[%c0_38, %c0_39, %c48], %19 {strides = array<i32>} : memref<8x8x72xf32, #tpu.memory_space<vmem>>, vector<8x8x8xf32>,
    %c0_40 = arith.constant 0 : index
    %c2_41 = arith.constant 2 : index
    %c1_42 = arith.constant 1 : index
    %c0_43 = arith.constant 0 : index
    %21 = vector.load %arg1[%c0_40, %c2_41, %c1_42, %c0_43] : memref<1x10x10x8xf32, #tpu.memory_space<vmem>>, vector<1x8x8x8xf32>
    %22 = vector.shape_cast %21 : vector<1x8x8x8xf32> to vector<8x8x8xf32>
    %c0_44 = arith.constant 0 : index
    %c0_45 = arith.constant 0 : index
    %c56 = arith.constant 56 : index
    %23 = vector.load %arg6[%c0_44, %c0_45, %c56] : memref<8x8x72xf32, #tpu.memory_space<vmem>>, vector<8x8x8xf32>
    tpu.vector_store %arg6[%c0_44, %c0_45, %c56], %22 {strides = array<i32>} : memref<8x8x72xf32, #tpu.memory_space<vmem>>, vector<8x8x8xf32>,
    %c0_46 = arith.constant 0 : index
    %c2_47 = arith.constant 2 : index
    %c2_48 = arith.constant 2 : index
    %c0_49 = arith.constant 0 : index
    %24 = vector.load %arg1[%c0_46, %c2_47, %c2_48, %c0_49] : memref<1x10x10x8xf32, #tpu.memory_space<vmem>>, vector<1x8x8x8xf32>
    %25 = vector.shape_cast %24 : vector<1x8x8x8xf32> to vector<8x8x8xf32>
    %c0_50 = arith.constant 0 : index
    %c0_51 = arith.constant 0 : index
    %c64 = arith.constant 64 : index
    %26 = vector.load %arg6[%c0_50, %c0_51, %c64] : memref<8x8x72xf32, #tpu.memory_space<vmem>>, vector<8x8x8xf32>
    tpu.vector_store %arg6[%c0_50, %c0_51, %c64], %25 {strides = array<i32>} : memref<8x8x72xf32, #tpu.memory_space<vmem>>, vector<8x8x8xf32>,
    %c0_52 = arith.constant 0 : index
    %c0_53 = arith.constant 0 : index
    %c0_54 = arith.constant 0 : index
    %27 = vector.load %arg6[%c0_52, %c0_53, %c0_54] : memref<8x8x72xf32, #tpu.memory_space<vmem>>, vector<8x8x72xf32>
    %28 = vector.shape_cast %27 : vector<8x8x72xf32> to vector<64x72xf32>
    %29 = arith.truncf %28 : vector<64x72xf32> to vector<64x72xbf16>
    %c0_55 = arith.constant 0 : index
    %c0_56 = arith.constant 0 : index
    %30 = vector.load %arg2[%c0_55, %c0_56] : memref<72x16xbf16, #tpu.memory_space<vmem>>, vector<72x16xbf16>
    %cst = arith.constant dense<0.000000e+00> : vector<64x16xf32>
    %31 = tpu.matmul %29, %30, %cst {dimension_numbers = #tpu.dot_dimension_numbers<[1], [0], [0], [1], [0, 0, 1, 1], [], []>} : vector<64x72xbf16>, vector<72x16xbf16>, vector<64x16xf32> -> vector<64x16xf32>
    %c0_57 = arith.constant 0 : index
    %c0_58 = arith.constant 0 : index
    %32 = vector.load %arg3[%c0_57, %c0_58] : memref<1x16xf32, #tpu.memory_space<vmem>>, vector<1x16xf32>
    %33 = vector.broadcast %32 : vector<1x16xf32> to vector<64x16xf32>
    %34 = arith.mulf %31, %33 : vector<64x16xf32>
    %c0_59 = arith.constant 0 : index
    %c0_60 = arith.constant 0 : index
    %35 = vector.load %arg4[%c0_59, %c0_60] : memref<1x16xf32, #tpu.memory_space<vmem>>, vector<1x16xf32>
    %36 = vector.broadcast %35 : vector<1x16xf32> to vector<64x16xf32>
    %37 = arith.addf %34, %36 : vector<64x16xf32>
    %cst_61 = arith.constant 0.000000e+00 : f32
    %38 = vector.broadcast %cst_61 : f32 to vector<64x16xf32>
    %39 = arith.maximumf %37, %38 : vector<64x16xf32>
    %c0_62 = arith.constant 0 : index
    %c0_63 = arith.constant 0 : index
    %c0_64 = arith.constant 0 : index
    %40 = vector.load %arg5[%c0_62, %c0_63, %c0_64] : memref<1x64x16xf32, #tpu.memory_space<vmem>>, vector<1x64x16xf32>
    %41 = vector.shape_cast %40 : vector<1x64x16xf32> to vector<64x16xf32>
    %42 = vector.shape_cast %39 : vector<64x16xf32> to vector<1x64x16xf32>
    tpu.vector_store %arg5[%c0_62, %c0_63, %c0_64], %42 {strides = array<i32>} : memref<1x64x16xf32, #tpu.memory_space<vmem>>, vector<1x64x16xf32>,
    return
  }
  func.func @transform_0(%arg0: i32) -> (i32, i32, i32, i32) {
    %c0_i32 = arith.constant 0 : i32
    %c0_i32_0 = arith.constant 0 : i32
    %c0_i32_1 = arith.constant 0 : i32
    %c0_i32_2 = arith.constant 0 : i32
    return %arg0, %c0_i32, %c0_i32_0, %c0_i32_1 : i32, i32, i32, i32
  }
  func.func @transform_1(%arg0: i32) -> (i32, i32) {
    %c0_i32 = arith.constant 0 : i32
    %c0_i32_0 = arith.constant 0 : i32
    %c0_i32_1 = arith.constant 0 : i32
    return %c0_i32, %c0_i32_0 : i32, i32
  }
  func.func @transform_2(%arg0: i32) -> (i32, i32) {
    %c0_i32 = arith.constant 0 : i32
    %c0_i32_0 = arith.constant 0 : i32
    %c0_i32_1 = arith.constant 0 : i32
    return %c0_i32, %c0_i32_0 : i32, i32
  }
  func.func @transform_3(%arg0: i32) -> (i32, i32) {
    %c0_i32 = arith.constant 0 : i32
    %c0_i32_0 = arith.constant 0 : i32
    %c0_i32_1 = arith.constant 0 : i32
    return %c0_i32, %c0_i32_0 : i32, i32
  }
  func.func @transform_4(%arg0: i32) -> (i32, i32, i32) {
    %c0_i32 = arith.constant 0 : i32
    %c0_i32_0 = arith.constant 0 : i32
    %c0_i32_1 = arith.constant 0 : i32
    return %arg0, %c0_i32, %c0_i32_0 : i32, i32, i32
  }
}

module attributes {stable_mosaic.version = 11 : i64} {
  func.func @maxpool_kernel(%arg0: i32, %arg1: memref<1x4x2x4x32xf32, #tpu.memory_space<vmem>>, %arg2: memref<1x4x4x16xf32, #tpu.memory_space<vmem>>) attributes {dimension_semantics = [#tpu.dimension_semantics<parallel>], iteration_bounds = array<i64: 2>, scalar_prefetch = 0 : i64, scratch_operands = 0 : i64, tpu.core_type = #tpu.core_type<tc>, window_params = [{transform_indices = @transform_0, window_bounds = array<i64: 1, 4, 2, 4, 32>}, {transform_indices = @transform_1, window_bounds = array<i64: 1, 4, 4, 16>}]} {
    %c0 = arith.constant 0 : index
    %c0_0 = arith.constant 0 : index
    %c0_1 = arith.constant 0 : index
    %c0_2 = arith.constant 0 : index
    %c0_3 = arith.constant 0 : index
    %0 = vector.load %arg1[%c0, %c0_0, %c0_1, %c0_2, %c0_3] : memref<1x4x2x4x32xf32, #tpu.memory_space<vmem>>, vector<1x4x1x4x32xf32>
    %1 = vector.shape_cast %0 : vector<1x4x1x4x32xf32> to vector<4x4x32xf32>
    %c0_4 = arith.constant 0 : index
    %c0_5 = arith.constant 0 : index
    %c1 = arith.constant 1 : index
    %c0_6 = arith.constant 0 : index
    %c0_7 = arith.constant 0 : index
    %2 = vector.load %arg1[%c0_4, %c0_5, %c1, %c0_6, %c0_7] : memref<1x4x2x4x32xf32, #tpu.memory_space<vmem>>, vector<1x4x1x4x32xf32>
    %3 = vector.shape_cast %2 : vector<1x4x1x4x32xf32> to vector<4x4x32xf32>
    %4 = arith.maximumf %1, %3 : vector<4x4x32xf32>
    %5 = vector.extract_strided_slice %4 {offsets = [0, 0, 0], sizes = [4, 4, 16], strides = [1, 1, 1]} : vector<4x4x32xf32> to vector<4x4x16xf32>
    %6 = vector.extract_strided_slice %4 {offsets = [0, 0, 16], sizes = [4, 4, 16], strides = [1, 1, 1]} : vector<4x4x32xf32> to vector<4x4x16xf32>
    %7 = arith.maximumf %5, %6 : vector<4x4x16xf32>
    %c0_8 = arith.constant 0 : index
    %c0_9 = arith.constant 0 : index
    %c0_10 = arith.constant 0 : index
    %c0_11 = arith.constant 0 : index
    %8 = vector.load %arg2[%c0_8, %c0_9, %c0_10, %c0_11] : memref<1x4x4x16xf32, #tpu.memory_space<vmem>>, vector<1x4x4x16xf32>
    %9 = vector.shape_cast %8 : vector<1x4x4x16xf32> to vector<4x4x16xf32>
    %10 = vector.shape_cast %7 : vector<4x4x16xf32> to vector<1x4x4x16xf32>
    tpu.vector_store %arg2[%c0_8, %c0_9, %c0_10, %c0_11], %10 {strides = array<i32>} : memref<1x4x4x16xf32, #tpu.memory_space<vmem>>, vector<1x4x4x16xf32>,
    return
  }
  func.func @transform_0(%arg0: i32) -> (i32, i32, i32, i32, i32) {
    %c0_i32 = arith.constant 0 : i32
    %c0_i32_0 = arith.constant 0 : i32
    %c0_i32_1 = arith.constant 0 : i32
    %c0_i32_2 = arith.constant 0 : i32
    %c0_i32_3 = arith.constant 0 : i32
    return %arg0, %c0_i32, %c0_i32_0, %c0_i32_1, %c0_i32_2 : i32, i32, i32, i32, i32
  }
  func.func @transform_1(%arg0: i32) -> (i32, i32, i32, i32) {
    %c0_i32 = arith.constant 0 : i32
    %c0_i32_0 = arith.constant 0 : i32
    %c0_i32_1 = arith.constant 0 : i32
    %c0_i32_2 = arith.constant 0 : i32
    return %arg0, %c0_i32, %c0_i32_0, %c0_i32_1 : i32, i32, i32, i32
  }
}

</mosaic_0001>

<bundles_post_ra>
// kernel: cnn_backbone.8
= control target key start
LH: loop header
LB: loop body
LE: loop exit
PB: predicated region body
PF: predicated region fallthrough
CT: control target
= control target key end

     0   :  { %6 = vsyncpa [#allocation3], 0  ;;  %s657_s0 = inlined_call_operand.hbm [shape: f32[2,8,2,8,16], index: 0, kind: input, shape index: {}]   ;;  %s658_s1 = inlined_call_operand.hbm [shape: f32[2,8,8,8], index: 1, kind: output, shape index: {}]  }
   0x1   :  { %8 = vsyncpa [#allocation3 + $0x1], 0 }
   0x2   :  { %9 = vsyncpa [#allocation4], 0 }
   0x3   :  { %11 = vsyncpa [#allocation4 + $0x1], 0  ;;  %s486_s6 = smov 0   ;;  %s488_s7 = smov 0  }
   0x4   :  { %s490_s8 = smov 0   ;;  %s492_s9 = smov 0  }
   0x5 LB: > { %s507_s10 = sadd.s32 4294967295, %s467_s9   ;;  %s296_s11 = sadd.s32 4294967294, %s467_s9   ;;  %s467_s9 = sphi %s492_s9, %s671_s9   ;;  %s463_s8 = sphi %s490_s8, %s670_s8   ;;  %s459_s7 = sphi %s488_s7, %s669_s7   ;;  %s455_s6 = sphi %s486_s6, %s668_s6  }
   0x6   : > { %s511_s12 = sadd.s32 1, %s467_s9   ;;  %s24_s13 = sadd.s32 1, %s463_s8 }
   0x7   : > { %s21_s14 = ssub.s32 %s467_s9, %s511_s12  ;;  %p31_p0 = scmp.ne.s32.totalorder %s463_s8, %s459_s7 }
   0x8   : > { %p22_p1 = scmp.eq.s32.totalorder %s21_s14, 0  ;;  %p32_p2 = scmp.eq.s32.totalorder %s467_s9, 0 }
   0x9   : > { %p37_p3 = scmp.ne.s32.totalorder %s459_s7, %s455_s6  ;;  %p38_p4 = scmp.eq.s32.totalorder %s507_s10, 0 }
   0xa   : > { %s523_s15 = scalar_select %p22_p1, %s463_s8, %s24_s13  }
   0xb   : > { %p525_p5 = por %p32_p2, %p31_p0  ;;  %p529_p6 = por %p38_p4, %p37_p3 }
   0xc   : > { %p61_p7 = scmp.eq.s32.totalorder %s507_s10, 1  ;;  %p67_p8 = scmp.eq.s32.totalorder %s296_s11, 1 }
   0xd   : > { %p332_p10 = scmp.lt.s32.totalorder %s467_s9, 2  ;;  %s87_s20 = sand.u32 1, %s463_s8  }
   0xe   : > { %p536_p11 = por %p61_p7, %p31_p0  ;;  %p540_p12 = por %p67_p8, %p37_p3 }
   0xf   : > { %s318_s21 = sshll.u32 %s467_s9, 11  ;;  %s299_s22 = sshll.u32 %s87_s20, 7 }
  0x10   : > { %s662_s18 = scalar_select %p536_p11, 1, 0 }
  0x11   : > { %s663_s19 = scalar_select %p540_p12, 1, 0 }
  0x12   : > { %s549_s25 = scalar_lea.hbm %s657_s0, %s318_s21  ;;  %s91_s26 = scalar_lea.vmem [#allocation2], %s299_s22 }
  0x13   : > { %s98_s27 = sshll.u32 %s91_s26, 4  ;;  %p553_p13 = pnand %p332_p10, %p525_p5  ;;  %s557_s27 = int_to_ptr.vmem [resolvable:$true] %s98_s27 }
  0x14   : > { %s559_s29 = scalar_lea.sflag [#allocation3], %s87_s20  ;;  %s371_s30 = scalar_lea.hbm %s549_s25, 2048 }
  0x15   : > { %p372_p0 = scmp.ne.s32.totalorder %s549_s25, %s371_s30  ;;  %p373_p1 = pneg %p553_p13 }
  0x16   : > { %s376_s4 = scalar_lea.hbm %s657_s0, 4096  ;;  %p377_p4 = scmp.lt.u32.totalorder %s549_s25, %s657_s0 }
  0x17   : > { %p374_p2 = pnand %p373_p1, %p372_p0  ;;  %p378_p5 = scmp.lt.u32.totalorder %s376_s4, %s371_s30 }
  0x18   : > { %p380_p8 = scmp.lt.u32.totalorder %s371_s30, %s549_s25 }
  0x19   : > { %p375_p3 = pneg %p374_p2  ;;  %p379_p7 = por %p378_p5, %p377_p4 }
  0x1b   : > { %p381_p10 = por %p380_p8, %p379_p7 }
  0x1d   : > { %p382_p9 = pnand %p381_p10, %p375_p3 }
  0x1f   : > { %385 = shalt.err (!%p382_p9)
}
  0x20   : > { %s386_s13 = scalar_lea.vmem %s557_s27, 2048  ;;  %s469_s14 = smov [#allocation2]  }
  0x21   : > { %p387_p0 = scmp.ne.s32.totalorder %s557_s27, %s386_s13  ;;  %s391_s16 = sshll.u32 %s469_s14, 4  ;;  %s392_s16 = int_to_ptr.vmem [resolvable:$false] %s391_s16 }
  0x22   : > { %s393_s20 = scalar_lea.vmem %s392_s16, 4096  ;;  %p394_p11 = scmp.lt.s32.totalorder %s557_s27, %s392_s16 }
  0x23   : > { %p389_p2 = pnand %p387_p0, %p373_p1  ;;  %p395_p4 = scmp.lt.s32.totalorder %s393_s20, %s386_s13 }
  0x25   : > { %p390_p12 = pneg %p389_p2  ;;  %p396_p5 = por %p395_p4, %p394_p11 }
  0x27   : > { %p397_p7 = pnand %p396_p5, %p390_p12 }
  0x29   : > { %400 = shalt.err (!%p397_p7)
}
  0x2a   : > { %s470_s21 = smov 128   ;;  %s471_s22 = smov 8  }
  0x2b   : > { %327 = dma.hbm_to_vmem [thread:$0]  (!%p553_p13), %s549_s25, 2048, %s557_s27, %s559_s29, %s470_s21, %s470_s21, %s471_s22  }
  0x2c   : > { %p302_p9 = scmp.ge.s32.totalorder %s467_s9, 1  ;;  %p106_p1 = scmp.lt.s32.totalorder %s467_s9, 3 }
  0x2e   : > { %p107_p3 = pnand %p302_p9, %p106_p1 }
  0x2f   : > { %s590_s23 = sand.u32 (!%p107_p3), 1, %s459_s7  }
  0x30   : > { %110 = sbr.rel (%p107_p3) target bundleno = 204 (0xcc), region = 24  ;;  %s303_s24 = sshll.u32 (!%p107_p3), %s590_s23, 7 }
  0x31   : > { %s113_s26 = scalar_lea.sflag (!%p107_p3), [#allocation3], %s590_s23  ;;  %s116_s30 = scalar_lea.vmem (!%p107_p3), [#allocation2], %s303_s24 }
  0x37   : > { %446 = dma.done.wait (%p529_p6), %s113_s26, 2048  }
  0x38   : > { %448 = vsyncadd (%p529_p6), %s113_s26, 4294965248  ;;  %v137_v0 = vld [vmem:[%s116_s30 + $0x20] sm:$0xff]  ;;  %v307_v1 = vld [vmem:[%s116_s30 + $0x28] sm:$0xff]  ;;  %s472_s25 = smov 120   ;;  %s304_s17 = sshll.u32 %s590_s23, 6  ;;  %vm200_vm0 = vcmask 64512  }
  0x39   : > { %v135_v2 = vld [vmem:[%s116_s30] sm:$0xff]  ;;  %v154_v3 = vmax.f32 %v137_v0, %v307_v1  ;;  %v305_v4 = vld [vmem:[%s116_s30 + $0x8] sm:$0xff]  ;;  %v138_v5 = vld [vmem:[%s116_s30 + $0x30] sm:$0xff]  ;;  %s134_s27 = scalar_lea.vmem [#allocation5], %s304_s17  ;;  %s319_s28 = sshll.u32 %s507_s10, 10 }
  0x3a   : > { %v308_v6 = vld [vmem:[%s116_s30 + $0x38] sm:$0xff]  ;;  %v152_v7 = vmax.f32 %v135_v2, %v305_v4  ;;  %v136_v8 = vld [vmem:[%s116_s30 + $0x10] sm:$0xff]  ;;  %v139_v14 = vld [vmem:[%s116_s30 + $0x40] sm:$0xff]  ;;  %s223_s29 = sshll.u32 %s134_s27, 4  ;;  %s609_s4 = scalar_lea.hbm %s658_s1, %s319_s28  ;;  %s611_s29 = int_to_ptr.vmem [resolvable:$true] %s223_s29 }
  0x3b   : > { %v306_v9 = vld [vmem:[%s116_s30 + $0x18] sm:$0xff]  ;;  %172 = vrot.lane.b32.xlu1 %v154_v3, %s472_s25  ;;  %v155_v10 = vmax.f32 %v138_v5, %v308_v6  ;;  %v140_v12 = vld [vmem:[%s116_s30 + $0x50] sm:$0xff]  ;;  %v309_v15 = vld [vmem:[%s116_s30 + $0x48] sm:$0xff]  ;;  %s210_s10 = scalar_lea.sflag [#allocation4], %s590_s23  ;;  %s401_s5 = scalar_lea.vmem %s611_s29, 1024 }
  0x3c   : > { %168 = vrot.lane.b32.xlu0 %v152_v7, %s472_s25  ;;  %v153_v11 = vmax.f32 %v136_v8, %v306_v9  ;;  %v310_v13 = vld [vmem:[%s116_s30 + $0x58] sm:$0xff]  ;;  %v156_v17 = vmax.f32 %v139_v14, %v309_v15  ;;  %v142_v18 = vld [vmem:[%s116_s30 + $0x70] sm:$0xff]  ;;  %v141_v20 = vld [vmem:[%s116_s30 + $0x60] sm:$0xff]  ;;  %p402_p6 = scmp.ne.s32.totalorder %s611_s29, %s401_s5  ;;  %p665_p11 = scmp.ne.s32.totalorder %s662_s18, 0 }
  0x3d   : > { %v157_v16 = vmax.f32 %v140_v12, %v310_v13  ;;  %v312_v19 = vld [vmem:[%s116_s30 + $0x78] sm:$0xff]  ;;  %v311_v21 = vld [vmem:[%s116_s30 + $0x68] sm:$0xff]  ;;  %s473_s11 = smov [#allocation5]  }
  0x3e   : > { %v159_v22 = vmax.f32 %v142_v18, %v312_v19  ;;  %v158_v23 = vmax.f32 %v141_v20, %v311_v21  ;;  %p403_p12 = pnand %p402_p6, %p665_p11  ;;  %s405_s13 = sshll.u32 %s473_s11, 4  ;;  %s406_s13 = int_to_ptr.vmem [resolvable:$false] %s405_s13 }
  0x3f   : > { %174 = vrot.lane.b32.xlu1 %v155_v10, %s472_s25  ;;  %s407_s14 = scalar_lea.vmem %s406_s13, 2048  ;;  %p408_p8 = scmp.lt.s32.totalorder %s611_s29, %s406_s13 }
  0x40   : > { %170 = vrot.lane.b32.xlu0 %v153_v11, %s472_s25  ;;  %p404_p13 = pneg %p403_p12  ;;  %p409_p10 = scmp.lt.s32.totalorder %s407_s14, %s401_s5 }
  0x42   : > { %p410_p0 = por %p409_p10, %p408_p8 }
  0x43   : > { %178 = vrot.lane.b32.xlu1 %v157_v16, %s472_s25 }
  0x44   : > { %176 = vrot.lane.b32.xlu0 %v156_v17, %s472_s25  ;;  %p411_p2 = pnand %p410_p0, %p404_p13 }
  0x47   : > { %182 = vrot.lane.b32.xlu1 %v159_v22, %s472_s25 }
  0x48   : > { %180 = vrot.lane.b32.xlu0 %v158_v23, %s472_s25 }
  0xad   : > { %v173_v24 = vpop.permute.xlu1 %172 }
  0xae   : > { %v194_v25 = vmax.f32 %v154_v3, %v173_v24  ;;  %v169_v26 = vpop.permute.xlu0 %168 }
  0xaf   : > { %v192_v27 = vmax.f32 %v152_v7, %v169_v26 }
  0xb0   : > { %203 = vst.msk [vmem:[%s134_s27 + $0x10] sm:$0xff] %vm200_vm0, %v194_v25 }
  0xb1   : > { %201 = vst.msk [vmem:[%s134_s27] sm:$0xff] %vm200_vm0, %v192_v27  ;;  %v175_v28 = vpop.permute.xlu1 %174 }
  0xb2   : > { %v195_v29 = vmax.f32 %v155_v10, %v175_v28  ;;  %v171_v30 = vpop.permute.xlu0 %170 }
  0xb3   : > { %v193_v31 = vmax.f32 %v153_v11, %v171_v30 }
  0xb4   : > { %204 = vst.msk [vmem:[%s134_s27 + $0x18] sm:$0xff] %vm200_vm0, %v195_v29 }
  0xb5   : > { %202 = vst.msk [vmem:[%s134_s27 + $0x8] sm:$0xff] %vm200_vm0, %v193_v31  ;;  %v179_v32 = vpop.permute.xlu1 %178 }
  0xb6   : > { %v197_v33 = vmax.f32 %v157_v16, %v179_v32  ;;  %v177_v34 = vpop.permute.xlu0 %176 }
  0xb7   : > { %v196_v35 = vmax.f32 %v156_v17, %v177_v34 }
  0xb8   : > { %206 = vst.msk [vmem:[%s134_s27 + $0x28] sm:$0xff] %vm200_vm0, %v197_v33 }
  0xb9   : > { %205 = vst.msk [vmem:[%s134_s27 + $0x20] sm:$0xff] %vm200_vm0, %v196_v35  ;;  %v183_v36 = vpop.permute.xlu1 %182 }
  0xba   : > { %v199_v37 = vmax.f32 %v159_v22, %v183_v36  ;;  %v181_v38 = vpop.permute.xlu0 %180 }
  0xbb   : > { %v198_v39 = vmax.f32 %v158_v23, %v181_v38 }
  0xbc   : > { %208 = vst.msk [vmem:[%s134_s27 + $0x38] sm:$0xff] %vm200_vm0, %v199_v37 }
  0xbd   : > { %207 = vst.msk [vmem:[%s134_s27 + $0x30] sm:$0xff] %vm200_vm0, %v198_v39 }
  0xbe   : > { %414 = shalt.err (!%p411_p2)
}
  0xbf   : > { %s415_s16 = scalar_lea.hbm %s609_s4, 1024  ;;  %s419_s22 = scalar_lea.hbm %s658_s1, 2048 }
  0xc0   : > { %p416_p4 = scmp.ne.s32.totalorder %s609_s4, %s415_s16  ;;  %p420_p9 = scmp.lt.u32.totalorder %s609_s4, %s658_s1 }
  0xc1   : > { %p421_p1 = scmp.lt.u32.totalorder %s419_s22, %s415_s16  ;;  %p423_p6 = scmp.lt.u32.totalorder %s415_s16, %s609_s4 }
  0xc2   : > { %p417_p5 = pnand %p416_p4, %p665_p11 }
  0xc3   : > { %p422_p3 = por %p421_p1, %p420_p9 }
  0xc4   : > { %p418_p7 = pneg %p417_p5 }
  0xc5   : > { %p424_p12 = por %p423_p6, %p422_p3 }
  0xc7   : > { %p425_p13 = pnand %p424_p12, %p418_p7 }
  0xc9   : > { %428 = shalt.err (!%p425_p13)
}
  0xca   : > { %s474_s30 = smov 128   ;;  %s475_s25 = smov 8  }
  0xcb   : > { %322 = dma.vmem_to_hbm [thread:$0]  (%p665_p11), %s611_s29, 1024, %s609_s4, %s210_s10, %s474_s30, %s474_s30, %s475_s25  }
  0xcc PF: > { %s238_s17 = sand.u32 1, %s455_s6   ;;  %p666_p8 = scmp.ne.s32.totalorder %s663_s19, 0 }
  0xcd   : > { %p667_p10 = scmp.ge.s32.totalorder %s467_s9, 2  ;;  %s239_s27 = scalar_lea.sflag [#allocation4], %s238_s17 }
  0xcf   : > { %p329_p0 = pnand %p667_p10, %p666_p8 }
  0xd1   : > { %450 = dma.done.wait (!%p329_p0), %s239_s27, 1024  }
  0xd2   : > { %452 = vsyncadd (!%p329_p0), %s239_s27, 4294966272  ;;  %p14_p2 = scmp.ge.s32.totalorder %s511_s12, 4   ;;  %s668_s6 = smov %s459_s7 }
  0xd3   : > { %s669_s7 = smov %s463_s8  ;;  %s670_s8 = smov %s523_s15 }
  0xd4   : > { %s671_s9 = smov %s511_s12  ;;  %16 = sbr.rel (!%p14_p2) target bundleno = 5 (0x5), region = 70 }
  0xdb   :  { %244 = vsyncpa [#allocation3], 1 }
  0xdc   :  { %246 = vsyncpa [#allocation3 + $0x1], 1 }
  0xdd   :  { %247 = vsyncpa [#allocation4], 1 }
  0xde   :  { %249 = vsyncpa [#allocation4 + $0x1], 1 }

// kernel: cnn_backbone.7
= control target key start
LH: loop header
LB: loop body
LE: loop exit
PB: predicated region body
PF: predicated region fallthrough
CT: control target
= control target key end

     0   :  { %9 = vsyncpa [#allocation4], 0  ;;  %s3442_s0 = inlined_call_operand.hbm [shape: f32[2,18,18,4], index: 0, kind: input, shape index: {}]   ;;  %s3443_s1 = inlined_call_operand.hbm [shape: bf16[36,8], index: 1, kind: input, shape index: {}]   ;;  %s3444_s2 = inlined_call_operand.hbm [shape: f32[1,8], index: 2, kind: input, shape index: {}]   ;;  %s3445_s3 = inlined_call_operand.hbm [shape: f32[1,8], index: 3, kind: input, shape index: {}]   ;;  %s3446_s4 = inlined_call_operand.hbm [shape: f32[2,256,8], index: 4, kind: output, shape index: {}]  }
   0x1   :  { %11 = vsyncpa [#allocation4 + $0x1], 0 }
   0x2   :  { %12 = vsyncpa [#allocation7], 0 }
   0x3   :  { %13 = vsyncpa [#allocation10], 0 }
   0x4   :  { %14 = vsyncpa [#allocation5], 0 }
   0x5   :  { %16 = vsyncpa [#allocation5 + $0x1], 0  ;;  %s2490_s15 = smov 0   ;;  %s2492_s16 = smov 0  }
   0x6   :  { %s2494_s17 = smov 0   ;;  %s2496_s18 = smov 0  }
   0x7 LB: > { %s2511_s19 = sadd.s32 4294967295, %s2445_s18   ;;  %s1865_s20 = sadd.s32 4294967294, %s2445_s18   ;;  %s2445_s18 = sphi %s2496_s18, %s3469_s18   ;;  %s2441_s17 = sphi %s2494_s17, %s3468_s17   ;;  %s2437_s16 = sphi %s2492_s16, %s3467_s16   ;;  %s2433_s15 = sphi %s2490_s15, %s3466_s15  }
   0x8   : > { %p42_p0 = scmp.ne.s32.totalorder %s2437_s16, %s2433_s15  ;;  %p3447_p1 = scmp.eq.s32.totalorder %s2511_s19, 0 }
   0x9   : > { %p135_p3 = scmp.eq.s32.totalorder %s1865_s20, 1  ;;  %p1866_p5 = scmp.ge.s32.totalorder %s2445_s18, 1 }
   0xa   : > { %p2520_p4 = por %p3447_p1, %p42_p0  ;;  %p142_p7 = scmp.lt.s32.totalorder %s2445_s18, 3 }
   0xb   : > { %p2525_p6 = por %p135_p3, %p42_p0  ;;  %s2447_s24 = smov [#allocation6]  }
   0xc   : > { %s3450_s21 = scalar_select %p2520_p4, 1, 0 }
   0xd   : > { %s3451_s22 = scalar_select %p2525_p6, 1, 0 }
   0xe   : > { %p2530_p8 = pnand %p1866_p5, %p142_p7  ;;  %s154_s25 = sshll.u32 %s2447_s24, 4  ;;  %s2534_s25 = int_to_ptr.vmem [resolvable:$true] %s154_s25 }
   0xf   : > { %s2448_s27 = smov [#allocation8]   ;;  %s2449_s29 = smov [#allocation9]  }
  0x10   : > { %s3452_s23 = scalar_select %p2530_p8, 1, 0 }
  0x11   : > { %p2180_p9 = pneg %p2530_p8  ;;  %s168_s28 = sshll.u32 %s2448_s27, 4  ;;  %s2545_s28 = int_to_ptr.vmem [resolvable:$true] %s168_s28 }
  0x12   : > { %s2547_s30 = sshll.u32 %s2449_s29, 4  ;;  %s2257_s7 = scalar_lea.hbm %s3443_s1, 320  ;;  %s180_s30 = int_to_ptr.vmem [resolvable:$true] %s2547_s30 }
  0x13   : > { %p2541_p11 = pnand %p2180_p9, %p3447_p1  ;;  %p2258_p12 = scmp.ne.s32.totalorder %s3443_s1, %s2257_s7 }
  0x14   : > { %p2264_p5 = scmp.lt.u32.totalorder %s2257_s7, %s3443_s1 }
  0x15   : > { %p2557_p13 = pneg %p2541_p11 }
  0x17   : > { %p2260_p0 = pnand %p2557_p13, %p2258_p12 }
  0x19   : > { %p2261_p3 = pneg %p2260_p0 }
  0x1b   : > { %p2266_p7 = pnand %p2264_p5, %p2261_p3 }
  0x1d   : > { %2269 = shalt.err (!%p2266_p7)
}
  0x1e   : > { %s2270_s13 = scalar_lea.vmem %s2534_s25, 320  ;;  %p2278_p2 = scmp.lt.s32.totalorder %s2534_s25, %s2534_s25 }
  0x1f   : > { %p2271_p9 = scmp.ne.s32.totalorder %s2534_s25, %s2270_s13  ;;  %p2279_p6 = scmp.lt.s32.totalorder %s2270_s13, %s2270_s13 }
  0x21   : > { %p2273_p10 = pnand %p2271_p9, %p2557_p13  ;;  %p2280_p12 = por %p2279_p6, %p2278_p2 }
  0x23   : > { %p2274_p1 = pneg %p2273_p10 }
  0x25   : > { %p2281_p0 = pnand %p2280_p12, %p2274_p1 }
  0x27   : > { %2284 = shalt.err (!%p2281_p0)
}
  0x28   : > { %s2450_s14 = smov 64   ;;  %s2451_s20 = smov 4  }
  0x29   : > { %2183 = dma.hbm_to_vmem [thread:$0]  (!%p2541_p11), %s3443_s1, 320, %s2534_s25, [#allocation7], %s2450_s14, %s2450_s14, %s2451_s20  }
  0x2a   : > { %s2285_s6 = scalar_lea.hbm %s3444_s2, 16 }
  0x2b   : > { %p2286_p2 = scmp.ne.s32.totalorder %s3444_s2, %s2285_s6  ;;  %p2292_p10 = scmp.lt.u32.totalorder %s2285_s6, %s3444_s2 }
  0x2d   : > { %p2288_p1 = pnand %p2286_p2, %p2557_p13 }
  0x2f   : > { %p2289_p6 = pneg %p2288_p1 }
  0x31   : > { %p2294_p3 = pnand %p2292_p10, %p2289_p6 }
  0x33   : > { %2297 = shalt.err (!%p2294_p3)
}
  0x34   : > { %s2298_s25 = scalar_lea.vmem %s2545_s28, 16  ;;  %s2305_s12 = scalar_lea.vmem %s2545_s28, 32 }
  0x35   : > { %p2299_p5 = scmp.ne.s32.totalorder %s2545_s28, %s2298_s25  ;;  %p2306_p12 = scmp.lt.s32.totalorder %s2545_s28, %s2545_s28 }
  0x36   : > { %p2307_p0 = scmp.lt.s32.totalorder %s2305_s12, %s2298_s25 }
  0x37   : > { %p2301_p7 = pnand %p2299_p5, %p2557_p13 }
  0x38   : > { %p2308_p2 = por %p2307_p0, %p2306_p12 }
  0x39   : > { %p2302_p9 = pneg %p2301_p7 }
  0x3b   : > { %p2309_p1 = pnand %p2308_p2, %p2302_p9 }
  0x3d   : > { %2312 = shalt.err (!%p2309_p1)
}
  0x3e   : > { %2186 = dma.hbm_to_vmem [thread:$0]  (!%p2541_p11), %s3444_s2, 16, %s2545_s28, [#allocation7]  }
  0x3f   : > { %s2313_s27 = scalar_lea.hbm %s3445_s3, 16 }
  0x40   : > { %p2314_p6 = scmp.ne.s32.totalorder %s3445_s3, %s2313_s27  ;;  %p2320_p5 = scmp.lt.u32.totalorder %s2313_s27, %s3445_s3 }
  0x42   : > { %p2316_p10 = pnand %p2314_p6, %p2557_p13 }
  0x44   : > { %p2317_p3 = pneg %p2316_p10 }
  0x46   : > { %p2322_p7 = pnand %p2320_p5, %p2317_p3 }
  0x48   : > { %2325 = shalt.err (!%p2322_p7)
}
  0x49   : > { %s2326_s8 = scalar_lea.vmem %s180_s30, 16  ;;  %s2333_s28 = scalar_lea.vmem %s180_s30, 32 }
  0x4a   : > { %p2327_p9 = scmp.ne.s32.totalorder %s180_s30, %s2326_s8  ;;  %p2334_p2 = scmp.lt.s32.totalorder %s180_s30, %s180_s30 }
  0x4b   : > { %p2335_p1 = scmp.lt.s32.totalorder %s2333_s28, %s2326_s8 }
  0x4c   : > { %p2329_p12 = pnand %p2327_p9, %p2557_p13 }
  0x4d   : > { %p2336_p4 = por %p2335_p1, %p2334_p2 }
  0x4e   : > { %p2330_p0 = pneg %p2329_p12 }
  0x50   : > { %p2337_p8 = pnand %p2336_p4, %p2330_p0 }
  0x52   : > { %2340 = shalt.err (!%p2337_p8)
}
  0x53   : > { %2189 = dma.hbm_to_vmem [thread:$0]  (!%p2541_p11), %s3445_s3, 16, %s180_s30, [#allocation10]  }
  0x54   : > { %s2622_s10 = sadd.s32 1, %s2445_s18   ;;  %s29_s26 = sadd.s32 1, %s2441_s17 }
  0x55   : > { %s26_s25 = ssub.s32 %s2445_s18, %s2622_s10  ;;  %p36_p8 = scmp.ne.s32.totalorder %s2441_s17, %s2437_s16 }
  0x56   : > { %p27_p4 = scmp.eq.s32.totalorder %s26_s25, 0  ;;  %p37_p13 = scmp.eq.s32.totalorder %s2445_s18, 0 }
  0x57   : > { %p2201_p6 = scmp.lt.s32.totalorder %s2445_s18, 2  ;;  %p3455_p3 = scmp.eq.s32.totalorder %s2511_s19, 1 }
  0x58   : > { %s2632_s12 = scalar_select %p27_p4, %s2441_s17, %s29_s26  }
  0x59   : > { %p38_p10 = por %p37_p13, %p36_p8  ;;  %p2636_p5 = por %p3455_p3, %p36_p8 }
  0x5a   : > { %s190_s14 = sand.u32 1, %s2441_s17   ;;  %s2162_s20 = smul.u32 6912, %s2445_s18 }
  0x5b   : > { %s2161_s30 = smul.u32 432, %s190_s14  ;;  %p2647_p11 = pnand %p2201_p6, %p38_p10 }
  0x5c   : > { %s2645_s29 = scalar_lea.hbm %s3442_s0, %s2162_s20  ;;  %s2653_s8 = scalar_lea.sflag [#allocation4], %s190_s14 }
  0x5d   : > { %s194_s6 = scalar_lea.vmem [#allocation3], %s2161_s30  ;;  %s2341_s28 = scalar_lea.hbm %s2645_s29, 6912 }
  0x5e   : > { %s201_s7 = sshll.u32 %s194_s6, 4  ;;  %p2342_p7 = scmp.ne.s32.totalorder %s2645_s29, %s2341_s28  ;;  %s2651_s7 = int_to_ptr.vmem [resolvable:$true] %s201_s7 }
  0x5f   : > { %p2343_p9 = pneg %p2647_p11  ;;  %s2346_s25 = scalar_lea.hbm %s3442_s0, 13824 }
  0x60   : > { %p2347_p2 = scmp.lt.u32.totalorder %s2645_s29, %s3442_s0  ;;  %p2348_p1 = scmp.lt.u32.totalorder %s2346_s25, %s2341_s28 }
  0x61   : > { %p2344_p12 = pnand %p2343_p9, %p2342_p7  ;;  %p2350_p8 = scmp.lt.u32.totalorder %s2341_s28, %s2645_s29 }
  0x62   : > { %p2349_p4 = por %p2348_p1, %p2347_p2 }
  0x63   : > { %p2345_p0 = pneg %p2344_p12 }
  0x64   : > { %p2351_p13 = por %p2350_p8, %p2349_p4 }
  0x66   : > { %p2352_p6 = pnand %p2351_p13, %p2345_p0 }
  0x68   : > { %2355 = shalt.err (!%p2352_p6)
}
  0x69   : > { %s2356_s14 = scalar_lea.vmem %s2651_s7, 6912  ;;  %s2452_s30 = smov [#allocation3]  }
  0x6a   : > { %p2357_p10 = scmp.ne.s32.totalorder %s2651_s7, %s2356_s14  ;;  %s2361_s24 = sshll.u32 %s2452_s30, 4  ;;  %s2362_s24 = int_to_ptr.vmem [resolvable:$false] %s2361_s24 }
  0x6b   : > { %s2363_s27 = scalar_lea.vmem %s2362_s24, 13824  ;;  %p2364_p12 = scmp.lt.s32.totalorder %s2651_s7, %s2362_s24 }
  0x6c   : > { %p2359_p3 = pnand %p2357_p10, %p2343_p9  ;;  %p2365_p2 = scmp.lt.s32.totalorder %s2363_s27, %s2356_s14 }
  0x6e   : > { %p2360_p7 = pneg %p2359_p3  ;;  %p2366_p1 = por %p2365_p2, %p2364_p12 }
  0x70   : > { %p2367_p4 = pnand %p2366_p1, %p2360_p7 }
  0x72   : > { %2370 = shalt.err (!%p2367_p4)
}
  0x73   : > { %s2453_s6 = smov 128   ;;  %s2454_s28 = smov 8  }
  0x74   : > { %2193 = dma.hbm_to_vmem [thread:$0]  (!%p2647_p11), %s2645_s29, 6912, %s2651_s7, %s2653_s8, %s2453_s6, %s2453_s6, %s2454_s28  }
  0x75   : > { %p3458_p9 = scmp.ne.s32.totalorder %s3452_s23, 0 }
  0x76   : > { %s2684_s9 = sand.u32 (!%p3458_p9), 1, %s2437_s16   ;;  %p3459_p0 = scmp.ne.s32.totalorder (!%p3458_p9), %s3450_s21, 0 }
  0x77   : > { %213 = sbr.rel (%p3458_p9) target bundleno = 749 (0x2ed), region = 36  ;;  %s216_s25 = scalar_lea.sflag (!%p3458_p9), [#allocation4], %s2684_s9 }
  0x78   : > { %s2163_s11 = smul.u32 (!%p3458_p9), 432, %s2684_s9 }
  0x7a   : > { %s2688_s26 = scalar_lea.vmem (!%p3458_p9), [#allocation3], %s2163_s11 }
  0x7e   : > { %2416 = dma.done.wait (%p3459_p0), %s216_s25, 6912  }
  0x7f   : > { %2418 = vsyncadd (%p3459_p0), %s216_s25, 4294960384  ;;  %p3460_p11 = scmp.eq.s32.totalorder %s2511_s19, 0 }
  0x81   : > { %2420 = dma.done.wait (%p3460_p11), [#allocation7], 336   ;;  %p3461_p8 = pmov %p3460_p11 }
  0x83   : > { %2422 = vsyncadd (%p3461_p8), [#allocation7], 4294966960  ;;  %p3462_p13 = pmov %p3461_p8 }
  0x84   : > { %p3463_p6 = pmov %p3461_p8 }
  0x85   : > { %2424 = dma.done.wait (%p3462_p13), [#allocation10], 16  }
  0x86   : > { %2426 = vsyncadd (%p3463_p6), [#allocation10], 4294967280  ;;  %v324_v0 = vld [vmem:[%s2688_s26 + $0x19] sm:$0xff]  ;;  %v325_v1 = vld [vmem:[%s2688_s26 + $0x21] sm:$0xff]  ;;  %s2455_s21 = smov 4   ;;  %vm305_vm0 = vcmask 31744  }
  0x87   : > { %v322_v2 = vld [vmem:[%s2688_s26 + $0x1] sm:$0xff]  ;;  %v2705_v3 = vpack.c.bf16 %v325_v1, %v324_v0  ;;  %v323_v4 = vld [vmem:[%s2688_s26 + $0x9] sm:$0xff]  ;;  %v340_v5 = vld [vmem:[%s2688_s26 + $0xd9] sm:$0xff]  ;;  %s2456_s23 = smov 8   ;;  %s2457_s29 = smov 12   ;;  %vm1441_vm1 = vcmask 1041408  }
  0x88   : > { %v341_v6 = vld [vmem:[%s2688_s26 + $0xe1] sm:$0xff]  ;;  %v354_v7 = vpack.c.bf16 %v323_v4, %v322_v2  ;;  %v339_v9 = vld [vmem:[%s2688_s26 + $0xc9] sm:$0xff]  ;;  %v1893_v16 = vld [vmem:[%s2688_s26 + $0xd8] sm:$0xff]  ;;  %s2458_s5 = smov 16   ;;  %s2459_s7 = smov 20   ;;  %vm434_vm2 = vcmask 64544  }
  0x89   : > { %v338_v8 = vld [vmem:[%s2688_s26 + $0xc1] sm:$0xff]  ;;  %388 = vrot.lane.b32.xlu1 %v2705_v3, %s2455_s21  ;;  %v2714_v10 = vpack.c.bf16 %v341_v6, %v340_v5  ;;  %v468_v13 = vld [vmem:[%s2688_s26 + $0xca] sm:$0xff]  ;;  %v1877_v19 = vld [vmem:[%s2688_s26 + $0x18] sm:$0xff]  ;;  %s2460_s8 = smov 24   ;;  %s2461_s20 = smov 28   ;;  %vm563_vm3 = vcmask 97344  }
  0x8a   : > { %386 = vrot.lane.b32.xlu0 %v354_v7, %s2455_s21  ;;  %v362_v11 = vpack.c.bf16 %v339_v9, %v338_v8  ;;  %v467_v12 = vld [vmem:[%s2688_s26 + $0xc2] sm:$0xff]  ;;  %v452_v15 = vld [vmem:[%s2688_s26 + $0xa] sm:$0xff]  ;;  %v1896_v24 = vld [vmem:[%s2688_s26 + $0xf8] sm:$0xff]  ;;  %s2462_s14 = smov 32   ;;  %vm693_vm4 = vcmask 130144   ;;  %vm822_vm5 = vcmask 162944  }
  0x8b   : > { %v451_v14 = vld [vmem:[%s2688_s26 + $0x2] sm:$0xff]  ;;  %v1895_v21 = vld [vmem:[%s2688_s26 + $0xf0] sm:$0xff]  ;;  %v491_v22 = vpack.c.bf16 %v468_v13, %v467_v12  ;;  %v1880_v26 = vld [vmem:[%s2688_s26 + $0x38] sm:$0xff]  ;;  %vm951_vm6 = vcmask 195744   ;;  %vm1081_vm7 = vcmask 228544   ;;  %vm1210_vm8 = vcmask 261344  }
  0x8c   : > { %v1894_v17 = vld [vmem:[%s2688_s26 + $0xe0] sm:$0xff]  ;;  %v1879_v25 = vld [vmem:[%s2688_s26 + $0x30] sm:$0xff]  ;;  %v483_v27 = vpack.c.bf16 %v452_v15, %v451_v14  ;;  %v2734_v30 = vpack.c.bf16 %v1896_v24, %v1895_v21  ;;  %v1991_v34 = vld [vmem:[%s2688_s26 + $0x108] sm:$0xff]  ;;  %vm1339_vm9 = vcmask 294144   ;;  %vm1392_vm10 = vcmask 293888   ;;  %s1876_s30 = sshll.u32 %s2684_s9, 8 }
  0x8d   : > { %v621_v18 = vpack.c.bf16 %v1894_v17, %v1893_v16  ;;  %v1878_v20 = vld [vmem:[%s2688_s26 + $0x20] sm:$0xff]  ;;  %404 = vrot.lane.b32.xlu1 %v2714_v10, %s2455_s21  ;;  %v2736_v31 = vpack.c.bf16 %v1880_v26, %v1879_v25  ;;  %v1992_v36 = vld [vmem:[%s2688_s26 + $0x110] sm:$0xff]  ;;  %v1975_v37 = vld [vmem:[%s2688_s26 + $0x48] sm:$0xff]  ;;  %vm1716_vm11 = vcmask 64512   ;;  %s3275_s24 = scalar_lea.vmem [#allocation11], %s1876_s30  ;;  %s2095_s27 = sshll.u32 %s2511_s19, 12 }
  0x8e   : > { %v613_v23 = vpack.c.bf16 %v1878_v20, %v1877_v19  ;;  %402 = vrot.lane.b32.xlu0 %v362_v11, %s2455_s21  ;;  %v469_v28 = vld [vmem:[%s2688_s26 + $0xda] sm:$0xff]  ;;  %v470_v29 = vld [vmem:[%s2688_s26 + $0xe2] sm:$0xff]  ;;  %316 = vst.msk [vmem:[#allocation2 + $0x50] sm:$0xff] %vm305_vm0, %v2734_v30  ;;  %v1976_v38 = vld [vmem:[%s2688_s26 + $0x50] sm:$0xff]  ;;  %v2754_v40 = vpack.c.bf16 %v1992_v36, %v1991_v34  ;;  %s1763_s6 = sshll.u32 %s3275_s24, 4  ;;  %s3385_s11 = scalar_lea.hbm %s3446_s4, %s2095_s27  ;;  %s3391_s6 = int_to_ptr.vmem [resolvable:$true] %s1763_s6 }
  0x8f   : > { %315 = vst.msk [vmem:[#allocation2 + $0x48] sm:$0xff] %vm305_vm0, %v621_v18  ;;  %v453_v32 = vld [vmem:[%s2688_s26 + $0x1a] sm:$0xff]  ;;  %v454_v33 = vld [vmem:[%s2688_s26 + $0x22] sm:$0xff]  ;;  %308 = vst.msk [vmem:[#allocation2 + $0x10] sm:$0xff] %vm305_vm0, %v2736_v31  ;;  %v2748_v35 = vpack.c.bf16 %v470_v29, %v469_v28  ;;  %v2756_v41 = vpack.c.bf16 %v1976_v38, %v1975_v37  ;;  %s1750_s25 = scalar_lea.sflag [#allocation5], %s2684_s9 }
  0x90   : > { %307 = vst.msk [vmem:[#allocation2 + $0x8] sm:$0xff] %vm305_vm0, %v613_v23  ;;  %v484_v39 = vpack.c.bf16 %v454_v33, %v453_v32  ;;  %v1899_v42 = vld [vmem:[%s2688_s26 + $0x120] sm:$0xff]  ;;  %317 = vst.msk [vmem:[#allocation2 + $0x58] sm:$0xff] %vm305_vm0, %v2754_v40  ;;  %v1900_v43 = vld [vmem:[%s2688_s26 + $0x128] sm:$0xff] }
  0x91   : > { %531 = vrot.lane.b32.xlu1 %v491_v22, %s2456_s23  ;;  %309 = vst.msk [vmem:[#allocation2 + $0x18] sm:$0xff] %vm305_vm0, %v2756_v41  ;;  %v1883_v44 = vld [vmem:[%s2688_s26 + $0x60] sm:$0xff]  ;;  %v1884_v45 = vld [vmem:[%s2688_s26 + $0x68] sm:$0xff]  ;;  %v2769_v46 = vpack.c.bf16 %v1900_v43, %v1899_v42  ;;  %v1995_v48 = vld [vmem:[%s2688_s26 + $0x138] sm:$0xff] }
  0x92   : > { %515 = vrot.lane.b32.xlu0 %v483_v27, %s2456_s23  ;;  %v2771_v47 = vpack.c.bf16 %v1884_v45, %v1883_v44  ;;  %v1996_v49 = vld [vmem:[%s2688_s26 + $0x140] sm:$0xff]  ;;  %v1979_v50 = vld [vmem:[%s2688_s26 + $0x78] sm:$0xff]  ;;  %v258_v55 = vld [vmem:[%s2688_s26 + $0x8] sm:$0xff] }
  0x93   : > { %318 = vst.msk [vmem:[#allocation2 + $0x60] sm:$0xff] %vm305_vm0, %v2769_v46  ;;  %v1980_v51 = vld [vmem:[%s2688_s26 + $0x80] sm:$0xff]  ;;  %v2783_v52 = vpack.c.bf16 %v1996_v49, %v1995_v48  ;;  %v1927_v57 = vld [vmem:[%s2688_s26 + $0xf1] sm:$0xff]  ;;  %v274_v59 = vld [vmem:[%s2688_s26 + $0xc8] sm:$0xff] }
  0x94   : > { %310 = vst.msk [vmem:[#allocation2 + $0x20] sm:$0xff] %vm305_vm0, %v2771_v47  ;;  %v2785_v53 = vpack.c.bf16 %v1980_v51, %v1979_v50  ;;  %v257_v54 = vld [vmem:[%s2688_s26] sm:$0xff]  ;;  %v1911_v61 = vld [vmem:[%s2688_s26 + $0x31] sm:$0xff]  ;;  %v1999_v14 = vld [vmem:[%s2688_s26 + $0x168] sm:$0xff] }
  0x95   : > { %533 = vrot.lane.b32.xlu1 %v2748_v35, %s2456_s23  ;;  %v289_v56 = vpack.c.bf16 %v258_v55, %v257_v54  ;;  %v273_v58 = vld [vmem:[%s2688_s26 + $0xc0] sm:$0xff]  ;;  %319 = vst.msk [vmem:[#allocation2 + $0x68] sm:$0xff] %vm305_vm0, %v2783_v52  ;;  %v1903_v0 = vld [vmem:[%s2688_s26 + $0x150] sm:$0xff]  ;;  %v1904_v1 = vld [vmem:[%s2688_s26 + $0x158] sm:$0xff] }
  0x96   : > { %517 = vrot.lane.b32.xlu0 %v484_v39, %s2456_s23  ;;  %311 = vst.msk [vmem:[#allocation2 + $0x28] sm:$0xff] %vm305_vm0, %v2785_v53  ;;  %v1928_v60 = vld [vmem:[%s2688_s26 + $0xf9] sm:$0xff]  ;;  %v2802_v63 = vpack.c.bf16 %v274_v59, %v273_v58  ;;  %v1887_v2 = vld [vmem:[%s2688_s26 + $0x90] sm:$0xff]  ;;  %v2811_v4 = vpack.c.bf16 %v1904_v1, %v1903_v0  ;;  %v1983_v16 = vld [vmem:[%s2688_s26 + $0xa8] sm:$0xff] }
  0x97   : > { %v1912_v62 = vld [vmem:[%s2688_s26 + $0x39] sm:$0xff]  ;;  %306 = vst.msk [vmem:[#allocation2] sm:$0xff] %vm305_vm0, %v289_v56  ;;  %v2818_v7 = vpack.c.bf16 %v1928_v60, %v1927_v57  ;;  %v2000_v15 = vld [vmem:[%s2688_s26 + $0x170] sm:$0xff]  ;;  %v1931_v36 = vld [vmem:[%s2688_s26 + $0x121] sm:$0xff] }
  0x98   : > { %314 = vst.msk [vmem:[#allocation2 + $0x40] sm:$0xff] %vm305_vm0, %v2802_v63  ;;  %v1888_v5 = vld [vmem:[%s2688_s26 + $0x98] sm:$0xff]  ;;  %320 = vst.msk [vmem:[#allocation2 + $0x70] sm:$0xff] %vm305_vm0, %v2811_v4  ;;  %v2824_v8 = vpack.c.bf16 %v1912_v62, %v1911_v61  ;;  %v2848_v17 = vpack.c.bf16 %v2000_v15, %v1999_v14  ;;  %v2023_v20 = vld [vmem:[%s2688_s26 + $0x109] sm:$0xff] }
  0x99   : > { %661 = vrot.lane.b32.xlu1 %v621_v18, %s2457_s29  ;;  %v2814_v6 = vpack.c.bf16 %v1888_v5, %v1887_v2  ;;  %v1959_v9 = vld [vmem:[%s2688_s26 + $0xf2] sm:$0xff]  ;;  %v1944_v12 = vld [vmem:[%s2688_s26 + $0x3a] sm:$0xff]  ;;  %v2007_v22 = vld [vmem:[%s2688_s26 + $0x49] sm:$0xff] }
  0x9a   : > { %645 = vrot.lane.b32.xlu0 %v613_v23, %s2457_s29  ;;  %v1943_v11 = vld [vmem:[%s2688_s26 + $0x32] sm:$0xff]  ;;  %321 = vst.msk [vmem:[#allocation2 + $0x78] sm:$0xff] %vm305_vm0, %v2848_v17  ;;  %v2256_v28 = vld [vmem:[#allocation6 + $0x10] ss:$0 sps:$4 sm:$0x33]   ;;  %v1915_v38 = vld [vmem:[%s2688_s26 + $0x61] sm:$0xff] }
  0x9b   : > { %312 = vst.msk [vmem:[#allocation2 + $0x30] sm:$0xff] %vm305_vm0, %v2814_v6  ;;  %v872_v13 = vpack.c.bf16 %v1944_v12, %v1943_v11  ;;  %v1984_v18 = vld [vmem:[%s2688_s26 + $0xb0] sm:$0xff]  ;;  %v2255_v27 = vld [vmem:[#allocation6 + $0x8] sm:$0xff]   ;;  %v1443_v29 = vsel %vm1441_vm1, %v2256_v28, 0 }
  0x9c   : > { %v2853_v19 = vpack.c.bf16 %v1984_v18, %v1983_v16  ;;  %v2024_v21 = vld [vmem:[%s2688_s26 + $0x111] sm:$0xff]  ;;  %v1932_v37 = vld [vmem:[%s2688_s26 + $0x129] sm:$0xff]  ;;  %v2027_v50 = vld [vmem:[%s2688_s26 + $0x139] sm:$0xff] }
  0x9d   : > { %663 = vrot.lane.b32.xlu1 %v2734_v30, %s2457_s29  ;;  %v2008_v23 = vld [vmem:[%s2688_s26 + $0x51] sm:$0xff]  ;;  %v1139_v25 = vpack.c.bf16 %v2024_v21, %v2023_v20  ;;  %v753_v42 = vpack.c.bf16 %v1932_v37, %v1931_v36  ;;  %v1947_v44 = vld [vmem:[%s2688_s26 + $0x62] sm:$0xff]  ;;  %v2011_v54 = vld [vmem:[%s2688_s26 + $0x79] sm:$0xff] }
  0x9e   : > { %647 = vrot.lane.b32.xlu0 %v2736_v31, %s2457_s29  ;;  %v2254_v24 = vld [vmem:[#allocation6] sm:$0xff]   ;;  %313 = vst.msk [vmem:[#allocation2 + $0x38] sm:$0xff] %vm305_vm0, %v2853_v19  ;;  %v1131_v26 = vpack.c.bf16 %v2008_v23, %v2007_v22 }
  0x9f   : > { %2115 = vmatprep.subr.bf16.mxu0 %v2254_v24  ;;  %2153 = vmatprep.subr.bf16.mxu1 %v2254_v24  ;;  %v2039_v32 = vld [vmem:[%s2688_s26 + $0x4a] sm:$0xff]  ;;  %v2040_v33 = vld [vmem:[%s2688_s26 + $0x52] sm:$0xff]  ;;  %v2028_v51 = vld [vmem:[%s2688_s26 + $0x141] sm:$0xff] }
  0xa0   : > { %2116 = vmatpush3.bf16.msra.mxu0 %v2254_v24  ;;  %2156 = vmatpush3.bf16.msra.mxu1 %v2254_v24  ;;  %v1964_v43 = vld [vmem:[%s2688_s26 + $0x12a] sm:$0xff]  ;;  %v2012_v55 = vld [vmem:[%s2688_s26 + $0x81] sm:$0xff]  ;;  %v2926_v56 = vpack.c.bf16 %v2028_v51, %v2027_v50  ;;  %v1936_v22 = vld [vmem:[%s2688_s26 + $0x159] sm:$0xff] }
  0xa1   : > { %790 = vrot.lane.b32.xlu1 %v2714_v10, %s2458_s5  ;;  %v1960_v10 = vld [vmem:[%s2688_s26 + $0xfa] sm:$0xff]  ;;  %2117 = vmatprep.subr.bf16.mxu0 %v2255_v27  ;;  %v1948_v45 = vld [vmem:[%s2688_s26 + $0x6a] sm:$0xff]  ;;  %v2060_v61 = vld [vmem:[%s2688_s26 + $0x142] sm:$0xff] }
  0xa2   : > { %774 = vrot.lane.b32.xlu0 %v2705_v3, %s2458_s5  ;;  %v880_v3 = vpack.c.bf16 %v1960_v10, %v1959_v9  ;;  %2154 = vmatprep.subr.bf16.mxu1 %v2255_v27  ;;  %v874_v49 = vpack.c.bf16 %v1948_v45, %v1947_v44  ;;  %v2059_v60 = vld [vmem:[%s2688_s26 + $0x13a] sm:$0xff]  ;;  %v2044_v1 = vld [vmem:[%s2688_s26 + $0x82] sm:$0xff]  ;;  %v1935_v21 = vld [vmem:[%s2688_s26 + $0x151] sm:$0xff] }
  0xa3   : > { %v2043_v0 = vld [vmem:[%s2688_s26 + $0x7a] sm:$0xff]  ;;  %v2948_v5 = vpack.c.bf16 %v2060_v61, %v2059_v60  ;;  %v2032_v44 = vld [vmem:[%s2688_s26 + $0x171] sm:$0xff] }
  0xa4   : > { %2118 = vmatpush3.bf16.msra.mxu0 %v2255_v27  ;;  %2157 = vmatpush3.bf16.msra.mxu1 %v2255_v27  ;;  %v1920_v24 = vld [vmem:[%s2688_s26 + $0x99] sm:$0xff]  ;;  %v2047_v61 = vld [vmem:[%s2688_s26 + $0xaa] sm:$0xff] }
  0xa5   : > { %792 = vrot.lane.b32.xlu1 %v2818_v7, %s2458_s5  ;;  %2159 = vmatprep.subr.msk.bf16.mxu0 %vm1441_vm1, %v2256_v28 }
  0xa6   : > { %776 = vrot.lane.b32.xlu0 %v2824_v8, %s2458_s5  ;;  %2160 = vmatprep.subr.msk.bf16.mxu1 %vm1441_vm1, %v2256_v28 }
  0xa8   : > { %2120 = vmatpush3.bf16.msra.mxu0 %v1443_v29  ;;  %2158 = vmatpush3.bf16.msra.mxu1 %v1443_v29  ;;  %v1967_v29 = vld [vmem:[%s2688_s26 + $0x152] sm:$0xff] }
  0xa9   : > { %919 = vrot.lane.b32.xlu1 %v2748_v35, %s2459_s7  ;;  %v1260_v35 = vpack.c.bf16 %v2040_v33, %v2039_v32  ;;  %v1951_v32 = vld [vmem:[%s2688_s26 + $0x92] sm:$0xff]  ;;  %v1952_v33 = vld [vmem:[%s2688_s26 + $0x9a] sm:$0xff] }
  0xaa   : > { %903 = vrot.lane.b32.xlu0 %v484_v39, %s2459_s7  ;;  %v1916_v39 = vld [vmem:[%s2688_s26 + $0x69] sm:$0xff]  ;;  %v3019_v36 = vpack.c.bf16 %v1952_v33, %v1951_v32 }
  0xab   : > { %v1955_v32 = vld [vmem:[%s2688_s26 + $0xc2] sm:$0xff]  ;;  %v1956_v33 = vld [vmem:[%s2688_s26 + $0xca] sm:$0xff] }
  0xad   : > { %921 = vrot.lane.b32.xlu1 %v880_v3, %s2459_s7 }
  0xae   : > { %905 = vrot.lane.b32.xlu0 %v872_v13, %s2459_s7 }
  0xb1   : > { %1049 = vrot.lane.b32.xlu1 %v2734_v30, %s2460_s8  ;;  %v2055_v30 = vld [vmem:[%s2688_s26 + $0x10a] sm:$0xff] }
  0xb2   : > { %1033 = vrot.lane.b32.xlu0 %v2736_v31, %s2460_s8  ;;  %v2056_v31 = vld [vmem:[%s2688_s26 + $0x112] sm:$0xff] }
  0xb3   : > { %v1268_v34 = vpack.c.bf16 %v2056_v31, %v2055_v30  ;;  %v1968_v30 = vld [vmem:[%s2688_s26 + $0x15a] sm:$0xff] }
  0xb5   : > { %1051 = vrot.lane.b32.xlu1 %v2754_v40, %s2460_s8 }
  0xb6   : > { %1035 = vrot.lane.b32.xlu0 %v2756_v41, %s2460_s8 }
  0xb9   : > { %1178 = vrot.lane.b32.xlu1 %v2818_v7, %s2461_s20 }
  0xba   : > { %1162 = vrot.lane.b32.xlu0 %v2824_v8, %s2461_s20 }
  0xbd   : > { %1180 = vrot.lane.b32.xlu1 %v1139_v25, %s2461_s20 }
  0xbe   : > { %1164 = vrot.lane.b32.xlu0 %v1131_v26, %s2461_s20 }
  0xc1   : > { %1307 = vrot.lane.b32.xlu1 %v880_v3, %s2462_s14 }
  0xc2   : > { %1291 = vrot.lane.b32.xlu0 %v872_v13, %s2462_s14 }
  0xc5   : > { %406 = vrot.lane.b32.xlu1 %v2818_v7, %s2455_s21  ;;  %v2951_v7 = vpack.c.bf16 %v2044_v1, %v2043_v0 }
  0xc6   : > { %390 = vrot.lane.b32.xlu0 %v2824_v8, %s2455_s21 }
  0xc9   : > { %1309 = vrot.lane.b32.xlu1 %v1268_v34, %s2462_s14 }
  0xca   : > { %1293 = vrot.lane.b32.xlu0 %v1260_v35, %s2462_s14 }
  0xcd   : > { %408 = vrot.lane.b32.xlu1 %v1139_v25, %s2455_s21 }
  0xce   : > { %392 = vrot.lane.b32.xlu0 %v1131_v26, %s2455_s21 }
  0xd1   : > { %535 = vrot.lane.b32.xlu1 %v880_v3, %s2456_s23 }
  0xd2   : > { %519 = vrot.lane.b32.xlu0 %v872_v13, %s2456_s23 }
  0xd5   : > { %537 = vrot.lane.b32.xlu1 %v1268_v34, %s2456_s23 }
  0xd6   : > { %521 = vrot.lane.b32.xlu0 %v1260_v35, %s2456_s23 }
  0xd9   : > { %665 = vrot.lane.b32.xlu1 %v2754_v40, %s2457_s29  ;;  %v745_v40 = vpack.c.bf16 %v1916_v39, %v1915_v38 }
  0xda   : > { %649 = vrot.lane.b32.xlu0 %v2756_v41, %s2457_s29  ;;  %v1963_v41 = vld [vmem:[%s2688_s26 + $0x122] sm:$0xff] }
  0xdb   : > { %v882_v48 = vpack.c.bf16 %v1964_v43, %v1963_v41  ;;  %v2031_v43 = vld [vmem:[%s2688_s26 + $0x169] sm:$0xff] }
  0xdd   : > { %667 = vrot.lane.b32.xlu1 %v2769_v46, %s2457_s29 }
  0xde   : > { %651 = vrot.lane.b32.xlu0 %v2771_v47, %s2457_s29 }
  0xe1   : > { %794 = vrot.lane.b32.xlu1 %v1139_v25, %s2458_s5  ;;  %v2995_v25 = vpack.c.bf16 %v1936_v22, %v1935_v21 }
  0xe2   : > { %778 = vrot.lane.b32.xlu0 %v1131_v26, %s2458_s5 }
  0xe5   : > { %796 = vrot.lane.b32.xlu1 %v753_v42, %s2458_s5 }
  0xe6   : > { %780 = vrot.lane.b32.xlu0 %v745_v40, %s2458_s5 }
  0xe9   : > { %923 = vrot.lane.b32.xlu1 %v1268_v34, %s2459_s7 }
  0xea   : > { %907 = vrot.lane.b32.xlu0 %v1260_v35, %s2459_s7  ;;  %v3015_v35 = vpack.c.bf16 %v1968_v30, %v1967_v29  ;;  %v1971_v29 = vld [vmem:[%s2688_s26 + $0x182] sm:$0xff]  ;;  %v1972_v30 = vld [vmem:[%s2688_s26 + $0x18a] sm:$0xff] }
  0xed   : > { %925 = vrot.lane.b32.xlu1 %v882_v48, %s2459_s7 }
  0xee   : > { %909 = vrot.lane.b32.xlu0 %v874_v49, %s2459_s7 }
  0xf1   : > { %1053 = vrot.lane.b32.xlu1 %v2769_v46, %s2460_s8  ;;  %v2929_v46 = vpack.c.bf16 %v2012_v55, %v2011_v54 }
  0xf2   : > { %1037 = vrot.lane.b32.xlu0 %v2771_v47, %s2460_s8 }
  0xf5   : > { %1055 = vrot.lane.b32.xlu1 %v2783_v52, %s2460_s8 }
  0xf6   : > { %1039 = vrot.lane.b32.xlu0 %v2785_v53, %s2460_s8 }
  0xf9   : > { %1182 = vrot.lane.b32.xlu1 %v753_v42, %s2461_s20 }
  0xfa   : > { %1166 = vrot.lane.b32.xlu0 %v745_v40, %s2461_s20 }
  0xfb   : > { %v389_v47 = vpop.permute.xlu1 %388 }
  0xfc   : > { %436 = vst.msk [vmem:[#allocation2 + $0x8] sm:$0xff] %vm434_vm2, %v389_v47  ;;  %v387_v57 = vpop.permute.xlu0 %386 }
  0xfd   : > { %435 = vst.msk [vmem:[#allocation2] sm:$0xff] %vm434_vm2, %v387_v57  ;;  %1184 = vrot.lane.b32.xlu1 %v2926_v56, %s2461_s20  ;;  %v2063_v57 = vld [vmem:[%s2688_s26 + $0x16a] sm:$0xff] }
  0xfe   : > { %1168 = vrot.lane.b32.xlu0 %v2929_v46, %s2461_s20 }
  0xff   : > { %v405_v58 = vpop.permute.xlu1 %404 }
 0x100   : > { %444 = vst.msk [vmem:[#allocation2 + $0x48] sm:$0xff] %vm434_vm2, %v405_v58  ;;  %v403_v59 = vpop.permute.xlu0 %402  ;;  %v2064_v58 = vld [vmem:[%s2688_s26 + $0x172] sm:$0xff] }
 0x101   : > { %443 = vst.msk [vmem:[#allocation2 + $0x40] sm:$0xff] %vm434_vm2, %v403_v59  ;;  %1311 = vrot.lane.b32.xlu1 %v882_v48, %s2462_s14 }
 0x102   : > { %1295 = vrot.lane.b32.xlu0 %v874_v49, %s2462_s14 }
 0x103   : > { %v532_v62 = vpop.permute.xlu1 %531 }
 0x104   : > { %572 = vst.msk [vmem:[#allocation2 + $0x40] sm:$0xff] %vm563_vm3, %v532_v62  ;;  %v516_v2 = vpop.permute.xlu0 %515  ;;  %v2048_v62 = vld [vmem:[%s2688_s26 + $0xb2] sm:$0xff] }
 0x105   : > { %564 = vst.msk [vmem:[#allocation2] sm:$0xff] %vm563_vm3, %v516_v2  ;;  %410 = vrot.lane.b32.xlu1 %v753_v42, %s2455_s21  ;;  %v3077_v2 = vpack.c.bf16 %v2064_v58, %v2063_v57 }
 0x106   : > { %394 = vrot.lane.b32.xlu0 %v745_v40, %s2455_s21 }
 0x107   : > { %v534_v8 = vpop.permute.xlu1 %533 }
 0x108   : > { %573 = vst.msk [vmem:[#allocation2 + $0x48] sm:$0xff] %vm563_vm3, %v534_v8  ;;  %v518_v9 = vpop.permute.xlu0 %517 }
 0x109   : > { %565 = vst.msk [vmem:[#allocation2 + $0x8] sm:$0xff] %vm563_vm3, %v518_v9  ;;  %1313 = vrot.lane.b32.xlu1 %v2948_v5, %s2462_s14 }
 0x10a   : > { %1297 = vrot.lane.b32.xlu0 %v2951_v7, %s2462_s14 }
 0x10b   : > { %v662_v10 = vpop.permute.xlu1 %661 }
 0x10c   : > { %702 = vst.msk [vmem:[#allocation2 + $0x40] sm:$0xff] %vm693_vm4, %v662_v10  ;;  %v646_v11 = vpop.permute.xlu0 %645 }
 0x10d   : > { %694 = vst.msk [vmem:[#allocation2] sm:$0xff] %vm693_vm4, %v646_v11  ;;  %412 = vrot.lane.b32.xlu1 %v2926_v56, %s2455_s21 }
 0x10e   : > { %396 = vrot.lane.b32.xlu0 %v2929_v46, %s2455_s21 }
 0x10f   : > { %v664_v12 = vpop.permute.xlu1 %663 }
 0x110   : > { %703 = vst.msk [vmem:[#allocation2 + $0x48] sm:$0xff] %vm693_vm4, %v664_v12  ;;  %v648_v3 = vpop.permute.xlu0 %647 }
 0x111   : > { %695 = vst.msk [vmem:[#allocation2 + $0x8] sm:$0xff] %vm693_vm4, %v648_v3  ;;  %539 = vrot.lane.b32.xlu1 %v882_v48, %s2456_s23  ;;  %v2016_v48 = vld [vmem:[%s2688_s26 + $0xb1] sm:$0xff] }
 0x112   : > { %523 = vrot.lane.b32.xlu0 %v874_v49, %s2456_s23  ;;  %v3047_v49 = vpack.c.bf16 %v2032_v44, %v2031_v43  ;;  %v1988_v43 = vld [vmem:[%s2688_s26 + $0xe0] sm:$0xff] }
 0x113   : > { %v791_v13 = vpop.permute.xlu1 %790 }
 0x114   : > { %831 = vst.msk [vmem:[#allocation2 + $0x40] sm:$0xff] %vm822_vm5, %v791_v13  ;;  %v775_v14 = vpop.permute.xlu0 %774 }
 0x115   : > { %823 = vst.msk [vmem:[#allocation2] sm:$0xff] %vm822_vm5, %v775_v14  ;;  %541 = vrot.lane.b32.xlu1 %v2948_v5, %s2456_s23  ;;  %v1907_v14 = vld [vmem:[%s2688_s26 + $0x180] sm:$0xff] }
 0x116   : > { %525 = vrot.lane.b32.xlu0 %v2951_v7, %s2456_s23 }
 0x117   : > { %v793_v15 = vpop.permute.xlu1 %792 }
 0x118   : > { %832 = vst.msk [vmem:[#allocation2 + $0x48] sm:$0xff] %vm822_vm5, %v793_v15  ;;  %v777_v16 = vpop.permute.xlu0 %776  ;;  %v1908_v15 = vld [vmem:[%s2688_s26 + $0x188] sm:$0xff] }
 0x119   : > { %824 = vst.msk [vmem:[#allocation2 + $0x8] sm:$0xff] %vm822_vm5, %v777_v16  ;;  %669 = vrot.lane.b32.xlu1 %v2783_v52, %s2457_s29  ;;  %v1919_v52 = vld [vmem:[%s2688_s26 + $0x91] sm:$0xff] }
 0x11a   : > { %653 = vrot.lane.b32.xlu0 %v2785_v53, %s2457_s29  ;;  %v2999_v26 = vpack.c.bf16 %v1920_v24, %v1919_v52  ;;  %v1940_v52 = vld [vmem:[%s2688_s26 + $0x189] sm:$0xff] }
 0x11b   : > { %v920_v18 = vpop.permute.xlu1 %919 }
 0x11c   : > { %960 = vst.msk [vmem:[#allocation2 + $0x40] sm:$0xff] %vm951_vm6, %v920_v18  ;;  %v904_v20 = vpop.permute.xlu0 %903 }
 0x11d   : > { %952 = vst.msk [vmem:[#allocation2] sm:$0xff] %vm951_vm6, %v904_v20  ;;  %671 = vrot.lane.b32.xlu1 %v2811_v4, %s2457_s29  ;;  %v628_v20 = vpack.c.bf16 %v1908_v15, %v1907_v14 }
 0x11e   : > { %655 = vrot.lane.b32.xlu0 %v2814_v6, %s2457_s29 }
 0x11f   : > { %v922_v23 = vpop.permute.xlu1 %921 }
 0x120   : > { %961 = vst.msk [vmem:[#allocation2 + $0x48] sm:$0xff] %vm951_vm6, %v922_v23  ;;  %v906_v53 = vpop.permute.xlu0 %905  ;;  %v1939_v23 = vld [vmem:[%s2688_s26 + $0x181] sm:$0xff] }
 0x121   : > { %953 = vst.msk [vmem:[#allocation2 + $0x8] sm:$0xff] %vm951_vm6, %v906_v53  ;;  %798 = vrot.lane.b32.xlu1 %v2926_v56, %s2458_s5  ;;  %v1924_v53 = vld [vmem:[%s2688_s26 + $0xc9] sm:$0xff] }
 0x122   : > { %782 = vrot.lane.b32.xlu0 %v2929_v46, %s2458_s5 }
 0x123   : > { %v1050_v27 = vpop.permute.xlu1 %1049 }
 0x124   : > { %1090 = vst.msk [vmem:[#allocation2 + $0x40] sm:$0xff] %vm1081_vm7, %v1050_v27  ;;  %v1034_v28 = vpop.permute.xlu0 %1033 }
 0x125   : > { %1082 = vst.msk [vmem:[#allocation2] sm:$0xff] %vm1081_vm7, %v1034_v28  ;;  %800 = vrot.lane.b32.xlu1 %v2995_v25, %s2458_s5 }
 0x126   : > { %784 = vrot.lane.b32.xlu0 %v2999_v26, %s2458_s5 }
 0x127   : > { %v1052_v31 = vpop.permute.xlu1 %1051 }
 0x128   : > { %1091 = vst.msk [vmem:[#allocation2 + $0x48] sm:$0xff] %vm1081_vm7, %v1052_v31  ;;  %v1036_v34 = vpop.permute.xlu0 %1035 }
 0x129   : > { %1083 = vst.msk [vmem:[#allocation2 + $0x8] sm:$0xff] %vm1081_vm7, %v1036_v34  ;;  %927 = vrot.lane.b32.xlu1 %v2948_v5, %s2459_s7  ;;  %v3081_v5 = vpack.c.bf16 %v2048_v62, %v2047_v61  ;;  %v2068_v61 = vld [vmem:[%s2688_s26 + $0x1a2] sm:$0xff] }
 0x12a   : > { %911 = vrot.lane.b32.xlu0 %v2951_v7, %s2459_s7 }
 0x12b   : > { %v1179_v37 = vpop.permute.xlu1 %1178 }
 0x12c   : > { %1219 = vst.msk [vmem:[#allocation2 + $0x40] sm:$0xff] %vm1210_vm8, %v1179_v37  ;;  %v1163_v38 = vpop.permute.xlu0 %1162 }
 0x12d   : > { %1211 = vst.msk [vmem:[#allocation2] sm:$0xff] %vm1210_vm8, %v1163_v38  ;;  %929 = vrot.lane.b32.xlu1 %v3015_v35, %s2459_s7 }
 0x12e   : > { %913 = vrot.lane.b32.xlu0 %v3019_v36, %s2459_s7 }
 0x12f   : > { %v1181_v39 = vpop.permute.xlu1 %1180 }
 0x130   : > { %1220 = vst.msk [vmem:[#allocation2 + $0x48] sm:$0xff] %vm1210_vm8, %v1181_v39  ;;  %v1165_v42 = vpop.permute.xlu0 %1164  ;;  %v2003_v39 = vld [vmem:[%s2688_s26 + $0x198] sm:$0xff] }
 0x131   : > { %1212 = vst.msk [vmem:[#allocation2 + $0x8] sm:$0xff] %vm1210_vm8, %v1165_v42  ;;  %1057 = vrot.lane.b32.xlu1 %v2811_v4, %s2460_s8  ;;  %v2015_v4 = vld [vmem:[%s2688_s26 + $0xa9] sm:$0xff]  ;;  %v2004_v42 = vld [vmem:[%s2688_s26 + $0x1a0] sm:$0xff] }
 0x132   : > { %1041 = vrot.lane.b32.xlu0 %v2814_v6, %s2460_s8  ;;  %v3051_v50 = vpack.c.bf16 %v2016_v48, %v2015_v4 }
 0x133   : > { %v1308_v40 = vpop.permute.xlu1 %1307 }
 0x134   : > { %1348 = vst.msk [vmem:[#allocation2 + $0x40] sm:$0xff] %vm1339_vm9, %v1308_v40  ;;  %v1292_v41 = vpop.permute.xlu0 %1291 }
 0x135   : > { %1340 = vst.msk [vmem:[#allocation2] sm:$0xff] %vm1339_vm9, %v1292_v41  ;;  %1059 = vrot.lane.b32.xlu1 %v2848_v17, %s2460_s8  ;;  %v1987_v41 = vld [vmem:[%s2688_s26 + $0xd8] sm:$0xff] }
 0x136   : > { %1043 = vrot.lane.b32.xlu0 %v2853_v19, %s2460_s8  ;;  %v1008_v4 = vpack.c.bf16 %v1988_v43, %v1987_v41 }
 0x137   : > { %v407_v45 = vpop.permute.xlu1 %406 }
 0x138   : > { %445 = vst.msk [vmem:[#allocation2 + $0x50] sm:$0xff] %vm434_vm2, %v407_v45  ;;  %v391_v6 = vpop.permute.xlu0 %390  ;;  %v1016_v45 = vpack.c.bf16 %v2004_v42, %v2003_v39 }
 0x139   : > { %437 = vst.msk [vmem:[#allocation2 + $0x10] sm:$0xff] %vm434_vm2, %v391_v6  ;;  %1186 = vrot.lane.b32.xlu1 %v2995_v25, %s2461_s20 }
 0x13a   : > { %1170 = vrot.lane.b32.xlu0 %v2999_v26, %s2461_s20 }
 0x13b   : > { %v1310_v51 = vpop.permute.xlu1 %1309  ;;  %v1364_v54 = vld [vmem:[#allocation2 + $0x40] sm:$0xff] }
 0x13c   : > { %1349 = vst.msk [vmem:[#allocation2 + $0x48] sm:$0xff] %vm1339_vm9, %v1310_v51  ;;  %v1294_v55 = vpop.permute.xlu0 %1293  ;;  %v1356_v56 = vld [vmem:[#allocation2] sm:$0xff]  ;;  %2137 = vmatprep.mubr.msk.bf16.mxu1 %vm1392_vm10, %v1364_v54 }
 0x13d   : > { %1341 = vst.msk [vmem:[#allocation2 + $0x8] sm:$0xff] %vm1339_vm9, %v1294_v55  ;;  %2121 = vmatprep.mubr.msk.bf16.mxu0 %vm1392_vm10, %v1356_v56  ;;  %1188 = vrot.lane.b32.xlu1 %v3047_v49, %s2461_s20  ;;  %v2019_v54 = vld [vmem:[%s2688_s26 + $0xd9] sm:$0xff]  ;;  %v2020_v55 = vld [vmem:[%s2688_s26 + $0xe1] sm:$0xff] }
 0x13e   : > { %1172 = vrot.lane.b32.xlu0 %v3051_v50, %s2461_s20 }
 0x13f   : > { %v409_v46 = vpop.permute.xlu1 %408 }
 0x140   : > { %446 = vst.msk [vmem:[#allocation2 + $0x58] sm:$0xff] %vm434_vm2, %v409_v46  ;;  %v393_v47 = vpop.permute.xlu0 %392  ;;  %v1137_v46 = vpack.c.bf16 %v2020_v55, %v2019_v54 }
 0x141   : > { %438 = vst.msk [vmem:[#allocation2 + $0x18] sm:$0xff] %vm434_vm2, %v393_v47  ;;  %1315 = vrot.lane.b32.xlu1 %v3015_v35, %s2462_s14 }
 0x142   : > { %1299 = vrot.lane.b32.xlu0 %v3019_v36, %s2462_s14 }
 0x143   : > { %v536_v59 = vpop.permute.xlu1 %535  ;;  %v1365_v60 = vld [vmem:[#allocation2 + $0x48] sm:$0xff] }
 0x144   : > { %574 = vst.msk [vmem:[#allocation2 + $0x50] sm:$0xff] %vm563_vm3, %v536_v59  ;;  %v520_v0 = vpop.permute.xlu0 %519  ;;  %v1357_v1 = vld [vmem:[#allocation2 + $0x8] sm:$0xff]  ;;  %2138 = vmatmul.mubr.msk.bf16.vlgmr.msra.gmra.mrb[0].mxu1 %vm1392_vm10, %v1365_v60 }
 0x145   : > { %566 = vst.msk [vmem:[#allocation2 + $0x10] sm:$0xff] %vm563_vm3, %v520_v0  ;;  %2122 = vmatmul.mubr.msk.bf16.vlgmr.msra.gmra.mrb[0].mxu0 %vm1392_vm10, %v1357_v1  ;;  %414 = vrot.lane.b32.xlu1 %v2995_v25, %s2455_s21  ;;  %v757_v25 = vpack.c.bf16 %v1940_v52, %v1939_v23  ;;  %v2067_v60 = vld [vmem:[%s2688_s26 + $0x19a] sm:$0xff]  ;;  %v2052_v1 = vld [vmem:[%s2688_s26 + $0xe2] sm:$0xff] }
 0x146   : > { %398 = vrot.lane.b32.xlu0 %v2999_v26, %s2455_s21  ;;  %v2051_v0 = vld [vmem:[%s2688_s26 + $0xda] sm:$0xff] }
 0x147   : > { %v538_v7 = vpop.permute.xlu1 %537 }
 0x148   : > { %575 = vst.msk [vmem:[#allocation2 + $0x58] sm:$0xff] %vm563_vm3, %v538_v7  ;;  %v522_v8 = vpop.permute.xlu0 %521  ;;  %v1266_v7 = vpack.c.bf16 %v2052_v1, %v2051_v0 }
 0x149   : > { %567 = vst.msk [vmem:[#allocation2 + $0x18] sm:$0xff] %vm563_vm3, %v522_v8  ;;  %1317 = vrot.lane.b32.xlu1 %v3077_v2, %s2462_s14 }
 0x14a   : > { %1301 = vrot.lane.b32.xlu0 %v3081_v5, %s2462_s14 }
 0x14b   : > { %v666_v9 = vpop.permute.xlu1 %665 }
 0x14c   : > { %704 = vst.msk [vmem:[#allocation2 + $0x50] sm:$0xff] %vm693_vm4, %v666_v9  ;;  %v650_v10 = vpop.permute.xlu0 %649 }
 0x14d   : > { %696 = vst.msk [vmem:[#allocation2 + $0x10] sm:$0xff] %vm693_vm4, %v650_v10  ;;  %416 = vrot.lane.b32.xlu1 %v3047_v49, %s2455_s21 }
 0x14e   : > { %400 = vrot.lane.b32.xlu0 %v3051_v50, %s2455_s21  ;;  %s2463_s21 = smov [#allocation11]  }
 0x14f   : > { %v668_v11 = vpop.permute.xlu1 %667 }
 0x150   : > { %705 = vst.msk [vmem:[#allocation2 + $0x58] sm:$0xff] %vm693_vm4, %v668_v11  ;;  %v652_v12 = vpop.permute.xlu0 %651 }
 0x151   : > { %697 = vst.msk [vmem:[#allocation2 + $0x18] sm:$0xff] %vm693_vm4, %v652_v12  ;;  %543 = vrot.lane.b32.xlu1 %v3015_v35, %s2456_s23  ;;  %v886_v35 = vpack.c.bf16 %v1972_v30, %v1971_v29 }
 0x152   : > { %527 = vrot.lane.b32.xlu0 %v3019_v36, %s2456_s23  ;;  %v878_v36 = vpack.c.bf16 %v1956_v33, %v1955_v32 }
 0x153   : > { %v795_v3 = vpop.permute.xlu1 %794 }
 0x154   : > { %833 = vst.msk [vmem:[#allocation2 + $0x50] sm:$0xff] %vm822_vm5, %v795_v3  ;;  %v779_v13 = vpop.permute.xlu0 %778 }
 0x155   : > { %825 = vst.msk [vmem:[#allocation2 + $0x10] sm:$0xff] %vm822_vm5, %v779_v13  ;;  %545 = vrot.lane.b32.xlu1 %v3077_v2, %s2456_s23 }
 0x156   : > { %529 = vrot.lane.b32.xlu0 %v3081_v5, %s2456_s23 }
 0x157   : > { %v797_v16 = vpop.permute.xlu1 %796 }
 0x158   : > { %834 = vst.msk [vmem:[#allocation2 + $0x58] sm:$0xff] %vm822_vm5, %v797_v16  ;;  %v781_v18 = vpop.permute.xlu0 %780 }
 0x159   : > { %826 = vst.msk [vmem:[#allocation2 + $0x18] sm:$0xff] %vm822_vm5, %v781_v18  ;;  %673 = vrot.lane.b32.xlu1 %v2848_v17, %s2457_s29  ;;  %v1923_v17 = vld [vmem:[%s2688_s26 + $0xc1] sm:$0xff] }
 0x15a   : > { %657 = vrot.lane.b32.xlu0 %v2853_v19, %s2457_s29  ;;  %v749_v26 = vpack.c.bf16 %v1924_v53, %v1923_v17 }
 0x15b   : > { %v924_v21 = vpop.permute.xlu1 %923 }
 0x15c   : > { %962 = vst.msk [vmem:[#allocation2 + $0x50] sm:$0xff] %vm951_vm6, %v924_v21  ;;  %v908_v22 = vpop.permute.xlu0 %907 }
 0x15d   : > { %954 = vst.msk [vmem:[#allocation2 + $0x10] sm:$0xff] %vm951_vm6, %v908_v22  ;;  %675 = vrot.lane.b32.xlu1 %v628_v20, %s2457_s29 }
 0x15e   : > { %659 = vrot.lane.b32.xlu0 %v2802_v63, %s2457_s29  ;;  %s2375_s29 = sshll.u32 %s2463_s21, 4  ;;  %s2376_s29 = int_to_ptr.vmem [resolvable:$false] %s2375_s29 }
 0x15f   : > { %v926_v24 = vpop.permute.xlu1 %925  ;;  %p2378_p12 = scmp.lt.s32.totalorder %s3391_s6, %s2376_s29 }
 0x160   : > { %963 = vst.msk [vmem:[#allocation2 + $0x58] sm:$0xff] %vm951_vm6, %v926_v24  ;;  %v910_v19 = vpop.permute.xlu0 %909 }
 0x161   : > { %955 = vst.msk [vmem:[#allocation2 + $0x18] sm:$0xff] %vm951_vm6, %v910_v19  ;;  %802 = vrot.lane.b32.xlu1 %v3047_v49, %s2458_s5  ;;  %v2035_v49 = vld [vmem:[%s2688_s26 + $0x199] sm:$0xff] }
 0x162   : > { %786 = vrot.lane.b32.xlu0 %v3051_v50, %s2458_s5  ;;  %v2036_v50 = vld [vmem:[%s2688_s26 + $0x1a1] sm:$0xff]  ;;  %s2371_s26 = scalar_lea.vmem %s3391_s6, 4096 }
 0x163   : > { %v1054_v27 = vpop.permute.xlu1 %1053  ;;  %p2372_p10 = scmp.ne.s32.totalorder %s3391_s6, %s2371_s26 }
 0x164   : > { %1092 = vst.msk [vmem:[#allocation2 + $0x50] sm:$0xff] %vm1081_vm7, %v1054_v27  ;;  %v1038_v28 = vpop.permute.xlu0 %1037 }
 0x165   : > { %1084 = vst.msk [vmem:[#allocation2 + $0x10] sm:$0xff] %vm1081_vm7, %v1038_v28  ;;  %804 = vrot.lane.b32.xlu1 %v757_v25, %s2458_s5  ;;  %p2373_p3 = pnand %p2372_p10, %p2636_p5 }
 0x166   : > { %788 = vrot.lane.b32.xlu0 %v749_v26, %s2458_s5  ;;  %s2377_s5 = scalar_lea.vmem %s2376_s29, 8192 }
 0x167   : > { %v1056_v31 = vpop.permute.xlu1 %1055  ;;  %p2374_p7 = pneg %p2373_p3  ;;  %p2379_p2 = scmp.lt.s32.totalorder %s2377_s5, %s2371_s26 }
 0x168   : > { %1093 = vst.msk [vmem:[#allocation2 + $0x58] sm:$0xff] %vm1081_vm7, %v1056_v31  ;;  %v1040_v34 = vpop.permute.xlu0 %1039 }
 0x169   : > { %1085 = vst.msk [vmem:[#allocation2 + $0x18] sm:$0xff] %vm1081_vm7, %v1040_v34  ;;  %931 = vrot.lane.b32.xlu1 %v3077_v2, %s2459_s7  ;;  %p2380_p1 = por %p2379_p2, %p2378_p12 }
 0x16a   : > { %915 = vrot.lane.b32.xlu0 %v3081_v5, %s2459_s7  ;;  %v1274_v5 = vpack.c.bf16 %v2068_v61, %v2067_v60 }
 0x16b   : > { %v1183_v37 = vpop.permute.xlu1 %1182  ;;  %p2381_p4 = pnand %p2380_p1, %p2374_p7 }
 0x16c   : > { %1221 = vst.msk [vmem:[#allocation2 + $0x50] sm:$0xff] %vm1210_vm8, %v1183_v37  ;;  %v1167_v38 = vpop.permute.xlu0 %1166 }
 0x16d   : > { %1213 = vst.msk [vmem:[#allocation2 + $0x10] sm:$0xff] %vm1210_vm8, %v1167_v38  ;;  %933 = vrot.lane.b32.xlu1 %v886_v35, %s2459_s7 }
 0x16e   : > { %917 = vrot.lane.b32.xlu0 %v878_v36, %s2459_s7 }
 0x16f   : > { %v1185_v40 = vpop.permute.xlu1 %1184 }
 0x170   : > { %1222 = vst.msk [vmem:[#allocation2 + $0x58] sm:$0xff] %vm1210_vm8, %v1185_v40  ;;  %v1169_v44 = vpop.permute.xlu0 %1168 }
 0x171   : > { %1214 = vst.msk [vmem:[#allocation2 + $0x18] sm:$0xff] %vm1210_vm8, %v1169_v44  ;;  %1061 = vrot.lane.b32.xlu1 %v628_v20, %s2460_s8 }
 0x172   : > { %1045 = vrot.lane.b32.xlu0 %v2802_v63, %s2460_s8  ;;  %v1145_v63 = vpack.c.bf16 %v2036_v50, %v2035_v49 }
 0x173   : > { %v1312_v48 = vpop.permute.xlu1 %1311 }
 0x174   : > { %1350 = vst.msk [vmem:[#allocation2 + $0x50] sm:$0xff] %vm1339_vm9, %v1312_v48  ;;  %v1296_v6 = vpop.permute.xlu0 %1295 }
 0x175   : > { %1342 = vst.msk [vmem:[#allocation2 + $0x10] sm:$0xff] %vm1339_vm9, %v1296_v6  ;;  %1063 = vrot.lane.b32.xlu1 %v1016_v45, %s2460_s8 }
 0x176   : > { %1047 = vrot.lane.b32.xlu0 %v1008_v4, %s2460_s8 }
 0x177   : > { %v411_v51 = vpop.permute.xlu1 %410 }
 0x178   : > { %447 = vst.msk [vmem:[#allocation2 + $0x60] sm:$0xff] %vm434_vm2, %v411_v51  ;;  %v395_v56 = vpop.permute.xlu0 %394 }
 0x179   : > { %439 = vst.msk [vmem:[#allocation2 + $0x20] sm:$0xff] %vm434_vm2, %v395_v56  ;;  %1190 = vrot.lane.b32.xlu1 %v757_v25, %s2461_s20 }
 0x17a   : > { %1174 = vrot.lane.b32.xlu0 %v749_v26, %s2461_s20 }
 0x17b   : > { %v1314_v47 = vpop.permute.xlu1 %1313  ;;  %v1366_v57 = vld [vmem:[#allocation2 + $0x50] sm:$0xff] }
 0x17c   : > { %1351 = vst.msk [vmem:[#allocation2 + $0x58] sm:$0xff] %vm1339_vm9, %v1314_v47  ;;  %v1298_v58 = vpop.permute.xlu0 %1297  ;;  %v1358_v59 = vld [vmem:[#allocation2 + $0x10] sm:$0xff]  ;;  %2141 = vmatprep.mubr.msk.bf16.mxu1 %vm1392_vm10, %v1366_v57 }
 0x17d   : > { %1343 = vst.msk [vmem:[#allocation2 + $0x18] sm:$0xff] %vm1339_vm9, %v1298_v58  ;;  %2125 = vmatprep.mubr.msk.bf16.mxu0 %vm1392_vm10, %v1358_v59  ;;  %1192 = vrot.lane.b32.xlu1 %v1145_v63, %s2461_s20 }
 0x17e   : > { %1176 = vrot.lane.b32.xlu0 %v1137_v46, %s2461_s20 }
 0x17f   : > { %v413_v62 = vpop.permute.xlu1 %412 }
 0x180   : > { %448 = vst.msk [vmem:[#allocation2 + $0x68] sm:$0xff] %vm434_vm2, %v413_v62  ;;  %v397_v2 = vpop.permute.xlu0 %396 }
 0x181   : > { %440 = vst.msk [vmem:[#allocation2 + $0x28] sm:$0xff] %vm434_vm2, %v397_v2  ;;  %1319 = vrot.lane.b32.xlu1 %v886_v35, %s2462_s14 }
 0x182   : > { %1303 = vrot.lane.b32.xlu0 %v878_v36, %s2462_s14 }
 0x183   : > { %v540_v8 = vpop.permute.xlu1 %539  ;;  %v1367_v9 = vld [vmem:[#allocation2 + $0x58] sm:$0xff] }
 0x184   : > { %576 = vst.msk [vmem:[#allocation2 + $0x60] sm:$0xff] %vm563_vm3, %v540_v8  ;;  %v524_v10 = vpop.permute.xlu0 %523  ;;  %v1359_v11 = vld [vmem:[#allocation2 + $0x18] sm:$0xff]  ;;  %2142 = vmatmul.mubr.msk.bf16.gmra.mrb[4].mxu1 %vm1392_vm10, %v1367_v9 }
 0x185   : > { %568 = vst.msk [vmem:[#allocation2 + $0x20] sm:$0xff] %vm563_vm3, %v524_v10  ;;  %2126 = vmatmul.mubr.msk.bf16.gmra.mrb[4].mxu0 %vm1392_vm10, %v1359_v11  ;;  %1321 = vrot.lane.b32.xlu1 %v1274_v5, %s2462_s14 }
 0x186   : > { %1305 = vrot.lane.b32.xlu0 %v1266_v7, %s2462_s14 }
 0x187   : > { %v542_v12 = vpop.permute.xlu1 %541 }
 0x188   : > { %577 = vst.msk [vmem:[#allocation2 + $0x68] sm:$0xff] %vm563_vm3, %v542_v12  ;;  %v526_v3 = vpop.permute.xlu0 %525 }
 0x189   : > { %569 = vst.msk [vmem:[#allocation2 + $0x28] sm:$0xff] %vm563_vm3, %v526_v3 }
 0x18b   : > { %v670_v13 = vpop.permute.xlu1 %669 }
 0x18c   : > { %706 = vst.msk [vmem:[#allocation2 + $0x60] sm:$0xff] %vm693_vm4, %v670_v13  ;;  %v654_v14 = vpop.permute.xlu0 %653  ;;  %v3255_v13 = vld [vmem:[#allocation8] ss:$0 sm:$0xff] }
 0x18d   : > { %698 = vst.msk [vmem:[#allocation2 + $0x20] sm:$0xff] %vm693_vm4, %v654_v14  ;;  %v3257_v14 = vld [vmem:[#allocation9] ss:$0 sm:$0xff] }
 0x18f   : > { %v672_v15 = vpop.permute.xlu1 %671 }
 0x190   : > { %707 = vst.msk [vmem:[#allocation2 + $0x68] sm:$0xff] %vm693_vm4, %v672_v15  ;;  %v656_v16 = vpop.permute.xlu0 %655 }
 0x191   : > { %699 = vst.msk [vmem:[#allocation2 + $0x28] sm:$0xff] %vm693_vm4, %v656_v16 }
 0x193   : > { %v799_v18 = vpop.permute.xlu1 %798 }
 0x194   : > { %835 = vst.msk [vmem:[#allocation2 + $0x60] sm:$0xff] %vm822_vm5, %v799_v18  ;;  %v783_v20 = vpop.permute.xlu0 %782 }
 0x195   : > { %827 = vst.msk [vmem:[#allocation2 + $0x20] sm:$0xff] %vm822_vm5, %v783_v20 }
 0x197   : > { %v801_v21 = vpop.permute.xlu1 %800 }
 0x198   : > { %836 = vst.msk [vmem:[#allocation2 + $0x68] sm:$0xff] %vm822_vm5, %v801_v21  ;;  %v785_v22 = vpop.permute.xlu0 %784 }
 0x199   : > { %828 = vst.msk [vmem:[#allocation2 + $0x28] sm:$0xff] %vm822_vm5, %v785_v22 }
 0x19b   : > { %v928_v23 = vpop.permute.xlu1 %927 }
 0x19c   : > { %964 = vst.msk [vmem:[#allocation2 + $0x60] sm:$0xff] %vm951_vm6, %v928_v23  ;;  %v912_v52 = vpop.permute.xlu0 %911 }
 0x19d   : > { %956 = vst.msk [vmem:[#allocation2 + $0x20] sm:$0xff] %vm951_vm6, %v912_v52 }
 0x19f   : > { %v930_v24 = vpop.permute.xlu1 %929 }
 0x1a0   : > { %965 = vst.msk [vmem:[#allocation2 + $0x68] sm:$0xff] %vm951_vm6, %v930_v24  ;;  %v914_v17 = vpop.permute.xlu0 %913 }
 0x1a1   : > { %957 = vst.msk [vmem:[#allocation2 + $0x28] sm:$0xff] %vm951_vm6, %v914_v17 }
 0x1a3   : > { %v1058_v53 = vpop.permute.xlu1 %1057 }
 0x1a4   : > { %1094 = vst.msk [vmem:[#allocation2 + $0x60] sm:$0xff] %vm1081_vm7, %v1058_v53  ;;  %v1042_v19 = vpop.permute.xlu0 %1041 }
 0x1a5   : > { %1086 = vst.msk [vmem:[#allocation2 + $0x20] sm:$0xff] %vm1081_vm7, %v1042_v19 }
 0x1a7   : > { %v1060_v25 = vpop.permute.xlu1 %1059 }
 0x1a8   : > { %1095 = vst.msk [vmem:[#allocation2 + $0x68] sm:$0xff] %vm1081_vm7, %v1060_v25  ;;  %v1044_v26 = vpop.permute.xlu0 %1043 }
 0x1a9   : > { %1087 = vst.msk [vmem:[#allocation2 + $0x28] sm:$0xff] %vm1081_vm7, %v1044_v26 }
 0x1ab   : > { %v1187_v27 = vpop.permute.xlu1 %1186 }
 0x1ac   : > { %1223 = vst.msk [vmem:[#allocation2 + $0x60] sm:$0xff] %vm1210_vm8, %v1187_v27  ;;  %v1171_v28 = vpop.permute.xlu0 %1170 }
 0x1ad   : > { %1215 = vst.msk [vmem:[#allocation2 + $0x20] sm:$0xff] %vm1210_vm8, %v1171_v28 }
 0x1af   : > { %v1189_v29 = vpop.permute.xlu1 %1188 }
 0x1b0   : > { %1224 = vst.msk [vmem:[#allocation2 + $0x68] sm:$0xff] %vm1210_vm8, %v1189_v29  ;;  %v1173_v30 = vpop.permute.xlu0 %1172 }
 0x1b1   : > { %1216 = vst.msk [vmem:[#allocation2 + $0x28] sm:$0xff] %vm1210_vm8, %v1173_v30 }
 0x1b3   : > { %v1316_v31 = vpop.permute.xlu1 %1315 }
 0x1b4   : > { %1352 = vst.msk [vmem:[#allocation2 + $0x60] sm:$0xff] %vm1339_vm9, %v1316_v31  ;;  %v1300_v32 = vpop.permute.xlu0 %1299 }
 0x1b5   : > { %1344 = vst.msk [vmem:[#allocation2 + $0x20] sm:$0xff] %vm1339_vm9, %v1300_v32 }
 0x1b7   : > { %v415_v33 = vpop.permute.xlu1 %414 }
 0x1b8   : > { %449 = vst.msk [vmem:[#allocation2 + $0x70] sm:$0xff] %vm434_vm2, %v415_v33  ;;  %v399_v34 = vpop.permute.xlu0 %398 }
 0x1b9   : > { %441 = vst.msk [vmem:[#allocation2 + $0x30] sm:$0xff] %vm434_vm2, %v399_v34 }
 0x1bb   : > { %v1318_v35 = vpop.permute.xlu1 %1317  ;;  %v1368_v36 = vld [vmem:[#allocation2 + $0x60] sm:$0xff] }
 0x1bc   : > { %1353 = vst.msk [vmem:[#allocation2 + $0x68] sm:$0xff] %vm1339_vm9, %v1318_v35  ;;  %v1302_v37 = vpop.permute.xlu0 %1301  ;;  %v1360_v38 = vld [vmem:[#allocation2 + $0x20] sm:$0xff]  ;;  %2145 = vmatprep.mubr.msk.bf16.mxu1 %vm1392_vm10, %v1368_v36 }
 0x1bd   : > { %1345 = vst.msk [vmem:[#allocation2 + $0x28] sm:$0xff] %vm1339_vm9, %v1302_v37  ;;  %2129 = vmatprep.mubr.msk.bf16.mxu0 %vm1392_vm10, %v1360_v38 }
 0x1bf   : > { %v417_v39 = vpop.permute.xlu1 %416 }
 0x1c0   : > { %450 = vst.msk [vmem:[#allocation2 + $0x78] sm:$0xff] %vm434_vm2, %v417_v39  ;;  %v401_v42 = vpop.permute.xlu0 %400 }
 0x1c1   : > { %442 = vst.msk [vmem:[#allocation2 + $0x38] sm:$0xff] %vm434_vm2, %v401_v42 }
 0x1c3   : > { %v544_v40 = vpop.permute.xlu1 %543  ;;  %v1369_v41 = vld [vmem:[#allocation2 + $0x68] sm:$0xff] }
 0x1c4   : > { %578 = vst.msk [vmem:[#allocation2 + $0x70] sm:$0xff] %vm563_vm3, %v544_v40  ;;  %v528_v43 = vpop.permute.xlu0 %527  ;;  %v1361_v44 = vld [vmem:[#allocation2 + $0x28] sm:$0xff]  ;;  %2146 = vmatmul.mubr.msk.bf16.gmra.mrb[8].mxu1 %vm1392_vm10, %v1369_v41 }
 0x1c5   : > { %570 = vst.msk [vmem:[#allocation2 + $0x30] sm:$0xff] %vm563_vm3, %v528_v43  ;;  %2130 = vmatmul.mubr.msk.bf16.gmra.mrb[8].mxu0 %vm1392_vm10, %v1361_v44 }
 0x1c7   : > { %v546_v45 = vpop.permute.xlu1 %545 }
 0x1c8   : > { %579 = vst.msk [vmem:[#allocation2 + $0x78] sm:$0xff] %vm563_vm3, %v546_v45  ;;  %v530_v4 = vpop.permute.xlu0 %529 }
 0x1c9   : > { %571 = vst.msk [vmem:[#allocation2 + $0x38] sm:$0xff] %vm563_vm3, %v530_v4 }
 0x1cb   : > { %v674_v48 = vpop.permute.xlu1 %673 }
 0x1cc   : > { %708 = vst.msk [vmem:[#allocation2 + $0x70] sm:$0xff] %vm693_vm4, %v674_v48  ;;  %v658_v6 = vpop.permute.xlu0 %657 }
 0x1cd   : > { %700 = vst.msk [vmem:[#allocation2 + $0x30] sm:$0xff] %vm693_vm4, %v658_v6 }
 0x1cf   : > { %v676_v49 = vpop.permute.xlu1 %675 }
 0x1d0   : > { %709 = vst.msk [vmem:[#allocation2 + $0x78] sm:$0xff] %vm693_vm4, %v676_v49  ;;  %v660_v50 = vpop.permute.xlu0 %659 }
 0x1d1   : > { %701 = vst.msk [vmem:[#allocation2 + $0x38] sm:$0xff] %vm693_vm4, %v660_v50 }
 0x1d3   : > { %v803_v51 = vpop.permute.xlu1 %802 }
 0x1d4   : > { %837 = vst.msk [vmem:[#allocation2 + $0x70] sm:$0xff] %vm822_vm5, %v803_v51  ;;  %v787_v54 = vpop.permute.xlu0 %786 }
 0x1d5   : > { %829 = vst.msk [vmem:[#allocation2 + $0x30] sm:$0xff] %vm822_vm5, %v787_v54 }
 0x1d7   : > { %v805_v55 = vpop.permute.xlu1 %804 }
 0x1d8   : > { %838 = vst.msk [vmem:[#allocation2 + $0x78] sm:$0xff] %vm822_vm5, %v805_v55  ;;  %v789_v56 = vpop.permute.xlu0 %788 }
 0x1d9   : > { %830 = vst.msk [vmem:[#allocation2 + $0x38] sm:$0xff] %vm822_vm5, %v789_v56 }
 0x1db   : > { %v932_v63 = vpop.permute.xlu1 %931 }
 0x1dc   : > { %966 = vst.msk [vmem:[#allocation2 + $0x70] sm:$0xff] %vm951_vm6, %v932_v63  ;;  %v916_v46 = vpop.permute.xlu0 %915 }
 0x1dd   : > { %958 = vst.msk [vmem:[#allocation2 + $0x30] sm:$0xff] %vm951_vm6, %v916_v46 }
 0x1df   : > { %v934_v47 = vpop.permute.xlu1 %933 }
 0x1e0   : > { %967 = vst.msk [vmem:[#allocation2 + $0x78] sm:$0xff] %vm951_vm6, %v934_v47  ;;  %v918_v57 = vpop.permute.xlu0 %917 }
 0x1e1   : > { %959 = vst.msk [vmem:[#allocation2 + $0x38] sm:$0xff] %vm951_vm6, %v918_v57 }
 0x1e3   : > { %v1062_v58 = vpop.permute.xlu1 %1061 }
 0x1e4   : > { %1096 = vst.msk [vmem:[#allocation2 + $0x70] sm:$0xff] %vm1081_vm7, %v1062_v58  ;;  %v1046_v59 = vpop.permute.xlu0 %1045 }
 0x1e5   : > { %1088 = vst.msk [vmem:[#allocation2 + $0x30] sm:$0xff] %vm1081_vm7, %v1046_v59 }
 0x1e7   : > { %v1064_v60 = vpop.permute.xlu1 %1063 }
 0x1e8   : > { %1097 = vst.msk [vmem:[#allocation2 + $0x78] sm:$0xff] %vm1081_vm7, %v1064_v60  ;;  %v1048_v61 = vpop.permute.xlu0 %1047 }
 0x1e9   : > { %1089 = vst.msk [vmem:[#allocation2 + $0x38] sm:$0xff] %vm1081_vm7, %v1048_v61 }
 0x1eb   : > { %v1191_v62 = vpop.permute.xlu1 %1190 }
 0x1ec   : > { %1225 = vst.msk [vmem:[#allocation2 + $0x70] sm:$0xff] %vm1210_vm8, %v1191_v62  ;;  %v1175_v0 = vpop.permute.xlu0 %1174 }
 0x1ed   : > { %1217 = vst.msk [vmem:[#allocation2 + $0x30] sm:$0xff] %vm1210_vm8, %v1175_v0 }
 0x1ef   : > { %v1193_v1 = vpop.permute.xlu1 %1192 }
 0x1f0   : > { %1226 = vst.msk [vmem:[#allocation2 + $0x78] sm:$0xff] %vm1210_vm8, %v1193_v1  ;;  %v1177_v2 = vpop.permute.xlu0 %1176 }
 0x1f1   : > { %1218 = vst.msk [vmem:[#allocation2 + $0x38] sm:$0xff] %vm1210_vm8, %v1177_v2 }
 0x1f3   : > { %v1320_v5 = vpop.permute.xlu1 %1319 }
 0x1f4   : > { %1354 = vst.msk [vmem:[#allocation2 + $0x70] sm:$0xff] %vm1339_vm9, %v1320_v5  ;;  %v1304_v7 = vpop.permute.xlu0 %1303 }
 0x1f5   : > { %1346 = vst.msk [vmem:[#allocation2 + $0x30] sm:$0xff] %vm1339_vm9, %v1304_v7 }
 0x1f7   : > { %v1322_v8 = vpop.permute.xlu1 %1321 }
 0x1f8   : > { %1355 = vst.msk [vmem:[#allocation2 + $0x78] sm:$0xff] %vm1339_vm9, %v1322_v8  ;;  %v1306_v9 = vpop.permute.xlu0 %1305 }
 0x1f9   : > { %1347 = vst.msk [vmem:[#allocation2 + $0x38] sm:$0xff] %vm1339_vm9, %v1306_v9 }
 0x1fb   : > { %v1370_v10 = vld [vmem:[#allocation2 + $0x70] sm:$0xff] }
 0x1fc   : > { %v1362_v11 = vld [vmem:[#allocation2 + $0x30] sm:$0xff]  ;;  %2149 = vmatprep.mubr.msk.bf16.mxu1 %vm1392_vm10, %v1370_v10 }
 0x1fd   : > { %2133 = vmatprep.mubr.msk.bf16.mxu0 %vm1392_vm10, %v1362_v11 }
 0x1ff   : > { %v1371_v12 = vld [vmem:[#allocation2 + $0x78] sm:$0xff] }
 0x200   : > { %v1363_v3 = vld [vmem:[#allocation2 + $0x38] sm:$0xff]  ;;  %2150 = vmatmul.mubr.msk.bf16.gmra.mrb[12].mxu1 %vm1392_vm10, %v1371_v12 }
 0x201   : > { %2134 = vmatmul.mubr.msk.bf16.gmra.mrb[12].mxu0 %vm1392_vm10, %v1363_v3 }
 0x217   : > { %v2139_v15 = vpop.f32.mrb[0].mxu1 }
 0x218   : > { %v2123_v16 = vpop.f32.mrb[0].mxu0  ;;  %v1631_v18 = vmul.f32 %v2139_v15, %v3255_v13  ;;  %v1543_v20 = vpop.f32.mrb[1].mxu1 }
 0x219   : > { %v1615_v21 = vmul.f32 %v2123_v16, %v3255_v13  ;;  %v1479_v22 = vpop.f32.mrb[1].mxu0  ;;  %v1629_v23 = vmul.f32 %v3255_v13, %v1543_v20  ;;  %v2140_v52 = vpop.f32.mrb[2].mxu1 }
 0x21a   : > { %v1670_v24 = vadd.f32 %v3257_v14, %v1631_v18  ;;  %v1613_v17 = vmul.f32 %v3255_v13, %v1479_v22  ;;  %v2124_v53 = vpop.f32.mrb[2].mxu0  ;;  %v1632_v19 = vmul.f32 %v2140_v52, %v3255_v13  ;;  %v1546_v25 = vpop.f32.mrb[3].mxu1 }
 0x21b   : > { %v1654_v26 = vadd.f32 %v3257_v14, %v1615_v21  ;;  %v1668_v27 = vadd.f32 %v3257_v14, %v1629_v23  ;;  %v1616_v28 = vmul.f32 %v2124_v53, %v3255_v13  ;;  %v1482_v29 = vpop.f32.mrb[3].mxu0  ;;  %v1630_v30 = vmul.f32 %v3255_v13, %v1546_v25 }
 0x21c   : > { %v1702_v31 = vmax.f32 %v1670_v24, 0.0  ;;  %v1652_v32 = vadd.f32 %v3257_v14, %v1613_v17  ;;  %v1671_v33 = vadd.f32 %v3257_v14, %v1632_v19  ;;  %v1614_v34 = vmul.f32 %v3255_v13, %v1482_v29 }
 0x21d   : > { %v1686_v35 = vmax.f32 %v1654_v26, 0.0  ;;  %v1700_v36 = vmax.f32 %v1668_v27, 0.0  ;;  %v1655_v37 = vadd.f32 %v3257_v14, %v1616_v28  ;;  %v1669_v38 = vadd.f32 %v3257_v14, %v1630_v30 }
 0x21e   : > { %1735 = vst.msk [vmem:[%s3275_s24 + $0x90] sm:$0xff] %vm1716_vm11, %v1702_v31  ;;  %v1684_v39 = vmax.f32 %v1652_v32, 0.0  ;;  %v1703_v42 = vmax.f32 %v1671_v33, 0.0  ;;  %v1653_v40 = vadd.f32 %v3257_v14, %v1614_v34 }
 0x21f   : > { %1719 = vst.msk [vmem:[%s3275_s24 + $0x10] sm:$0xff] %vm1716_vm11, %v1686_v35  ;;  %1733 = vst.msk [vmem:[%s3275_s24 + $0x80] sm:$0xff] %vm1716_vm11, %v1700_v36  ;;  %v1687_v41 = vmax.f32 %v1655_v37, 0.0  ;;  %v1701_v43 = vmax.f32 %v1669_v38, 0.0 }
 0x220   : > { %1717 = vst.msk [vmem:[%s3275_s24] sm:$0xff] %vm1716_vm11, %v1684_v39  ;;  %1736 = vst.msk [vmem:[%s3275_s24 + $0x98] sm:$0xff] %vm1716_vm11, %v1703_v42  ;;  %v1685_v44 = vmax.f32 %v1653_v40, 0.0 }
 0x221   : > { %1720 = vst.msk [vmem:[%s3275_s24 + $0x18] sm:$0xff] %vm1716_vm11, %v1687_v41  ;;  %1734 = vst.msk [vmem:[%s3275_s24 + $0x88] sm:$0xff] %vm1716_vm11, %v1701_v43 }
 0x222   : > { %1718 = vst.msk [vmem:[%s3275_s24 + $0x8] sm:$0xff] %vm1716_vm11, %v1685_v44 }
 0x257   : > { %v2143_v45 = vpop.f32.mrb[4].mxu1 }
 0x258   : > { %v2127_v4 = vpop.f32.mrb[4].mxu0  ;;  %v1635_v48 = vmul.f32 %v2143_v45, %v3255_v13  ;;  %v1559_v6 = vpop.f32.mrb[5].mxu1 }
 0x259   : > { %v1619_v49 = vmul.f32 %v2127_v4, %v3255_v13  ;;  %v1495_v50 = vpop.f32.mrb[5].mxu0  ;;  %v1633_v51 = vmul.f32 %v3255_v13, %v1559_v6  ;;  %v2144_v54 = vpop.f32.mrb[6].mxu1 }
 0x25a   : > { %v1674_v55 = vadd.f32 %v3257_v14, %v1635_v48  ;;  %v1617_v56 = vmul.f32 %v3255_v13, %v1495_v50  ;;  %v2128_v63 = vpop.f32.mrb[6].mxu0  ;;  %v1636_v46 = vmul.f32 %v2144_v54, %v3255_v13  ;;  %v1562_v47 = vpop.f32.mrb[7].mxu1 }
 0x25b   : > { %v1658_v57 = vadd.f32 %v3257_v14, %v1619_v49  ;;  %v1672_v58 = vadd.f32 %v3257_v14, %v1633_v51  ;;  %v1620_v59 = vmul.f32 %v2128_v63, %v3255_v13  ;;  %v1498_v60 = vpop.f32.mrb[7].mxu0  ;;  %v1634_v61 = vmul.f32 %v3255_v13, %v1562_v47 }
 0x25c   : > { %v1706_v62 = vmax.f32 %v1674_v55, 0.0  ;;  %v1656_v0 = vadd.f32 %v3257_v14, %v1617_v56  ;;  %v1675_v1 = vadd.f32 %v3257_v14, %v1636_v46  ;;  %v1618_v2 = vmul.f32 %v3255_v13, %v1498_v60 }
 0x25d   : > { %v1690_v5 = vmax.f32 %v1658_v57, 0.0  ;;  %v1704_v7 = vmax.f32 %v1672_v58, 0.0  ;;  %v1659_v8 = vadd.f32 %v3257_v14, %v1620_v59  ;;  %v1673_v9 = vadd.f32 %v3257_v14, %v1634_v61 }
 0x25e   : > { %1739 = vst.msk [vmem:[%s3275_s24 + $0xb0] sm:$0xff] %vm1716_vm11, %v1706_v62  ;;  %v1688_v10 = vmax.f32 %v1656_v0, 0.0  ;;  %v1707_v11 = vmax.f32 %v1675_v1, 0.0  ;;  %v1657_v12 = vadd.f32 %v3257_v14, %v1618_v2 }
 0x25f   : > { %1723 = vst.msk [vmem:[%s3275_s24 + $0x30] sm:$0xff] %vm1716_vm11, %v1690_v5  ;;  %1737 = vst.msk [vmem:[%s3275_s24 + $0xa0] sm:$0xff] %vm1716_vm11, %v1704_v7  ;;  %v1691_v3 = vmax.f32 %v1659_v8, 0.0  ;;  %v1705_v15 = vmax.f32 %v1673_v9, 0.0 }
 0x260   : > { %1721 = vst.msk [vmem:[%s3275_s24 + $0x20] sm:$0xff] %vm1716_vm11, %v1688_v10  ;;  %1740 = vst.msk [vmem:[%s3275_s24 + $0xb8] sm:$0xff] %vm1716_vm11, %v1707_v11  ;;  %v1689_v16 = vmax.f32 %v1657_v12, 0.0 }
 0x261   : > { %1724 = vst.msk [vmem:[%s3275_s24 + $0x38] sm:$0xff] %vm1716_vm11, %v1691_v3  ;;  %1738 = vst.msk [vmem:[%s3275_s24 + $0xa8] sm:$0xff] %vm1716_vm11, %v1705_v15 }
 0x262   : > { %1722 = vst.msk [vmem:[%s3275_s24 + $0x28] sm:$0xff] %vm1716_vm11, %v1689_v16 }
 0x297   : > { %v2147_v18 = vpop.f32.mrb[8].mxu1 }
 0x298   : > { %v2131_v20 = vpop.f32.mrb[8].mxu0  ;;  %v1639_v21 = vmul.f32 %v2147_v18, %v3255_v13  ;;  %v1575_v22 = vpop.f32.mrb[9].mxu1 }
 0x299   : > { %v1623_v23 = vmul.f32 %v2131_v20, %v3255_v13  ;;  %v1511_v52 = vpop.f32.mrb[9].mxu0  ;;  %v1637_v24 = vmul.f32 %v3255_v13, %v1575_v22  ;;  %v2148_v17 = vpop.f32.mrb[10].mxu1 }
 0x29a   : > { %v1678_v53 = vadd.f32 %v3257_v14, %v1639_v21  ;;  %v1621_v19 = vmul.f32 %v3255_v13, %v1511_v52  ;;  %v2132_v25 = vpop.f32.mrb[10].mxu0  ;;  %v1640_v26 = vmul.f32 %v2148_v17, %v3255_v13  ;;  %v1578_v27 = vpop.f32.mrb[11].mxu1 }
 0x29b   : > { %v1662_v28 = vadd.f32 %v3257_v14, %v1623_v23  ;;  %v1676_v29 = vadd.f32 %v3257_v14, %v1637_v24  ;;  %v1624_v30 = vmul.f32 %v2132_v25, %v3255_v13  ;;  %v1514_v31 = vpop.f32.mrb[11].mxu0  ;;  %v1638_v32 = vmul.f32 %v3255_v13, %v1578_v27 }
 0x29c   : > { %v1710_v33 = vmax.f32 %v1678_v53, 0.0  ;;  %v1660_v34 = vadd.f32 %v3257_v14, %v1621_v19  ;;  %v1679_v35 = vadd.f32 %v3257_v14, %v1640_v26  ;;  %v1622_v36 = vmul.f32 %v3255_v13, %v1514_v31 }
 0x29d   : > { %v1694_v37 = vmax.f32 %v1662_v28, 0.0  ;;  %v1708_v38 = vmax.f32 %v1676_v29, 0.0  ;;  %v1663_v39 = vadd.f32 %v3257_v14, %v1624_v30  ;;  %v1677_v42 = vadd.f32 %v3257_v14, %v1638_v32 }
 0x29e   : > { %1743 = vst.msk [vmem:[%s3275_s24 + $0xd0] sm:$0xff] %vm1716_vm11, %v1710_v33  ;;  %v1692_v40 = vmax.f32 %v1660_v34, 0.0  ;;  %v1711_v41 = vmax.f32 %v1679_v35, 0.0  ;;  %v1661_v43 = vadd.f32 %v3257_v14, %v1622_v36 }
 0x29f   : > { %1727 = vst.msk [vmem:[%s3275_s24 + $0x50] sm:$0xff] %vm1716_vm11, %v1694_v37  ;;  %1741 = vst.msk [vmem:[%s3275_s24 + $0xc0] sm:$0xff] %vm1716_vm11, %v1708_v38  ;;  %v1695_v44 = vmax.f32 %v1663_v39, 0.0  ;;  %v1709_v45 = vmax.f32 %v1677_v42, 0.0 }
 0x2a0   : > { %1725 = vst.msk [vmem:[%s3275_s24 + $0x40] sm:$0xff] %vm1716_vm11, %v1692_v40  ;;  %1744 = vst.msk [vmem:[%s3275_s24 + $0xd8] sm:$0xff] %vm1716_vm11, %v1711_v41  ;;  %v1693_v4 = vmax.f32 %v1661_v43, 0.0 }
 0x2a1   : > { %1728 = vst.msk [vmem:[%s3275_s24 + $0x58] sm:$0xff] %vm1716_vm11, %v1695_v44  ;;  %1742 = vst.msk [vmem:[%s3275_s24 + $0xc8] sm:$0xff] %vm1716_vm11, %v1709_v45 }
 0x2a2   : > { %1726 = vst.msk [vmem:[%s3275_s24 + $0x48] sm:$0xff] %vm1716_vm11, %v1693_v4 }
 0x2d3   : > { %v2151_v48 = vpop.f32.mrb[12].mxu1 }
 0x2d4   : > { %v2135_v6 = vpop.f32.mrb[12].mxu0  ;;  %v1643_v49 = vmul.f32 %v2151_v48, %v3255_v13  ;;  %v1591_v50 = vpop.f32.mrb[13].mxu1 }
 0x2d5   : > { %v1627_v51 = vmul.f32 %v2135_v6, %v3255_v13  ;;  %v1527_v54 = vpop.f32.mrb[13].mxu0  ;;  %v1641_v55 = vmul.f32 %v3255_v13, %v1591_v50  ;;  %v2152_v56 = vpop.f32.mrb[14].mxu1 }
 0x2d6   : > { %v1682_v63 = vadd.f32 %v3257_v14, %v1643_v49  ;;  %v1625_v46 = vmul.f32 %v3255_v13, %v1527_v54  ;;  %v2136_v47 = vpop.f32.mrb[14].mxu0  ;;  %v1644_v57 = vmul.f32 %v2152_v56, %v3255_v13  ;;  %v1594_v58 = vpop.f32.mrb[15].mxu1 }
 0x2d7   : > { %v1666_v59 = vadd.f32 %v3257_v14, %v1627_v51  ;;  %v1680_v60 = vadd.f32 %v3257_v14, %v1641_v55  ;;  %v1628_v61 = vmul.f32 %v2136_v47, %v3255_v13  ;;  %v1530_v62 = vpop.f32.mrb[15].mxu0  ;;  %v1642_v0 = vmul.f32 %v3255_v13, %v1594_v58 }
 0x2d8   : > { %v1714_v1 = vmax.f32 %v1682_v63, 0.0  ;;  %v1664_v2 = vadd.f32 %v3257_v14, %v1625_v46  ;;  %v1683_v5 = vadd.f32 %v3257_v14, %v1644_v57  ;;  %v1626_v7 = vmul.f32 %v3255_v13, %v1530_v62 }
 0x2d9   : > { %v1698_v8 = vmax.f32 %v1666_v59, 0.0  ;;  %v1712_v9 = vmax.f32 %v1680_v60, 0.0  ;;  %v1667_v10 = vadd.f32 %v3257_v14, %v1628_v61  ;;  %v1681_v11 = vadd.f32 %v3257_v14, %v1642_v0 }
 0x2da   : > { %1747 = vst.msk [vmem:[%s3275_s24 + $0xf0] sm:$0xff] %vm1716_vm11, %v1714_v1  ;;  %v1696_v12 = vmax.f32 %v1664_v2, 0.0  ;;  %v1715_v3 = vmax.f32 %v1683_v5, 0.0  ;;  %v1665_v13 = vadd.f32 %v3257_v14, %v1626_v7 }
 0x2db   : > { %1731 = vst.msk [vmem:[%s3275_s24 + $0x70] sm:$0xff] %vm1716_vm11, %v1698_v8  ;;  %1745 = vst.msk [vmem:[%s3275_s24 + $0xe0] sm:$0xff] %vm1716_vm11, %v1712_v9  ;;  %v1699_v15 = vmax.f32 %v1667_v10, 0.0  ;;  %v1713_v16 = vmax.f32 %v1681_v11, 0.0 }
 0x2dc   : > { %1729 = vst.msk [vmem:[%s3275_s24 + $0x60] sm:$0xff] %vm1716_vm11, %v1696_v12  ;;  %1748 = vst.msk [vmem:[%s3275_s24 + $0xf8] sm:$0xff] %vm1716_vm11, %v1715_v3  ;;  %v1697_v18 = vmax.f32 %v1665_v13, 0.0 }
 0x2dd   : > { %1732 = vst.msk [vmem:[%s3275_s24 + $0x78] sm:$0xff] %vm1716_vm11, %v1699_v15  ;;  %1746 = vst.msk [vmem:[%s3275_s24 + $0xe8] sm:$0xff] %vm1716_vm11, %v1713_v16 }
 0x2de   : > { %1730 = vst.msk [vmem:[%s3275_s24 + $0x68] sm:$0xff] %vm1716_vm11, %v1697_v18 }
 0x2df   : > { %2384 = shalt.err (!%p2381_p4)
}
 0x2e0   : > { %s2385_s7 = scalar_lea.hbm %s3385_s11, 4096  ;;  %s2389_s14 = scalar_lea.hbm %s3446_s4, 8192 }
 0x2e1   : > { %p2386_p9 = scmp.ne.s32.totalorder %s3385_s11, %s2385_s7  ;;  %p2390_p8 = scmp.lt.u32.totalorder %s3385_s11, %s3446_s4 }
 0x2e2   : > { %p2391_p13 = scmp.lt.u32.totalorder %s2389_s14, %s2385_s7  ;;  %p2393_p10 = scmp.lt.u32.totalorder %s2385_s7, %s3385_s11 }
 0x2e3   : > { %p2387_p0 = pnand %p2386_p9, %p2636_p5 }
 0x2e4   : > { %p2392_p6 = por %p2391_p13, %p2390_p8 }
 0x2e5   : > { %p2388_p11 = pneg %p2387_p0 }
 0x2e6   : > { %p2394_p3 = por %p2393_p10, %p2392_p6 }
 0x2e8   : > { %p2395_p7 = pnand %p2394_p3, %p2388_p11 }
 0x2ea   : > { %2398 = shalt.err (!%p2395_p7)
}
 0x2eb   : > { %s2464_s27 = smov 128  }
 0x2ec   : > { %2178 = dma.vmem_to_hbm [thread:$0]  (%p2636_p5), %s3391_s6, 4096, %s3385_s11, %s1750_s25, %s2464_s27, %s2464_s27, %s2456_s23  }
 0x2ed PF: > { %s1778_s19 = sand.u32 1, %s2433_s15   ;;  %p3464_p12 = scmp.ne.s32.totalorder %s3451_s22, 0 }
 0x2ee   : > { %p3465_p2 = scmp.ge.s32.totalorder %s2445_s18, 2  ;;  %s1779_s28 = scalar_lea.sflag [#allocation5], %s1778_s19 }
 0x2f0   : > { %p2195_p1 = pnand %p3465_p2, %p3464_p12 }
 0x2f2   : > { %2428 = dma.done.wait (!%p2195_p1), %s1779_s28, 4096  }
 0x2f3   : > { %2430 = vsyncadd (!%p2195_p1), %s1779_s28, 4294963200  ;;  %p19_p4 = scmp.ge.s32.totalorder %s2622_s10, 4   ;;  %s3466_s15 = smov %s2437_s16 }
 0x2f4   : > { %s3467_s16 = smov %s2441_s17  ;;  %s3468_s17 = smov %s2632_s12 }
 0x2f5   : > { %s3469_s18 = smov %s2622_s10  ;;  %21 = sbr.rel (!%p19_p4) target bundleno = 7 (0x7), region = 95 }
 0x2fc   :  { %1784 = vsyncpa [#allocation4], 1 }
 0x2fd   :  { %1786 = vsyncpa [#allocation4 + $0x1], 1 }
 0x2fe   :  { %1787 = vsyncpa [#allocation7], 1 }
 0x2ff   :  { %1788 = vsyncpa [#allocation10], 1 }
 0x300   :  { %1789 = vsyncpa [#allocation5], 1 }
 0x301   :  { %1791 = vsyncpa [#allocation5 + $0x1], 1 }

// kernel: cnn_backbone.6
= control target key start
LH: loop header
LB: loop body
LE: loop exit
PB: predicated region body
PF: predicated region fallthrough
CT: control target
= control target key end

     0   :  { %9 = vsyncpa [#allocation4], 0  ;;  %s3297_s0 = inlined_call_operand.hbm [shape: f32[2,18,18,4], index: 0, kind: input, shape index: {}]   ;;  %s3298_s1 = inlined_call_operand.hbm [shape: bf16[36,8], index: 1, kind: input, shape index: {}]   ;;  %s3299_s2 = inlined_call_operand.hbm [shape: f32[2,1,8], index: 2, kind: output, shape index: {0}]   ;;  %s3300_s3 = inlined_call_operand.hbm [shape: f32[2,1,8], index: 3, kind: output, shape index: {1}]  }
   0x1   :  { %11 = vsyncpa [#allocation4 + $0x1], 0 }
   0x2   :  { %12 = vsyncpa [#allocation7], 0 }
   0x3   :  { %13 = vsyncpa [#allocation5], 0 }
   0x4   :  { %15 = vsyncpa [#allocation5 + $0x1], 0 }
   0x5   :  { %16 = vsyncpa [#allocation10], 0 }
   0x6   :  { %18 = vsyncpa [#allocation10 + $0x1], 0  ;;  %s2507_s12 = smov 0   ;;  %s2509_s13 = smov 0  }
   0x7   :  { %s2511_s14 = smov 0   ;;  %s2513_s15 = smov 0  }
   0x8   :  { %s2515_s16 = smov 0   ;;  %s2517_s17 = smov 0  }
   0x9 LB: > { %s1907_s18 = sadd.s32 4294967295, %s2468_s17   ;;  %s1908_s19 = sadd.s32 4294967294, %s2468_s17   ;;  %s2468_s17 = sphi %s2517_s17, %s24_s17   ;;  %s2464_s16 = sphi %s2515_s16, %s3323_s16   ;;  %s2460_s15 = sphi %s2513_s15, %s3322_s15   ;;  %s2456_s14 = sphi %s2511_s14, %s3321_s14   ;;  %s2452_s13 = sphi %s2509_s13, %s3320_s13   ;;  %s2448_s12 = sphi %s2507_s12, %s3319_s12  }
   0xa   : > { %p58_p0 = scmp.ne.s32.totalorder %s2452_s13, %s2448_s12  ;;  %p2541_p1 = scmp.eq.s32.totalorder %s1907_s18, 0 }
   0xb   : > { %p2545_p2 = scmp.eq.s32.totalorder %s1907_s18, 1  ;;  %p109_p3 = scmp.eq.s32.totalorder %s1908_s19, 1 }
   0xc   : > { %s3305_s20 = scalar_select %p2541_p1, 1, 0 }
   0xd   : > { %s3306_s21 = scalar_select %p2545_p2, 1, 0 }
   0xe   : > { %p2551_p4 = por %p2541_p1, %p58_p0  ;;  %p1909_p5 = scmp.ge.s32.totalorder %s2468_s17, 1 }
   0xf   : > { %p2556_p6 = por %p109_p3, %p58_p0  ;;  %p142_p7 = scmp.lt.s32.totalorder %s2468_s17, 3 }
  0x10   : > { %s3307_s22 = scalar_select %p2551_p4, 1, 0 }
  0x11   : > { %s3308_s23 = scalar_select %p2556_p6, 1, 0 }
  0x12   : > { %p2561_p8 = pnand %p1909_p5, %p142_p7  ;;  %s2470_s25 = smov [#allocation6]  }
  0x13   : > { %s154_s26 = sshll.u32 %s2470_s25, 4  ;;  %s36_s28 = sadd.s32 1, %s2464_s16  ;;  %s155_s26 = int_to_ptr.vmem [resolvable:$true] %s154_s26 }
  0x14   : > { %s3309_s24 = scalar_select %p2561_p8, 1, 0 }
  0x15   : > { %p2208_p9 = pneg %p2561_p8  ;;  %s2292_s4 = scalar_lea.hbm %s3298_s1, 320 }
  0x16   : > { %p2293_p12 = scmp.ne.s32.totalorder %s3298_s1, %s2292_s4  ;;  %p2299_p5 = scmp.lt.u32.totalorder %s2292_s4, %s3298_s1 }
  0x17   : > { %p2570_p11 = pnand %p2208_p9, %p2541_p1 }
  0x19   : > { %p2294_p13 = pneg %p2570_p11 }
  0x1b   : > { %p2295_p0 = pnand %p2294_p13, %p2293_p12 }
  0x1d   : > { %p2296_p3 = pneg %p2295_p0 }
  0x1f   : > { %p2301_p7 = pnand %p2299_p5, %p2296_p3 }
  0x21   : > { %2304 = shalt.err (!%p2301_p7)
}
  0x22   : > { %s2305_s9 = scalar_lea.vmem %s155_s26, 320  ;;  %p2313_p1 = scmp.lt.s32.totalorder %s155_s26, %s155_s26 }
  0x23   : > { %p2306_p9 = scmp.ne.s32.totalorder %s155_s26, %s2305_s9  ;;  %p2314_p4 = scmp.lt.s32.totalorder %s2305_s9, %s2305_s9 }
  0x25   : > { %p2308_p10 = pnand %p2306_p9, %p2294_p13  ;;  %p2315_p8 = por %p2314_p4, %p2313_p1 }
  0x27   : > { %p2309_p6 = pneg %p2308_p10 }
  0x29   : > { %p2316_p2 = pnand %p2315_p8, %p2309_p6 }
  0x2b   : > { %2319 = shalt.err (!%p2316_p2)
}
  0x2c   : > { %s2471_s10 = smov 64   ;;  %s2472_s11 = smov 4  }
  0x2d   : > { %2211 = dma.hbm_to_vmem [thread:$0]  (!%p2570_p11), %s3298_s1, 320, %s155_s26, [#allocation7], %s2471_s10, %s2471_s10, %s2472_s11  }
  0x2e   : > { %p38_p1 = scmp.ge.s32.totalorder %s36_s28, 2  ;;  %s45_s25 = sadd.s32 1, %s2456_s14 }
  0x2f   : > { %p52_p2 = scmp.ne.s32.totalorder %s2456_s14, %s2452_s13  ;;  %p53_p4 = scmp.eq.s32.totalorder %s2468_s17, 0 }
  0x30   : > { %s3325_s28 = smov (%p38_p1, %s36_s28), 0  ;;  %p3311_p8 = scmp.ne.s32.totalorder %s3306_s21, 0 }
  0x31   : > { %p54_p6 = por %p53_p4, %p52_p2  ;;  %s42_s30 = ssub.s32 %s2464_s16, %s3325_s28 }
  0x32   : > { %p2599_p10 = por %p3311_p8, %p52_p2  ;;  %p2224_p12 = scmp.lt.s32.totalorder %s2468_s17, 2 }
  0x33   : > { %p43_p13 = scmp.eq.s32.totalorder %s42_s30, 0  ;;  %s168_s27 = sand.u32 1, %s2456_s14  }
  0x34   : > { %s2195_s4 = smul.u32 432, %s168_s27  ;;  %p2611_p11 = pnand %p2224_p12, %p54_p6 }
  0x35   : > { %s2608_s5 = scalar_select %p43_p13, %s2456_s14, %s45_s25  }
  0x36   : > { %s2196_s26 = smul.u32 6912, %s2464_s16  ;;  %s172_s6 = scalar_lea.vmem [#allocation3], %s2195_s4 }
  0x37   : > { %s180_s7 = sshll.u32 %s172_s6, 4  ;;  %s2622_s11 = scalar_lea.sflag [#allocation4], %s168_s27  ;;  %s2620_s7 = int_to_ptr.vmem [resolvable:$true] %s180_s7 }
  0x38   : > { %s2618_s10 = scalar_lea.hbm %s3297_s0, %s2196_s26  ;;  %p2322_p3 = pneg %p2611_p11 }
  0x39   : > { %s2320_s18 = scalar_lea.hbm %s2618_s10, 6912  ;;  %s2325_s30 = scalar_lea.hbm %s3297_s0, 13824 }
  0x3a   : > { %p2321_p0 = scmp.ne.s32.totalorder %s2618_s10, %s2320_s18  ;;  %p2326_p9 = scmp.lt.u32.totalorder %s2618_s10, %s3297_s0 }
  0x3b   : > { %p2327_p1 = scmp.lt.u32.totalorder %s2325_s30, %s2320_s18  ;;  %p2329_p4 = scmp.lt.u32.totalorder %s2320_s18, %s2618_s10 }
  0x3c   : > { %p2323_p5 = pnand %p2322_p3, %p2321_p0 }
  0x3d   : > { %p2328_p2 = por %p2327_p1, %p2326_p9 }
  0x3e   : > { %p2324_p7 = pneg %p2323_p5 }
  0x3f   : > { %p2330_p6 = por %p2329_p4, %p2328_p2 }
  0x41   : > { %p2331_p8 = pnand %p2330_p6, %p2324_p7 }
  0x43   : > { %2334 = shalt.err (!%p2331_p8)
}
  0x44   : > { %s2335_s27 = scalar_lea.vmem %s2620_s7, 6912  ;;  %s2473_s6 = smov [#allocation3]  }
  0x45   : > { %p2336_p12 = scmp.ne.s32.totalorder %s2620_s7, %s2335_s27  ;;  %s2340_s9 = sshll.u32 %s2473_s6, 4  ;;  %s2341_s9 = int_to_ptr.vmem [resolvable:$false] %s2340_s9 }
  0x46   : > { %s2342_s21 = scalar_lea.vmem %s2341_s9, 13824  ;;  %p2343_p5 = scmp.lt.s32.totalorder %s2620_s7, %s2341_s9 }
  0x47   : > { %p2338_p13 = pnand %p2336_p12, %p2322_p3  ;;  %p2344_p9 = scmp.lt.s32.totalorder %s2342_s21, %s2335_s27 }
  0x49   : > { %p2339_p0 = pneg %p2338_p13  ;;  %p2345_p1 = por %p2344_p9, %p2343_p5 }
  0x4b   : > { %p2346_p2 = pnand %p2345_p1, %p2339_p0 }
  0x4d   : > { %2349 = shalt.err (!%p2346_p2)
}
  0x4e   : > { %s2474_s18 = smov 128   ;;  %s2475_s19 = smov 8  }
  0x4f   : > { %2215 = dma.hbm_to_vmem [thread:$0]  (!%p2611_p11), %s2618_s10, 6912, %s2620_s7, %s2622_s11, %s2474_s18, %s2474_s18, %s2475_s19  }
  0x50   : > { %p3314_p3 = scmp.ne.s32.totalorder %s3309_s24, 0 }
  0x51   : > { %s2653_s25 = sand.u32 (!%p3314_p3), 1, %s2452_s13   ;;  %p3315_p7 = scmp.ne.s32.totalorder (!%p3314_p3), %s3307_s22, 0 }
  0x52   : > { %192 = sbr.rel (%p3314_p3) target bundleno = 745 (0x2e9), region = 28  ;;  %s195_s4 = scalar_lea.sflag (!%p3314_p3), [#allocation4], %s2653_s25 }
  0x53   : > { %s2197_s30 = smul.u32 (!%p3314_p3), 432, %s2653_s25 }
  0x55   : > { %s2657_s26 = scalar_lea.vmem (!%p3314_p3), [#allocation3], %s2197_s30 }
  0x59   : > { %2431 = dma.done.wait (%p3315_p7), %s195_s4, 6912  }
  0x5a   : > { %2433 = vsyncadd (%p3315_p7), %s195_s4, 4294960384  ;;  %p3316_p11 = scmp.ne.s32.totalorder %s3305_s20, 0 }
  0x5c   : > { %2435 = dma.done.wait (%p3316_p11), [#allocation7], 320  }
  0x5d   : > { %2437 = vsyncadd (%p3316_p11), [#allocation7], 4294966976  ;;  %v295_v0 = vld [vmem:[%s2657_s26 + $0x1] sm:$0xff]  ;;  %v296_v1 = vld [vmem:[%s2657_s26 + $0x9] sm:$0xff]  ;;  %s2476_s20 = smov 4   ;;  %s2477_s22 = smov 8  }
  0x5e   : > { %v424_v2 = vld [vmem:[%s2657_s26 + $0x2] sm:$0xff]  ;;  %v327_v3 = vpack.c.bf16 %v296_v1, %v295_v0  ;;  %v425_v4 = vld [vmem:[%s2657_s26 + $0xa] sm:$0xff]  ;;  %v297_v5 = vld [vmem:[%s2657_s26 + $0x19] sm:$0xff]  ;;  %vm278_vm0 = vcmask 31744   ;;  %s2478_s24 = smov 12   ;;  %s2479_s7 = smov 16  }
  0x5f   : > { %v298_v6 = vld [vmem:[%s2657_s26 + $0x21] sm:$0xff]  ;;  %v456_v7 = vpack.c.bf16 %v425_v4, %v424_v2  ;;  %v1915_v10 = vld [vmem:[%s2657_s26 + $0x18] sm:$0xff]  ;;  %v1917_v13 = vld [vmem:[%s2657_s26 + $0x30] sm:$0xff]  ;;  %s2480_s8 = smov 20   ;;  %s2481_s10 = smov 24   ;;  %vm1414_vm1 = vcmask 1041408  }
  0x60   : > { %v426_v8 = vld [vmem:[%s2657_s26 + $0x1a] sm:$0xff]  ;;  %v427_v9 = vld [vmem:[%s2657_s26 + $0x22] sm:$0xff]  ;;  %359 = vrot.lane.b32.xlu0 %v327_v3, %s2476_s20  ;;  %v328_v11 = vpack.c.bf16 %v298_v6, %v297_v5  ;;  %v2014_v19 = vld [vmem:[%s2657_s26 + $0x50] sm:$0xff]  ;;  %s2482_s11 = smov 28   ;;  %s2483_s27 = smov 32   ;;  %vm407_vm2 = vcmask 64544  }
  0x61   : > { %v1916_v12 = vld [vmem:[%s2657_s26 + $0x20] sm:$0xff]  ;;  %v1918_v14 = vld [vmem:[%s2657_s26 + $0x38] sm:$0xff]  ;;  %488 = vrot.lane.b32.xlu1 %v456_v7, %s2477_s22  ;;  %v457_v15 = vpack.c.bf16 %v427_v9, %v426_v8  ;;  %v2013_v18 = vld [vmem:[%s2657_s26 + $0x48] sm:$0xff]  ;;  %vm536_vm3 = vcmask 97344   ;;  %vm666_vm4 = vcmask 130144   ;;  %vm795_vm5 = vcmask 162944  }
  0x62   : > { %v586_v16 = vpack.c.bf16 %v1916_v12, %v1915_v10  ;;  %v587_v17 = vpack.c.bf16 %v1918_v14, %v1917_v13  ;;  %v2683_v20 = vpack.c.bf16 %v2014_v19, %v2013_v18  ;;  %v1921_v21 = vld [vmem:[%s2657_s26 + $0x60] sm:$0xff]  ;;  %v1922_v22 = vld [vmem:[%s2657_s26 + $0x68] sm:$0xff]  ;;  %v1949_v23 = vld [vmem:[%s2657_s26 + $0x31] sm:$0xff]  ;;  %vm924_vm6 = vcmask 195744   ;;  %s3166_s6 = scalar_lea.vmem [#allocation8], %s2653_s25  ;;  %s3171_s9 = scalar_lea.vmem [#allocation9], %s2653_s25 }
  0x63   : > { %v2692_v24 = vpack.c.bf16 %v1922_v22, %v1921_v21  ;;  %v1950_v25 = vld [vmem:[%s2657_s26 + $0x39] sm:$0xff]  ;;  %v1925_v29 = vld [vmem:[%s2657_s26 + $0x90] sm:$0xff]  ;;  %v2021_v35 = vld [vmem:[%s2657_s26 + $0xa8] sm:$0xff]  ;;  %vm1054_vm7 = vcmask 228544   ;;  %vm1183_vm8 = vcmask 261344   ;;  %vm1312_vm9 = vcmask 294144  }
  0x64   : > { %280 = vst.msk [vmem:[#allocation2 + $0x8] sm:$0xff] %vm278_vm0, %v586_v16  ;;  %281 = vst.msk [vmem:[#allocation2 + $0x10] sm:$0xff] %vm278_vm0, %v587_v17  ;;  %361 = vrot.lane.b32.xlu0 %v328_v11, %s2476_s20  ;;  %v2017_v26 = vld [vmem:[%s2657_s26 + $0x78] sm:$0xff]  ;;  %v2018_v27 = vld [vmem:[%s2657_s26 + $0x80] sm:$0xff]  ;;  %v2707_v31 = vpack.c.bf16 %v1950_v25, %v1949_v23  ;;  %vm1365_vm10 = vcmask 293888   ;;  %vm1587_vm11 = vcmask 64512  }
  0x65   : > { %490 = vrot.lane.b32.xlu1 %v457_v15, %s2477_s22  ;;  %282 = vst.msk [vmem:[#allocation2 + $0x18] sm:$0xff] %vm278_vm0, %v2683_v20  ;;  %v2699_v28 = vpack.c.bf16 %v2018_v27, %v2017_v26  ;;  %283 = vst.msk [vmem:[#allocation2 + $0x20] sm:$0xff] %vm278_vm0, %v2692_v24  ;;  %v1926_v30 = vld [vmem:[%s2657_s26 + $0x98] sm:$0xff]  ;;  %v2022_v36 = vld [vmem:[%s2657_s26 + $0xb0] sm:$0xff]  ;;  %vm1583_vm12 = vcmask 57344   ;;  %s2126_s21 = sshll.u32 %s2460_s15, 4 }
  0x66   : > { %v1981_v32 = vld [vmem:[%s2657_s26 + $0x32] sm:$0xff]  ;;  %v2710_v33 = vpack.c.bf16 %v1926_v30, %v1925_v29  ;;  %v1982_v34 = vld [vmem:[%s2657_s26 + $0x3a] sm:$0xff]  ;;  %v2717_v37 = vpack.c.bf16 %v2022_v36, %v2021_v35  ;;  %v1930_v39 = vld [vmem:[%s2657_s26 + $0xc8] sm:$0xff]  ;;  %s1781_s18 = sshll.u32 %s3166_s6, 4  ;;  %s1794_s19 = sshll.u32 %s3171_s9, 4  ;;  %s3217_s18 = int_to_ptr.vmem [resolvable:$true] %s1781_s18  ;;  %s3226_s19 = int_to_ptr.vmem [resolvable:$true] %s1794_s19 }
  0x67   : > { %284 = vst.msk [vmem:[#allocation2 + $0x28] sm:$0xff] %vm278_vm0, %v2699_v28  ;;  %v1929_v38 = vld [vmem:[%s2657_s26 + $0xc0] sm:$0xff]  ;;  %v845_v40 = vpack.c.bf16 %v1982_v34, %v1981_v32  ;;  %v231_v43 = vld [vmem:[%s2657_s26 + $0x8] sm:$0xff]  ;;  %v2025_v45 = vld [vmem:[%s2657_s26 + $0xd8] sm:$0xff] }
  0x68   : > { %618 = vrot.lane.b32.xlu0 %v586_v16, %s2478_s24  ;;  %285 = vst.msk [vmem:[#allocation2 + $0x30] sm:$0xff] %vm278_vm0, %v2710_v33  ;;  %v2726_v41 = vpack.c.bf16 %v1930_v39, %v1929_v38  ;;  %286 = vst.msk [vmem:[#allocation2 + $0x38] sm:$0xff] %vm278_vm0, %v2717_v37  ;;  %v230_v42 = vld [vmem:[%s2657_s26] sm:$0xff]  ;;  %v2045_v48 = vld [vmem:[%s2657_s26 + $0x49] sm:$0xff] }
  0x69   : > { %620 = vrot.lane.b32.xlu1 %v587_v17, %s2478_s24  ;;  %v262_v44 = vpack.c.bf16 %v231_v43, %v230_v42  ;;  %v2026_v46 = vld [vmem:[%s2657_s26 + $0xe0] sm:$0xff]  ;;  %v1933_v49 = vld [vmem:[%s2657_s26 + $0xf0] sm:$0xff]  ;;  %v1934_v50 = vld [vmem:[%s2657_s26 + $0xf8] sm:$0xff] }
  0x6a   : > { %287 = vst.msk [vmem:[#allocation2 + $0x40] sm:$0xff] %vm278_vm0, %v2726_v41  ;;  %v2737_v47 = vpack.c.bf16 %v2026_v46, %v2025_v45  ;;  %v2046_v51 = vld [vmem:[%s2657_s26 + $0x51] sm:$0xff]  ;;  %v2745_v52 = vpack.c.bf16 %v1934_v50, %v1933_v49  ;;  %v2029_v56 = vld [vmem:[%s2657_s26 + $0x108] sm:$0xff]  ;;  %v2291_v59 = vld [vmem:[#allocation6 + $0x10] ss:$0 sps:$4 sm:$0x33]  }
  0x6b   : > { %279 = vst.msk [vmem:[#allocation2] sm:$0xff] %vm278_vm0, %v262_v44  ;;  %v2289_v53 = vld [vmem:[#allocation6] sm:$0xff]   ;;  %v2290_v54 = vld [vmem:[#allocation6 + $0x8] sm:$0xff]   ;;  %v1104_v55 = vpack.c.bf16 %v2046_v51, %v2045_v48  ;;  %v1416_v62 = vsel %vm1414_vm1, %v2291_v59, 0 }
  0x6c   : > { %747 = vrot.lane.b32.xlu0 %v328_v11, %s2479_s7  ;;  %288 = vst.msk [vmem:[#allocation2 + $0x48] sm:$0xff] %vm278_vm0, %v2737_v47  ;;  %289 = vst.msk [vmem:[#allocation2 + $0x50] sm:$0xff] %vm278_vm0, %v2745_v52  ;;  %2149 = vmatprep.subr.bf16.mxu0 %v2289_v53  ;;  %v2030_v57 = vld [vmem:[%s2657_s26 + $0x110] sm:$0xff]  ;;  %v1953_v0 = vld [vmem:[%s2657_s26 + $0x61] sm:$0xff] }
  0x6d   : > { %749 = vrot.lane.b32.xlu1 %v2707_v31, %s2479_s7  ;;  %2150 = vmatpush3.bf16.msra.mxu0 %v2289_v53  ;;  %v2756_v58 = vpack.c.bf16 %v2030_v57, %v2029_v56  ;;  %v2077_v60 = vld [vmem:[%s2657_s26 + $0x4a] sm:$0xff]  ;;  %v2078_v61 = vld [vmem:[%s2657_s26 + $0x52] sm:$0xff]  ;;  %v1937_v2 = vld [vmem:[%s2657_s26 + $0x120] sm:$0xff] }
  0x6e   : > { %2187 = vmatprep.subr.bf16.mxu1 %v2289_v53  ;;  %2151 = vmatprep.subr.bf16.mxu0 %v2290_v54  ;;  %v1233_v63 = vpack.c.bf16 %v2078_v61, %v2077_v60  ;;  %v1954_v1 = vld [vmem:[%s2657_s26 + $0x69] sm:$0xff]  ;;  %v2049_v9 = vld [vmem:[%s2657_s26 + $0x79] sm:$0xff]  ;;  %v2050_v10 = vld [vmem:[%s2657_s26 + $0x81] sm:$0xff] }
  0x6f   : > { %2190 = vmatpush3.bf16.msra.mxu1 %v2289_v53  ;;  %290 = vst.msk [vmem:[#allocation2 + $0x58] sm:$0xff] %vm278_vm0, %v2756_v58  ;;  %v1938_v3 = vld [vmem:[%s2657_s26 + $0x128] sm:$0xff]  ;;  %v718_v5 = vpack.c.bf16 %v1954_v1, %v1953_v0  ;;  %v2033_v11 = vld [vmem:[%s2657_s26 + $0x138] sm:$0xff]  ;;  %v2034_v12 = vld [vmem:[%s2657_s26 + $0x140] sm:$0xff]  ;;  %v1106_v14 = vpack.c.bf16 %v2050_v10, %v2049_v9 }
  0x70   : > { %876 = vrot.lane.b32.xlu0 %v457_v15, %s2480_s8  ;;  %2188 = vmatprep.subr.bf16.mxu1 %v2290_v54  ;;  %v2776_v4 = vpack.c.bf16 %v1938_v3, %v1937_v2  ;;  %v1985_v6 = vld [vmem:[%s2657_s26 + $0x62] sm:$0xff]  ;;  %v1986_v7 = vld [vmem:[%s2657_s26 + $0x6a] sm:$0xff]  ;;  %v2794_v13 = vpack.c.bf16 %v2034_v12, %v2033_v11  ;;  %v2081_v15 = vld [vmem:[%s2657_s26 + $0x7a] sm:$0xff] }
  0x71   : > { %878 = vrot.lane.b32.xlu1 %v845_v40, %s2480_s8  ;;  %2152 = vmatpush3.bf16.msra.mxu0 %v2290_v54  ;;  %v847_v8 = vpack.c.bf16 %v1986_v7, %v1985_v6  ;;  %v2082_v16 = vld [vmem:[%s2657_s26 + $0x82] sm:$0xff]  ;;  %v1957_v18 = vld [vmem:[%s2657_s26 + $0x91] sm:$0xff]  ;;  %v1958_v19 = vld [vmem:[%s2657_s26 + $0x99] sm:$0xff] }
  0x72   : > { %2193 = vmatprep.subr.msk.bf16.mxu0 %vm1414_vm1, %v2291_v59  ;;  %291 = vst.msk [vmem:[#allocation2 + $0x60] sm:$0xff] %vm278_vm0, %v2776_v4  ;;  %292 = vst.msk [vmem:[#allocation2 + $0x68] sm:$0xff] %vm278_vm0, %v2794_v13  ;;  %v1942_v21 = vld [vmem:[%s2657_s26 + $0x158] sm:$0xff]  ;;  %v720_v23 = vpack.c.bf16 %v1958_v19, %v1957_v18  ;;  %v2053_v27 = vld [vmem:[%s2657_s26 + $0xa9] sm:$0xff] }
  0x73   : > { %2191 = vmatpush3.bf16.msra.mxu1 %v2290_v54  ;;  %v1990_v25 = vld [vmem:[%s2657_s26 + $0x9a] sm:$0xff]  ;;  %v2037_v29 = vld [vmem:[%s2657_s26 + $0x168] sm:$0xff]  ;;  %v2038_v30 = vld [vmem:[%s2657_s26 + $0x170] sm:$0xff] }
  0x74   : > { %1006 = vrot.lane.b32.xlu0 %v587_v17, %s2481_s10  ;;  %2194 = vmatprep.subr.msk.bf16.mxu1 %vm1414_vm1, %v2291_v59  ;;  %v1235_v17 = vpack.c.bf16 %v2082_v16, %v2081_v15  ;;  %v2085_v34 = vld [vmem:[%s2657_s26 + $0xaa] sm:$0xff]  ;;  %v2086_v35 = vld [vmem:[%s2657_s26 + $0xb2] sm:$0xff]  ;;  %v2058_v45 = vld [vmem:[%s2657_s26 + $0xe1] sm:$0xff] }
  0x75   : > { %1008 = vrot.lane.b32.xlu1 %v2683_v20, %s2481_s10  ;;  %2154 = vmatpush3.bf16.msra.mxu0 %v1416_v62  ;;  %v1237_v36 = vpack.c.bf16 %v2086_v35, %v2085_v34  ;;  %v1962_v38 = vld [vmem:[%s2657_s26 + $0xc9] sm:$0xff]  ;;  %v2089_v51 = vld [vmem:[%s2657_s26 + $0xda] sm:$0xff]  ;;  %v1997_v3 = vld [vmem:[%s2657_s26 + $0xf2] sm:$0xff] }
  0x76   : > { %v1994_v42 = vld [vmem:[%s2657_s26 + $0xca] sm:$0xff]  ;;  %v2090_v53 = vld [vmem:[%s2657_s26 + $0xe2] sm:$0xff] }
  0x77   : > { %2192 = vmatpush3.bf16.msra.mxu1 %v1416_v62  ;;  %v1965_v62 = vld [vmem:[%s2657_s26 + $0xf1] sm:$0xff]  ;;  %v2061_v10 = vld [vmem:[%s2657_s26 + $0x109] sm:$0xff] }
  0x78   : > { %1135 = vrot.lane.b32.xlu0 %v2707_v31, %s2482_s11  ;;  %v2062_v11 = vld [vmem:[%s2657_s26 + $0x111] sm:$0xff] }
  0x79   : > { %1137 = vrot.lane.b32.xlu1 %v1104_v55, %s2482_s11  ;;  %v2093_v18 = vld [vmem:[%s2657_s26 + $0x10a] sm:$0xff] }
  0x7c   : > { %1264 = vrot.lane.b32.xlu0 %v845_v40, %s2483_s27 }
  0x7d   : > { %363 = vrot.lane.b32.xlu1 %v2707_v31, %s2476_s20  ;;  %v2834_v31 = vpack.c.bf16 %v2038_v30, %v2037_v29  ;;  %v1969_v29 = vld [vmem:[%s2657_s26 + $0x121] sm:$0xff]  ;;  %v1970_v30 = vld [vmem:[%s2657_s26 + $0x129] sm:$0xff] }
  0x7e   : > { %v726_v34 = vpack.c.bf16 %v1970_v30, %v1969_v29  ;;  %v1977_v29 = vld [vmem:[%s2657_s26 + $0x181] sm:$0xff]  ;;  %v1978_v30 = vld [vmem:[%s2657_s26 + $0x189] sm:$0xff] }
  0x7f   : > { %294 = vst.msk [vmem:[#allocation2 + $0x78] sm:$0xff] %vm278_vm0, %v2834_v31 }
  0x80   : > { %1266 = vrot.lane.b32.xlu0 %v1233_v63, %s2483_s27 }
  0x81   : > { %365 = vrot.lane.b32.xlu1 %v1104_v55, %s2476_s20 }
  0x84   : > { %492 = vrot.lane.b32.xlu0 %v845_v40, %s2477_s22  ;;  %v1993_v40 = vld [vmem:[%s2657_s26 + $0xc2] sm:$0xff] }
  0x85   : > { %494 = vrot.lane.b32.xlu1 %v1233_v63, %s2477_s22  ;;  %v851_v43 = vpack.c.bf16 %v1994_v42, %v1993_v40 }
  0x88   : > { %622 = vrot.lane.b32.xlu0 %v2683_v20, %s2478_s24  ;;  %v1941_v20 = vld [vmem:[%s2657_s26 + $0x150] sm:$0xff] }
  0x89   : > { %624 = vrot.lane.b32.xlu1 %v2692_v24, %s2478_s24  ;;  %v2816_v22 = vpack.c.bf16 %v1942_v21, %v1941_v20 }
  0x8b   : > { %293 = vst.msk [vmem:[#allocation2 + $0x70] sm:$0xff] %vm278_vm0, %v2816_v22 }
  0x8c   : > { %751 = vrot.lane.b32.xlu0 %v1104_v55, %s2479_s7  ;;  %v1239_v55 = vpack.c.bf16 %v2090_v53, %v2089_v51  ;;  %v2098_v51 = vld [vmem:[%s2657_s26 + $0x142] sm:$0xff] }
  0x8d   : > { %753 = vrot.lane.b32.xlu1 %v718_v5, %s2479_s7 }
  0x90   : > { %880 = vrot.lane.b32.xlu0 %v1233_v63, %s2480_s8  ;;  %v1966_v63 = vld [vmem:[%s2657_s26 + $0xf9] sm:$0xff] }
  0x91   : > { %882 = vrot.lane.b32.xlu1 %v847_v8, %s2480_s8  ;;  %v724_v1 = vpack.c.bf16 %v1966_v63, %v1965_v62  ;;  %v1974_v62 = vld [vmem:[%s2657_s26 + $0x159] sm:$0xff] }
  0x94   : > { %1010 = vrot.lane.b32.xlu0 %v2692_v24, %s2481_s10  ;;  %v1989_v24 = vld [vmem:[%s2657_s26 + $0x92] sm:$0xff] }
  0x95   : > { %1012 = vrot.lane.b32.xlu1 %v2699_v28, %s2481_s10  ;;  %v849_v26 = vpack.c.bf16 %v1990_v25, %v1989_v24 }
  0x98   : > { %1139 = vrot.lane.b32.xlu0 %v718_v5, %s2482_s11 }
  0x99   : > { %1141 = vrot.lane.b32.xlu1 %v1106_v14, %s2482_s11 }
  0x9c   : > { %1268 = vrot.lane.b32.xlu0 %v847_v8, %s2483_s27 }
  0x9d   : > { %367 = vrot.lane.b32.xlu1 %v718_v5, %s2476_s20  ;;  %v1998_v5 = vld [vmem:[%s2657_s26 + $0xfa] sm:$0xff] }
  0xa0   : > { %1270 = vrot.lane.b32.xlu0 %v1235_v17, %s2483_s27 }
  0xa1   : > { %369 = vrot.lane.b32.xlu1 %v1106_v14, %s2476_s20 }
  0xa4   : > { %496 = vrot.lane.b32.xlu0 %v847_v8, %s2477_s22 }
  0xa5   : > { %498 = vrot.lane.b32.xlu1 %v1235_v17, %s2477_s22 }
  0xa8   : > { %626 = vrot.lane.b32.xlu0 %v2699_v28, %s2478_s24  ;;  %v2054_v28 = vld [vmem:[%s2657_s26 + $0xb1] sm:$0xff] }
  0xa9   : > { %628 = vrot.lane.b32.xlu1 %v2710_v33, %s2478_s24  ;;  %v1108_v32 = vpack.c.bf16 %v2054_v28, %v2053_v27 }
  0xac   : > { %755 = vrot.lane.b32.xlu0 %v1106_v14, %s2479_s7  ;;  %v1112_v14 = vpack.c.bf16 %v2062_v11, %v2061_v10 }
  0xad   : > { %757 = vrot.lane.b32.xlu1 %v720_v23, %s2479_s7 }
  0xb0   : > { %884 = vrot.lane.b32.xlu0 %v1235_v17, %s2480_s8 }
  0xb1   : > { %886 = vrot.lane.b32.xlu1 %v849_v26, %s2480_s8 }
  0xb4   : > { %1014 = vrot.lane.b32.xlu0 %v2710_v33, %s2481_s10  ;;  %v1961_v33 = vld [vmem:[%s2657_s26 + $0xc1] sm:$0xff] }
  0xb5   : > { %1016 = vrot.lane.b32.xlu1 %v2717_v37, %s2481_s10  ;;  %v722_v39 = vpack.c.bf16 %v1962_v38, %v1961_v33  ;;  %v2002_v33 = vld [vmem:[%s2657_s26 + $0x12a] sm:$0xff] }
  0xb8   : > { %1143 = vrot.lane.b32.xlu0 %v720_v23, %s2482_s11 }
  0xb9   : > { %1145 = vrot.lane.b32.xlu1 %v1108_v32, %s2482_s11 }
  0xbc   : > { %1272 = vrot.lane.b32.xlu0 %v849_v26, %s2483_s27 }
  0xbd   : > { %371 = vrot.lane.b32.xlu1 %v720_v23, %s2476_s20 }
  0xc0   : > { %1274 = vrot.lane.b32.xlu0 %v1237_v36, %s2483_s27 }
  0xc1   : > { %373 = vrot.lane.b32.xlu1 %v1108_v32, %s2476_s20 }
  0xc4   : > { %500 = vrot.lane.b32.xlu0 %v849_v26, %s2477_s22 }
  0xc5   : > { %502 = vrot.lane.b32.xlu1 %v1237_v36, %s2477_s22 }
  0xc8   : > { %630 = vrot.lane.b32.xlu0 %v2717_v37, %s2478_s24  ;;  %v2057_v37 = vld [vmem:[%s2657_s26 + $0xd9] sm:$0xff] }
  0xc9   : > { %632 = vrot.lane.b32.xlu1 %v2726_v41, %s2478_s24  ;;  %v1110_v48 = vpack.c.bf16 %v2058_v45, %v2057_v37 }
  0xcc   : > { %759 = vrot.lane.b32.xlu0 %v1108_v32, %s2479_s7 }
  0xcd   : > { %761 = vrot.lane.b32.xlu1 %v722_v39, %s2479_s7 }
  0xd0   : > { %888 = vrot.lane.b32.xlu0 %v1237_v36, %s2480_s8  ;;  %v2001_v36 = vld [vmem:[%s2657_s26 + $0x122] sm:$0xff] }
  0xd1   : > { %890 = vrot.lane.b32.xlu1 %v851_v43, %s2480_s8 }
  0xd2   : > { %v360_v44 = vpop.permute.xlu0 %359 }
  0xd3   : > { %408 = vst.msk [vmem:[#allocation2] sm:$0xff] %vm407_vm2, %v360_v44  ;;  %v489_v46 = vpop.permute.xlu1 %488  ;;  %v2066_v44 = vld [vmem:[%s2657_s26 + $0x141] sm:$0xff] }
  0xd4   : > { %537 = vst.msk [vmem:[#allocation2] sm:$0xff] %vm536_vm3, %v489_v46  ;;  %1018 = vrot.lane.b32.xlu0 %v2726_v41, %s2481_s10 }
  0xd5   : > { %1020 = vrot.lane.b32.xlu1 %v2737_v47, %s2481_s10 }
  0xd6   : > { %v362_v49 = vpop.permute.xlu0 %361 }
  0xd7   : > { %409 = vst.msk [vmem:[#allocation2 + $0x8] sm:$0xff] %vm407_vm2, %v362_v49  ;;  %v491_v50 = vpop.permute.xlu1 %490 }
  0xd8   : > { %538 = vst.msk [vmem:[#allocation2 + $0x8] sm:$0xff] %vm536_vm3, %v491_v50  ;;  %1147 = vrot.lane.b32.xlu0 %v722_v39, %s2482_s11  ;;  %v2097_v50 = vld [vmem:[%s2657_s26 + $0x13a] sm:$0xff] }
  0xd9   : > { %1149 = vrot.lane.b32.xlu1 %v1110_v48, %s2482_s11 }
  0xda   : > { %v619_v54 = vpop.permute.xlu0 %618 }
  0xdb   : > { %667 = vst.msk [vmem:[#allocation2] sm:$0xff] %vm666_vm4, %v619_v54  ;;  %v621_v41 = vpop.permute.xlu1 %620 }
  0xdc   : > { %668 = vst.msk [vmem:[#allocation2 + $0x8] sm:$0xff] %vm666_vm4, %v621_v41  ;;  %1276 = vrot.lane.b32.xlu0 %v851_v43, %s2483_s27  ;;  %v1243_v41 = vpack.c.bf16 %v2098_v51, %v2097_v50  ;;  %v2105_v51 = vld [vmem:[%s2657_s26 + $0x19a] sm:$0xff] }
  0xdd   : > { %375 = vrot.lane.b32.xlu1 %v722_v39, %s2476_s20  ;;  %v855_v39 = vpack.c.bf16 %v2002_v33, %v2001_v36  ;;  %v2009_v36 = vld [vmem:[%s2657_s26 + $0x182] sm:$0xff]  ;;  %v2010_v33 = vld [vmem:[%s2657_s26 + $0x18a] sm:$0xff] }
  0xde   : > { %v748_v56 = vpop.permute.xlu0 %747 }
  0xdf   : > { %796 = vst.msk [vmem:[#allocation2] sm:$0xff] %vm795_vm5, %v748_v56  ;;  %v750_v57 = vpop.permute.xlu1 %749 }
  0xe0   : > { %797 = vst.msk [vmem:[#allocation2 + $0x8] sm:$0xff] %vm795_vm5, %v750_v57  ;;  %1278 = vrot.lane.b32.xlu0 %v1239_v55, %s2483_s27 }
  0xe1   : > { %377 = vrot.lane.b32.xlu1 %v1110_v48, %s2476_s20 }
  0xe2   : > { %v877_v59 = vpop.permute.xlu0 %876 }
  0xe3   : > { %925 = vst.msk [vmem:[#allocation2] sm:$0xff] %vm924_vm6, %v877_v59  ;;  %v879_v60 = vpop.permute.xlu1 %878 }
  0xe4   : > { %926 = vst.msk [vmem:[#allocation2 + $0x8] sm:$0xff] %vm924_vm6, %v879_v60  ;;  %504 = vrot.lane.b32.xlu0 %v851_v43, %s2477_s22  ;;  %v2065_v43 = vld [vmem:[%s2657_s26 + $0x139] sm:$0xff] }
  0xe5   : > { %506 = vrot.lane.b32.xlu1 %v1239_v55, %s2477_s22  ;;  %v1114_v45 = vpack.c.bf16 %v2066_v44, %v2065_v43 }
  0xe6   : > { %v1007_v61 = vpop.permute.xlu0 %1006 }
  0xe7   : > { %1055 = vst.msk [vmem:[#allocation2] sm:$0xff] %vm1054_vm7, %v1007_v61  ;;  %v1009_v0 = vpop.permute.xlu1 %1008  ;;  %v1973_v61 = vld [vmem:[%s2657_s26 + $0x151] sm:$0xff] }
  0xe8   : > { %1056 = vst.msk [vmem:[#allocation2 + $0x8] sm:$0xff] %vm1054_vm7, %v1009_v0  ;;  %634 = vrot.lane.b32.xlu0 %v2737_v47, %s2478_s24  ;;  %v853_v47 = vpack.c.bf16 %v1998_v5, %v1997_v3  ;;  %v728_v0 = vpack.c.bf16 %v1974_v62, %v1973_v61  ;;  %v2006_v3 = vld [vmem:[%s2657_s26 + $0x15a] sm:$0xff] }
  0xe9   : > { %636 = vrot.lane.b32.xlu1 %v2745_v52, %s2478_s24 }
  0xea   : > { %v1136_v2 = vpop.permute.xlu0 %1135 }
  0xeb   : > { %1184 = vst.msk [vmem:[#allocation2] sm:$0xff] %vm1183_vm8, %v1136_v2  ;;  %v1138_v6 = vpop.permute.xlu1 %1137  ;;  %v2005_v2 = vld [vmem:[%s2657_s26 + $0x152] sm:$0xff] }
  0xec   : > { %1185 = vst.msk [vmem:[#allocation2 + $0x8] sm:$0xff] %vm1183_vm8, %v1138_v6  ;;  %763 = vrot.lane.b32.xlu0 %v1110_v48, %s2479_s7  ;;  %v857_v6 = vpack.c.bf16 %v2006_v3, %v2005_v2 }
  0xed   : > { %765 = vrot.lane.b32.xlu1 %v724_v1, %s2479_s7 }
  0xee   : > { %v1265_v7 = vpop.permute.xlu0 %1264 }
  0xef   : > { %1313 = vst.msk [vmem:[#allocation2] sm:$0xff] %vm1312_vm9, %v1265_v7  ;;  %v364_v8 = vpop.permute.xlu1 %363 }
  0xf0   : > { %410 = vst.msk [vmem:[#allocation2 + $0x10] sm:$0xff] %vm407_vm2, %v364_v8  ;;  %892 = vrot.lane.b32.xlu0 %v1239_v55, %s2480_s8  ;;  %v2069_v8 = vld [vmem:[%s2657_s26 + $0x169] sm:$0xff] }
  0xf1   : > { %894 = vrot.lane.b32.xlu1 %v853_v47, %s2480_s8 }
  0xf2   : > { %v1267_v9 = vpop.permute.xlu0 %1266 }
  0xf3   : > { %1314 = vst.msk [vmem:[#allocation2 + $0x8] sm:$0xff] %vm1312_vm9, %v1267_v9  ;;  %v366_v12 = vpop.permute.xlu1 %365  ;;  %v2070_v9 = vld [vmem:[%s2657_s26 + $0x171] sm:$0xff] }
  0xf4   : > { %411 = vst.msk [vmem:[#allocation2 + $0x18] sm:$0xff] %vm407_vm2, %v366_v12  ;;  %1022 = vrot.lane.b32.xlu0 %v2745_v52, %s2481_s10  ;;  %v2094_v52 = vld [vmem:[%s2657_s26 + $0x112] sm:$0xff]  ;;  %v1116_v11 = vpack.c.bf16 %v2070_v9, %v2069_v8 }
  0xf5   : > { %1024 = vrot.lane.b32.xlu1 %v2756_v58, %s2481_s10  ;;  %v1241_v23 = vpack.c.bf16 %v2094_v52, %v2093_v18 }
  0xf6   : > { %v493_v15 = vpop.permute.xlu0 %492  ;;  %v1329_v16 = vld [vmem:[#allocation2] sm:$0xff] }
  0xf7   : > { %539 = vst.msk [vmem:[#allocation2 + $0x10] sm:$0xff] %vm536_vm3, %v493_v15  ;;  %v495_v17 = vpop.permute.xlu1 %494  ;;  %2155 = vmatprep.mubr.msk.bf16.mxu0 %vm1365_vm10, %v1329_v16  ;;  %v2101_v16 = vld [vmem:[%s2657_s26 + $0x16a] sm:$0xff] }
  0xf8   : > { %540 = vst.msk [vmem:[#allocation2 + $0x18] sm:$0xff] %vm536_vm3, %v495_v17  ;;  %1151 = vrot.lane.b32.xlu0 %v724_v1, %s2482_s11  ;;  %v2102_v17 = vld [vmem:[%s2657_s26 + $0x172] sm:$0xff] }
  0xf9   : > { %1153 = vrot.lane.b32.xlu1 %v1112_v14, %s2482_s11 }
  0xfa   : > { %v623_v19 = vpop.permute.xlu0 %622  ;;  %v1330_v20 = vld [vmem:[#allocation2 + $0x8] sm:$0xff] }
  0xfb   : > { %669 = vst.msk [vmem:[#allocation2 + $0x10] sm:$0xff] %vm666_vm4, %v623_v19  ;;  %v625_v21 = vpop.permute.xlu1 %624  ;;  %2156 = vmatmul.mubr.msk.bf16.vlgmr.msra.gmra.mrb[0].mxu0 %vm1365_vm10, %v1330_v20  ;;  %v1245_v19 = vpack.c.bf16 %v2102_v17, %v2101_v16 }
  0xfc   : > { %670 = vst.msk [vmem:[#allocation2 + $0x18] sm:$0xff] %vm666_vm4, %v625_v21  ;;  %1280 = vrot.lane.b32.xlu0 %v853_v47, %s2483_s27 }
  0xfd   : > { %379 = vrot.lane.b32.xlu1 %v724_v1, %s2476_s20 }
  0xfe   : > { %v752_v24 = vpop.permute.xlu0 %751 }
  0xff   : > { %798 = vst.msk [vmem:[#allocation2 + $0x10] sm:$0xff] %vm795_vm5, %v752_v24  ;;  %v754_v25 = vpop.permute.xlu1 %753  ;;  %v1945_v24 = vld [vmem:[%s2657_s26 + $0x180] sm:$0xff] }
 0x100   : > { %799 = vst.msk [vmem:[#allocation2 + $0x18] sm:$0xff] %vm795_vm5, %v754_v25  ;;  %1282 = vrot.lane.b32.xlu0 %v1241_v23, %s2483_s27  ;;  %v1946_v25 = vld [vmem:[%s2657_s26 + $0x188] sm:$0xff] }
 0x101   : > { %381 = vrot.lane.b32.xlu1 %v1112_v14, %s2476_s20 }
 0x102   : > { %v881_v26 = vpop.permute.xlu0 %880 }
 0x103   : > { %927 = vst.msk [vmem:[#allocation2 + $0x10] sm:$0xff] %vm924_vm6, %v881_v26  ;;  %v883_v27 = vpop.permute.xlu1 %882 }
 0x104   : > { %928 = vst.msk [vmem:[#allocation2 + $0x18] sm:$0xff] %vm924_vm6, %v883_v27  ;;  %508 = vrot.lane.b32.xlu0 %v853_v47, %s2477_s22  ;;  %v601_v27 = vpack.c.bf16 %v1946_v25, %v1945_v24 }
 0x105   : > { %510 = vrot.lane.b32.xlu1 %v1241_v23, %s2477_s22 }
 0x106   : > { %v1011_v28 = vpop.permute.xlu0 %1010 }
 0x107   : > { %1057 = vst.msk [vmem:[#allocation2 + $0x10] sm:$0xff] %vm1054_vm7, %v1011_v28  ;;  %v1013_v32 = vpop.permute.xlu1 %1012 }
 0x108   : > { %1058 = vst.msk [vmem:[#allocation2 + $0x18] sm:$0xff] %vm1054_vm7, %v1013_v32  ;;  %638 = vrot.lane.b32.xlu0 %v2756_v58, %s2478_s24 }
 0x109   : > { %640 = vrot.lane.b32.xlu1 %v2776_v4, %s2478_s24 }
 0x10a   : > { %v1140_v35 = vpop.permute.xlu0 %1139 }
 0x10b   : > { %1186 = vst.msk [vmem:[#allocation2 + $0x10] sm:$0xff] %vm1183_vm8, %v1140_v35  ;;  %v1142_v38 = vpop.permute.xlu1 %1141 }
 0x10c   : > { %1187 = vst.msk [vmem:[#allocation2 + $0x18] sm:$0xff] %vm1183_vm8, %v1142_v38  ;;  %767 = vrot.lane.b32.xlu0 %v1112_v14, %s2479_s7 }
 0x10d   : > { %769 = vrot.lane.b32.xlu1 %v726_v34, %s2479_s7 }
 0x10e   : > { %v1269_v58 = vpop.permute.xlu0 %1268 }
 0x10f   : > { %1315 = vst.msk [vmem:[#allocation2 + $0x10] sm:$0xff] %vm1312_vm9, %v1269_v58  ;;  %v368_v40 = vpop.permute.xlu1 %367 }
 0x110   : > { %412 = vst.msk [vmem:[#allocation2 + $0x20] sm:$0xff] %vm407_vm2, %v368_v40  ;;  %896 = vrot.lane.b32.xlu0 %v1241_v23, %s2480_s8  ;;  %v2042_v40 = vld [vmem:[%s2657_s26 + $0x1a0] sm:$0xff] }
 0x111   : > { %898 = vrot.lane.b32.xlu1 %v855_v39, %s2480_s8 }
 0x112   : > { %v1271_v42 = vpop.permute.xlu0 %1270 }
 0x113   : > { %1316 = vst.msk [vmem:[#allocation2 + $0x18] sm:$0xff] %vm1312_vm9, %v1271_v42  ;;  %v370_v37 = vpop.permute.xlu1 %369 }
 0x114   : > { %413 = vst.msk [vmem:[#allocation2 + $0x28] sm:$0xff] %vm407_vm2, %v370_v37  ;;  %1026 = vrot.lane.b32.xlu0 %v2776_v4, %s2481_s10  ;;  %v2073_v37 = vld [vmem:[%s2657_s26 + $0x199] sm:$0xff] }
 0x115   : > { %1028 = vrot.lane.b32.xlu1 %v2794_v13, %s2481_s10 }
 0x116   : > { %v497_v46 = vpop.permute.xlu0 %496  ;;  %v1331_v48 = vld [vmem:[#allocation2 + $0x10] sm:$0xff] }
 0x117   : > { %541 = vst.msk [vmem:[#allocation2 + $0x20] sm:$0xff] %vm536_vm3, %v497_v46  ;;  %v499_v49 = vpop.permute.xlu1 %498  ;;  %2159 = vmatprep.mubr.msk.bf16.mxu0 %vm1365_vm10, %v1331_v48 }
 0x118   : > { %542 = vst.msk [vmem:[#allocation2 + $0x28] sm:$0xff] %vm536_vm3, %v499_v49  ;;  %1155 = vrot.lane.b32.xlu0 %v726_v34, %s2482_s11 }
 0x119   : > { %1157 = vrot.lane.b32.xlu1 %v1114_v45, %s2482_s11 }
 0x11a   : > { %v627_v4 = vpop.permute.xlu0 %626  ;;  %v1332_v53 = vld [vmem:[#allocation2 + $0x18] sm:$0xff] }
 0x11b   : > { %671 = vst.msk [vmem:[#allocation2 + $0x20] sm:$0xff] %vm666_vm4, %v627_v4  ;;  %v629_v54 = vpop.permute.xlu1 %628  ;;  %2160 = vmatmul.mubr.msk.bf16.gmra.mrb[4].mxu0 %vm1365_vm10, %v1332_v53  ;;  %v2106_v4 = vld [vmem:[%s2657_s26 + $0x1a2] sm:$0xff] }
 0x11c   : > { %672 = vst.msk [vmem:[#allocation2 + $0x28] sm:$0xff] %vm666_vm4, %v629_v54  ;;  %1284 = vrot.lane.b32.xlu0 %v855_v39, %s2483_s27  ;;  %v1247_v54 = vpack.c.bf16 %v2106_v4, %v2105_v51 }
 0x11d   : > { %383 = vrot.lane.b32.xlu1 %v726_v34, %s2476_s20  ;;  %v730_v34 = vpack.c.bf16 %v1978_v30, %v1977_v29 }
 0x11e   : > { %v756_v55 = vpop.permute.xlu0 %755 }
 0x11f   : > { %800 = vst.msk [vmem:[#allocation2 + $0x20] sm:$0xff] %vm795_vm5, %v756_v55  ;;  %v758_v56 = vpop.permute.xlu1 %757 }
 0x120   : > { %801 = vst.msk [vmem:[#allocation2 + $0x28] sm:$0xff] %vm795_vm5, %v758_v56  ;;  %1286 = vrot.lane.b32.xlu0 %v1243_v41, %s2483_s27 }
 0x121   : > { %385 = vrot.lane.b32.xlu1 %v1114_v45, %s2476_s20 }
 0x122   : > { %v885_v57 = vpop.permute.xlu0 %884 }
 0x123   : > { %929 = vst.msk [vmem:[#allocation2 + $0x20] sm:$0xff] %vm924_vm6, %v885_v57  ;;  %v887_v59 = vpop.permute.xlu1 %886 }
 0x124   : > { %930 = vst.msk [vmem:[#allocation2 + $0x28] sm:$0xff] %vm924_vm6, %v887_v59  ;;  %512 = vrot.lane.b32.xlu0 %v855_v39, %s2477_s22  ;;  %v859_v39 = vpack.c.bf16 %v2010_v33, %v2009_v36 }
 0x125   : > { %514 = vrot.lane.b32.xlu1 %v1243_v41, %s2477_s22 }
 0x126   : > { %v1015_v60 = vpop.permute.xlu0 %1014 }
 0x127   : > { %1059 = vst.msk [vmem:[#allocation2 + $0x20] sm:$0xff] %vm1054_vm7, %v1015_v60  ;;  %v1017_v63 = vpop.permute.xlu1 %1016 }
 0x128   : > { %1060 = vst.msk [vmem:[#allocation2 + $0x28] sm:$0xff] %vm1054_vm7, %v1017_v63  ;;  %642 = vrot.lane.b32.xlu0 %v2794_v13, %s2478_s24 }
 0x129   : > { %644 = vrot.lane.b32.xlu1 %v2816_v22, %s2478_s24 }
 0x12a   : > { %v1144_v1 = vpop.permute.xlu0 %1143 }
 0x12b   : > { %1188 = vst.msk [vmem:[#allocation2 + $0x20] sm:$0xff] %vm1183_vm8, %v1144_v1  ;;  %v1146_v5 = vpop.permute.xlu1 %1145 }
 0x12c   : > { %1189 = vst.msk [vmem:[#allocation2 + $0x28] sm:$0xff] %vm1183_vm8, %v1146_v5  ;;  %771 = vrot.lane.b32.xlu0 %v1114_v45, %s2479_s7  ;;  %v2074_v45 = vld [vmem:[%s2657_s26 + $0x1a1] sm:$0xff] }
 0x12d   : > { %773 = vrot.lane.b32.xlu1 %v728_v0, %s2479_s7  ;;  %v1118_v48 = vpack.c.bf16 %v2074_v45, %v2073_v37 }
 0x12e   : > { %v1273_v13 = vpop.permute.xlu0 %1272 }
 0x12f   : > { %1317 = vst.msk [vmem:[#allocation2 + $0x20] sm:$0xff] %vm1312_vm9, %v1273_v13  ;;  %v372_v47 = vpop.permute.xlu1 %371 }
 0x130   : > { %414 = vst.msk [vmem:[#allocation2 + $0x30] sm:$0xff] %vm407_vm2, %v372_v47  ;;  %900 = vrot.lane.b32.xlu0 %v1243_v41, %s2480_s8 }
 0x131   : > { %902 = vrot.lane.b32.xlu1 %v857_v6, %s2480_s8 }
 0x132   : > { %v1275_v7 = vpop.permute.xlu0 %1274 }
 0x133   : > { %1318 = vst.msk [vmem:[#allocation2 + $0x28] sm:$0xff] %vm1312_vm9, %v1275_v7  ;;  %v374_v10 = vpop.permute.xlu1 %373 }
 0x134   : > { %415 = vst.msk [vmem:[#allocation2 + $0x38] sm:$0xff] %vm407_vm2, %v374_v10  ;;  %1030 = vrot.lane.b32.xlu0 %v2816_v22, %s2481_s10 }
 0x135   : > { %1032 = vrot.lane.b32.xlu1 %v2834_v31, %s2481_s10 }
 0x136   : > { %v501_v12 = vpop.permute.xlu0 %500  ;;  %v1333_v14 = vld [vmem:[#allocation2 + $0x20] sm:$0xff] }
 0x137   : > { %543 = vst.msk [vmem:[#allocation2 + $0x30] sm:$0xff] %vm536_vm3, %v501_v12  ;;  %v503_v15 = vpop.permute.xlu1 %502  ;;  %2163 = vmatprep.mubr.msk.bf16.mxu0 %vm1365_vm10, %v1333_v14 }
 0x138   : > { %544 = vst.msk [vmem:[#allocation2 + $0x38] sm:$0xff] %vm536_vm3, %v503_v15  ;;  %1159 = vrot.lane.b32.xlu0 %v728_v0, %s2482_s11 }
 0x139   : > { %1161 = vrot.lane.b32.xlu1 %v1116_v11, %s2482_s11 }
 0x13a   : > { %v631_v22 = vpop.permute.xlu0 %630  ;;  %v1334_v18 = vld [vmem:[#allocation2 + $0x28] sm:$0xff] }
 0x13b   : > { %673 = vst.msk [vmem:[#allocation2 + $0x30] sm:$0xff] %vm666_vm4, %v631_v22  ;;  %v633_v52 = vpop.permute.xlu1 %632  ;;  %2164 = vmatmul.mubr.msk.bf16.gmra.mrb[8].mxu0 %vm1365_vm10, %v1334_v18 }
 0x13c   : > { %674 = vst.msk [vmem:[#allocation2 + $0x38] sm:$0xff] %vm666_vm4, %v633_v52  ;;  %1288 = vrot.lane.b32.xlu0 %v857_v6, %s2483_s27 }
 0x13d   : > { %387 = vrot.lane.b32.xlu1 %v728_v0, %s2476_s20 }
 0x13e   : > { %v760_v20 = vpop.permute.xlu0 %759 }
 0x13f   : > { %802 = vst.msk [vmem:[#allocation2 + $0x30] sm:$0xff] %vm795_vm5, %v760_v20  ;;  %v762_v21 = vpop.permute.xlu1 %761 }
 0x140   : > { %803 = vst.msk [vmem:[#allocation2 + $0x38] sm:$0xff] %vm795_vm5, %v762_v21  ;;  %1290 = vrot.lane.b32.xlu0 %v1245_v19, %s2483_s27 }
 0x141   : > { %389 = vrot.lane.b32.xlu1 %v1116_v11, %s2476_s20 }
 0x142   : > { %v889_v23 = vpop.permute.xlu0 %888 }
 0x143   : > { %931 = vst.msk [vmem:[#allocation2 + $0x30] sm:$0xff] %vm924_vm6, %v889_v23  ;;  %v891_v26 = vpop.permute.xlu1 %890 }
 0x144   : > { %932 = vst.msk [vmem:[#allocation2 + $0x38] sm:$0xff] %vm924_vm6, %v891_v26  ;;  %516 = vrot.lane.b32.xlu0 %v857_v6, %s2477_s22 }
 0x145   : > { %518 = vrot.lane.b32.xlu1 %v1245_v19, %s2477_s22  ;;  %s3224_s22 = scalar_lea.hbm %s3300_s3, %s2126_s21 }
 0x146   : > { %v1019_v28 = vpop.permute.xlu0 %1018 }
 0x147   : > { %1061 = vst.msk [vmem:[#allocation2 + $0x30] sm:$0xff] %vm1054_vm7, %v1019_v28  ;;  %v1021_v32 = vpop.permute.xlu1 %1020 }
 0x148   : > { %1062 = vst.msk [vmem:[#allocation2 + $0x38] sm:$0xff] %vm1054_vm7, %v1021_v32  ;;  %646 = vrot.lane.b32.xlu0 %v2834_v31, %s2478_s24  ;;  %v2041_v31 = vld [vmem:[%s2657_s26 + $0x198] sm:$0xff]  ;;  %s3215_s26 = scalar_lea.hbm %s3299_s2, %s2126_s21 }
 0x149   : > { %648 = vrot.lane.b32.xlu1 %v601_v27, %s2478_s24  ;;  %v989_v43 = vpack.c.bf16 %v2042_v40, %v2041_v31  ;;  %s1765_s24 = scalar_lea.sflag [#allocation5], %s2653_s25 }
 0x14a   : > { %v1148_v35 = vpop.permute.xlu0 %1147 }
 0x14b   : > { %1190 = vst.msk [vmem:[#allocation2 + $0x30] sm:$0xff] %vm1183_vm8, %v1148_v35  ;;  %v1150_v38 = vpop.permute.xlu1 %1149 }
 0x14c   : > { %1191 = vst.msk [vmem:[#allocation2 + $0x38] sm:$0xff] %vm1183_vm8, %v1150_v38  ;;  %775 = vrot.lane.b32.xlu0 %v1116_v11, %s2479_s7 }
 0x14d   : > { %777 = vrot.lane.b32.xlu1 %v730_v34, %s2479_s7  ;;  %s2350_s7 = scalar_lea.vmem %s3217_s18, 16 }
 0x14e   : > { %v1277_v58 = vpop.permute.xlu0 %1276  ;;  %p2351_p4 = scmp.ne.s32.totalorder %s3217_s18, %s2350_s7 }
 0x14f   : > { %1319 = vst.msk [vmem:[#allocation2 + $0x30] sm:$0xff] %vm1312_vm9, %v1277_v58  ;;  %v376_v42 = vpop.permute.xlu1 %375 }
 0x150   : > { %416 = vst.msk [vmem:[#allocation2 + $0x40] sm:$0xff] %vm407_vm2, %v376_v42  ;;  %904 = vrot.lane.b32.xlu0 %v1245_v19, %s2480_s8  ;;  %p2352_p6 = pnand %p2351_p4, %p2599_p10 }
 0x151   : > { %906 = vrot.lane.b32.xlu1 %v859_v39, %s2480_s8  ;;  %s2485_s8 = smov [#allocation8]  }
 0x152   : > { %v1279_v44 = vpop.permute.xlu0 %1278  ;;  %p2353_p8 = pneg %p2352_p6 }
 0x153   : > { %1320 = vst.msk [vmem:[#allocation2 + $0x38] sm:$0xff] %vm1312_vm9, %v1279_v44  ;;  %v378_v46 = vpop.permute.xlu1 %377 }
 0x154   : > { %417 = vst.msk [vmem:[#allocation2 + $0x48] sm:$0xff] %vm407_vm2, %v378_v46  ;;  %1034 = vrot.lane.b32.xlu0 %v601_v27, %s2481_s10 }
 0x155   : > { %1036 = vrot.lane.b32.xlu1 %v989_v43, %s2481_s10  ;;  %s2354_s10 = sshll.u32 %s2485_s8, 4  ;;  %s2355_s10 = int_to_ptr.vmem [resolvable:$false] %s2354_s10 }
 0x156   : > { %v505_v49 = vpop.permute.xlu0 %504  ;;  %v1335_v50 = vld [vmem:[#allocation2 + $0x30] sm:$0xff]  ;;  %p2357_p12 = scmp.lt.s32.totalorder %s3217_s18, %s2355_s10 }
 0x157   : > { %545 = vst.msk [vmem:[#allocation2 + $0x40] sm:$0xff] %vm536_vm3, %v505_v49  ;;  %v507_v53 = vpop.permute.xlu1 %506  ;;  %2167 = vmatprep.mubr.msk.bf16.mxu0 %vm1365_vm10, %v1335_v50 }
 0x158   : > { %546 = vst.msk [vmem:[#allocation2 + $0x48] sm:$0xff] %vm536_vm3, %v507_v53  ;;  %1163 = vrot.lane.b32.xlu0 %v730_v34, %s2482_s11 }
 0x159   : > { %1165 = vrot.lane.b32.xlu1 %v1118_v48, %s2482_s11  ;;  %s2356_s11 = scalar_lea.vmem %s2355_s10, 32 }
 0x15a   : > { %v635_v41 = vpop.permute.xlu0 %634  ;;  %v1336_v55 = vld [vmem:[#allocation2 + $0x38] sm:$0xff]  ;;  %p2358_p13 = scmp.lt.s32.totalorder %s2356_s11, %s2350_s7 }
 0x15b   : > { %675 = vst.msk [vmem:[#allocation2 + $0x40] sm:$0xff] %vm666_vm4, %v635_v41  ;;  %v637_v56 = vpop.permute.xlu1 %636  ;;  %2168 = vmatmul.mubr.msk.bf16.gmra.mrb[12].mxu0 %vm1365_vm10, %v1336_v55 }
 0x15c   : > { %676 = vst.msk [vmem:[#allocation2 + $0x48] sm:$0xff] %vm666_vm4, %v637_v56  ;;  %1292 = vrot.lane.b32.xlu0 %v859_v39, %s2483_s27  ;;  %p2359_p0 = por %p2358_p13, %p2357_p12 }
 0x15d   : > { %1294 = vrot.lane.b32.xlu1 %v1247_v54, %s2483_s27 }
 0x15e   : > { %v764_v57 = vpop.permute.xlu0 %763  ;;  %p2360_p5 = pnand %p2359_p0, %p2353_p8 }
 0x15f   : > { %804 = vst.msk [vmem:[#allocation2 + $0x40] sm:$0xff] %vm795_vm5, %v764_v57  ;;  %v766_v59 = vpop.permute.xlu1 %765 }
 0x160   : > { %805 = vst.msk [vmem:[#allocation2 + $0x48] sm:$0xff] %vm795_vm5, %v766_v59 }
 0x162   : > { %v893_v60 = vpop.permute.xlu0 %892 }
 0x163   : > { %933 = vst.msk [vmem:[#allocation2 + $0x40] sm:$0xff] %vm924_vm6, %v893_v60  ;;  %v895_v61 = vpop.permute.xlu1 %894 }
 0x164   : > { %934 = vst.msk [vmem:[#allocation2 + $0x48] sm:$0xff] %vm924_vm6, %v895_v61 }
 0x166   : > { %v1023_v62 = vpop.permute.xlu0 %1022 }
 0x167   : > { %1063 = vst.msk [vmem:[#allocation2 + $0x40] sm:$0xff] %vm1054_vm7, %v1023_v62  ;;  %v1025_v63 = vpop.permute.xlu1 %1024 }
 0x168   : > { %1064 = vst.msk [vmem:[#allocation2 + $0x48] sm:$0xff] %vm1054_vm7, %v1025_v63 }
 0x16a   : > { %v1152_v0 = vpop.permute.xlu0 %1151 }
 0x16b   : > { %1192 = vst.msk [vmem:[#allocation2 + $0x40] sm:$0xff] %vm1183_vm8, %v1152_v0  ;;  %v1154_v1 = vpop.permute.xlu1 %1153 }
 0x16c   : > { %1193 = vst.msk [vmem:[#allocation2 + $0x48] sm:$0xff] %vm1183_vm8, %v1154_v1 }
 0x16e   : > { %v1281_v2 = vpop.permute.xlu0 %1280 }
 0x16f   : > { %1321 = vst.msk [vmem:[#allocation2 + $0x40] sm:$0xff] %vm1312_vm9, %v1281_v2  ;;  %v380_v3 = vpop.permute.xlu1 %379 }
 0x170   : > { %418 = vst.msk [vmem:[#allocation2 + $0x50] sm:$0xff] %vm407_vm2, %v380_v3 }
 0x172   : > { %v1283_v5 = vpop.permute.xlu0 %1282 }
 0x173   : > { %1322 = vst.msk [vmem:[#allocation2 + $0x48] sm:$0xff] %vm1312_vm9, %v1283_v5  ;;  %v382_v6 = vpop.permute.xlu1 %381 }
 0x174   : > { %419 = vst.msk [vmem:[#allocation2 + $0x58] sm:$0xff] %vm407_vm2, %v382_v6 }
 0x176   : > { %v509_v13 = vpop.permute.xlu0 %508  ;;  %v1337_v47 = vld [vmem:[#allocation2 + $0x40] sm:$0xff] }
 0x177   : > { %547 = vst.msk [vmem:[#allocation2 + $0x50] sm:$0xff] %vm536_vm3, %v509_v13  ;;  %v511_v7 = vpop.permute.xlu1 %510  ;;  %2171 = vmatprep.mubr.msk.bf16.mxu1 %vm1365_vm10, %v1337_v47 }
 0x178   : > { %548 = vst.msk [vmem:[#allocation2 + $0x58] sm:$0xff] %vm536_vm3, %v511_v7 }
 0x17a   : > { %v639_v8 = vpop.permute.xlu0 %638  ;;  %v1338_v9 = vld [vmem:[#allocation2 + $0x48] sm:$0xff] }
 0x17b   : > { %677 = vst.msk [vmem:[#allocation2 + $0x50] sm:$0xff] %vm666_vm4, %v639_v8  ;;  %v641_v10 = vpop.permute.xlu1 %640  ;;  %2172 = vmatmul.mubr.msk.bf16.vlgmr.msra.gmra.mrb[0].mxu1 %vm1365_vm10, %v1338_v9 }
 0x17c   : > { %678 = vst.msk [vmem:[#allocation2 + $0x58] sm:$0xff] %vm666_vm4, %v641_v10 }
 0x17e   : > { %v768_v11 = vpop.permute.xlu0 %767 }
 0x17f   : > { %806 = vst.msk [vmem:[#allocation2 + $0x50] sm:$0xff] %vm795_vm5, %v768_v11  ;;  %v770_v12 = vpop.permute.xlu1 %769 }
 0x180   : > { %807 = vst.msk [vmem:[#allocation2 + $0x58] sm:$0xff] %vm795_vm5, %v770_v12 }
 0x182   : > { %v897_v14 = vpop.permute.xlu0 %896 }
 0x183   : > { %935 = vst.msk [vmem:[#allocation2 + $0x50] sm:$0xff] %vm924_vm6, %v897_v14  ;;  %v899_v15 = vpop.permute.xlu1 %898 }
 0x184   : > { %936 = vst.msk [vmem:[#allocation2 + $0x58] sm:$0xff] %vm924_vm6, %v899_v15 }
 0x186   : > { %v1027_v16 = vpop.permute.xlu0 %1026 }
 0x187   : > { %1065 = vst.msk [vmem:[#allocation2 + $0x50] sm:$0xff] %vm1054_vm7, %v1027_v16  ;;  %v1029_v17 = vpop.permute.xlu1 %1028 }
 0x188   : > { %1066 = vst.msk [vmem:[#allocation2 + $0x58] sm:$0xff] %vm1054_vm7, %v1029_v17 }
 0x18a   : > { %v1156_v22 = vpop.permute.xlu0 %1155 }
 0x18b   : > { %1194 = vst.msk [vmem:[#allocation2 + $0x50] sm:$0xff] %vm1183_vm8, %v1156_v22  ;;  %v1158_v18 = vpop.permute.xlu1 %1157 }
 0x18c   : > { %1195 = vst.msk [vmem:[#allocation2 + $0x58] sm:$0xff] %vm1183_vm8, %v1158_v18 }
 0x18e   : > { %v1285_v52 = vpop.permute.xlu0 %1284 }
 0x18f   : > { %1323 = vst.msk [vmem:[#allocation2 + $0x50] sm:$0xff] %vm1312_vm9, %v1285_v52  ;;  %v384_v19 = vpop.permute.xlu1 %383 }
 0x190   : > { %420 = vst.msk [vmem:[#allocation2 + $0x60] sm:$0xff] %vm407_vm2, %v384_v19 }
 0x192   : > { %v1287_v20 = vpop.permute.xlu0 %1286 }
 0x193   : > { %1324 = vst.msk [vmem:[#allocation2 + $0x58] sm:$0xff] %vm1312_vm9, %v1287_v20  ;;  %v386_v21 = vpop.permute.xlu1 %385 }
 0x194   : > { %421 = vst.msk [vmem:[#allocation2 + $0x68] sm:$0xff] %vm407_vm2, %v386_v21 }
 0x196   : > { %v513_v23 = vpop.permute.xlu0 %512  ;;  %v1339_v24 = vld [vmem:[#allocation2 + $0x50] sm:$0xff] }
 0x197   : > { %549 = vst.msk [vmem:[#allocation2 + $0x60] sm:$0xff] %vm536_vm3, %v513_v23  ;;  %v515_v25 = vpop.permute.xlu1 %514  ;;  %2175 = vmatprep.mubr.msk.bf16.mxu1 %vm1365_vm10, %v1339_v24 }
 0x198   : > { %550 = vst.msk [vmem:[#allocation2 + $0x68] sm:$0xff] %vm536_vm3, %v515_v25 }
 0x19a   : > { %v643_v26 = vpop.permute.xlu0 %642  ;;  %v1340_v27 = vld [vmem:[#allocation2 + $0x58] sm:$0xff] }
 0x19b   : > { %679 = vst.msk [vmem:[#allocation2 + $0x60] sm:$0xff] %vm666_vm4, %v643_v26  ;;  %v645_v28 = vpop.permute.xlu1 %644  ;;  %2176 = vmatmul.mubr.msk.bf16.gmra.mrb[4].mxu1 %vm1365_vm10, %v1340_v27 }
 0x19c   : > { %680 = vst.msk [vmem:[#allocation2 + $0x68] sm:$0xff] %vm666_vm4, %v645_v28 }
 0x19e   : > { %v772_v29 = vpop.permute.xlu0 %771 }
 0x19f   : > { %808 = vst.msk [vmem:[#allocation2 + $0x60] sm:$0xff] %vm795_vm5, %v772_v29  ;;  %v774_v30 = vpop.permute.xlu1 %773 }
 0x1a0   : > { %809 = vst.msk [vmem:[#allocation2 + $0x68] sm:$0xff] %vm795_vm5, %v774_v30 }
 0x1a2   : > { %v901_v32 = vpop.permute.xlu0 %900 }
 0x1a3   : > { %937 = vst.msk [vmem:[#allocation2 + $0x60] sm:$0xff] %vm924_vm6, %v901_v32  ;;  %v903_v34 = vpop.permute.xlu1 %902 }
 0x1a4   : > { %938 = vst.msk [vmem:[#allocation2 + $0x68] sm:$0xff] %vm924_vm6, %v903_v34 }
 0x1a6   : > { %v1031_v35 = vpop.permute.xlu0 %1030 }
 0x1a7   : > { %1067 = vst.msk [vmem:[#allocation2 + $0x60] sm:$0xff] %vm1054_vm7, %v1031_v35  ;;  %v1033_v36 = vpop.permute.xlu1 %1032 }
 0x1a8   : > { %1068 = vst.msk [vmem:[#allocation2 + $0x68] sm:$0xff] %vm1054_vm7, %v1033_v36 }
 0x1aa   : > { %v1160_v33 = vpop.permute.xlu0 %1159 }
 0x1ab   : > { %1196 = vst.msk [vmem:[#allocation2 + $0x60] sm:$0xff] %vm1183_vm8, %v1160_v33  ;;  %v1162_v38 = vpop.permute.xlu1 %1161 }
 0x1ac   : > { %1197 = vst.msk [vmem:[#allocation2 + $0x68] sm:$0xff] %vm1183_vm8, %v1162_v38 }
 0x1ae   : > { %v1289_v39 = vpop.permute.xlu0 %1288 }
 0x1af   : > { %1325 = vst.msk [vmem:[#allocation2 + $0x60] sm:$0xff] %vm1312_vm9, %v1289_v39  ;;  %v388_v58 = vpop.permute.xlu1 %387 }
 0x1b0   : > { %422 = vst.msk [vmem:[#allocation2 + $0x70] sm:$0xff] %vm407_vm2, %v388_v58 }
 0x1b2   : > { %v1291_v31 = vpop.permute.xlu0 %1290 }
 0x1b3   : > { %1326 = vst.msk [vmem:[#allocation2 + $0x68] sm:$0xff] %vm1312_vm9, %v1291_v31  ;;  %v390_v40 = vpop.permute.xlu1 %389 }
 0x1b4   : > { %423 = vst.msk [vmem:[#allocation2 + $0x78] sm:$0xff] %vm407_vm2, %v390_v40 }
 0x1b6   : > { %v517_v42 = vpop.permute.xlu0 %516  ;;  %v1341_v43 = vld [vmem:[#allocation2 + $0x60] sm:$0xff] }
 0x1b7   : > { %551 = vst.msk [vmem:[#allocation2 + $0x70] sm:$0xff] %vm536_vm3, %v517_v42  ;;  %v519_v44 = vpop.permute.xlu1 %518  ;;  %2179 = vmatprep.mubr.msk.bf16.mxu1 %vm1365_vm10, %v1341_v43 }
 0x1b8   : > { %552 = vst.msk [vmem:[#allocation2 + $0x78] sm:$0xff] %vm536_vm3, %v519_v44 }
 0x1ba   : > { %v647_v37 = vpop.permute.xlu0 %646  ;;  %v1342_v45 = vld [vmem:[#allocation2 + $0x68] sm:$0xff] }
 0x1bb   : > { %681 = vst.msk [vmem:[#allocation2 + $0x70] sm:$0xff] %vm666_vm4, %v647_v37  ;;  %v649_v46 = vpop.permute.xlu1 %648  ;;  %2180 = vmatmul.mubr.msk.bf16.gmra.mrb[8].mxu1 %vm1365_vm10, %v1342_v45 }
 0x1bc   : > { %682 = vst.msk [vmem:[#allocation2 + $0x78] sm:$0xff] %vm666_vm4, %v649_v46 }
 0x1be   : > { %v776_v48 = vpop.permute.xlu0 %775 }
 0x1bf   : > { %810 = vst.msk [vmem:[#allocation2 + $0x70] sm:$0xff] %vm795_vm5, %v776_v48  ;;  %v778_v49 = vpop.permute.xlu1 %777 }
 0x1c0   : > { %811 = vst.msk [vmem:[#allocation2 + $0x78] sm:$0xff] %vm795_vm5, %v778_v49 }
 0x1c2   : > { %v905_v50 = vpop.permute.xlu0 %904 }
 0x1c3   : > { %939 = vst.msk [vmem:[#allocation2 + $0x70] sm:$0xff] %vm924_vm6, %v905_v50  ;;  %v907_v51 = vpop.permute.xlu1 %906 }
 0x1c4   : > { %940 = vst.msk [vmem:[#allocation2 + $0x78] sm:$0xff] %vm924_vm6, %v907_v51 }
 0x1c6   : > { %v1035_v4 = vpop.permute.xlu0 %1034 }
 0x1c7   : > { %1069 = vst.msk [vmem:[#allocation2 + $0x70] sm:$0xff] %vm1054_vm7, %v1035_v4  ;;  %v1037_v53 = vpop.permute.xlu1 %1036 }
 0x1c8   : > { %1070 = vst.msk [vmem:[#allocation2 + $0x78] sm:$0xff] %vm1054_vm7, %v1037_v53 }
 0x1ca   : > { %v1164_v54 = vpop.permute.xlu0 %1163 }
 0x1cb   : > { %1198 = vst.msk [vmem:[#allocation2 + $0x70] sm:$0xff] %vm1183_vm8, %v1164_v54  ;;  %v1166_v41 = vpop.permute.xlu1 %1165 }
 0x1cc   : > { %1199 = vst.msk [vmem:[#allocation2 + $0x78] sm:$0xff] %vm1183_vm8, %v1166_v41 }
 0x1ce   : > { %v1293_v55 = vpop.permute.xlu0 %1292  ;;  %v2157_v56 = vpop.f32.mrb[0].mxu0 }
 0x1cf   : > { %1327 = vst.msk [vmem:[#allocation2 + $0x70] sm:$0xff] %vm1312_vm9, %v1293_v55  ;;  %v1295_v57 = vpop.permute.xlu1 %1294  ;;  %v1452_v59 = vpop.f32.mrb[1].mxu0  ;;  %v1663_v63 = vmul.f32 %v2157_v56, %v2157_v56  ;;  %v1591_v5 = vsel %vm1587_vm11, %v2157_v56, 0.0 }
 0x1d0   : > { %1328 = vst.msk [vmem:[#allocation2 + $0x78] sm:$0xff] %vm1312_vm9, %v1295_v57  ;;  %v1661_v60 = vmul.f32 %v1452_v59, %v1452_v59  ;;  %v2158_v61 = vpop.f32.mrb[2].mxu0  ;;  %v1588_v0 = vsel %vm1587_vm11, %v1452_v59, 0.0 }
 0x1d1   : > { %v1455_v62 = vpop.f32.mrb[3].mxu0  ;;  %v1664_v13 = vmul.f32 %v2158_v61, %v2158_v61  ;;  %v1696_v9 = vsel %vm1587_vm11, %v1663_v63, 0.0  ;;  %v1593_v10 = vsel %vm1587_vm11, %v2158_v61, 0.0 }
 0x1d2   : > { %v1589_v1 = vsel %vm1587_vm11, %v1455_v62, 0.0  ;;  %v1662_v2 = vmul.f32 %v1455_v62, %v1455_v62  ;;  %v1693_v6 = vsel %vm1587_vm11, %v1661_v60, 0.0 }
 0x1d3   : > { %v1590_v3 = vadd.f32 %v1589_v1, %v1588_v0  ;;  %v1698_v16 = vsel %vm1587_vm11, %v1664_v13, 0.0 }
 0x1d4   : > { %v1694_v47 = vsel %vm1587_vm11, %v1662_v2, 0.0 }
 0x1d5   : > { %v1592_v7 = vadd.f32 %v1591_v5, %v1590_v3  ;;  %v1695_v8 = vadd.f32 %v1694_v47, %v1693_v6 }
 0x1d6   : > { %v1343_v11 = vld [vmem:[#allocation2 + $0x70] sm:$0xff] }
 0x1d7   : > { %v1697_v12 = vadd.f32 %v1696_v9, %v1695_v8  ;;  %2183 = vmatprep.mubr.msk.bf16.mxu1 %vm1365_vm10, %v1343_v11  ;;  %v1344_v14 = vld [vmem:[#allocation2 + $0x78] sm:$0xff]  ;;  %v1594_v15 = vadd.f32 %v1593_v10, %v1592_v7 }
 0x1d8   : > { %2184 = vmatmul.mubr.msk.bf16.gmra.mrb[12].mxu1 %vm1365_vm10, %v1344_v14 }
 0x1d9   : > { %v1699_v17 = vadd.f32 %v1698_v16, %v1697_v12 }
 0x1ee   : > { %v2161_v22 = vpop.f32.mrb[4].mxu0 }
 0x1ef   : > { %v1468_v18 = vpop.f32.mrb[5].mxu0  ;;  %v1667_v24 = vmul.f32 %v2161_v22, %v2161_v22  ;;  %v1599_v30 = vsel %vm1587_vm11, %v2161_v22, 0.0 }
 0x1f0   : > { %v1595_v52 = vsel %vm1587_vm11, %v1468_v18, 0.0  ;;  %v1665_v19 = vmul.f32 %v1468_v18, %v1468_v18  ;;  %v2162_v20 = vpop.f32.mrb[6].mxu0 }
 0x1f1   : > { %v1596_v21 = vadd.f32 %v1595_v52, %v1594_v15  ;;  %v1471_v23 = vpop.f32.mrb[7].mxu0  ;;  %v1668_v32 = vmul.f32 %v2162_v20, %v2162_v20  ;;  %v1704_v33 = vsel %vm1587_vm11, %v1667_v24, 0.0  ;;  %v1601_v38 = vsel %vm1587_vm11, %v2162_v20, 0.0 }
 0x1f2   : > { %v1700_v25 = vsel %vm1587_vm11, %v1665_v19, 0.0  ;;  %v1597_v26 = vsel %vm1587_vm11, %v1471_v23, 0.0  ;;  %v1666_v27 = vmul.f32 %v1471_v23, %v1471_v23 }
 0x1f3   : > { %v1701_v28 = vadd.f32 %v1700_v25, %v1699_v17  ;;  %v1598_v29 = vadd.f32 %v1597_v26, %v1596_v21  ;;  %v1706_v31 = vsel %vm1587_vm11, %v1668_v32, 0.0  ;;  %v2484_v25 = vmov 0.0  }
 0x1f4   : > { %v1702_v34 = vsel %vm1587_vm11, %v1666_v27, 0.0  ;;  %1584 = vst.msk [vmem:[%s3166_s6] sm:$0x1] %vm1583_vm12, %v2484_v25  ;;  %1585 = vst.msk [vmem:[%s3171_s9] sm:$0x1] %vm1583_vm12, %v2484_v25 }
 0x1f5   : > { %v1600_v35 = vadd.f32 %v1599_v30, %v1598_v29  ;;  %v1703_v36 = vadd.f32 %v1702_v34, %v1701_v28 }
 0x1f7   : > { %v1705_v39 = vadd.f32 %v1704_v33, %v1703_v36  ;;  %v1602_v58 = vadd.f32 %v1601_v38, %v1600_v35 }
 0x1f9   : > { %v1707_v40 = vadd.f32 %v1706_v31, %v1705_v39 }
 0x20e   : > { %v2165_v42 = vpop.f32.mrb[8].mxu0 }
 0x20f   : > { %v1484_v43 = vpop.f32.mrb[9].mxu0  ;;  %v1671_v49 = vmul.f32 %v2165_v42, %v2165_v42  ;;  %v1607_v41 = vsel %vm1587_vm11, %v2165_v42, 0.0 }
 0x210   : > { %v1603_v44 = vsel %vm1587_vm11, %v1484_v43, 0.0  ;;  %v1669_v37 = vmul.f32 %v1484_v43, %v1484_v43  ;;  %v2166_v45 = vpop.f32.mrb[10].mxu0 }
 0x211   : > { %v1604_v46 = vadd.f32 %v1603_v44, %v1602_v58  ;;  %v1487_v48 = vpop.f32.mrb[11].mxu0  ;;  %v1672_v55 = vmul.f32 %v2166_v45, %v2166_v45  ;;  %v1712_v60 = vsel %vm1587_vm11, %v1671_v49, 0.0  ;;  %v1609_v61 = vsel %vm1587_vm11, %v2166_v45, 0.0 }
 0x212   : > { %v1708_v50 = vsel %vm1587_vm11, %v1669_v37, 0.0  ;;  %v1605_v51 = vsel %vm1587_vm11, %v1487_v48, 0.0  ;;  %v1670_v4 = vmul.f32 %v1487_v48, %v1487_v48 }
 0x213   : > { %v1709_v53 = vadd.f32 %v1708_v50, %v1707_v40  ;;  %v1606_v54 = vadd.f32 %v1605_v51, %v1604_v46  ;;  %v1714_v0 = vsel %vm1587_vm11, %v1672_v55, 0.0 }
 0x214   : > { %v1710_v56 = vsel %vm1587_vm11, %v1670_v4, 0.0 }
 0x215   : > { %v1608_v57 = vadd.f32 %v1607_v41, %v1606_v54  ;;  %v1711_v59 = vadd.f32 %v1710_v56, %v1709_v53 }
 0x217   : > { %v1713_v62 = vadd.f32 %v1712_v60, %v1711_v59  ;;  %v1610_v63 = vadd.f32 %v1609_v61, %v1608_v57 }
 0x219   : > { %v1715_v1 = vadd.f32 %v1714_v0, %v1713_v62 }
 0x22e   : > { %v2169_v2 = vpop.f32.mrb[12].mxu0 }
 0x22f   : > { %v1500_v3 = vpop.f32.mrb[13].mxu0  ;;  %v1675_v8 = vmul.f32 %v2169_v2, %v2169_v2  ;;  %v1615_v15 = vsel %vm1587_vm11, %v2169_v2, 0.0 }
 0x230   : > { %v1611_v5 = vsel %vm1587_vm11, %v1500_v3, 0.0  ;;  %v1673_v6 = vmul.f32 %v1500_v3, %v1500_v3  ;;  %v2170_v13 = vpop.f32.mrb[14].mxu0 }
 0x231   : > { %v1612_v47 = vadd.f32 %v1611_v5, %v1610_v63  ;;  %v1503_v7 = vpop.f32.mrb[15].mxu0  ;;  %v1676_v16 = vmul.f32 %v2170_v13, %v2170_v13  ;;  %v1720_v52 = vsel %vm1587_vm11, %v1675_v8, 0.0  ;;  %v1617_v19 = vsel %vm1587_vm11, %v2170_v13, 0.0 }
 0x232   : > { %v1716_v9 = vsel %vm1587_vm11, %v1673_v6, 0.0  ;;  %v1613_v10 = vsel %vm1587_vm11, %v1503_v7, 0.0  ;;  %v1674_v11 = vmul.f32 %v1503_v7, %v1503_v7 }
 0x233   : > { %v1717_v12 = vadd.f32 %v1716_v9, %v1715_v1  ;;  %v1614_v14 = vadd.f32 %v1613_v10, %v1612_v47  ;;  %v1722_v23 = vsel %vm1587_vm11, %v1676_v16, 0.0 }
 0x234   : > { %v1718_v17 = vsel %vm1587_vm11, %v1674_v11, 0.0 }
 0x235   : > { %v1616_v22 = vadd.f32 %v1615_v15, %v1614_v14  ;;  %v1719_v18 = vadd.f32 %v1718_v17, %v1717_v12 }
 0x237   : > { %v1721_v20 = vadd.f32 %v1720_v52, %v1719_v18  ;;  %v1618_v21 = vadd.f32 %v1617_v19, %v1616_v22 }
 0x239   : > { %v1723_v24 = vadd.f32 %v1722_v23, %v1721_v20 }
 0x24e   : > { %v2173_v26 = vpop.f32.mrb[0].mxu1 }
 0x24f   : > { %v1516_v27 = vpop.f32.mrb[1].mxu1  ;;  %v1679_v35 = vmul.f32 %v2173_v26, %v2173_v26  ;;  %v1623_v31 = vsel %vm1587_vm11, %v2173_v26, 0.0 }
 0x250   : > { %v1619_v28 = vsel %vm1587_vm11, %v1516_v27, 0.0  ;;  %v1677_v29 = vmul.f32 %v1516_v27, %v1516_v27  ;;  %v2174_v30 = vpop.f32.mrb[2].mxu1 }
 0x251   : > { %v1620_v32 = vadd.f32 %v1619_v28, %v1618_v21  ;;  %v1519_v34 = vpop.f32.mrb[3].mxu1  ;;  %v1680_v40 = vmul.f32 %v2174_v30, %v2174_v30  ;;  %v1728_v37 = vsel %vm1587_vm11, %v1679_v35, 0.0  ;;  %v1625_v45 = vsel %vm1587_vm11, %v2174_v30, 0.0 }
 0x252   : > { %v1724_v36 = vsel %vm1587_vm11, %v1677_v29, 0.0  ;;  %v1621_v33 = vsel %vm1587_vm11, %v1519_v34, 0.0  ;;  %v1678_v38 = vmul.f32 %v1519_v34, %v1519_v34 }
 0x253   : > { %v1725_v39 = vadd.f32 %v1724_v36, %v1723_v24  ;;  %v1622_v58 = vadd.f32 %v1621_v33, %v1620_v32  ;;  %v1730_v49 = vsel %vm1587_vm11, %v1680_v40, 0.0 }
 0x254   : > { %v1726_v42 = vsel %vm1587_vm11, %v1678_v38, 0.0 }
 0x255   : > { %v1624_v43 = vadd.f32 %v1623_v31, %v1622_v58  ;;  %v1727_v44 = vadd.f32 %v1726_v42, %v1725_v39 }
 0x257   : > { %v1729_v46 = vadd.f32 %v1728_v37, %v1727_v44  ;;  %v1626_v48 = vadd.f32 %v1625_v45, %v1624_v43 }
 0x259   : > { %v1731_v50 = vadd.f32 %v1730_v49, %v1729_v46 }
 0x26e   : > { %v2177_v51 = vpop.f32.mrb[4].mxu1 }
 0x26f   : > { %v1532_v4 = vpop.f32.mrb[5].mxu1  ;;  %v1683_v57 = vmul.f32 %v2177_v51, %v2177_v51  ;;  %v1631_v0 = vsel %vm1587_vm11, %v2177_v51, 0.0 }
 0x270   : > { %v1627_v53 = vsel %vm1587_vm11, %v1532_v4, 0.0  ;;  %v1681_v54 = vmul.f32 %v1532_v4, %v1532_v4  ;;  %v2178_v41 = vpop.f32.mrb[6].mxu1 }
 0x271   : > { %v1628_v55 = vadd.f32 %v1627_v53, %v1626_v48  ;;  %v1535_v56 = vpop.f32.mrb[7].mxu1  ;;  %v1684_v1 = vmul.f32 %v2178_v41, %v2178_v41  ;;  %v1736_v6 = vsel %vm1587_vm11, %v1683_v57, 0.0  ;;  %v1633_v13 = vsel %vm1587_vm11, %v2178_v41, 0.0 }
 0x272   : > { %v1732_v59 = vsel %vm1587_vm11, %v1681_v54, 0.0  ;;  %v1629_v60 = vsel %vm1587_vm11, %v1535_v56, 0.0  ;;  %v1682_v61 = vmul.f32 %v1535_v56, %v1535_v56 }
 0x273   : > { %v1733_v62 = vadd.f32 %v1732_v59, %v1731_v50  ;;  %v1630_v63 = vadd.f32 %v1629_v60, %v1628_v55  ;;  %v1738_v8 = vsel %vm1587_vm11, %v1684_v1, 0.0 }
 0x274   : > { %v1734_v2 = vsel %vm1587_vm11, %v1682_v61, 0.0 }
 0x275   : > { %v1632_v3 = vadd.f32 %v1631_v0, %v1630_v63  ;;  %v1735_v5 = vadd.f32 %v1734_v2, %v1733_v62 }
 0x277   : > { %v1737_v47 = vadd.f32 %v1736_v6, %v1735_v5  ;;  %v1634_v7 = vadd.f32 %v1633_v13, %v1632_v3  ;;  %v1586_v5 = vld [vmem:[%s3166_s6] sm:$0x1] }
 0x279   : > { %v1739_v9 = vadd.f32 %v1738_v8, %v1737_v47  ;;  %v1660_v47 = vld [vmem:[%s3171_s9] sm:$0x1] }
 0x28e   : > { %v2181_v10 = vpop.f32.mrb[8].mxu1 }
 0x28f   : > { %v1548_v11 = vpop.f32.mrb[9].mxu1  ;;  %v1687_v22 = vmul.f32 %v2181_v10, %v2181_v10  ;;  %v1639_v23 = vsel %vm1587_vm11, %v2181_v10, 0.0 }
 0x290   : > { %v1635_v12 = vsel %vm1587_vm11, %v1548_v11, 0.0  ;;  %v1685_v14 = vmul.f32 %v1548_v11, %v1548_v11  ;;  %v2182_v15 = vpop.f32.mrb[10].mxu1 }
 0x291   : > { %v1636_v16 = vadd.f32 %v1635_v12, %v1634_v7  ;;  %v1551_v17 = vpop.f32.mrb[11].mxu1  ;;  %v1688_v24 = vmul.f32 %v2182_v15, %v2182_v15  ;;  %v1744_v28 = vsel %vm1587_vm11, %v1687_v22, 0.0  ;;  %v1641_v29 = vsel %vm1587_vm11, %v2182_v15, 0.0 }
 0x292   : > { %v1740_v18 = vsel %vm1587_vm11, %v1685_v14, 0.0  ;;  %v1637_v52 = vsel %vm1587_vm11, %v1551_v17, 0.0  ;;  %v1686_v19 = vmul.f32 %v1551_v17, %v1551_v17 }
 0x293   : > { %v1741_v20 = vadd.f32 %v1740_v18, %v1739_v9  ;;  %v1638_v21 = vadd.f32 %v1637_v52, %v1636_v16  ;;  %v1746_v34 = vsel %vm1587_vm11, %v1688_v24, 0.0 }
 0x294   : > { %v1742_v25 = vsel %vm1587_vm11, %v1686_v19, 0.0 }
 0x295   : > { %v1640_v26 = vadd.f32 %v1639_v23, %v1638_v21  ;;  %v1743_v27 = vadd.f32 %v1742_v25, %v1741_v20 }
 0x297   : > { %v1745_v30 = vadd.f32 %v1744_v28, %v1743_v27  ;;  %v1642_v32 = vadd.f32 %v1641_v29, %v1640_v26 }
 0x299   : > { %v1747_v35 = vadd.f32 %v1746_v34, %v1745_v30 }
 0x2ab   : > { %v2185_v36 = vpop.f32.mrb[12].mxu1 }
 0x2ac   : > { %v1564_v33 = vpop.f32.mrb[13].mxu1  ;;  %v1691_v42 = vmul.f32 %v2185_v36, %v2185_v36  ;;  %v1647_v48 = vsel %vm1587_vm11, %v2185_v36, 0.0 }
 0x2ad   : > { %v1643_v38 = vsel %vm1587_vm11, %v1564_v33, 0.0  ;;  %v1689_v39 = vmul.f32 %v1564_v33, %v1564_v33  ;;  %v2186_v58 = vpop.f32.mrb[14].mxu1 }
 0x2ae   : > { %v1644_v31 = vadd.f32 %v1643_v38, %v1642_v32  ;;  %v1567_v40 = vpop.f32.mrb[15].mxu1  ;;  %v1692_v49 = vmul.f32 %v2186_v58, %v2186_v58  ;;  %v1752_v53 = vsel %vm1587_vm11, %v1691_v42, 0.0  ;;  %v1649_v54 = vsel %vm1587_vm11, %v2186_v58, 0.0 }
 0x2af   : > { %v1748_v43 = vsel %vm1587_vm11, %v1689_v39, 0.0  ;;  %v1645_v44 = vsel %vm1587_vm11, %v1567_v40, 0.0  ;;  %v1690_v37 = vmul.f32 %v1567_v40, %v1567_v40 }
 0x2b0   : > { %v1749_v45 = vadd.f32 %v1748_v43, %v1747_v35  ;;  %v1646_v46 = vadd.f32 %v1645_v44, %v1644_v31  ;;  %v1754_v56 = vsel %vm1587_vm11, %v1692_v49, 0.0 }
 0x2b1   : > { %v1750_v50 = vsel %vm1587_vm11, %v1690_v37, 0.0 }
 0x2b2   : > { %v1648_v51 = vadd.f32 %v1647_v48, %v1646_v46  ;;  %v1751_v4 = vadd.f32 %v1750_v50, %v1749_v45 }
 0x2b4   : > { %v1650_v41 = vadd.f32 %v1649_v54, %v1648_v51  ;;  %v1753_v55 = vadd.f32 %v1752_v53, %v1751_v4 }
 0x2b6   : > { %v1651_v57 = vrot.slane %v1650_v41, 4  ;;  %v1755_v59 = vadd.f32 %v1754_v56, %v1753_v55 }
 0x2b8   : > { %v1652_v60 = vadd.f32 %v1651_v57, %v1650_v41  ;;  %v1756_v61 = vrot.slane %v1755_v59, 4 }
 0x2ba   : > { %v1653_v62 = vrot.slane %v1652_v60, 2  ;;  %v1757_v63 = vadd.f32 %v1756_v61, %v1755_v59 }
 0x2bc   : > { %v1654_v0 = vadd.f32 %v1653_v62, %v1652_v60  ;;  %v1758_v1 = vrot.slane %v1757_v63, 2 }
 0x2be   : > { %v1655_v2 = vrot.slane %v1654_v0, 1  ;;  %v1759_v3 = vadd.f32 %v1758_v1, %v1757_v63 }
 0x2c0   : > { %v1656_v6 = vadd.f32 %v1655_v2, %v1654_v0  ;;  %v1760_v13 = vrot.slane %v1759_v3, 1 }
 0x2c2   : > { %v1761_v7 = vadd.f32 %v1760_v13, %v1759_v3  ;;  %v1657_v8 = vadd.f32 %v1656_v6, %v1586_v5 }
 0x2c4   : > { %1659 = vst.msk [vmem:[%s3166_s6] sm:$0x1] %vm1583_vm12, %v1657_v8  ;;  %v1762_v9 = vadd.f32 %v1761_v7, %v1660_v47 }
 0x2c5   : > { %2363 = shalt.err (!%p2360_p5)
}
 0x2c6   : > { %s2364_s27 = scalar_lea.hbm %s3215_s26, 16  ;;  %s2368_s30 = scalar_lea.hbm %s3299_s2, 32 }
 0x2c7   : > { %p2365_p9 = scmp.ne.s32.totalorder %s3215_s26, %s2364_s27  ;;  %p2369_p3 = scmp.lt.u32.totalorder %s3215_s26, %s3299_s2 }
 0x2c8   : > { %p2370_p7 = scmp.lt.u32.totalorder %s2368_s30, %s2364_s27  ;;  %p2372_p4 = scmp.lt.u32.totalorder %s2364_s27, %s3215_s26 }
 0x2c9   : > { %p2366_p1 = pnand %p2365_p9, %p2599_p10 }
 0x2ca   : > { %p2371_p11 = por %p2370_p7, %p2369_p3 }
 0x2cb   : > { %p2367_p2 = pneg %p2366_p1 }
 0x2cc   : > { %p2373_p6 = por %p2372_p4, %p2371_p11 }
 0x2ce   : > { %p2374_p8 = pnand %p2373_p6, %p2367_p2 }
 0x2d0   : > { %2377 = shalt.err (!%p2374_p8)
}
 0x2d1   : > { %2204 = dma.vmem_to_hbm [thread:$0]  (%p2599_p10), %s3217_s18, 16, %s3215_s26, %s1765_s24   ;;  %1763 = vst.msk [vmem:[%s3171_s9] sm:$0x1] %vm1583_vm12, %v1762_v9 }
 0x2d2   : > { %s1769_s20 = scalar_lea.sflag [#allocation10], %s2653_s25  ;;  %s2378_s7 = scalar_lea.vmem %s3226_s19, 16 }
 0x2d3   : > { %p2379_p12 = scmp.ne.s32.totalorder %s3226_s19, %s2378_s7  ;;  %s2486_s8 = smov [#allocation9]  }
 0x2d4   : > { %s2382_s10 = sshll.u32 %s2486_s8, 4  ;;  %s2383_s10 = int_to_ptr.vmem [resolvable:$false] %s2382_s10 }
 0x2d5   : > { %p2380_p13 = pnand %p2379_p12, %p2599_p10  ;;  %s2384_s11 = scalar_lea.vmem %s2383_s10, 32 }
 0x2d6   : > { %p2385_p5 = scmp.lt.s32.totalorder %s3226_s19, %s2383_s10  ;;  %p2386_p9 = scmp.lt.s32.totalorder %s2384_s11, %s2378_s7 }
 0x2d7   : > { %p2381_p0 = pneg %p2380_p13 }
 0x2d8   : > { %p2387_p1 = por %p2386_p9, %p2385_p5 }
 0x2da   : > { %p2388_p2 = pnand %p2387_p1, %p2381_p0 }
 0x2dc   : > { %2391 = shalt.err (!%p2388_p2)
}
 0x2dd   : > { %s2392_s25 = scalar_lea.hbm %s3224_s22, 16  ;;  %s2396_s26 = scalar_lea.hbm %s3300_s3, 32 }
 0x2de   : > { %p2393_p3 = scmp.ne.s32.totalorder %s3224_s22, %s2392_s25  ;;  %p2397_p4 = scmp.lt.u32.totalorder %s3224_s22, %s3300_s3 }
 0x2df   : > { %p2398_p6 = scmp.lt.u32.totalorder %s2396_s26, %s2392_s25  ;;  %p2400_p12 = scmp.lt.u32.totalorder %s2392_s25, %s3224_s22 }
 0x2e0   : > { %p2394_p7 = pnand %p2393_p3, %p2599_p10 }
 0x2e1   : > { %p2399_p8 = por %p2398_p6, %p2397_p4 }
 0x2e2   : > { %p2395_p11 = pneg %p2394_p7 }
 0x2e3   : > { %p2401_p13 = por %p2400_p12, %p2399_p8 }
 0x2e5   : > { %p2402_p0 = pnand %p2401_p13, %p2395_p11 }
 0x2e7   : > { %2405 = shalt.err (!%p2402_p0)
}
 0x2e8   : > { %2205 = dma.vmem_to_hbm [thread:$0]  (%p2599_p10), %s3226_s19, 16, %s3224_s22, %s1769_s20  }
 0x2e9 PF: > { %s1806_s6 = sand.u32 1, %s2448_s12   ;;  %p3317_p5 = scmp.ne.s32.totalorder %s3308_s23, 0 }
 0x2ea   : > { %p3318_p9 = scmp.ge.s32.totalorder %s2468_s17, 2  ;;  %s1807_s21 = scalar_lea.sflag [#allocation5], %s1806_s6 }
 0x2ec   : > { %p2217_p1 = pnand %p3318_p9, %p3317_p5 }
 0x2ee   : > { %2439 = dma.done.wait (!%p2217_p1), %s1807_s21, 16  }
 0x2ef   : > { %2441 = vsyncadd (!%p2217_p1), %s1807_s21, 4294967280  ;;  %s1815_s30 = scalar_lea.sflag [#allocation10], %s1806_s6 }
 0x2f0   : > { %2443 = dma.done.wait (!%p2217_p1), %s1815_s30, 16  }
 0x2f1   : > { %2445 = vsyncadd (!%p2217_p1), %s1815_s30, 4294967280  ;;  %s24_s17 = sadd.s32 1, %s2468_s17   ;;  %s3319_s12 = smov %s2452_s13 }
 0x2f2   : > { %p21_p2 = scmp.ge.s32.totalorder %s24_s17, 4   ;;  %s3320_s13 = smov %s2456_s14 }
 0x2f3   : > { %s3321_s14 = smov %s2608_s5  ;;  %s3322_s15 = smov %s2464_s16 }
 0x2f4   : > { %s3323_s16 = smov %s3325_s28  ;;  %23 = sbr.rel (!%p21_p2) target bundleno = 9 (0x9), region = 100 }
 0x2fb   :  { %1819 = vsyncpa [#allocation4], 1 }
 0x2fc   :  { %1821 = vsyncpa [#allocation4 + $0x1], 1 }
 0x2fd   :  { %1822 = vsyncpa [#allocation7], 1 }
 0x2fe   :  { %1823 = vsyncpa [#allocation5], 1 }
 0x2ff   :  { %1825 = vsyncpa [#allocation5 + $0x1], 1 }
 0x300   :  { %1826 = vsyncpa [#allocation10], 1 }
 0x301   :  { %1828 = vsyncpa [#allocation10 + $0x1], 1 }

// kernel: cnn_backbone.9
= control target key start
LH: loop header
LB: loop body
LE: loop exit
PB: predicated region body
PF: predicated region fallthrough
CT: control target
= control target key end

     0   :  { %9 = vsyncpa [#allocation4], 0  ;;  %s1867_s0 = inlined_call_operand.hbm [shape: f32[2,10,10,8], index: 0, kind: input, shape index: {}]   ;;  %s1868_s1 = inlined_call_operand.hbm [shape: bf16[72,16], index: 1, kind: input, shape index: {}]   ;;  %s1869_s2 = inlined_call_operand.hbm [shape: f32[2,1,16], index: 2, kind: output, shape index: {0}]   ;;  %s1870_s3 = inlined_call_operand.hbm [shape: f32[2,1,16], index: 3, kind: output, shape index: {1}]  }
   0x1   :  { %11 = vsyncpa [#allocation4 + $0x1], 0 }
   0x2   :  { %12 = vsyncpa [#allocation7], 0 }
   0x3   :  { %13 = vsyncpa [#allocation5], 0 }
   0x4   :  { %15 = vsyncpa [#allocation5 + $0x1], 0 }
   0x5   :  { %16 = vsyncpa [#allocation10], 0 }
   0x6   :  { %18 = vsyncpa [#allocation10 + $0x1], 0  ;;  %s1401_s12 = smov 0   ;;  %s1403_s13 = smov 0  }
   0x7   :  { %s1405_s14 = smov 0   ;;  %s1407_s15 = smov 0  }
   0x8   :  { %s1409_s16 = smov 0   ;;  %s1411_s17 = smov 0  }
   0x9 LB: > { %s979_s18 = sadd.s32 4294967295, %s1362_s17   ;;  %s980_s19 = sadd.s32 4294967294, %s1362_s17   ;;  %s1362_s17 = sphi %s1411_s17, %s24_s17   ;;  %s1358_s16 = sphi %s1409_s16, %s1893_s16   ;;  %s1354_s15 = sphi %s1407_s15, %s1892_s15   ;;  %s1350_s14 = sphi %s1405_s14, %s1891_s14   ;;  %s1346_s13 = sphi %s1403_s13, %s1890_s13   ;;  %s1342_s12 = sphi %s1401_s12, %s1889_s12  }
   0xa   : > { %p58_p0 = scmp.ne.s32.totalorder %s1346_s13, %s1342_s12  ;;  %p1435_p1 = scmp.eq.s32.totalorder %s979_s18, 0 }
   0xb   : > { %p1439_p2 = scmp.eq.s32.totalorder %s979_s18, 1  ;;  %p109_p3 = scmp.eq.s32.totalorder %s980_s19, 1 }
   0xc   : > { %s1875_s20 = scalar_select %p1435_p1, 1, 0 }
   0xd   : > { %s1876_s21 = scalar_select %p1439_p2, 1, 0 }
   0xe   : > { %p1445_p4 = por %p1435_p1, %p58_p0  ;;  %p981_p5 = scmp.ge.s32.totalorder %s1362_s17, 1 }
   0xf   : > { %p1450_p6 = por %p109_p3, %p58_p0  ;;  %p142_p7 = scmp.lt.s32.totalorder %s1362_s17, 3 }
  0x10   : > { %s1877_s22 = scalar_select %p1445_p4, 1, 0 }
  0x11   : > { %s1878_s23 = scalar_select %p1450_p6, 1, 0 }
  0x12   : > { %p1455_p8 = pnand %p981_p5, %p142_p7  ;;  %s1364_s25 = smov [#allocation6]  }
  0x13   : > { %s154_s26 = sshll.u32 %s1364_s25, 4  ;;  %s36_s28 = sadd.s32 1, %s1358_s16  ;;  %s155_s26 = int_to_ptr.vmem [resolvable:$true] %s154_s26 }
  0x14   : > { %s1879_s24 = scalar_select %p1455_p8, 1, 0 }
  0x15   : > { %p1100_p9 = pneg %p1455_p8  ;;  %s1186_s4 = scalar_lea.hbm %s1868_s1, 576 }
  0x16   : > { %p1187_p12 = scmp.ne.s32.totalorder %s1868_s1, %s1186_s4  ;;  %p1193_p5 = scmp.lt.u32.totalorder %s1186_s4, %s1868_s1 }
  0x17   : > { %p1464_p11 = pnand %p1100_p9, %p1435_p1 }
  0x19   : > { %p1188_p13 = pneg %p1464_p11 }
  0x1b   : > { %p1189_p0 = pnand %p1188_p13, %p1187_p12 }
  0x1d   : > { %p1190_p3 = pneg %p1189_p0 }
  0x1f   : > { %p1195_p7 = pnand %p1193_p5, %p1190_p3 }
  0x21   : > { %1198 = shalt.err (!%p1195_p7)
}
  0x22   : > { %s1199_s9 = scalar_lea.vmem %s155_s26, 576  ;;  %p1207_p1 = scmp.lt.s32.totalorder %s155_s26, %s155_s26 }
  0x23   : > { %p1200_p9 = scmp.ne.s32.totalorder %s155_s26, %s1199_s9  ;;  %p1208_p4 = scmp.lt.s32.totalorder %s1199_s9, %s1199_s9 }
  0x25   : > { %p1202_p10 = pnand %p1200_p9, %p1188_p13  ;;  %p1209_p8 = por %p1208_p4, %p1207_p1 }
  0x27   : > { %p1203_p6 = pneg %p1202_p10 }
  0x29   : > { %p1210_p2 = pnand %p1209_p8, %p1203_p6 }
  0x2b   : > { %1213 = shalt.err (!%p1210_p2)
}
  0x2c   : > { %s1365_s10 = smov 64   ;;  %s1366_s11 = smov 4  }
  0x2d   : > { %1103 = dma.hbm_to_vmem [thread:$0]  (!%p1464_p11), %s1868_s1, 576, %s155_s26, [#allocation7], %s1365_s10, %s1365_s10, %s1366_s11  }
  0x2e   : > { %p38_p1 = scmp.ge.s32.totalorder %s36_s28, 2  ;;  %s45_s25 = sadd.s32 1, %s1350_s14 }
  0x2f   : > { %p52_p2 = scmp.ne.s32.totalorder %s1350_s14, %s1346_s13  ;;  %p53_p4 = scmp.eq.s32.totalorder %s1362_s17, 0 }
  0x30   : > { %s1895_s28 = smov (%p38_p1, %s36_s28), 0  ;;  %p1881_p8 = scmp.ne.s32.totalorder %s1876_s21, 0 }
  0x31   : > { %p54_p6 = por %p53_p4, %p52_p2  ;;  %s42_s30 = ssub.s32 %s1358_s16, %s1895_s28 }
  0x32   : > { %p1493_p10 = por %p1881_p8, %p52_p2  ;;  %p1116_p12 = scmp.lt.s32.totalorder %s1362_s17, 2 }
  0x33   : > { %p43_p13 = scmp.eq.s32.totalorder %s42_s30, 0  ;;  %s168_s27 = sand.u32 1, %s1350_s14  }
  0x34   : > { %s1087_s4 = smul.u32 160, %s168_s27  ;;  %p1505_p11 = pnand %p1116_p12, %p54_p6 }
  0x35   : > { %s1502_s5 = scalar_select %p43_p13, %s1350_s14, %s45_s25  }
  0x36   : > { %s1088_s26 = smul.u32 2560, %s1358_s16  ;;  %s172_s6 = scalar_lea.vmem [#allocation3], %s1087_s4 }
  0x37   : > { %s180_s7 = sshll.u32 %s172_s6, 4  ;;  %s1516_s11 = scalar_lea.sflag [#allocation4], %s168_s27  ;;  %s1514_s7 = int_to_ptr.vmem [resolvable:$true] %s180_s7 }
  0x38   : > { %s1512_s10 = scalar_lea.hbm %s1867_s0, %s1088_s26  ;;  %p1216_p3 = pneg %p1505_p11 }
  0x39   : > { %s1214_s18 = scalar_lea.hbm %s1512_s10, 2560  ;;  %s1219_s30 = scalar_lea.hbm %s1867_s0, 5120 }
  0x3a   : > { %p1215_p0 = scmp.ne.s32.totalorder %s1512_s10, %s1214_s18  ;;  %p1220_p9 = scmp.lt.u32.totalorder %s1512_s10, %s1867_s0 }
  0x3b   : > { %p1221_p1 = scmp.lt.u32.totalorder %s1219_s30, %s1214_s18  ;;  %p1223_p4 = scmp.lt.u32.totalorder %s1214_s18, %s1512_s10 }
  0x3c   : > { %p1217_p5 = pnand %p1216_p3, %p1215_p0 }
  0x3d   : > { %p1222_p2 = por %p1221_p1, %p1220_p9 }
  0x3e   : > { %p1218_p7 = pneg %p1217_p5 }
  0x3f   : > { %p1224_p6 = por %p1223_p4, %p1222_p2 }
  0x41   : > { %p1225_p8 = pnand %p1224_p6, %p1218_p7 }
  0x43   : > { %1228 = shalt.err (!%p1225_p8)
}
  0x44   : > { %s1229_s27 = scalar_lea.vmem %s1514_s7, 2560  ;;  %s1367_s6 = smov [#allocation3]  }
  0x45   : > { %p1230_p12 = scmp.ne.s32.totalorder %s1514_s7, %s1229_s27  ;;  %s1234_s9 = sshll.u32 %s1367_s6, 4  ;;  %s1235_s9 = int_to_ptr.vmem [resolvable:$false] %s1234_s9 }
  0x46   : > { %s1236_s21 = scalar_lea.vmem %s1235_s9, 5120  ;;  %p1237_p5 = scmp.lt.s32.totalorder %s1514_s7, %s1235_s9 }
  0x47   : > { %p1232_p13 = pnand %p1230_p12, %p1216_p3  ;;  %p1238_p9 = scmp.lt.s32.totalorder %s1236_s21, %s1229_s27 }
  0x49   : > { %p1233_p0 = pneg %p1232_p13  ;;  %p1239_p1 = por %p1238_p9, %p1237_p5 }
  0x4b   : > { %p1240_p2 = pnand %p1239_p1, %p1233_p0 }
  0x4d   : > { %1243 = shalt.err (!%p1240_p2)
}
  0x4e   : > { %s1368_s18 = smov 128   ;;  %s1369_s19 = smov 8  }
  0x4f   : > { %1107 = dma.hbm_to_vmem [thread:$0]  (!%p1505_p11), %s1512_s10, 2560, %s1514_s7, %s1516_s11, %s1368_s18, %s1368_s18, %s1369_s19  }
  0x50   : > { %p1884_p3 = scmp.ne.s32.totalorder %s1879_s24, 0 }
  0x51   : > { %s1547_s25 = sand.u32 (!%p1884_p3), 1, %s1346_s13   ;;  %p1885_p7 = scmp.ne.s32.totalorder (!%p1884_p3), %s1877_s22, 0 }
  0x52   : > { %192 = sbr.rel (%p1884_p3) target bundleno = 617 (0x269), region = 28  ;;  %s195_s4 = scalar_lea.sflag (!%p1884_p3), [#allocation4], %s1547_s25 }
  0x53   : > { %s1089_s30 = smul.u32 (!%p1884_p3), 160, %s1547_s25 }
  0x55   : > { %s1551_s26 = scalar_lea.vmem (!%p1884_p3), [#allocation3], %s1089_s30 }
  0x59   : > { %1325 = dma.done.wait (%p1885_p7), %s195_s4, 2560  }
  0x5a   : > { %1327 = vsyncadd (%p1885_p7), %s195_s4, 4294964736  ;;  %p1886_p11 = scmp.ne.s32.totalorder %s1875_s20, 0 }
  0x5c   : > { %1329 = dma.done.wait (%p1886_p11), [#allocation7], 576  }
  0x5d   : > { %1331 = vsyncadd (%p1886_p11), [#allocation7], 4294966720  ;;  %v1562_v0 = vld [vmem:[%s1551_s26 + $0x21] sm:$0xff]  ;;  %s1370_s22 = smov 8   ;;  %vm238_vm0 = vcmask 64512   ;;  %v250_v2 = vld [vmem:[%s1551_s26 + $0x31] sm:$0xff] }
  0x5e   : > { %v247_v1 = vld [vmem:[%s1551_s26 + $0x1] sm:$0xff]  ;;  %267 = vrot.lane.b32.xlu1 %v1562_v0, %s1370_s22  ;;  %v248_v3 = vld [vmem:[%s1551_s26 + $0x11] sm:$0xff]  ;;  %s1371_s20 = smov 16   ;;  %s1372_s24 = smov 24   ;;  %v1185_v23 = vld [vmem:[#allocation6 + $0x20] ss:$0 sps:$4 sm:$0xff]  }
  0x5f   : > { %263 = vrot.lane.b32.xlu0 %v247_v1, %s1370_s22  ;;  %v988_v4 = vld [vmem:[%s1551_s26 + $0x20] sm:$0xff]  ;;  %v987_v5 = vld [vmem:[%s1551_s26 + $0x10] sm:$0xff]  ;;  %s1373_s7 = smov 32   ;;  %s1374_s8 = smov 40   ;;  %v1182_v19 = vld [vmem:[#allocation6 + $0x8] sm:$0xff]   ;;  %vm702_vm1 = vcmask 1043456  }
  0x60   : > { %v990_v6 = vld [vmem:[%s1551_s26 + $0x40] sm:$0xff]  ;;  %v989_v7 = vld [vmem:[%s1551_s26 + $0x30] sm:$0xff]  ;;  %241 = vst.msk [vmem:[#allocation2 + $0x10] sm:$0xff] %vm238_vm0, %v988_v4  ;;  %240 = vst.msk [vmem:[#allocation2 + $0x8] sm:$0xff] %vm238_vm0, %v987_v5  ;;  %s1375_s10 = smov 48   ;;  %s1376_s11 = smov 56  }
  0x61   : > { %243 = vst.msk [vmem:[#allocation2 + $0x20] sm:$0xff] %vm238_vm0, %v990_v6  ;;  %v1580_v8 = vld [vmem:[%s1551_s26 + $0x50] sm:$0xff]  ;;  %242 = vst.msk [vmem:[#allocation2 + $0x18] sm:$0xff] %vm238_vm0, %v989_v7  ;;  %v296_v10 = vld [vmem:[%s1551_s26 + $0x2] sm:$0xff]  ;;  %s1377_s27 = smov 64   ;;  %v704_v24 = vsel %vm702_vm1, %v1185_v23, 0 }
  0x62   : > { %269 = vrot.lane.b32.xlu1 %v250_v2, %s1370_s22  ;;  %v297_v9 = vld [vmem:[%s1551_s26 + $0x12] sm:$0xff]  ;;  %244 = vst.msk [vmem:[#allocation2 + $0x28] sm:$0xff] %vm238_vm0, %v1580_v8  ;;  %v1588_v11 = vld [vmem:[%s1551_s26 + $0x60] sm:$0xff]  ;;  %vm287_vm2 = vcmask 130112   ;;  %vm336_vm3 = vcmask 195712   ;;  %vm386_vm4 = vcmask 261312  }
  0x63   : > { %265 = vrot.lane.b32.xlu0 %v248_v3, %s1370_s22  ;;  %v1591_v12 = vld [vmem:[%s1551_s26 + $0x70] sm:$0xff]  ;;  %245 = vst.msk [vmem:[#allocation2 + $0x30] sm:$0xff] %vm238_vm0, %v1588_v11  ;;  %v298_v14 = vld [vmem:[%s1551_s26 + $0x22] sm:$0xff]  ;;  %v1184_v22 = vld [vmem:[#allocation6 + $0x18] sm:$0xff]   ;;  %vm435_vm5 = vcmask 326912   ;;  %vm484_vm6 = vcmask 392512  }
  0x64   : > { %246 = vst.msk [vmem:[#allocation2 + $0x38] sm:$0xff] %vm238_vm0, %v1591_v12  ;;  %v299_v13 = vld [vmem:[%s1551_s26 + $0x32] sm:$0xff]  ;;  %v230_v15 = vld [vmem:[%s1551_s26] sm:$0xff]  ;;  %vm534_vm7 = vcmask 458112   ;;  %vm583_vm8 = vcmask 523712   ;;  %vm632_vm9 = vcmask 589312  }
  0x65   : > { %239 = vst.msk [vmem:[#allocation2] sm:$0xff] %vm238_vm0, %v230_v15  ;;  %v998_v16 = vld [vmem:[%s1551_s26 + $0x41] sm:$0xff]  ;;  %v1183_v20 = vld [vmem:[#allocation6 + $0x10] sm:$0xff]   ;;  %vm689_vm10 = vcmask 588800   ;;  %vm775_vm11 = vcmask 122880   ;;  %s1752_s6 = scalar_lea.vmem [#allocation8], %s1547_s25 }
  0x66   : > { %314 = vrot.lane.b32.xlu1 %v297_v9, %s1371_s20  ;;  %v1006_v17 = vld [vmem:[%s1551_s26 + $0x42] sm:$0xff]  ;;  %v1022_v21 = vld [vmem:[%s1551_s26 + $0x51] sm:$0xff]  ;;  %s1757_s9 = scalar_lea.vmem [#allocation9], %s1547_s25  ;;  %vm779_vm12 = vcmask 130048   ;;  %s1044_s21 = sshll.u32 %s1354_s15, 4 }
  0x67   : > { %312 = vrot.lane.b32.xlu0 %v296_v10, %s1371_s20  ;;  %v1181_v18 = vld [vmem:[#allocation6] sm:$0xff]   ;;  %v1030_v25 = vld [vmem:[%s1551_s26 + $0x52] sm:$0xff]  ;;  %s853_s18 = sshll.u32 %s1752_s6, 4  ;;  %s866_s19 = sshll.u32 %s1757_s9, 4  ;;  %s1787_s18 = int_to_ptr.vmem [resolvable:$true] %s853_s18  ;;  %s1796_s19 = int_to_ptr.vmem [resolvable:$true] %s866_s19 }
  0x68   : > { %1057 = vmatprep.subr.bf16.mxu0 %v1181_v18  ;;  %1075 = vmatprep.subr.bf16.mxu1 %v1181_v18  ;;  %v254_v26 = vld [vmem:[%s1551_s26 + $0x71] sm:$0xff]  ;;  %v253_v27 = vld [vmem:[%s1551_s26 + $0x61] sm:$0xff] }
  0x69   : > { %1058 = vmatpush3.bf16.msra.mxu0 %v1181_v18  ;;  %1080 = vmatpush3.bf16.msra.mxu1 %v1181_v18  ;;  %v303_v28 = vld [vmem:[%s1551_s26 + $0x72] sm:$0xff]  ;;  %v302_v29 = vld [vmem:[%s1551_s26 + $0x62] sm:$0xff] }
  0x6a   : > { %318 = vrot.lane.b32.xlu1 %v299_v13, %s1371_s20  ;;  %1059 = vmatprep.subr.bf16.mxu0 %v1182_v19  ;;  %v994_v30 = vld [vmem:[%s1551_s26 + $0x80] sm:$0xff]  ;;  %v1018_v33 = vld [vmem:[%s1551_s26 + $0x90] sm:$0xff] }
  0x6b   : > { %316 = vrot.lane.b32.xlu0 %v298_v14, %s1371_s20  ;;  %1076 = vmatprep.subr.bf16.mxu1 %v1182_v19  ;;  %v1002_v31 = vld [vmem:[%s1551_s26 + $0x81] sm:$0xff]  ;;  %v1026_v34 = vld [vmem:[%s1551_s26 + $0x91] sm:$0xff] }
  0x6c   : > { %v1010_v32 = vld [vmem:[%s1551_s26 + $0x82] sm:$0xff]  ;;  %v1034_v39 = vld [vmem:[%s1551_s26 + $0x92] sm:$0xff]  ;;  %s1785_s26 = scalar_lea.hbm %s1869_s2, %s1044_s21 }
  0x6d   : > { %1060 = vmatpush3.bf16.msra.mxu0 %v1182_v19  ;;  %1081 = vmatpush3.bf16.msra.mxu1 %v1182_v19 }
  0x6e   : > { %364 = vrot.lane.b32.xlu1 %v988_v4, %s1372_s24  ;;  %1061 = vmatprep.subr.bf16.mxu0 %v1183_v20 }
  0x6f   : > { %362 = vrot.lane.b32.xlu0 %v987_v5, %s1372_s24  ;;  %1077 = vmatprep.subr.bf16.mxu1 %v1183_v20 }
  0x71   : > { %1062 = vmatpush3.bf16.msra.mxu0 %v1183_v20  ;;  %1082 = vmatpush3.bf16.msra.mxu1 %v1183_v20 }
  0x72   : > { %368 = vrot.lane.b32.xlu1 %v990_v6, %s1372_s24  ;;  %1063 = vmatprep.subr.bf16.mxu0 %v1184_v22 }
  0x73   : > { %366 = vrot.lane.b32.xlu0 %v989_v7, %s1372_s24  ;;  %1078 = vmatprep.subr.bf16.mxu1 %v1184_v22 }
  0x75   : > { %1064 = vmatpush3.bf16.msra.mxu0 %v1184_v22  ;;  %1083 = vmatpush3.bf16.msra.mxu1 %v1184_v22 }
  0x76   : > { %413 = vrot.lane.b32.xlu1 %v1562_v0, %s1373_s7  ;;  %1085 = vmatprep.subr.msk.bf16.mxu0 %vm702_vm1, %v1185_v23 }
  0x77   : > { %411 = vrot.lane.b32.xlu0 %v248_v3, %s1373_s7  ;;  %1086 = vmatprep.subr.msk.bf16.mxu1 %vm702_vm1, %v1185_v23 }
  0x79   : > { %1066 = vmatpush3.bf16.msra.mxu0 %v704_v24  ;;  %1084 = vmatpush3.bf16.msra.mxu1 %v704_v24 }
  0x7a   : > { %417 = vrot.lane.b32.xlu1 %v998_v16, %s1373_s7 }
  0x7b   : > { %415 = vrot.lane.b32.xlu0 %v250_v2, %s1373_s7 }
  0x7e   : > { %462 = vrot.lane.b32.xlu1 %v298_v14, %s1374_s8 }
  0x7f   : > { %460 = vrot.lane.b32.xlu0 %v297_v9, %s1374_s8 }
  0x82   : > { %466 = vrot.lane.b32.xlu1 %v1006_v17, %s1374_s8 }
  0x83   : > { %464 = vrot.lane.b32.xlu0 %v299_v13, %s1374_s8 }
  0x86   : > { %512 = vrot.lane.b32.xlu1 %v989_v7, %s1375_s10 }
  0x87   : > { %510 = vrot.lane.b32.xlu0 %v988_v4, %s1375_s10 }
  0x8a   : > { %516 = vrot.lane.b32.xlu1 %v1580_v8, %s1375_s10 }
  0x8b   : > { %514 = vrot.lane.b32.xlu0 %v990_v6, %s1375_s10 }
  0x8e   : > { %561 = vrot.lane.b32.xlu1 %v250_v2, %s1376_s11 }
  0x8f   : > { %559 = vrot.lane.b32.xlu0 %v1562_v0, %s1376_s11 }
  0x92   : > { %565 = vrot.lane.b32.xlu1 %v1022_v21, %s1376_s11 }
  0x93   : > { %563 = vrot.lane.b32.xlu0 %v998_v16, %s1376_s11 }
  0x96   : > { %610 = vrot.lane.b32.xlu1 %v299_v13, %s1377_s27 }
  0x97   : > { %608 = vrot.lane.b32.xlu0 %v298_v14, %s1377_s27 }
  0x9a   : > { %273 = vrot.lane.b32.xlu1 %v1022_v21, %s1370_s22 }
  0x9b   : > { %271 = vrot.lane.b32.xlu0 %v998_v16, %s1370_s22 }
  0x9e   : > { %614 = vrot.lane.b32.xlu1 %v1030_v25, %s1377_s27 }
  0x9f   : > { %612 = vrot.lane.b32.xlu0 %v1006_v17, %s1377_s27 }
  0xa2   : > { %277 = vrot.lane.b32.xlu1 %v254_v26, %s1370_s22 }
  0xa3   : > { %275 = vrot.lane.b32.xlu0 %v253_v27, %s1370_s22 }
  0xa6   : > { %322 = vrot.lane.b32.xlu1 %v1030_v25, %s1371_s20 }
  0xa7   : > { %320 = vrot.lane.b32.xlu0 %v1006_v17, %s1371_s20 }
  0xaa   : > { %326 = vrot.lane.b32.xlu1 %v303_v28, %s1371_s20 }
  0xab   : > { %324 = vrot.lane.b32.xlu0 %v302_v29, %s1371_s20  ;;  %s1794_s20 = scalar_lea.hbm %s1870_s3, %s1044_s21 }
  0xae   : > { %372 = vrot.lane.b32.xlu1 %v1588_v11, %s1372_s24 }
  0xaf   : > { %370 = vrot.lane.b32.xlu0 %v1580_v8, %s1372_s24 }
  0xb2   : > { %376 = vrot.lane.b32.xlu1 %v994_v30, %s1372_s24 }
  0xb3   : > { %374 = vrot.lane.b32.xlu0 %v1591_v12, %s1372_s24  ;;  %s837_s24 = scalar_lea.sflag [#allocation5], %s1547_s25 }
  0xb6   : > { %421 = vrot.lane.b32.xlu1 %v253_v27, %s1373_s7 }
  0xb7   : > { %419 = vrot.lane.b32.xlu0 %v1022_v21, %s1373_s7 }
  0xba   : > { %425 = vrot.lane.b32.xlu1 %v1002_v31, %s1373_s7 }
  0xbb   : > { %423 = vrot.lane.b32.xlu0 %v254_v26, %s1373_s7  ;;  %s1244_s7 = scalar_lea.vmem %s1787_s18, 16 }
  0xbc   : > { %p1245_p4 = scmp.ne.s32.totalorder %s1787_s18, %s1244_s7 }
  0xbe   : > { %470 = vrot.lane.b32.xlu1 %v302_v29, %s1374_s8  ;;  %p1246_p6 = pnand %p1245_p4, %p1493_p10 }
  0xbf   : > { %468 = vrot.lane.b32.xlu0 %v1030_v25, %s1374_s8 }
  0xc0   : > { %p1247_p8 = pneg %p1246_p6 }
  0xc2   : > { %474 = vrot.lane.b32.xlu1 %v1010_v32, %s1374_s8 }
  0xc3   : > { %472 = vrot.lane.b32.xlu0 %v303_v28, %s1374_s8  ;;  %s1379_s8 = smov [#allocation8]  }
  0xc6   : > { %520 = vrot.lane.b32.xlu1 %v1591_v12, %s1375_s10 }
  0xc7   : > { %518 = vrot.lane.b32.xlu0 %v1588_v11, %s1375_s10 }
  0xca   : > { %524 = vrot.lane.b32.xlu1 %v1018_v33, %s1375_s10 }
  0xcb   : > { %522 = vrot.lane.b32.xlu0 %v994_v30, %s1375_s10  ;;  %s1248_s10 = sshll.u32 %s1379_s8, 4  ;;  %s1249_s10 = int_to_ptr.vmem [resolvable:$false] %s1248_s10 }
  0xcc   : > { %p1251_p12 = scmp.lt.s32.totalorder %s1787_s18, %s1249_s10 }
  0xce   : > { %569 = vrot.lane.b32.xlu1 %v254_v26, %s1376_s11 }
  0xcf   : > { %567 = vrot.lane.b32.xlu0 %v253_v27, %s1376_s11 }
  0xd0   : > { %v268_v35 = vpop.permute.xlu1 %267 }
  0xd1   : > { %v264_v36 = vpop.permute.xlu0 %263  ;;  %290 = vst.msk [vmem:[#allocation2 + $0x10] sm:$0xff] %vm287_vm2, %v268_v35 }
  0xd2   : > { %288 = vst.msk [vmem:[#allocation2] sm:$0xff] %vm287_vm2, %v264_v36  ;;  %573 = vrot.lane.b32.xlu1 %v1026_v34, %s1376_s11 }
  0xd3   : > { %571 = vrot.lane.b32.xlu0 %v1002_v31, %s1376_s11  ;;  %s1250_s11 = scalar_lea.vmem %s1249_s10, 32 }
  0xd4   : > { %v270_v37 = vpop.permute.xlu1 %269  ;;  %p1252_p13 = scmp.lt.s32.totalorder %s1250_s11, %s1244_s7 }
  0xd5   : > { %v266_v38 = vpop.permute.xlu0 %265  ;;  %291 = vst.msk [vmem:[#allocation2 + $0x18] sm:$0xff] %vm287_vm2, %v270_v37 }
  0xd6   : > { %289 = vst.msk [vmem:[#allocation2 + $0x8] sm:$0xff] %vm287_vm2, %v266_v38  ;;  %618 = vrot.lane.b32.xlu1 %v303_v28, %s1377_s27  ;;  %p1253_p0 = por %p1252_p13, %p1251_p12 }
  0xd7   : > { %616 = vrot.lane.b32.xlu0 %v302_v29, %s1377_s27 }
  0xd8   : > { %v315_v40 = vpop.permute.xlu1 %314  ;;  %p1254_p5 = pnand %p1253_p0, %p1247_p8 }
  0xd9   : > { %v313_v41 = vpop.permute.xlu0 %312  ;;  %338 = vst.msk [vmem:[#allocation2 + $0x8] sm:$0xff] %vm336_vm3, %v315_v40 }
  0xda   : > { %337 = vst.msk [vmem:[#allocation2] sm:$0xff] %vm336_vm3, %v313_v41  ;;  %622 = vrot.lane.b32.xlu1 %v1034_v39, %s1377_s27 }
  0xdb   : > { %620 = vrot.lane.b32.xlu0 %v1010_v32, %s1377_s27 }
  0xdc   : > { %v319_v42 = vpop.permute.xlu1 %318 }
  0xdd   : > { %v317_v43 = vpop.permute.xlu0 %316  ;;  %340 = vst.msk [vmem:[#allocation2 + $0x18] sm:$0xff] %vm336_vm3, %v319_v42 }
  0xde   : > { %339 = vst.msk [vmem:[#allocation2 + $0x10] sm:$0xff] %vm336_vm3, %v317_v43 }
  0xe0   : > { %v365_v44 = vpop.permute.xlu1 %364 }
  0xe1   : > { %v363_v45 = vpop.permute.xlu0 %362  ;;  %388 = vst.msk [vmem:[#allocation2 + $0x8] sm:$0xff] %vm386_vm4, %v365_v44 }
  0xe2   : > { %387 = vst.msk [vmem:[#allocation2] sm:$0xff] %vm386_vm4, %v363_v45 }
  0xe4   : > { %v369_v46 = vpop.permute.xlu1 %368 }
  0xe5   : > { %v367_v47 = vpop.permute.xlu0 %366  ;;  %390 = vst.msk [vmem:[#allocation2 + $0x18] sm:$0xff] %vm386_vm4, %v369_v46 }
  0xe6   : > { %389 = vst.msk [vmem:[#allocation2 + $0x10] sm:$0xff] %vm386_vm4, %v367_v47 }
  0xe8   : > { %v414_v48 = vpop.permute.xlu1 %413 }
  0xe9   : > { %v412_v49 = vpop.permute.xlu0 %411  ;;  %437 = vst.msk [vmem:[#allocation2 + $0x8] sm:$0xff] %vm435_vm5, %v414_v48  ;;  %v1378_v48 = vmov 0.0  }
  0xea   : > { %436 = vst.msk [vmem:[#allocation2] sm:$0xff] %vm435_vm5, %v412_v49 }
  0xeb   : > { %776 = vst.msk [vmem:[%s1752_s6] sm:$0x1] %vm775_vm11, %v1378_v48  ;;  %777 = vst.msk [vmem:[%s1757_s9] sm:$0x1] %vm775_vm11, %v1378_v48 }
  0xec   : > { %v418_v50 = vpop.permute.xlu1 %417 }
  0xed   : > { %v416_v51 = vpop.permute.xlu0 %415  ;;  %439 = vst.msk [vmem:[#allocation2 + $0x18] sm:$0xff] %vm435_vm5, %v418_v50 }
  0xee   : > { %438 = vst.msk [vmem:[#allocation2 + $0x10] sm:$0xff] %vm435_vm5, %v416_v51 }
  0xf0   : > { %v463_v52 = vpop.permute.xlu1 %462 }
  0xf1   : > { %v461_v53 = vpop.permute.xlu0 %460  ;;  %486 = vst.msk [vmem:[#allocation2 + $0x8] sm:$0xff] %vm484_vm6, %v463_v52 }
  0xf2   : > { %485 = vst.msk [vmem:[#allocation2] sm:$0xff] %vm484_vm6, %v461_v53 }
  0xf4   : > { %v467_v54 = vpop.permute.xlu1 %466 }
  0xf5   : > { %v465_v55 = vpop.permute.xlu0 %464  ;;  %488 = vst.msk [vmem:[#allocation2 + $0x18] sm:$0xff] %vm484_vm6, %v467_v54 }
  0xf6   : > { %487 = vst.msk [vmem:[#allocation2 + $0x10] sm:$0xff] %vm484_vm6, %v465_v55 }
  0xf8   : > { %v513_v56 = vpop.permute.xlu1 %512 }
  0xf9   : > { %v511_v57 = vpop.permute.xlu0 %510  ;;  %536 = vst.msk [vmem:[#allocation2 + $0x8] sm:$0xff] %vm534_vm7, %v513_v56 }
  0xfa   : > { %535 = vst.msk [vmem:[#allocation2] sm:$0xff] %vm534_vm7, %v511_v57 }
  0xfc   : > { %v517_v58 = vpop.permute.xlu1 %516 }
  0xfd   : > { %v515_v59 = vpop.permute.xlu0 %514  ;;  %538 = vst.msk [vmem:[#allocation2 + $0x18] sm:$0xff] %vm534_vm7, %v517_v58 }
  0xfe   : > { %537 = vst.msk [vmem:[#allocation2 + $0x10] sm:$0xff] %vm534_vm7, %v515_v59 }
 0x100   : > { %v562_v60 = vpop.permute.xlu1 %561 }
 0x101   : > { %v560_v61 = vpop.permute.xlu0 %559  ;;  %585 = vst.msk [vmem:[#allocation2 + $0x8] sm:$0xff] %vm583_vm8, %v562_v60 }
 0x102   : > { %584 = vst.msk [vmem:[#allocation2] sm:$0xff] %vm583_vm8, %v560_v61 }
 0x104   : > { %v566_v62 = vpop.permute.xlu1 %565 }
 0x105   : > { %v564_v63 = vpop.permute.xlu0 %563  ;;  %587 = vst.msk [vmem:[#allocation2 + $0x18] sm:$0xff] %vm583_vm8, %v566_v62 }
 0x106   : > { %586 = vst.msk [vmem:[#allocation2 + $0x10] sm:$0xff] %vm583_vm8, %v564_v63 }
 0x108   : > { %v611_v0 = vpop.permute.xlu1 %610 }
 0x109   : > { %v609_v1 = vpop.permute.xlu0 %608  ;;  %634 = vst.msk [vmem:[#allocation2 + $0x8] sm:$0xff] %vm632_vm9, %v611_v0 }
 0x10a   : > { %633 = vst.msk [vmem:[#allocation2] sm:$0xff] %vm632_vm9, %v609_v1 }
 0x10c   : > { %v274_v2 = vpop.permute.xlu1 %273 }
 0x10d   : > { %v272_v3 = vpop.permute.xlu0 %271  ;;  %293 = vst.msk [vmem:[#allocation2 + $0x28] sm:$0xff] %vm287_vm2, %v274_v2 }
 0x10e   : > { %292 = vst.msk [vmem:[#allocation2 + $0x20] sm:$0xff] %vm287_vm2, %v272_v3 }
 0x110   : > { %v615_v4 = vpop.permute.xlu1 %614  ;;  %v642_v7 = vld [vmem:[#allocation2 + $0x8] sm:$0xff] }
 0x111   : > { %v613_v5 = vpop.permute.xlu0 %612  ;;  %v641_v6 = vld [vmem:[#allocation2] sm:$0xff]  ;;  %636 = vst.msk [vmem:[#allocation2 + $0x18] sm:$0xff] %vm632_vm9, %v615_v4 }
 0x112   : > { %635 = vst.msk [vmem:[#allocation2 + $0x10] sm:$0xff] %vm632_vm9, %v613_v5  ;;  %v649_v8 = vpack.c.bf16 %v642_v7, %v641_v6 }
 0x114   : > { %1067 = vmatprep.mubr.msk.bf16.mxu0 %vm689_vm10, %v649_v8  ;;  %v278_v9 = vpop.permute.xlu1 %277 }
 0x115   : > { %v276_v10 = vpop.permute.xlu0 %275  ;;  %295 = vst.msk [vmem:[#allocation2 + $0x38] sm:$0xff] %vm287_vm2, %v278_v9 }
 0x116   : > { %294 = vst.msk [vmem:[#allocation2 + $0x30] sm:$0xff] %vm287_vm2, %v276_v10 }
 0x118   : > { %v323_v11 = vpop.permute.xlu1 %322  ;;  %v644_v14 = vld [vmem:[#allocation2 + $0x18] sm:$0xff] }
 0x119   : > { %v321_v12 = vpop.permute.xlu0 %320  ;;  %v643_v13 = vld [vmem:[#allocation2 + $0x10] sm:$0xff]  ;;  %342 = vst.msk [vmem:[#allocation2 + $0x28] sm:$0xff] %vm336_vm3, %v323_v11 }
 0x11a   : > { %341 = vst.msk [vmem:[#allocation2 + $0x20] sm:$0xff] %vm336_vm3, %v321_v12  ;;  %v650_v15 = vpack.c.bf16 %v644_v14, %v643_v13 }
 0x11c   : > { %1068 = vmatmul.mubr.msk.bf16.vlgmr.msra.gmra.mrb[0].mxu0 %vm689_vm10, %v650_v15  ;;  %v327_v16 = vpop.permute.xlu1 %326 }
 0x11d   : > { %v325_v17 = vpop.permute.xlu0 %324  ;;  %344 = vst.msk [vmem:[#allocation2 + $0x38] sm:$0xff] %vm336_vm3, %v327_v16 }
 0x11e   : > { %343 = vst.msk [vmem:[#allocation2 + $0x30] sm:$0xff] %vm336_vm3, %v325_v17 }
 0x120   : > { %v373_v18 = vpop.permute.xlu1 %372 }
 0x121   : > { %v371_v19 = vpop.permute.xlu0 %370  ;;  %392 = vst.msk [vmem:[#allocation2 + $0x28] sm:$0xff] %vm386_vm4, %v373_v18 }
 0x122   : > { %391 = vst.msk [vmem:[#allocation2 + $0x20] sm:$0xff] %vm386_vm4, %v371_v19 }
 0x124   : > { %v377_v20 = vpop.permute.xlu1 %376 }
 0x125   : > { %v375_v21 = vpop.permute.xlu0 %374  ;;  %394 = vst.msk [vmem:[#allocation2 + $0x38] sm:$0xff] %vm386_vm4, %v377_v20 }
 0x126   : > { %393 = vst.msk [vmem:[#allocation2 + $0x30] sm:$0xff] %vm386_vm4, %v375_v21 }
 0x128   : > { %v422_v22 = vpop.permute.xlu1 %421 }
 0x129   : > { %v420_v23 = vpop.permute.xlu0 %419  ;;  %441 = vst.msk [vmem:[#allocation2 + $0x28] sm:$0xff] %vm435_vm5, %v422_v22 }
 0x12a   : > { %440 = vst.msk [vmem:[#allocation2 + $0x20] sm:$0xff] %vm435_vm5, %v420_v23 }
 0x12c   : > { %v426_v24 = vpop.permute.xlu1 %425 }
 0x12d   : > { %v424_v25 = vpop.permute.xlu0 %423  ;;  %443 = vst.msk [vmem:[#allocation2 + $0x38] sm:$0xff] %vm435_vm5, %v426_v24 }
 0x12e   : > { %442 = vst.msk [vmem:[#allocation2 + $0x30] sm:$0xff] %vm435_vm5, %v424_v25 }
 0x130   : > { %v471_v26 = vpop.permute.xlu1 %470 }
 0x131   : > { %v469_v27 = vpop.permute.xlu0 %468  ;;  %490 = vst.msk [vmem:[#allocation2 + $0x28] sm:$0xff] %vm484_vm6, %v471_v26 }
 0x132   : > { %489 = vst.msk [vmem:[#allocation2 + $0x20] sm:$0xff] %vm484_vm6, %v469_v27 }
 0x134   : > { %v475_v28 = vpop.permute.xlu1 %474 }
 0x135   : > { %v473_v29 = vpop.permute.xlu0 %472  ;;  %492 = vst.msk [vmem:[#allocation2 + $0x38] sm:$0xff] %vm484_vm6, %v475_v28 }
 0x136   : > { %491 = vst.msk [vmem:[#allocation2 + $0x30] sm:$0xff] %vm484_vm6, %v473_v29 }
 0x138   : > { %v521_v30 = vpop.permute.xlu1 %520 }
 0x139   : > { %v519_v31 = vpop.permute.xlu0 %518  ;;  %540 = vst.msk [vmem:[#allocation2 + $0x28] sm:$0xff] %vm534_vm7, %v521_v30 }
 0x13a   : > { %539 = vst.msk [vmem:[#allocation2 + $0x20] sm:$0xff] %vm534_vm7, %v519_v31 }
 0x13c   : > { %v525_v32 = vpop.permute.xlu1 %524 }
 0x13d   : > { %v523_v33 = vpop.permute.xlu0 %522  ;;  %542 = vst.msk [vmem:[#allocation2 + $0x38] sm:$0xff] %vm534_vm7, %v525_v32 }
 0x13e   : > { %541 = vst.msk [vmem:[#allocation2 + $0x30] sm:$0xff] %vm534_vm7, %v523_v33 }
 0x140   : > { %v570_v34 = vpop.permute.xlu1 %569 }
 0x141   : > { %v568_v35 = vpop.permute.xlu0 %567  ;;  %589 = vst.msk [vmem:[#allocation2 + $0x28] sm:$0xff] %vm583_vm8, %v570_v34 }
 0x142   : > { %588 = vst.msk [vmem:[#allocation2 + $0x20] sm:$0xff] %vm583_vm8, %v568_v35 }
 0x144   : > { %v574_v36 = vpop.permute.xlu1 %573 }
 0x145   : > { %v572_v37 = vpop.permute.xlu0 %571  ;;  %591 = vst.msk [vmem:[#allocation2 + $0x38] sm:$0xff] %vm583_vm8, %v574_v36 }
 0x146   : > { %590 = vst.msk [vmem:[#allocation2 + $0x30] sm:$0xff] %vm583_vm8, %v572_v37 }
 0x148   : > { %v619_v38 = vpop.permute.xlu1 %618 }
 0x149   : > { %v617_v39 = vpop.permute.xlu0 %616  ;;  %638 = vst.msk [vmem:[#allocation2 + $0x28] sm:$0xff] %vm632_vm9, %v619_v38 }
 0x14a   : > { %637 = vst.msk [vmem:[#allocation2 + $0x20] sm:$0xff] %vm632_vm9, %v617_v39 }
 0x14c   : > { %v623_v40 = vpop.permute.xlu1 %622 }
 0x14d   : > { %v621_v41 = vpop.permute.xlu0 %620  ;;  %640 = vst.msk [vmem:[#allocation2 + $0x38] sm:$0xff] %vm632_vm9, %v623_v40  ;;  %v778_v40 = vld [vmem:[%s1752_s6] sm:$0x1] }
 0x14e   : > { %639 = vst.msk [vmem:[#allocation2 + $0x30] sm:$0xff] %vm632_vm9, %v621_v41 }
 0x150   : > { %v646_v43 = vld [vmem:[#allocation2 + $0x28] sm:$0xff] }
 0x151   : > { %v645_v42 = vld [vmem:[#allocation2 + $0x20] sm:$0xff] }
 0x152   : > { %v651_v44 = vpack.c.bf16 %v646_v43, %v645_v42  ;;  %v804_v43 = vld [vmem:[%s1757_s9] sm:$0x1] }
 0x154   : > { %1071 = vmatprep.mubr.msk.bf16.mxu1 %vm689_vm10, %v651_v44  ;;  %v648_v46 = vld [vmem:[#allocation2 + $0x38] sm:$0xff] }
 0x155   : > { %v647_v45 = vld [vmem:[#allocation2 + $0x30] sm:$0xff] }
 0x156   : > { %v652_v47 = vpack.c.bf16 %v648_v46, %v647_v45 }
 0x158   : > { %1072 = vmatmul.mubr.msk.bf16.vlgmr.msra.gmra.mrb[0].mxu1 %vm689_vm10, %v652_v47 }
 0x1ef   : > { %v1069_v49 = vpop.f32.mrb[0].mxu0 }
 0x1f0   : > { %v740_v50 = vpop.f32.mrb[1].mxu0  ;;  %v807_v54 = vmul.f32 %v1069_v49, %v1069_v49  ;;  %v783_v59 = vsel %vm779_vm12, %v1069_v49, 0.0 }
 0x1f1   : > { %v805_v51 = vmul.f32 %v740_v50, %v740_v50  ;;  %v1070_v52 = vpop.f32.mrb[2].mxu0  ;;  %v780_v55 = vsel %vm779_vm12, %v740_v50, 0.0 }
 0x1f2   : > { %v743_v53 = vpop.f32.mrb[3].mxu0  ;;  %v808_v61 = vmul.f32 %v1070_v52, %v1070_v52  ;;  %v816_v1 = vsel %vm779_vm12, %v807_v54, 0.0  ;;  %v785_v2 = vsel %vm779_vm12, %v1070_v52, 0.0 }
 0x1f3   : > { %v781_v56 = vsel %vm779_vm12, %v743_v53, 0.0  ;;  %v806_v57 = vmul.f32 %v743_v53, %v743_v53  ;;  %v813_v60 = vsel %vm779_vm12, %v805_v51, 0.0 }
 0x1f4   : > { %v782_v58 = vadd.f32 %v781_v56, %v780_v55  ;;  %v818_v5 = vsel %vm779_vm12, %v808_v61, 0.0 }
 0x1f5   : > { %v814_v62 = vsel %vm779_vm12, %v806_v57, 0.0 }
 0x1f6   : > { %v784_v63 = vadd.f32 %v783_v59, %v782_v58  ;;  %v815_v0 = vadd.f32 %v814_v62, %v813_v60 }
 0x1f8   : > { %v817_v3 = vadd.f32 %v816_v1, %v815_v0  ;;  %v786_v4 = vadd.f32 %v785_v2, %v784_v63 }
 0x1fa   : > { %v819_v6 = vadd.f32 %v818_v5, %v817_v3 }
 0x22b   : > { %v1073_v7 = vpop.f32.mrb[0].mxu1 }
 0x22c   : > { %v756_v8 = vpop.f32.mrb[1].mxu1  ;;  %v811_v14 = vmul.f32 %v1073_v7, %v1073_v7  ;;  %v791_v20 = vsel %vm779_vm12, %v1073_v7, 0.0 }
 0x22d   : > { %v787_v9 = vsel %vm779_vm12, %v756_v8, 0.0  ;;  %v809_v10 = vmul.f32 %v756_v8, %v756_v8  ;;  %v1074_v11 = vpop.f32.mrb[2].mxu1 }
 0x22e   : > { %v788_v12 = vadd.f32 %v787_v9, %v786_v4  ;;  %v759_v13 = vpop.f32.mrb[3].mxu1  ;;  %v812_v21 = vmul.f32 %v1074_v11, %v1074_v11  ;;  %v824_v25 = vsel %vm779_vm12, %v811_v14, 0.0  ;;  %v793_v26 = vsel %vm779_vm12, %v1074_v11, 0.0 }
 0x22f   : > { %v820_v15 = vsel %vm779_vm12, %v809_v10, 0.0  ;;  %v789_v16 = vsel %vm779_vm12, %v759_v13, 0.0  ;;  %v810_v17 = vmul.f32 %v759_v13, %v759_v13 }
 0x230   : > { %v821_v18 = vadd.f32 %v820_v15, %v819_v6  ;;  %v790_v19 = vadd.f32 %v789_v16, %v788_v12  ;;  %v826_v29 = vsel %vm779_vm12, %v812_v21, 0.0 }
 0x231   : > { %v822_v22 = vsel %vm779_vm12, %v810_v17, 0.0 }
 0x232   : > { %v792_v23 = vadd.f32 %v791_v20, %v790_v19  ;;  %v823_v24 = vadd.f32 %v822_v22, %v821_v18 }
 0x234   : > { %v794_v27 = vadd.f32 %v793_v26, %v792_v23  ;;  %v825_v28 = vadd.f32 %v824_v25, %v823_v24 }
 0x236   : > { %v795_v30 = vrot.slane %v794_v27, 4  ;;  %v827_v31 = vadd.f32 %v826_v29, %v825_v28 }
 0x238   : > { %v796_v32 = vadd.f32 %v795_v30, %v794_v27  ;;  %v828_v33 = vrot.slane %v827_v31, 4 }
 0x23a   : > { %v797_v34 = vrot.slane %v796_v32, 2  ;;  %v829_v35 = vadd.f32 %v828_v33, %v827_v31 }
 0x23c   : > { %v798_v36 = vadd.f32 %v797_v34, %v796_v32  ;;  %v830_v37 = vrot.slane %v829_v35, 2 }
 0x23e   : > { %v799_v38 = vrot.slane %v798_v36, 1  ;;  %v831_v39 = vadd.f32 %v830_v37, %v829_v35 }
 0x240   : > { %v800_v41 = vadd.f32 %v799_v38, %v798_v36  ;;  %v832_v42 = vrot.slane %v831_v39, 1 }
 0x242   : > { %v833_v44 = vadd.f32 %v832_v42, %v831_v39  ;;  %v801_v45 = vadd.f32 %v800_v41, %v778_v40 }
 0x244   : > { %803 = vst.msk [vmem:[%s1752_s6] sm:$0x1] %vm775_vm11, %v801_v45  ;;  %v834_v46 = vadd.f32 %v833_v44, %v804_v43 }
 0x245   : > { %1257 = shalt.err (!%p1254_p5)
}
 0x246   : > { %s1258_s27 = scalar_lea.hbm %s1785_s26, 16  ;;  %s1262_s30 = scalar_lea.hbm %s1869_s2, 32 }
 0x247   : > { %p1259_p9 = scmp.ne.s32.totalorder %s1785_s26, %s1258_s27  ;;  %p1263_p3 = scmp.lt.u32.totalorder %s1785_s26, %s1869_s2 }
 0x248   : > { %p1264_p7 = scmp.lt.u32.totalorder %s1262_s30, %s1258_s27  ;;  %p1266_p4 = scmp.lt.u32.totalorder %s1258_s27, %s1785_s26 }
 0x249   : > { %p1260_p1 = pnand %p1259_p9, %p1493_p10 }
 0x24a   : > { %p1265_p11 = por %p1264_p7, %p1263_p3 }
 0x24b   : > { %p1261_p2 = pneg %p1260_p1 }
 0x24c   : > { %p1267_p6 = por %p1266_p4, %p1265_p11 }
 0x24e   : > { %p1268_p8 = pnand %p1267_p6, %p1261_p2 }
 0x250   : > { %1271 = shalt.err (!%p1268_p8)
}
 0x251   : > { %1096 = dma.vmem_to_hbm [thread:$0]  (%p1493_p10), %s1787_s18, 16, %s1785_s26, %s837_s24   ;;  %835 = vst.msk [vmem:[%s1757_s9] sm:$0x1] %vm775_vm11, %v834_v46 }
 0x252   : > { %s841_s22 = scalar_lea.sflag [#allocation10], %s1547_s25  ;;  %s1272_s7 = scalar_lea.vmem %s1796_s19, 16 }
 0x253   : > { %p1273_p12 = scmp.ne.s32.totalorder %s1796_s19, %s1272_s7  ;;  %s1380_s8 = smov [#allocation9]  }
 0x254   : > { %s1276_s10 = sshll.u32 %s1380_s8, 4  ;;  %s1277_s10 = int_to_ptr.vmem [resolvable:$false] %s1276_s10 }
 0x255   : > { %p1274_p13 = pnand %p1273_p12, %p1493_p10  ;;  %s1278_s11 = scalar_lea.vmem %s1277_s10, 32 }
 0x256   : > { %p1279_p5 = scmp.lt.s32.totalorder %s1796_s19, %s1277_s10  ;;  %p1280_p9 = scmp.lt.s32.totalorder %s1278_s11, %s1272_s7 }
 0x257   : > { %p1275_p0 = pneg %p1274_p13 }
 0x258   : > { %p1281_p1 = por %p1280_p9, %p1279_p5 }
 0x25a   : > { %p1282_p2 = pnand %p1281_p1, %p1275_p0 }
 0x25c   : > { %1285 = shalt.err (!%p1282_p2)
}
 0x25d   : > { %s1286_s25 = scalar_lea.hbm %s1794_s20, 16  ;;  %s1290_s26 = scalar_lea.hbm %s1870_s3, 32 }
 0x25e   : > { %p1287_p3 = scmp.ne.s32.totalorder %s1794_s20, %s1286_s25  ;;  %p1291_p4 = scmp.lt.u32.totalorder %s1794_s20, %s1870_s3 }
 0x25f   : > { %p1292_p6 = scmp.lt.u32.totalorder %s1290_s26, %s1286_s25  ;;  %p1294_p12 = scmp.lt.u32.totalorder %s1286_s25, %s1794_s20 }
 0x260   : > { %p1288_p7 = pnand %p1287_p3, %p1493_p10 }
 0x261   : > { %p1293_p8 = por %p1292_p6, %p1291_p4 }
 0x262   : > { %p1289_p11 = pneg %p1288_p7 }
 0x263   : > { %p1295_p13 = por %p1294_p12, %p1293_p8 }
 0x265   : > { %p1296_p0 = pnand %p1295_p13, %p1289_p11 }
 0x267   : > { %1299 = shalt.err (!%p1296_p0)
}
 0x268   : > { %1097 = dma.vmem_to_hbm [thread:$0]  (%p1493_p10), %s1796_s19, 16, %s1794_s20, %s841_s22  }
 0x269 PF: > { %s878_s6 = sand.u32 1, %s1342_s12   ;;  %p1887_p5 = scmp.ne.s32.totalorder %s1878_s23, 0 }
 0x26a   : > { %p1888_p9 = scmp.ge.s32.totalorder %s1362_s17, 2  ;;  %s879_s21 = scalar_lea.sflag [#allocation5], %s878_s6 }
 0x26c   : > { %p1109_p1 = pnand %p1888_p9, %p1887_p5 }
 0x26e   : > { %1333 = dma.done.wait (!%p1109_p1), %s879_s21, 16  }
 0x26f   : > { %1335 = vsyncadd (!%p1109_p1), %s879_s21, 4294967280  ;;  %s887_s30 = scalar_lea.sflag [#allocation10], %s878_s6 }
 0x270   : > { %1337 = dma.done.wait (!%p1109_p1), %s887_s30, 16  }
 0x271   : > { %1339 = vsyncadd (!%p1109_p1), %s887_s30, 4294967280  ;;  %s24_s17 = sadd.s32 1, %s1362_s17   ;;  %s1889_s12 = smov %s1346_s13 }
 0x272   : > { %p21_p2 = scmp.ge.s32.totalorder %s24_s17, 4   ;;  %s1890_s13 = smov %s1350_s14 }
 0x273   : > { %s1891_s14 = smov %s1502_s5  ;;  %s1892_s15 = smov %s1358_s16 }
 0x274   : > { %s1893_s16 = smov %s1895_s28  ;;  %23 = sbr.rel (!%p21_p2) target bundleno = 9 (0x9), region = 100 }
 0x27b   :  { %891 = vsyncpa [#allocation4], 1 }
 0x27c   :  { %893 = vsyncpa [#allocation4 + $0x1], 1 }
 0x27d   :  { %894 = vsyncpa [#allocation7], 1 }
 0x27e   :  { %895 = vsyncpa [#allocation5], 1 }
 0x27f   :  { %897 = vsyncpa [#allocation5 + $0x1], 1 }
 0x280   :  { %898 = vsyncpa [#allocation10], 1 }
 0x281   :  { %900 = vsyncpa [#allocation10 + $0x1], 1 }

// kernel: cnn_backbone.10
= control target key start
LH: loop header
LB: loop body
LE: loop exit
PB: predicated region body
PF: predicated region fallthrough
CT: control target
= control target key end

     0   :  { %9 = vsyncpa [#allocation4], 0  ;;  %s1883_s0 = inlined_call_operand.hbm [shape: f32[2,10,10,8], index: 0, kind: input, shape index: {}]   ;;  %s1884_s1 = inlined_call_operand.hbm [shape: bf16[72,16], index: 1, kind: input, shape index: {}]   ;;  %s1885_s2 = inlined_call_operand.hbm [shape: f32[1,16], index: 2, kind: input, shape index: {}]   ;;  %s1886_s3 = inlined_call_operand.hbm [shape: f32[1,16], index: 3, kind: input, shape index: {}]   ;;  %s1887_s4 = inlined_call_operand.hbm [shape: f32[2,64,16], index: 4, kind: output, shape index: {}]  }
   0x1   :  { %11 = vsyncpa [#allocation4 + $0x1], 0 }
   0x2   :  { %12 = vsyncpa [#allocation7], 0 }
   0x3   :  { %13 = vsyncpa [#allocation10], 0 }
   0x4   :  { %14 = vsyncpa [#allocation5], 0 }
   0x5   :  { %16 = vsyncpa [#allocation5 + $0x1], 0  ;;  %s1408_s15 = smov 0   ;;  %s1410_s16 = smov 0  }
   0x6   :  { %s1412_s17 = smov 0   ;;  %s1414_s18 = smov 0  }
   0x7 LB: > { %s1429_s19 = sadd.s32 4294967295, %s1363_s18   ;;  %s961_s20 = sadd.s32 4294967294, %s1363_s18   ;;  %s1363_s18 = sphi %s1414_s18, %s1910_s18   ;;  %s1359_s17 = sphi %s1412_s17, %s1909_s17   ;;  %s1355_s16 = sphi %s1410_s16, %s1908_s16   ;;  %s1351_s15 = sphi %s1408_s15, %s1907_s15  }
   0x8   : > { %p42_p0 = scmp.ne.s32.totalorder %s1355_s16, %s1351_s15  ;;  %p1888_p1 = scmp.eq.s32.totalorder %s1429_s19, 0 }
   0x9   : > { %p135_p3 = scmp.eq.s32.totalorder %s961_s20, 1  ;;  %p962_p5 = scmp.ge.s32.totalorder %s1363_s18, 1 }
   0xa   : > { %p1438_p4 = por %p1888_p1, %p42_p0  ;;  %p142_p7 = scmp.lt.s32.totalorder %s1363_s18, 3 }
   0xb   : > { %p1443_p6 = por %p135_p3, %p42_p0  ;;  %s1365_s24 = smov [#allocation6]  }
   0xc   : > { %s1891_s21 = scalar_select %p1438_p4, 1, 0 }
   0xd   : > { %s1892_s22 = scalar_select %p1443_p6, 1, 0 }
   0xe   : > { %p1448_p8 = pnand %p962_p5, %p142_p7  ;;  %s154_s25 = sshll.u32 %s1365_s24, 4  ;;  %s1452_s25 = int_to_ptr.vmem [resolvable:$true] %s154_s25 }
   0xf   : > { %s1366_s27 = smov [#allocation8]   ;;  %s1367_s29 = smov [#allocation9]  }
  0x10   : > { %s1893_s23 = scalar_select %p1448_p8, 1, 0 }
  0x11   : > { %p1096_p9 = pneg %p1448_p8  ;;  %s168_s28 = sshll.u32 %s1366_s27, 4  ;;  %s1463_s28 = int_to_ptr.vmem [resolvable:$true] %s168_s28 }
  0x12   : > { %s1465_s30 = sshll.u32 %s1367_s29, 4  ;;  %s1175_s7 = scalar_lea.hbm %s1884_s1, 576  ;;  %s180_s30 = int_to_ptr.vmem [resolvable:$true] %s1465_s30 }
  0x13   : > { %p1459_p11 = pnand %p1096_p9, %p1888_p1  ;;  %p1176_p12 = scmp.ne.s32.totalorder %s1884_s1, %s1175_s7 }
  0x14   : > { %p1182_p5 = scmp.lt.u32.totalorder %s1175_s7, %s1884_s1 }
  0x15   : > { %p1475_p13 = pneg %p1459_p11 }
  0x17   : > { %p1178_p0 = pnand %p1475_p13, %p1176_p12 }
  0x19   : > { %p1179_p3 = pneg %p1178_p0 }
  0x1b   : > { %p1184_p7 = pnand %p1182_p5, %p1179_p3 }
  0x1d   : > { %1187 = shalt.err (!%p1184_p7)
}
  0x1e   : > { %s1188_s13 = scalar_lea.vmem %s1452_s25, 576  ;;  %p1196_p2 = scmp.lt.s32.totalorder %s1452_s25, %s1452_s25 }
  0x1f   : > { %p1189_p9 = scmp.ne.s32.totalorder %s1452_s25, %s1188_s13  ;;  %p1197_p6 = scmp.lt.s32.totalorder %s1188_s13, %s1188_s13 }
  0x21   : > { %p1191_p10 = pnand %p1189_p9, %p1475_p13  ;;  %p1198_p12 = por %p1197_p6, %p1196_p2 }
  0x23   : > { %p1192_p1 = pneg %p1191_p10 }
  0x25   : > { %p1199_p0 = pnand %p1198_p12, %p1192_p1 }
  0x27   : > { %1202 = shalt.err (!%p1199_p0)
}
  0x28   : > { %s1368_s14 = smov 64   ;;  %s1369_s20 = smov 4  }
  0x29   : > { %1099 = dma.hbm_to_vmem [thread:$0]  (!%p1459_p11), %s1884_s1, 576, %s1452_s25, [#allocation7], %s1368_s14, %s1368_s14, %s1369_s20  }
  0x2a   : > { %s1203_s6 = scalar_lea.hbm %s1885_s2, 16 }
  0x2b   : > { %p1204_p2 = scmp.ne.s32.totalorder %s1885_s2, %s1203_s6  ;;  %p1210_p10 = scmp.lt.u32.totalorder %s1203_s6, %s1885_s2 }
  0x2d   : > { %p1206_p1 = pnand %p1204_p2, %p1475_p13 }
  0x2f   : > { %p1207_p6 = pneg %p1206_p1 }
  0x31   : > { %p1212_p3 = pnand %p1210_p10, %p1207_p6 }
  0x33   : > { %1215 = shalt.err (!%p1212_p3)
}
  0x34   : > { %s1216_s25 = scalar_lea.vmem %s1463_s28, 16  ;;  %s1223_s12 = scalar_lea.vmem %s1463_s28, 32 }
  0x35   : > { %p1217_p5 = scmp.ne.s32.totalorder %s1463_s28, %s1216_s25  ;;  %p1224_p12 = scmp.lt.s32.totalorder %s1463_s28, %s1463_s28 }
  0x36   : > { %p1225_p0 = scmp.lt.s32.totalorder %s1223_s12, %s1216_s25 }
  0x37   : > { %p1219_p7 = pnand %p1217_p5, %p1475_p13 }
  0x38   : > { %p1226_p2 = por %p1225_p0, %p1224_p12 }
  0x39   : > { %p1220_p9 = pneg %p1219_p7 }
  0x3b   : > { %p1227_p1 = pnand %p1226_p2, %p1220_p9 }
  0x3d   : > { %1230 = shalt.err (!%p1227_p1)
}
  0x3e   : > { %1102 = dma.hbm_to_vmem [thread:$0]  (!%p1459_p11), %s1885_s2, 16, %s1463_s28, [#allocation7]  }
  0x3f   : > { %s1231_s27 = scalar_lea.hbm %s1886_s3, 16 }
  0x40   : > { %p1232_p6 = scmp.ne.s32.totalorder %s1886_s3, %s1231_s27  ;;  %p1238_p5 = scmp.lt.u32.totalorder %s1231_s27, %s1886_s3 }
  0x42   : > { %p1234_p10 = pnand %p1232_p6, %p1475_p13 }
  0x44   : > { %p1235_p3 = pneg %p1234_p10 }
  0x46   : > { %p1240_p7 = pnand %p1238_p5, %p1235_p3 }
  0x48   : > { %1243 = shalt.err (!%p1240_p7)
}
  0x49   : > { %s1244_s8 = scalar_lea.vmem %s180_s30, 16  ;;  %s1251_s28 = scalar_lea.vmem %s180_s30, 32 }
  0x4a   : > { %p1245_p9 = scmp.ne.s32.totalorder %s180_s30, %s1244_s8  ;;  %p1252_p2 = scmp.lt.s32.totalorder %s180_s30, %s180_s30 }
  0x4b   : > { %p1253_p1 = scmp.lt.s32.totalorder %s1251_s28, %s1244_s8 }
  0x4c   : > { %p1247_p12 = pnand %p1245_p9, %p1475_p13 }
  0x4d   : > { %p1254_p4 = por %p1253_p1, %p1252_p2 }
  0x4e   : > { %p1248_p0 = pneg %p1247_p12 }
  0x50   : > { %p1255_p8 = pnand %p1254_p4, %p1248_p0 }
  0x52   : > { %1258 = shalt.err (!%p1255_p8)
}
  0x53   : > { %1105 = dma.hbm_to_vmem [thread:$0]  (!%p1459_p11), %s1886_s3, 16, %s180_s30, [#allocation10]  }
  0x54   : > { %s1540_s10 = sadd.s32 1, %s1363_s18   ;;  %s29_s26 = sadd.s32 1, %s1359_s17 }
  0x55   : > { %s26_s25 = ssub.s32 %s1363_s18, %s1540_s10  ;;  %p36_p8 = scmp.ne.s32.totalorder %s1359_s17, %s1355_s16 }
  0x56   : > { %p27_p4 = scmp.eq.s32.totalorder %s26_s25, 0  ;;  %p37_p13 = scmp.eq.s32.totalorder %s1363_s18, 0 }
  0x57   : > { %p1117_p6 = scmp.lt.s32.totalorder %s1363_s18, 2  ;;  %p1896_p3 = scmp.eq.s32.totalorder %s1429_s19, 1 }
  0x58   : > { %s1550_s12 = scalar_select %p27_p4, %s1359_s17, %s29_s26  }
  0x59   : > { %p38_p10 = por %p37_p13, %p36_p8  ;;  %p1554_p5 = por %p1896_p3, %p36_p8 }
  0x5a   : > { %s190_s14 = sand.u32 1, %s1359_s17   ;;  %s1078_s20 = smul.u32 2560, %s1363_s18 }
  0x5b   : > { %s1077_s30 = smul.u32 160, %s190_s14  ;;  %p1565_p11 = pnand %p1117_p6, %p38_p10 }
  0x5c   : > { %s1563_s29 = scalar_lea.hbm %s1883_s0, %s1078_s20  ;;  %s1571_s8 = scalar_lea.sflag [#allocation4], %s190_s14 }
  0x5d   : > { %s194_s6 = scalar_lea.vmem [#allocation3], %s1077_s30  ;;  %s1259_s28 = scalar_lea.hbm %s1563_s29, 2560 }
  0x5e   : > { %s201_s7 = sshll.u32 %s194_s6, 4  ;;  %p1260_p7 = scmp.ne.s32.totalorder %s1563_s29, %s1259_s28  ;;  %s1569_s7 = int_to_ptr.vmem [resolvable:$true] %s201_s7 }
  0x5f   : > { %p1261_p9 = pneg %p1565_p11  ;;  %s1264_s25 = scalar_lea.hbm %s1883_s0, 5120 }
  0x60   : > { %p1265_p2 = scmp.lt.u32.totalorder %s1563_s29, %s1883_s0  ;;  %p1266_p1 = scmp.lt.u32.totalorder %s1264_s25, %s1259_s28 }
  0x61   : > { %p1262_p12 = pnand %p1261_p9, %p1260_p7  ;;  %p1268_p8 = scmp.lt.u32.totalorder %s1259_s28, %s1563_s29 }
  0x62   : > { %p1267_p4 = por %p1266_p1, %p1265_p2 }
  0x63   : > { %p1263_p0 = pneg %p1262_p12 }
  0x64   : > { %p1269_p13 = por %p1268_p8, %p1267_p4 }
  0x66   : > { %p1270_p6 = pnand %p1269_p13, %p1263_p0 }
  0x68   : > { %1273 = shalt.err (!%p1270_p6)
}
  0x69   : > { %s1274_s14 = scalar_lea.vmem %s1569_s7, 2560  ;;  %s1370_s30 = smov [#allocation3]  }
  0x6a   : > { %p1275_p10 = scmp.ne.s32.totalorder %s1569_s7, %s1274_s14  ;;  %s1279_s24 = sshll.u32 %s1370_s30, 4  ;;  %s1280_s24 = int_to_ptr.vmem [resolvable:$false] %s1279_s24 }
  0x6b   : > { %s1281_s27 = scalar_lea.vmem %s1280_s24, 5120  ;;  %p1282_p12 = scmp.lt.s32.totalorder %s1569_s7, %s1280_s24 }
  0x6c   : > { %p1277_p3 = pnand %p1275_p10, %p1261_p9  ;;  %p1283_p2 = scmp.lt.s32.totalorder %s1281_s27, %s1274_s14 }
  0x6e   : > { %p1278_p7 = pneg %p1277_p3  ;;  %p1284_p1 = por %p1283_p2, %p1282_p12 }
  0x70   : > { %p1285_p4 = pnand %p1284_p1, %p1278_p7 }
  0x72   : > { %1288 = shalt.err (!%p1285_p4)
}
  0x73   : > { %s1371_s6 = smov 128   ;;  %s1372_s28 = smov 8  }
  0x74   : > { %1109 = dma.hbm_to_vmem [thread:$0]  (!%p1565_p11), %s1563_s29, 2560, %s1569_s7, %s1571_s8, %s1371_s6, %s1371_s6, %s1372_s28  }
  0x75   : > { %p1899_p9 = scmp.ne.s32.totalorder %s1893_s23, 0 }
  0x76   : > { %s1602_s9 = sand.u32 (!%p1899_p9), 1, %s1355_s16   ;;  %p1900_p0 = scmp.ne.s32.totalorder (!%p1899_p9), %s1891_s21, 0 }
  0x77   : > { %213 = sbr.rel (%p1899_p9) target bundleno = 621 (0x26d), region = 36  ;;  %s216_s25 = scalar_lea.sflag (!%p1899_p9), [#allocation4], %s1602_s9 }
  0x78   : > { %s1079_s11 = smul.u32 (!%p1899_p9), 160, %s1602_s9 }
  0x7a   : > { %s1606_s26 = scalar_lea.vmem (!%p1899_p9), [#allocation3], %s1079_s11 }
  0x7e   : > { %1334 = dma.done.wait (%p1900_p0), %s216_s25, 2560  }
  0x7f   : > { %1336 = vsyncadd (%p1900_p0), %s216_s25, 4294964736  ;;  %p1901_p11 = scmp.eq.s32.totalorder %s1429_s19, 0 }
  0x81   : > { %1338 = dma.done.wait (%p1901_p11), [#allocation7], 592   ;;  %p1902_p8 = pmov %p1901_p11 }
  0x83   : > { %1340 = vsyncadd (%p1902_p8), [#allocation7], 4294966704  ;;  %p1903_p13 = pmov %p1902_p8 }
  0x84   : > { %p1904_p6 = pmov %p1902_p8 }
  0x85   : > { %1342 = dma.done.wait (%p1903_p13), [#allocation10], 16  }
  0x86   : > { %1344 = vsyncadd (%p1904_p6), [#allocation10], 4294967280  ;;  %v1621_v0 = vld [vmem:[%s1606_s26 + $0x41] sm:$0xff]  ;;  %s1373_s21 = smov 8   ;;  %v1628_v2 = vld [vmem:[%s1606_s26 + $0x51] sm:$0xff]  ;;  %vm265_vm0 = vcmask 64512  }
  0x87   : > { %v274_v1 = vld [vmem:[%s1606_s26 + $0x1] sm:$0xff]  ;;  %298 = vrot.lane.b32.xlu1 %v1621_v0, %s1373_s21  ;;  %v275_v3 = vld [vmem:[%s1606_s26 + $0x11] sm:$0xff]  ;;  %s1374_s23 = smov 16   ;;  %s1375_s29 = smov 24   ;;  %v1174_v33 = vld [vmem:[#allocation6 + $0x20] ss:$0 sps:$4 sm:$0xff]  }
  0x88   : > { %290 = vrot.lane.b32.xlu0 %v274_v1, %s1373_s21  ;;  %v1635_v4 = vld [vmem:[%s1606_s26 + $0x31] sm:$0xff]  ;;  %v1638_v5 = vld [vmem:[%s1606_s26 + $0x21] sm:$0xff]  ;;  %s1376_s5 = smov 32   ;;  %s1377_s7 = smov 40   ;;  %vm729_vm1 = vcmask 1043456   ;;  %vm314_vm2 = vcmask 130112  }
  0x89   : > { %v1641_v6 = vld [vmem:[%s1606_s26 + $0x20] sm:$0xff]  ;;  %v973_v7 = vld [vmem:[%s1606_s26 + $0x10] sm:$0xff]  ;;  %s1378_s8 = smov 48   ;;  %s1379_s20 = smov 56   ;;  %v1171_v29 = vld [vmem:[#allocation6 + $0x8] sm:$0xff]   ;;  %v731_v34 = vsel %vm729_vm1, %v1174_v33, 0 }
  0x8a   : > { %v1645_v8 = vld [vmem:[%s1606_s26 + $0x60] sm:$0xff]  ;;  %v1648_v9 = vld [vmem:[%s1606_s26 + $0x50] sm:$0xff]  ;;  %267 = vst.msk [vmem:[#allocation2 + $0x8] sm:$0xff] %vm265_vm0, %v973_v7  ;;  %268 = vst.msk [vmem:[#allocation2 + $0x10] sm:$0xff] %vm265_vm0, %v1641_v6  ;;  %s1380_s14 = smov 64   ;;  %vm363_vm3 = vcmask 195712  }
  0x8b   : > { %300 = vrot.lane.b32.xlu1 %v1628_v2, %s1373_s21  ;;  %v1651_v10 = vld [vmem:[%s1606_s26 + $0x40] sm:$0xff]  ;;  %v1654_v11 = vld [vmem:[%s1606_s26 + $0x30] sm:$0xff]  ;;  %272 = vst.msk [vmem:[#allocation2 + $0x30] sm:$0xff] %vm265_vm0, %v1645_v8  ;;  %271 = vst.msk [vmem:[#allocation2 + $0x28] sm:$0xff] %vm265_vm0, %v1648_v9  ;;  %vm413_vm4 = vcmask 261312   ;;  %vm462_vm5 = vcmask 326912  }
  0x8c   : > { %292 = vrot.lane.b32.xlu0 %v275_v3, %s1373_s21  ;;  %v979_v12 = vld [vmem:[%s1606_s26 + $0x70] sm:$0xff]  ;;  %270 = vst.msk [vmem:[#allocation2 + $0x20] sm:$0xff] %vm265_vm0, %v1651_v10  ;;  %269 = vst.msk [vmem:[#allocation2 + $0x18] sm:$0xff] %vm265_vm0, %v1654_v11  ;;  %v1677_v14 = vld [vmem:[%s1606_s26 + $0x61] sm:$0xff]  ;;  %vm511_vm6 = vcmask 392512   ;;  %vm561_vm7 = vcmask 458112  }
  0x8d   : > { %273 = vst.msk [vmem:[#allocation2 + $0x38] sm:$0xff] %vm265_vm0, %v979_v12  ;;  %v1674_v13 = vld [vmem:[%s1606_s26 + $0x71] sm:$0xff]  ;;  %v257_v15 = vld [vmem:[%s1606_s26] sm:$0xff]  ;;  %vm610_vm8 = vcmask 523712   ;;  %vm659_vm9 = vcmask 589312   ;;  %vm716_vm10 = vcmask 588800  }
  0x8e   : > { %266 = vst.msk [vmem:[#allocation2] sm:$0xff] %vm265_vm0, %v257_v15  ;;  %v324_v16 = vld [vmem:[%s1606_s26 + $0x12] sm:$0xff]  ;;  %v323_v17 = vld [vmem:[%s1606_s26 + $0x2] sm:$0xff]  ;;  %s972_s30 = sshll.u32 %s1602_s9, 6  ;;  %vm836_vm11 = vcmask 130048   ;;  %s1037_s27 = sshll.u32 %s1429_s19, 10 }
  0x8f   : > { %296 = vrot.lane.b32.xlu1 %v1635_v4, %s1373_s21  ;;  %v1688_v18 = vld [vmem:[%s1606_s26 + $0x52] sm:$0xff]  ;;  %v1691_v19 = vld [vmem:[%s1606_s26 + $0x42] sm:$0xff]  ;;  %s255_s24 = scalar_lea.vmem [#allocation11], %s972_s30  ;;  %s1833_s25 = scalar_lea.hbm %s1887_s4, %s1037_s27 }
  0x90   : > { %294 = vrot.lane.b32.xlu0 %v1638_v5, %s1373_s21  ;;  %v1696_v20 = vld [vmem:[%s1606_s26 + $0x32] sm:$0xff]  ;;  %v1699_v21 = vld [vmem:[%s1606_s26 + $0x22] sm:$0xff]  ;;  %s859_s6 = sshll.u32 %s255_s24, 4  ;;  %s846_s19 = scalar_lea.sflag [#allocation5], %s1602_s9  ;;  %s1836_s6 = int_to_ptr.vmem [resolvable:$true] %s859_s6 }
  0x91   : > { %v1704_v22 = vld [vmem:[%s1606_s26 + $0x72] sm:$0xff]  ;;  %v1707_v23 = vld [vmem:[%s1606_s26 + $0x62] sm:$0xff] }
  0x92   : > { %v980_v24 = vld [vmem:[%s1606_s26 + $0x80] sm:$0xff]  ;;  %v1004_v27 = vld [vmem:[%s1606_s26 + $0x90] sm:$0xff]  ;;  %v1173_v32 = vld [vmem:[#allocation6 + $0x18] sm:$0xff]  }
  0x93   : > { %304 = vrot.lane.b32.xlu1 %v1674_v13, %s1373_s21  ;;  %v988_v25 = vld [vmem:[%s1606_s26 + $0x81] sm:$0xff]  ;;  %v1172_v30 = vld [vmem:[#allocation6 + $0x10] sm:$0xff]  }
  0x94   : > { %302 = vrot.lane.b32.xlu0 %v1677_v14, %s1373_s21  ;;  %v1730_v26 = vld [vmem:[%s1606_s26 + $0x82] sm:$0xff]  ;;  %v1012_v31 = vld [vmem:[%s1606_s26 + $0x91] sm:$0xff] }
  0x95   : > { %v1170_v28 = vld [vmem:[#allocation6] sm:$0xff]   ;;  %v1020_v39 = vld [vmem:[%s1606_s26 + $0x92] sm:$0xff]  ;;  %s1289_s26 = scalar_lea.vmem %s1836_s6, 1024 }
  0x96   : > { %1047 = vmatprep.subr.bf16.mxu0 %v1170_v28  ;;  %1065 = vmatprep.subr.bf16.mxu1 %v1170_v28  ;;  %p1290_p10 = scmp.ne.s32.totalorder %s1836_s6, %s1289_s26 }
  0x97   : > { %341 = vrot.lane.b32.xlu1 %v324_v16, %s1374_s23  ;;  %1048 = vmatpush3.bf16.msra.mxu0 %v1170_v28 }
  0x98   : > { %339 = vrot.lane.b32.xlu0 %v323_v17, %s1374_s23  ;;  %1070 = vmatpush3.bf16.msra.mxu1 %v1170_v28  ;;  %p1291_p3 = pnand %p1290_p10, %p1554_p5 }
  0x99   : > { %1049 = vmatprep.subr.bf16.mxu0 %v1171_v29  ;;  %1066 = vmatprep.subr.bf16.mxu1 %v1171_v29 }
  0x9a   : > { %p1292_p7 = pneg %p1291_p3 }
  0x9b   : > { %349 = vrot.lane.b32.xlu1 %v1688_v18, %s1374_s23  ;;  %1050 = vmatpush3.bf16.msra.mxu0 %v1171_v29 }
  0x9c   : > { %347 = vrot.lane.b32.xlu0 %v1691_v19, %s1374_s23  ;;  %1071 = vmatpush3.bf16.msra.mxu1 %v1171_v29 }
  0x9d   : > { %1051 = vmatprep.subr.bf16.mxu0 %v1172_v30  ;;  %1067 = vmatprep.subr.bf16.mxu1 %v1172_v30 }
  0x9f   : > { %345 = vrot.lane.b32.xlu1 %v1696_v20, %s1374_s23  ;;  %1052 = vmatpush3.bf16.msra.mxu0 %v1172_v30 }
  0xa0   : > { %343 = vrot.lane.b32.xlu0 %v1699_v21, %s1374_s23  ;;  %1072 = vmatpush3.bf16.msra.mxu1 %v1172_v30 }
  0xa1   : > { %1053 = vmatprep.subr.bf16.mxu0 %v1173_v32  ;;  %1068 = vmatprep.subr.bf16.mxu1 %v1173_v32 }
  0xa3   : > { %353 = vrot.lane.b32.xlu1 %v1704_v22, %s1374_s23  ;;  %1054 = vmatpush3.bf16.msra.mxu0 %v1173_v32 }
  0xa4   : > { %351 = vrot.lane.b32.xlu0 %v1707_v23, %s1374_s23  ;;  %1073 = vmatpush3.bf16.msra.mxu1 %v1173_v32  ;;  %s1381_s23 = smov [#allocation11]  }
  0xa5   : > { %1075 = vmatprep.subr.msk.bf16.mxu0 %vm729_vm1, %v1174_v33  ;;  %1076 = vmatprep.subr.msk.bf16.mxu1 %vm729_vm1, %v1174_v33 }
  0xa7   : > { %391 = vrot.lane.b32.xlu1 %v1641_v6, %s1375_s29  ;;  %1056 = vmatpush3.bf16.msra.mxu0 %v731_v34 }
  0xa8   : > { %389 = vrot.lane.b32.xlu0 %v973_v7, %s1375_s29  ;;  %1074 = vmatpush3.bf16.msra.mxu1 %v731_v34 }
  0xab   : > { %399 = vrot.lane.b32.xlu1 %v1645_v8, %s1375_s29 }
  0xac   : > { %397 = vrot.lane.b32.xlu0 %v1648_v9, %s1375_s29 }
  0xaf   : > { %395 = vrot.lane.b32.xlu1 %v1651_v10, %s1375_s29 }
  0xb0   : > { %393 = vrot.lane.b32.xlu0 %v1654_v11, %s1375_s29 }
  0xb3   : > { %403 = vrot.lane.b32.xlu1 %v980_v24, %s1375_s29 }
  0xb4   : > { %401 = vrot.lane.b32.xlu0 %v979_v12, %s1375_s29  ;;  %s1293_s29 = sshll.u32 %s1381_s23, 4  ;;  %s1294_s29 = int_to_ptr.vmem [resolvable:$false] %s1293_s29 }
  0xb5   : > { %p1296_p12 = scmp.lt.s32.totalorder %s1836_s6, %s1294_s29 }
  0xb7   : > { %440 = vrot.lane.b32.xlu1 %v1638_v5, %s1376_s5 }
  0xb8   : > { %438 = vrot.lane.b32.xlu0 %v275_v3, %s1376_s5 }
  0xbb   : > { %448 = vrot.lane.b32.xlu1 %v1677_v14, %s1376_s5 }
  0xbc   : > { %446 = vrot.lane.b32.xlu0 %v1628_v2, %s1376_s5 }
  0xbf   : > { %444 = vrot.lane.b32.xlu1 %v1621_v0, %s1376_s5 }
  0xc0   : > { %442 = vrot.lane.b32.xlu0 %v1635_v4, %s1376_s5 }
  0xc3   : > { %452 = vrot.lane.b32.xlu1 %v988_v25, %s1376_s5 }
  0xc4   : > { %450 = vrot.lane.b32.xlu0 %v1674_v13, %s1376_s5  ;;  %s1295_s5 = scalar_lea.vmem %s1294_s29, 2048 }
  0xc5   : > { %p1297_p2 = scmp.lt.s32.totalorder %s1295_s5, %s1289_s26 }
  0xc7   : > { %489 = vrot.lane.b32.xlu1 %v1699_v21, %s1377_s7  ;;  %p1298_p1 = por %p1297_p2, %p1296_p12 }
  0xc8   : > { %487 = vrot.lane.b32.xlu0 %v324_v16, %s1377_s7 }
  0xc9   : > { %p1299_p4 = pnand %p1298_p1, %p1292_p7 }
  0xcb   : > { %497 = vrot.lane.b32.xlu1 %v1707_v23, %s1377_s7 }
  0xcc   : > { %495 = vrot.lane.b32.xlu0 %v1688_v18, %s1377_s7 }
  0xcf   : > { %493 = vrot.lane.b32.xlu1 %v1691_v19, %s1377_s7 }
  0xd0   : > { %491 = vrot.lane.b32.xlu0 %v1696_v20, %s1377_s7 }
  0xd3   : > { %501 = vrot.lane.b32.xlu1 %v1730_v26, %s1377_s7 }
  0xd4   : > { %499 = vrot.lane.b32.xlu0 %v1704_v22, %s1377_s7 }
  0xd7   : > { %539 = vrot.lane.b32.xlu1 %v1654_v11, %s1378_s8 }
  0xd8   : > { %537 = vrot.lane.b32.xlu0 %v1641_v6, %s1378_s8 }
  0xdb   : > { %547 = vrot.lane.b32.xlu1 %v979_v12, %s1378_s8 }
  0xdc   : > { %545 = vrot.lane.b32.xlu0 %v1645_v8, %s1378_s8 }
  0xdf   : > { %543 = vrot.lane.b32.xlu1 %v1648_v9, %s1378_s8 }
  0xe0   : > { %541 = vrot.lane.b32.xlu0 %v1651_v10, %s1378_s8 }
  0xe3   : > { %551 = vrot.lane.b32.xlu1 %v1004_v27, %s1378_s8 }
  0xe4   : > { %549 = vrot.lane.b32.xlu0 %v980_v24, %s1378_s8 }
  0xe7   : > { %588 = vrot.lane.b32.xlu1 %v1635_v4, %s1379_s20 }
  0xe8   : > { %586 = vrot.lane.b32.xlu0 %v1638_v5, %s1379_s20 }
  0xeb   : > { %596 = vrot.lane.b32.xlu1 %v1674_v13, %s1379_s20 }
  0xec   : > { %594 = vrot.lane.b32.xlu0 %v1677_v14, %s1379_s20 }
  0xef   : > { %592 = vrot.lane.b32.xlu1 %v1628_v2, %s1379_s20 }
  0xf0   : > { %590 = vrot.lane.b32.xlu0 %v1621_v0, %s1379_s20 }
  0xf3   : > { %600 = vrot.lane.b32.xlu1 %v1012_v31, %s1379_s20 }
  0xf4   : > { %598 = vrot.lane.b32.xlu0 %v988_v25, %s1379_s20 }
  0xf7   : > { %637 = vrot.lane.b32.xlu1 %v1696_v20, %s1380_s14 }
  0xf8   : > { %635 = vrot.lane.b32.xlu0 %v1699_v21, %s1380_s14 }
  0xf9   : > { %v299_v35 = vpop.permute.xlu1 %298 }
  0xfa   : > { %v291_v36 = vpop.permute.xlu0 %290  ;;  %319 = vst.msk [vmem:[#allocation2 + $0x20] sm:$0xff] %vm314_vm2, %v299_v35 }
  0xfb   : > { %315 = vst.msk [vmem:[#allocation2] sm:$0xff] %vm314_vm2, %v291_v36  ;;  %645 = vrot.lane.b32.xlu1 %v1704_v22, %s1380_s14 }
  0xfc   : > { %643 = vrot.lane.b32.xlu0 %v1707_v23, %s1380_s14 }
  0xfd   : > { %v301_v37 = vpop.permute.xlu1 %300 }
  0xfe   : > { %v293_v38 = vpop.permute.xlu0 %292  ;;  %320 = vst.msk [vmem:[#allocation2 + $0x28] sm:$0xff] %vm314_vm2, %v301_v37 }
  0xff   : > { %316 = vst.msk [vmem:[#allocation2 + $0x8] sm:$0xff] %vm314_vm2, %v293_v38  ;;  %641 = vrot.lane.b32.xlu1 %v1688_v18, %s1380_s14 }
 0x100   : > { %639 = vrot.lane.b32.xlu0 %v1691_v19, %s1380_s14 }
 0x101   : > { %v297_v40 = vpop.permute.xlu1 %296 }
 0x102   : > { %v295_v41 = vpop.permute.xlu0 %294  ;;  %318 = vst.msk [vmem:[#allocation2 + $0x18] sm:$0xff] %vm314_vm2, %v297_v40 }
 0x103   : > { %317 = vst.msk [vmem:[#allocation2 + $0x10] sm:$0xff] %vm314_vm2, %v295_v41  ;;  %649 = vrot.lane.b32.xlu1 %v1020_v39, %s1380_s14 }
 0x104   : > { %647 = vrot.lane.b32.xlu0 %v1730_v26, %s1380_s14 }
 0x105   : > { %v305_v42 = vpop.permute.xlu1 %304 }
 0x106   : > { %v303_v43 = vpop.permute.xlu0 %302  ;;  %322 = vst.msk [vmem:[#allocation2 + $0x38] sm:$0xff] %vm314_vm2, %v305_v42 }
 0x107   : > { %321 = vst.msk [vmem:[#allocation2 + $0x30] sm:$0xff] %vm314_vm2, %v303_v43 }
 0x109   : > { %v342_v44 = vpop.permute.xlu1 %341 }
 0x10a   : > { %v340_v45 = vpop.permute.xlu0 %339  ;;  %365 = vst.msk [vmem:[#allocation2 + $0x8] sm:$0xff] %vm363_vm3, %v342_v44 }
 0x10b   : > { %364 = vst.msk [vmem:[#allocation2] sm:$0xff] %vm363_vm3, %v340_v45 }
 0x10d   : > { %v350_v46 = vpop.permute.xlu1 %349 }
 0x10e   : > { %v348_v47 = vpop.permute.xlu0 %347  ;;  %369 = vst.msk [vmem:[#allocation2 + $0x28] sm:$0xff] %vm363_vm3, %v350_v46 }
 0x10f   : > { %368 = vst.msk [vmem:[#allocation2 + $0x20] sm:$0xff] %vm363_vm3, %v348_v47 }
 0x111   : > { %v346_v48 = vpop.permute.xlu1 %345 }
 0x112   : > { %v344_v49 = vpop.permute.xlu0 %343  ;;  %367 = vst.msk [vmem:[#allocation2 + $0x18] sm:$0xff] %vm363_vm3, %v346_v48  ;;  %v1030_v48 = vld [vmem:[#allocation8] ss:$0 sm:$0xff] }
 0x113   : > { %366 = vst.msk [vmem:[#allocation2 + $0x10] sm:$0xff] %vm363_vm3, %v344_v49 }
 0x115   : > { %v354_v50 = vpop.permute.xlu1 %353 }
 0x116   : > { %v352_v51 = vpop.permute.xlu0 %351  ;;  %371 = vst.msk [vmem:[#allocation2 + $0x38] sm:$0xff] %vm363_vm3, %v354_v50  ;;  %v1031_v50 = vld [vmem:[#allocation9] ss:$0 sm:$0xff] }
 0x117   : > { %370 = vst.msk [vmem:[#allocation2 + $0x30] sm:$0xff] %vm363_vm3, %v352_v51 }
 0x119   : > { %v392_v52 = vpop.permute.xlu1 %391 }
 0x11a   : > { %v390_v53 = vpop.permute.xlu0 %389  ;;  %415 = vst.msk [vmem:[#allocation2 + $0x8] sm:$0xff] %vm413_vm4, %v392_v52 }
 0x11b   : > { %414 = vst.msk [vmem:[#allocation2] sm:$0xff] %vm413_vm4, %v390_v53 }
 0x11d   : > { %v400_v54 = vpop.permute.xlu1 %399 }
 0x11e   : > { %v398_v55 = vpop.permute.xlu0 %397  ;;  %419 = vst.msk [vmem:[#allocation2 + $0x28] sm:$0xff] %vm413_vm4, %v400_v54 }
 0x11f   : > { %418 = vst.msk [vmem:[#allocation2 + $0x20] sm:$0xff] %vm413_vm4, %v398_v55 }
 0x121   : > { %v396_v56 = vpop.permute.xlu1 %395 }
 0x122   : > { %v394_v57 = vpop.permute.xlu0 %393  ;;  %417 = vst.msk [vmem:[#allocation2 + $0x18] sm:$0xff] %vm413_vm4, %v396_v56 }
 0x123   : > { %416 = vst.msk [vmem:[#allocation2 + $0x10] sm:$0xff] %vm413_vm4, %v394_v57 }
 0x125   : > { %v404_v58 = vpop.permute.xlu1 %403 }
 0x126   : > { %v402_v59 = vpop.permute.xlu0 %401  ;;  %421 = vst.msk [vmem:[#allocation2 + $0x38] sm:$0xff] %vm413_vm4, %v404_v58 }
 0x127   : > { %420 = vst.msk [vmem:[#allocation2 + $0x30] sm:$0xff] %vm413_vm4, %v402_v59 }
 0x129   : > { %v441_v60 = vpop.permute.xlu1 %440 }
 0x12a   : > { %v439_v61 = vpop.permute.xlu0 %438  ;;  %464 = vst.msk [vmem:[#allocation2 + $0x8] sm:$0xff] %vm462_vm5, %v441_v60 }
 0x12b   : > { %463 = vst.msk [vmem:[#allocation2] sm:$0xff] %vm462_vm5, %v439_v61 }
 0x12d   : > { %v449_v62 = vpop.permute.xlu1 %448 }
 0x12e   : > { %v447_v63 = vpop.permute.xlu0 %446  ;;  %468 = vst.msk [vmem:[#allocation2 + $0x28] sm:$0xff] %vm462_vm5, %v449_v62 }
 0x12f   : > { %467 = vst.msk [vmem:[#allocation2 + $0x20] sm:$0xff] %vm462_vm5, %v447_v63 }
 0x131   : > { %v445_v0 = vpop.permute.xlu1 %444 }
 0x132   : > { %v443_v1 = vpop.permute.xlu0 %442  ;;  %466 = vst.msk [vmem:[#allocation2 + $0x18] sm:$0xff] %vm462_vm5, %v445_v0 }
 0x133   : > { %465 = vst.msk [vmem:[#allocation2 + $0x10] sm:$0xff] %vm462_vm5, %v443_v1 }
 0x135   : > { %v453_v2 = vpop.permute.xlu1 %452 }
 0x136   : > { %v451_v3 = vpop.permute.xlu0 %450  ;;  %470 = vst.msk [vmem:[#allocation2 + $0x38] sm:$0xff] %vm462_vm5, %v453_v2 }
 0x137   : > { %469 = vst.msk [vmem:[#allocation2 + $0x30] sm:$0xff] %vm462_vm5, %v451_v3 }
 0x139   : > { %v490_v4 = vpop.permute.xlu1 %489 }
 0x13a   : > { %v488_v5 = vpop.permute.xlu0 %487  ;;  %513 = vst.msk [vmem:[#allocation2 + $0x8] sm:$0xff] %vm511_vm6, %v490_v4 }
 0x13b   : > { %512 = vst.msk [vmem:[#allocation2] sm:$0xff] %vm511_vm6, %v488_v5 }
 0x13d   : > { %v498_v6 = vpop.permute.xlu1 %497 }
 0x13e   : > { %v496_v7 = vpop.permute.xlu0 %495  ;;  %517 = vst.msk [vmem:[#allocation2 + $0x28] sm:$0xff] %vm511_vm6, %v498_v6 }
 0x13f   : > { %516 = vst.msk [vmem:[#allocation2 + $0x20] sm:$0xff] %vm511_vm6, %v496_v7 }
 0x141   : > { %v494_v8 = vpop.permute.xlu1 %493 }
 0x142   : > { %v492_v9 = vpop.permute.xlu0 %491  ;;  %515 = vst.msk [vmem:[#allocation2 + $0x18] sm:$0xff] %vm511_vm6, %v494_v8 }
 0x143   : > { %514 = vst.msk [vmem:[#allocation2 + $0x10] sm:$0xff] %vm511_vm6, %v492_v9 }
 0x145   : > { %v502_v10 = vpop.permute.xlu1 %501 }
 0x146   : > { %v500_v11 = vpop.permute.xlu0 %499  ;;  %519 = vst.msk [vmem:[#allocation2 + $0x38] sm:$0xff] %vm511_vm6, %v502_v10 }
 0x147   : > { %518 = vst.msk [vmem:[#allocation2 + $0x30] sm:$0xff] %vm511_vm6, %v500_v11 }
 0x149   : > { %v540_v12 = vpop.permute.xlu1 %539 }
 0x14a   : > { %v538_v13 = vpop.permute.xlu0 %537  ;;  %563 = vst.msk [vmem:[#allocation2 + $0x8] sm:$0xff] %vm561_vm7, %v540_v12 }
 0x14b   : > { %562 = vst.msk [vmem:[#allocation2] sm:$0xff] %vm561_vm7, %v538_v13 }
 0x14d   : > { %v548_v14 = vpop.permute.xlu1 %547 }
 0x14e   : > { %v546_v15 = vpop.permute.xlu0 %545  ;;  %567 = vst.msk [vmem:[#allocation2 + $0x28] sm:$0xff] %vm561_vm7, %v548_v14 }
 0x14f   : > { %566 = vst.msk [vmem:[#allocation2 + $0x20] sm:$0xff] %vm561_vm7, %v546_v15 }
 0x151   : > { %v544_v16 = vpop.permute.xlu1 %543 }
 0x152   : > { %v542_v17 = vpop.permute.xlu0 %541  ;;  %565 = vst.msk [vmem:[#allocation2 + $0x18] sm:$0xff] %vm561_vm7, %v544_v16 }
 0x153   : > { %564 = vst.msk [vmem:[#allocation2 + $0x10] sm:$0xff] %vm561_vm7, %v542_v17 }
 0x155   : > { %v552_v18 = vpop.permute.xlu1 %551 }
 0x156   : > { %v550_v19 = vpop.permute.xlu0 %549  ;;  %569 = vst.msk [vmem:[#allocation2 + $0x38] sm:$0xff] %vm561_vm7, %v552_v18 }
 0x157   : > { %568 = vst.msk [vmem:[#allocation2 + $0x30] sm:$0xff] %vm561_vm7, %v550_v19 }
 0x159   : > { %v589_v20 = vpop.permute.xlu1 %588 }
 0x15a   : > { %v587_v21 = vpop.permute.xlu0 %586  ;;  %612 = vst.msk [vmem:[#allocation2 + $0x8] sm:$0xff] %vm610_vm8, %v589_v20 }
 0x15b   : > { %611 = vst.msk [vmem:[#allocation2] sm:$0xff] %vm610_vm8, %v587_v21 }
 0x15d   : > { %v597_v22 = vpop.permute.xlu1 %596 }
 0x15e   : > { %v595_v23 = vpop.permute.xlu0 %594  ;;  %616 = vst.msk [vmem:[#allocation2 + $0x28] sm:$0xff] %vm610_vm8, %v597_v22 }
 0x15f   : > { %615 = vst.msk [vmem:[#allocation2 + $0x20] sm:$0xff] %vm610_vm8, %v595_v23 }
 0x161   : > { %v593_v24 = vpop.permute.xlu1 %592 }
 0x162   : > { %v591_v25 = vpop.permute.xlu0 %590  ;;  %614 = vst.msk [vmem:[#allocation2 + $0x18] sm:$0xff] %vm610_vm8, %v593_v24 }
 0x163   : > { %613 = vst.msk [vmem:[#allocation2 + $0x10] sm:$0xff] %vm610_vm8, %v591_v25 }
 0x165   : > { %v601_v26 = vpop.permute.xlu1 %600 }
 0x166   : > { %v599_v27 = vpop.permute.xlu0 %598  ;;  %618 = vst.msk [vmem:[#allocation2 + $0x38] sm:$0xff] %vm610_vm8, %v601_v26 }
 0x167   : > { %617 = vst.msk [vmem:[#allocation2 + $0x30] sm:$0xff] %vm610_vm8, %v599_v27 }
 0x169   : > { %v638_v28 = vpop.permute.xlu1 %637 }
 0x16a   : > { %v636_v29 = vpop.permute.xlu0 %635  ;;  %661 = vst.msk [vmem:[#allocation2 + $0x8] sm:$0xff] %vm659_vm9, %v638_v28 }
 0x16b   : > { %660 = vst.msk [vmem:[#allocation2] sm:$0xff] %vm659_vm9, %v636_v29 }
 0x16d   : > { %v646_v30 = vpop.permute.xlu1 %645 }
 0x16e   : > { %v644_v31 = vpop.permute.xlu0 %643  ;;  %665 = vst.msk [vmem:[#allocation2 + $0x28] sm:$0xff] %vm659_vm9, %v646_v30 }
 0x16f   : > { %664 = vst.msk [vmem:[#allocation2 + $0x20] sm:$0xff] %vm659_vm9, %v644_v31 }
 0x171   : > { %v642_v32 = vpop.permute.xlu1 %641  ;;  %v669_v35 = vld [vmem:[#allocation2 + $0x8] sm:$0xff] }
 0x172   : > { %v640_v33 = vpop.permute.xlu0 %639  ;;  %v668_v34 = vld [vmem:[#allocation2] sm:$0xff]  ;;  %663 = vst.msk [vmem:[#allocation2 + $0x18] sm:$0xff] %vm659_vm9, %v642_v32 }
 0x173   : > { %662 = vst.msk [vmem:[#allocation2 + $0x10] sm:$0xff] %vm659_vm9, %v640_v33  ;;  %v676_v36 = vpack.c.bf16 %v669_v35, %v668_v34 }
 0x175   : > { %1057 = vmatprep.mubr.msk.bf16.mxu0 %vm716_vm10, %v676_v36  ;;  %v650_v37 = vpop.permute.xlu1 %649  ;;  %v673_v40 = vld [vmem:[#allocation2 + $0x28] sm:$0xff] }
 0x176   : > { %v648_v38 = vpop.permute.xlu0 %647  ;;  %v672_v39 = vld [vmem:[#allocation2 + $0x20] sm:$0xff]  ;;  %667 = vst.msk [vmem:[#allocation2 + $0x38] sm:$0xff] %vm659_vm9, %v650_v37 }
 0x177   : > { %666 = vst.msk [vmem:[#allocation2 + $0x30] sm:$0xff] %vm659_vm9, %v648_v38  ;;  %v678_v41 = vpack.c.bf16 %v673_v40, %v672_v39 }
 0x179   : > { %1061 = vmatprep.mubr.msk.bf16.mxu1 %vm716_vm10, %v678_v41  ;;  %v671_v43 = vld [vmem:[#allocation2 + $0x18] sm:$0xff] }
 0x17a   : > { %v670_v42 = vld [vmem:[#allocation2 + $0x10] sm:$0xff] }
 0x17b   : > { %v677_v44 = vpack.c.bf16 %v671_v43, %v670_v42 }
 0x17d   : > { %1058 = vmatmul.mubr.msk.bf16.vlgmr.msra.gmra.mrb[0].mxu0 %vm716_vm10, %v677_v44  ;;  %v675_v46 = vld [vmem:[#allocation2 + $0x38] sm:$0xff] }
 0x17e   : > { %v674_v45 = vld [vmem:[#allocation2 + $0x30] sm:$0xff] }
 0x17f   : > { %v679_v47 = vpack.c.bf16 %v675_v46, %v674_v45 }
 0x181   : > { %1062 = vmatmul.mubr.msk.bf16.vlgmr.msra.gmra.mrb[0].mxu1 %vm716_vm10, %v679_v47 }
 0x250   : > { %v1059_v49 = vpop.f32.mrb[0].mxu0 }
 0x251   : > { %v807_v51 = vmul.f32 %v1059_v49, %v1030_v48  ;;  %v767_v52 = vpop.f32.mrb[1].mxu0 }
 0x252   : > { %v805_v53 = vmul.f32 %v1030_v48, %v767_v52  ;;  %v1060_v54 = vpop.f32.mrb[2].mxu0 }
 0x253   : > { %v822_v55 = vadd.f32 %v1031_v50, %v807_v51  ;;  %v808_v56 = vmul.f32 %v1060_v54, %v1030_v48  ;;  %v770_v57 = vpop.f32.mrb[3].mxu0 }
 0x254   : > { %v820_v58 = vadd.f32 %v1031_v50, %v805_v53  ;;  %v806_v59 = vmul.f32 %v1030_v48, %v770_v57  ;;  %v1063_v60 = vpop.f32.mrb[0].mxu1 }
 0x255   : > { %v830_v61 = vmax.f32 %v822_v55, 0.0  ;;  %v823_v62 = vadd.f32 %v1031_v50, %v808_v56  ;;  %v811_v63 = vmul.f32 %v1063_v60, %v1030_v48  ;;  %v783_v0 = vpop.f32.mrb[1].mxu1 }
 0x256   : > { %v828_v1 = vmax.f32 %v820_v58, 0.0  ;;  %v821_v2 = vadd.f32 %v1031_v50, %v806_v59  ;;  %v809_v3 = vmul.f32 %v1030_v48, %v783_v0  ;;  %v1064_v4 = vpop.f32.mrb[2].mxu1 }
 0x257   : > { %839 = vst.msk [vmem:[%s255_s24 + $0x10] sm:$0xff] %vm836_vm11, %v830_v61  ;;  %v831_v5 = vmax.f32 %v823_v62, 0.0  ;;  %v826_v6 = vadd.f32 %v1031_v50, %v811_v63  ;;  %v812_v7 = vmul.f32 %v1064_v4, %v1030_v48  ;;  %v786_v8 = vpop.f32.mrb[3].mxu1 }
 0x258   : > { %837 = vst.msk [vmem:[%s255_s24] sm:$0xff] %vm836_vm11, %v828_v1  ;;  %v829_v9 = vmax.f32 %v821_v2, 0.0  ;;  %v824_v10 = vadd.f32 %v1031_v50, %v809_v3  ;;  %v810_v11 = vmul.f32 %v1030_v48, %v786_v8 }
 0x259   : > { %840 = vst.msk [vmem:[%s255_s24 + $0x18] sm:$0xff] %vm836_vm11, %v831_v5  ;;  %v834_v12 = vmax.f32 %v826_v6, 0.0  ;;  %v827_v13 = vadd.f32 %v1031_v50, %v812_v7 }
 0x25a   : > { %838 = vst.msk [vmem:[%s255_s24 + $0x8] sm:$0xff] %vm836_vm11, %v829_v9  ;;  %v832_v14 = vmax.f32 %v824_v10, 0.0  ;;  %v825_v15 = vadd.f32 %v1031_v50, %v810_v11 }
 0x25b   : > { %843 = vst.msk [vmem:[%s255_s24 + $0x30] sm:$0xff] %vm836_vm11, %v834_v12  ;;  %v835_v16 = vmax.f32 %v827_v13, 0.0 }
 0x25c   : > { %841 = vst.msk [vmem:[%s255_s24 + $0x20] sm:$0xff] %vm836_vm11, %v832_v14  ;;  %v833_v17 = vmax.f32 %v825_v15, 0.0 }
 0x25d   : > { %844 = vst.msk [vmem:[%s255_s24 + $0x38] sm:$0xff] %vm836_vm11, %v835_v16 }
 0x25e   : > { %842 = vst.msk [vmem:[%s255_s24 + $0x28] sm:$0xff] %vm836_vm11, %v833_v17 }
 0x25f   : > { %1302 = shalt.err (!%p1299_p4)
}
 0x260   : > { %s1303_s7 = scalar_lea.hbm %s1833_s25, 1024  ;;  %s1307_s14 = scalar_lea.hbm %s1887_s4, 2048 }
 0x261   : > { %p1304_p9 = scmp.ne.s32.totalorder %s1833_s25, %s1303_s7  ;;  %p1308_p8 = scmp.lt.u32.totalorder %s1833_s25, %s1887_s4 }
 0x262   : > { %p1309_p13 = scmp.lt.u32.totalorder %s1307_s14, %s1303_s7  ;;  %p1311_p10 = scmp.lt.u32.totalorder %s1303_s7, %s1833_s25 }
 0x263   : > { %p1305_p0 = pnand %p1304_p9, %p1554_p5 }
 0x264   : > { %p1310_p6 = por %p1309_p13, %p1308_p8 }
 0x265   : > { %p1306_p11 = pneg %p1305_p0 }
 0x266   : > { %p1312_p3 = por %p1311_p10, %p1310_p6 }
 0x268   : > { %p1313_p7 = pnand %p1312_p3, %p1306_p11 }
 0x26a   : > { %1316 = shalt.err (!%p1313_p7)
}
 0x26b   : > { %s1382_s27 = smov 128  }
 0x26c   : > { %1094 = dma.vmem_to_hbm [thread:$0]  (%p1554_p5), %s1836_s6, 1024, %s1833_s25, %s846_s19, %s1382_s27, %s1382_s27, %s1373_s21  }
 0x26d PF: > { %s874_s28 = sand.u32 1, %s1351_s15   ;;  %p1905_p12 = scmp.ne.s32.totalorder %s1892_s22, 0 }
 0x26e   : > { %p1906_p2 = scmp.ge.s32.totalorder %s1363_s18, 2  ;;  %s875_s11 = scalar_lea.sflag [#allocation5], %s874_s28 }
 0x270   : > { %p1111_p1 = pnand %p1906_p2, %p1905_p12 }
 0x272   : > { %1346 = dma.done.wait (!%p1111_p1), %s875_s11, 1024  }
 0x273   : > { %1348 = vsyncadd (!%p1111_p1), %s875_s11, 4294966272  ;;  %p19_p4 = scmp.ge.s32.totalorder %s1540_s10, 4   ;;  %s1907_s15 = smov %s1355_s16 }
 0x274   : > { %s1908_s16 = smov %s1359_s17  ;;  %s1909_s17 = smov %s1550_s12 }
 0x275   : > { %s1910_s18 = smov %s1540_s10  ;;  %21 = sbr.rel (!%p19_p4) target bundleno = 7 (0x7), region = 95 }
 0x27c   :  { %880 = vsyncpa [#allocation4], 1 }
 0x27d   :  { %882 = vsyncpa [#allocation4 + $0x1], 1 }
 0x27e   :  { %883 = vsyncpa [#allocation7], 1 }
 0x27f   :  { %884 = vsyncpa [#allocation10], 1 }
 0x280   :  { %885 = vsyncpa [#allocation5], 1 }
 0x281   :  { %887 = vsyncpa [#allocation5 + $0x1], 1 }

// kernel: cnn_backbone.11
= control target key start
LH: loop header
LB: loop body
LE: loop exit
PB: predicated region body
PF: predicated region fallthrough
CT: control target
= control target key end

     0   :  { %6 = vsyncpa [#allocation3], 0  ;;  %s613_s0 = inlined_call_operand.hbm [shape: f32[2,4,2,4,32], index: 0, kind: input, shape index: {}]   ;;  %s614_s1 = inlined_call_operand.hbm [shape: f32[2,4,4,16], index: 1, kind: output, shape index: {}]  }
   0x1   :  { %8 = vsyncpa [#allocation3 + $0x1], 0 }
   0x2   :  { %9 = vsyncpa [#allocation4], 0 }
   0x3   :  { %11 = vsyncpa [#allocation4 + $0x1], 0  ;;  %s446_s6 = smov 0   ;;  %s448_s7 = smov 0  }
   0x4   :  { %s450_s8 = smov 0   ;;  %s452_s9 = smov 0  }
   0x5 LB: > { %s467_s10 = sadd.s32 4294967295, %s427_s9   ;;  %s260_s11 = sadd.s32 4294967294, %s427_s9   ;;  %s427_s9 = sphi %s452_s9, %s627_s9   ;;  %s423_s8 = sphi %s450_s8, %s626_s8   ;;  %s419_s7 = sphi %s448_s7, %s625_s7   ;;  %s415_s6 = sphi %s446_s6, %s624_s6  }
   0x6   : > { %s471_s12 = sadd.s32 1, %s427_s9   ;;  %s24_s13 = sadd.s32 1, %s423_s8 }
   0x7   : > { %s21_s14 = ssub.s32 %s427_s9, %s471_s12  ;;  %p31_p0 = scmp.ne.s32.totalorder %s423_s8, %s419_s7 }
   0x8   : > { %p22_p1 = scmp.eq.s32.totalorder %s21_s14, 0  ;;  %p32_p2 = scmp.eq.s32.totalorder %s427_s9, 0 }
   0x9   : > { %p37_p3 = scmp.ne.s32.totalorder %s419_s7, %s415_s6  ;;  %p38_p4 = scmp.eq.s32.totalorder %s467_s10, 0 }
   0xa   : > { %s483_s15 = scalar_select %p22_p1, %s423_s8, %s24_s13  }
   0xb   : > { %p485_p5 = por %p32_p2, %p31_p0  ;;  %p489_p6 = por %p38_p4, %p37_p3 }
   0xc   : > { %p61_p7 = scmp.eq.s32.totalorder %s467_s10, 1  ;;  %p67_p8 = scmp.eq.s32.totalorder %s260_s11, 1 }
   0xd   : > { %p292_p10 = scmp.lt.s32.totalorder %s427_s9, 2  ;;  %s87_s20 = sand.u32 1, %s423_s8  }
   0xe   : > { %p496_p11 = por %p61_p7, %p31_p0  ;;  %p500_p12 = por %p67_p8, %p37_p3 }
   0xf   : > { %s278_s21 = sshll.u32 %s427_s9, 9  ;;  %s263_s22 = sshll.u32 %s87_s20, 5 }
  0x10   : > { %s618_s18 = scalar_select %p496_p11, 1, 0 }
  0x11   : > { %s619_s19 = scalar_select %p500_p12, 1, 0 }
  0x12   : > { %s509_s25 = scalar_lea.hbm %s613_s0, %s278_s21  ;;  %s91_s26 = scalar_lea.vmem [#allocation2], %s263_s22 }
  0x13   : > { %s98_s27 = sshll.u32 %s91_s26, 4  ;;  %p513_p13 = pnand %p292_p10, %p485_p5  ;;  %s517_s27 = int_to_ptr.vmem [resolvable:$true] %s98_s27 }
  0x14   : > { %s519_s29 = scalar_lea.sflag [#allocation3], %s87_s20  ;;  %s331_s30 = scalar_lea.hbm %s509_s25, 512 }
  0x15   : > { %p332_p0 = scmp.ne.s32.totalorder %s509_s25, %s331_s30  ;;  %p333_p1 = pneg %p513_p13 }
  0x16   : > { %s336_s4 = scalar_lea.hbm %s613_s0, 1024  ;;  %p337_p4 = scmp.lt.u32.totalorder %s509_s25, %s613_s0 }
  0x17   : > { %p334_p2 = pnand %p333_p1, %p332_p0  ;;  %p338_p5 = scmp.lt.u32.totalorder %s336_s4, %s331_s30 }
  0x18   : > { %p340_p8 = scmp.lt.u32.totalorder %s331_s30, %s509_s25 }
  0x19   : > { %p335_p3 = pneg %p334_p2  ;;  %p339_p7 = por %p338_p5, %p337_p4 }
  0x1b   : > { %p341_p10 = por %p340_p8, %p339_p7 }
  0x1d   : > { %p342_p9 = pnand %p341_p10, %p335_p3 }
  0x1f   : > { %345 = shalt.err (!%p342_p9)
}
  0x20   : > { %s346_s13 = scalar_lea.vmem %s517_s27, 512  ;;  %s429_s14 = smov [#allocation2]  }
  0x21   : > { %p347_p0 = scmp.ne.s32.totalorder %s517_s27, %s346_s13  ;;  %s351_s16 = sshll.u32 %s429_s14, 4  ;;  %s352_s16 = int_to_ptr.vmem [resolvable:$false] %s351_s16 }
  0x22   : > { %s353_s20 = scalar_lea.vmem %s352_s16, 1024  ;;  %p354_p11 = scmp.lt.s32.totalorder %s517_s27, %s352_s16 }
  0x23   : > { %p349_p2 = pnand %p347_p0, %p333_p1  ;;  %p355_p4 = scmp.lt.s32.totalorder %s353_s20, %s346_s13 }
  0x25   : > { %p350_p12 = pneg %p349_p2  ;;  %p356_p5 = por %p355_p4, %p354_p11 }
  0x27   : > { %p357_p7 = pnand %p356_p5, %p350_p12 }
  0x29   : > { %360 = shalt.err (!%p357_p7)
}
  0x2a   : > { %s430_s21 = smov 64   ;;  %s431_s22 = smov 4  }
  0x2b   : > { %287 = dma.hbm_to_vmem [thread:$0]  (!%p513_p13), %s509_s25, 512, %s517_s27, %s519_s29, %s430_s21, %s430_s21, %s431_s22  }
  0x2c   : > { %p266_p9 = scmp.ge.s32.totalorder %s427_s9, 1  ;;  %p106_p1 = scmp.lt.s32.totalorder %s427_s9, 3 }
  0x2e   : > { %p107_p3 = pnand %p266_p9, %p106_p1 }
  0x2f   : > { %s550_s23 = sand.u32 (!%p107_p3), 1, %s419_s7  }
  0x30   : > { %110 = sbr.rel (%p107_p3) target bundleno = 196 (0xc4), region = 24  ;;  %s267_s24 = sshll.u32 (!%p107_p3), %s550_s23, 5 }
  0x31   : > { %s113_s26 = scalar_lea.sflag (!%p107_p3), [#allocation3], %s550_s23  ;;  %s116_s30 = scalar_lea.vmem (!%p107_p3), [#allocation2], %s267_s24 }
  0x37   : > { %406 = dma.done.wait (%p489_p6), %s113_s26, 512  }
  0x38   : > { %408 = vsyncadd (%p489_p6), %s113_s26, 4294966784  ;;  %v137_v0 = vld [vmem:[%s116_s30 + $0x10] sm:$0xf]  ;;  %v271_v1 = vld [vmem:[%s116_s30 + $0x14] sm:$0xf]  ;;  %s432_s25 = smov 112  }
  0x39   : > { %v135_v2 = vld [vmem:[%s116_s30] sm:$0xf]  ;;  %v146_v3 = vmax.f32 %v137_v0, %v271_v1  ;;  %v269_v4 = vld [vmem:[%s116_s30 + $0x4] sm:$0xf]  ;;  %v138_v5 = vld [vmem:[%s116_s30 + $0x18] sm:$0xf] }
  0x3a   : > { %v272_v6 = vld [vmem:[%s116_s30 + $0x1c] sm:$0xf]  ;;  %v144_v7 = vmax.f32 %v135_v2, %v269_v4  ;;  %v136_v8 = vld [vmem:[%s116_s30 + $0x8] sm:$0xf]  ;;  %v270_v9 = vld [vmem:[%s116_s30 + $0xc] sm:$0xf] }
  0x3b   : > { %156 = vrot.lane.b32.xlu1 %v146_v3, %s432_s25  ;;  %v147_v10 = vmax.f32 %v138_v5, %v272_v6  ;;  %v145_v11 = vmax.f32 %v136_v8, %v270_v9  ;;  %s268_s17 = sshll.u32 %s550_s23, 4  ;;  %vm168_vm0 = vcmask 125952   ;;  %s279_s29 = sshll.u32 %s467_s10, 8 }
  0x3c   : > { %152 = vrot.lane.b32.xlu0 %v144_v7, %s432_s25  ;;  %s134_s27 = scalar_lea.vmem [#allocation5], %s268_s17  ;;  %s567_s4 = scalar_lea.hbm %s614_s1, %s279_s29 }
  0x3d   : > { %s187_s28 = sshll.u32 %s134_s27, 4  ;;  %s174_s10 = scalar_lea.sflag [#allocation4], %s550_s23  ;;  %s561_s28 = int_to_ptr.vmem [resolvable:$true] %s187_s28 }
  0x3e   : > { %s361_s5 = scalar_lea.vmem %s561_s28, 256  ;;  %p621_p11 = scmp.ne.s32.totalorder %s618_s18, 0 }
  0x3f   : > { %158 = vrot.lane.b32.xlu1 %v147_v10, %s432_s25  ;;  %p362_p6 = scmp.ne.s32.totalorder %s561_s28, %s361_s5  ;;  %s433_s11 = smov [#allocation5]  }
  0x40   : > { %154 = vrot.lane.b32.xlu0 %v145_v11, %s432_s25  ;;  %s365_s13 = sshll.u32 %s433_s11, 4  ;;  %s366_s13 = int_to_ptr.vmem [resolvable:$false] %s365_s13 }
  0x41   : > { %p363_p12 = pnand %p362_p6, %p621_p11  ;;  %s367_s14 = scalar_lea.vmem %s366_s13, 512 }
  0x42   : > { %p368_p8 = scmp.lt.s32.totalorder %s561_s28, %s366_s13  ;;  %p369_p10 = scmp.lt.s32.totalorder %s367_s14, %s361_s5 }
  0x43   : > { %p364_p13 = pneg %p363_p12 }
  0x44   : > { %p370_p0 = por %p369_p10, %p368_p8 }
  0x46   : > { %p371_p2 = pnand %p370_p0, %p364_p13 }
  0xad   : > { %v157_v12 = vpop.permute.xlu1 %156 }
  0xae   : > { %v166_v13 = vmax.f32 %v146_v3, %v157_v12  ;;  %v153_v14 = vpop.permute.xlu0 %152 }
  0xaf   : > { %v164_v15 = vmax.f32 %v144_v7, %v153_v14 }
  0xb0   : > { %171 = vst.msk [vmem:[%s134_s27 + $0x8] sm:$0xf] %vm168_vm0, %v166_v13 }
  0xb1   : > { %169 = vst.msk [vmem:[%s134_s27] sm:$0xf] %vm168_vm0, %v164_v15  ;;  %v159_v16 = vpop.permute.xlu1 %158 }
  0xb2   : > { %v167_v17 = vmax.f32 %v147_v10, %v159_v16  ;;  %v155_v18 = vpop.permute.xlu0 %154 }
  0xb3   : > { %v165_v19 = vmax.f32 %v145_v11, %v155_v18 }
  0xb4   : > { %172 = vst.msk [vmem:[%s134_s27 + $0xc] sm:$0xf] %vm168_vm0, %v167_v17 }
  0xb5   : > { %170 = vst.msk [vmem:[%s134_s27 + $0x4] sm:$0xf] %vm168_vm0, %v165_v19 }
  0xb6   : > { %374 = shalt.err (!%p371_p2)
}
  0xb7   : > { %s375_s16 = scalar_lea.hbm %s567_s4, 256  ;;  %s379_s22 = scalar_lea.hbm %s614_s1, 512 }
  0xb8   : > { %p376_p4 = scmp.ne.s32.totalorder %s567_s4, %s375_s16  ;;  %p380_p9 = scmp.lt.u32.totalorder %s567_s4, %s614_s1 }
  0xb9   : > { %p381_p1 = scmp.lt.u32.totalorder %s379_s22, %s375_s16  ;;  %p383_p6 = scmp.lt.u32.totalorder %s375_s16, %s567_s4 }
  0xba   : > { %p377_p5 = pnand %p376_p4, %p621_p11 }
  0xbb   : > { %p382_p3 = por %p381_p1, %p380_p9 }
  0xbc   : > { %p378_p7 = pneg %p377_p5 }
  0xbd   : > { %p384_p12 = por %p383_p6, %p382_p3 }
  0xbf   : > { %p385_p13 = pnand %p384_p12, %p378_p7 }
  0xc1   : > { %388 = shalt.err (!%p385_p13)
}
  0xc2   : > { %s434_s30 = smov 64   ;;  %s435_s25 = smov 4  }
  0xc3   : > { %282 = dma.vmem_to_hbm [thread:$0]  (%p621_p11), %s561_s28, 256, %s567_s4, %s174_s10, %s434_s30, %s434_s30, %s435_s25  }
  0xc4 PF: > { %s202_s17 = sand.u32 1, %s415_s6   ;;  %p622_p8 = scmp.ne.s32.totalorder %s619_s19, 0 }
  0xc5   : > { %p623_p10 = scmp.ge.s32.totalorder %s427_s9, 2  ;;  %s203_s27 = scalar_lea.sflag [#allocation4], %s202_s17 }
  0xc7   : > { %p289_p0 = pnand %p623_p10, %p622_p8 }
  0xc9   : > { %410 = dma.done.wait (!%p289_p0), %s203_s27, 256  }
  0xca   : > { %412 = vsyncadd (!%p289_p0), %s203_s27, 4294967040  ;;  %p14_p2 = scmp.ge.s32.totalorder %s471_s12, 4   ;;  %s624_s6 = smov %s419_s7 }
  0xcb   : > { %s625_s7 = smov %s423_s8  ;;  %s626_s8 = smov %s483_s15 }
  0xcc   : > { %s627_s9 = smov %s471_s12  ;;  %16 = sbr.rel (!%p14_p2) target bundleno = 5 (0x5), region = 70 }
  0xd3   :  { %208 = vsyncpa [#allocation3], 1 }
  0xd4   :  { %210 = vsyncpa [#allocation3 + $0x1], 1 }
  0xd5   :  { %211 = vsyncpa [#allocation4], 1 }
  0xd6   :  { %213 = vsyncpa [#allocation4 + $0x1], 1 }

</bundles_post_ra>
